<compile_context>
chip_gen: v5e
topology: v5e:2x2
jax: 0.10.0
libtpu: 0.0.40
codegen_flags: <defaults>
</compile_context>

<pallas_src>
import functools

import jax
import jax.numpy as jnp
from jax.experimental import pallas as pl
from jax.experimental.pallas import tpu as pltpu


TILE = 256  # row/column tile of the dense adjacency; with the K axis this fits
            # comfortably on v5e/v6e (128 MiB VMEM) and v7x (64 MiB VMEM).


# --------------- fused GCN layer: act(((deg_inv*A) @ feat) @ W + b) -----------------
def _make_gcn_layer_kernel(activation):
    def kernel(a_ref, dinv_ref, feat_ref, w_ref, b_ref, o_ref, acc_ref):
        k = pl.program_id(1)

        @pl.when(k == 0)
        def _():
            acc_ref[...] = jnp.zeros_like(acc_ref)

        # Fused row normalization; bf16 operands feed the MXU, f32 accumulation.
        a_n = a_ref[...] * dinv_ref[...].astype(a_ref.dtype)
        acc_ref[...] += jnp.dot(a_n, feat_ref[...].astype(a_ref.dtype),
                                preferred_element_type=jnp.float32)

        @pl.when(k == pl.num_programs(1) - 1)
        def _():
            # Tiny resident-weight contraction + bias + activation, f32 for precision.
            h = jnp.dot(acc_ref[...], w_ref[...], preferred_element_type=jnp.float32)
            h = h + b_ref[...]
            if activation == "relu":
                h = jnp.maximum(h, 0.0)
            elif activation == "sigmoid":
                h = jax.nn.sigmoid(h)
            o_ref[...] = h

    return kernel


def gcn_layer(a_bf16, deg_inv, feat, w, bias, activation, *, tile=TILE):
    n = a_bf16.shape[0]
    f_in = feat.shape[1]
    f_out = w.shape[1]
    return pl.pallas_call(
        _make_gcn_layer_kernel(activation),
        out_shape=jax.ShapeDtypeStruct((n, f_out), jnp.float32),
        grid=(n // tile, n // tile),
        in_specs=[
            pl.BlockSpec((tile, tile), lambda i, k: (i, k)),    # A tile (bf16)
            pl.BlockSpec((tile, 1), lambda i, k: (i, 0)),       # deg_inv rows (f32)
            pl.BlockSpec((tile, f_in), lambda i, k: (k, 0)),    # feature column block
            pl.BlockSpec((f_in, f_out), lambda i, k: (0, 0)),   # W (VMEM-resident)
            pl.BlockSpec((1, f_out), lambda i, k: (0, 0)),      # bias
        ],
        out_specs=pl.BlockSpec((tile, f_out), lambda i, k: (i, 0)),
        scratch_shapes=[pltpu.VMEM((tile, f_in), jnp.float32)],
        compiler_params=pltpu.CompilerParams(
            dimension_semantics=("parallel", "arbitrary")),
    )(a_bf16, deg_inv, feat, w, bias)


# --------------------- one LPA iteration: (deg_inv*A) @ labels ----------------------
def _make_propagate_kernel(apply_sigmoid):
    def kernel(a_ref, dinv_ref, y_ref, o_ref, acc_ref):
        k = pl.program_id(1)

        @pl.when(k == 0)
        def _():
            acc_ref[...] = jnp.zeros_like(acc_ref)

        a_n = a_ref[...] * dinv_ref[...].astype(a_ref.dtype)
        acc_ref[...] += jnp.dot(a_n, y_ref[...].astype(a_ref.dtype),
                                preferred_element_type=jnp.float32)

        @pl.when(k == pl.num_programs(1) - 1)
        def _():
            out = acc_ref[...]
            if apply_sigmoid:
                out = jax.nn.sigmoid(out)
            o_ref[...] = out

    return kernel


def propagate(a_bf16, deg_inv, labels, apply_sigmoid, *, tile=TILE):
    n = a_bf16.shape[0]
    c = labels.shape[1]
    return pl.pallas_call(
        _make_propagate_kernel(apply_sigmoid),
        out_shape=jax.ShapeDtypeStruct((n, c), jnp.float32),
        grid=(n // tile, n // tile),
        in_specs=[
            pl.BlockSpec((tile, tile), lambda i, k: (i, k)),
            pl.BlockSpec((tile, 1), lambda i, k: (i, 0)),
            pl.BlockSpec((tile, c), lambda i, k: (k, 0)),
        ],
        out_specs=pl.BlockSpec((tile, c), lambda i, k: (i, 0)),
        scratch_shapes=[pltpu.VMEM((tile, c), jnp.float32)],
        compiler_params=pltpu.CompilerParams(
            dimension_semantics=("parallel", "arbitrary")),
    )(a_bf16, deg_inv, labels)


# ------------------------------------ forward ---------------------------------------
@functools.partial(jax.jit, static_argnames=("lpa_iter",))
def gcn_lpa_forward(params, x, soft_labels, edge_index, edge_attr, *, lpa_iter):
    n = x.shape[0]
    n_pad = pl.cdiv(n, TILE) * TILE

    # Dense weighted adjacency A[i, j] = w(i -> j), summed over duplicate edges.
    # Stored bf16 in HBM to halve the dominant N^2 read traffic of all kernels.
    # TODO(synk): for large graphs keep this sparse (CSR + PrefetchScalarGridSpec)
    # instead of densifying to N^2.
    a = (jnp.zeros((n_pad, n_pad), jnp.float32)
         .at[edge_index[0], edge_index[1]].add(edge_attr))
    a_bf16 = a.astype(jnp.bfloat16)

    # Row degrees directly from the edge list (== dense row sums); deg^-1, inf -> 0.
    deg = jnp.zeros((n_pad,), jnp.float32).at[edge_index[0]].add(edge_attr)
    deg_inv = jnp.where(deg != 0.0, 1.0 / deg, 0.0).reshape(n_pad, 1)

    x_p = jnp.zeros((n_pad, x.shape[1]), jnp.float32).at[:n].set(x)
    y_p = jnp.zeros((n_pad, soft_labels.shape[1]), jnp.float32).at[:n].set(soft_labels)

    # dropout(p=0.5) == identity in eval mode.
    h = gcn_layer(a_bf16, deg_inv, x_p, params["w0"], params["b0"], "relu")
    x_out = gcn_layer(a_bf16, deg_inv, h, params["w1"], params["b1"], "sigmoid")

    if lpa_iter == 0:
        labels = jax.nn.sigmoid(y_p)
    else:
        labels = y_p
        for it in range(lpa_iter):  # static unroll: one row-parallel call per iteration
            labels = propagate(a_bf16, deg_inv, labels,
                               apply_sigmoid=(it == lpa_iter - 1))

    return x_out[:n], labels[:n]


# ------------------------------------- main ------------------------------------------
if __name__ == "__main__":
    N, IN_C, HID_C, OUT_C = 256, 16, 32, 8
    NUM_EDGES = 2048
    LPA_ITER = 3

    key = jax.random.PRNGKey(0)
    k_x, k_y, k_r, k_c, k_w, k_w0, k_w1 = jax.random.split(key, 7)

    x = jax.random.normal(k_x, (N, IN_C), jnp.float32)
    soft_labels = jax.nn.softmax(jax.random.normal(k_y, (N, OUT_C), jnp.float32), axis=-1)

    row = jax.random.randint(k_r, (NUM_EDGES,), 0, N)
    col = jax.random.randint(k_c, (NUM_EDGES,), 0, N)
    edge_index = jnp.stack([row, col]).astype(jnp.int32)
    # self.edge_attr = Parameter(G.edge_weights.abs())
    edge_attr = jnp.abs(jax.random.normal(k_w, (NUM_EDGES,), jnp.float32))

    def glorot(k, shape):  # PyG GCNConv weight init; bias init is zeros
        lim = (6.0 / (shape[0] + shape[1])) ** 0.5
        return jax.random.uniform(k, shape, jnp.float32, -lim, lim)

    params = {
        "w0": glorot(k_w0, (IN_C, HID_C)),
        "b0": jnp.zeros((1, HID_C), jnp.float32),
        "w1": glorot(k_w1, (HID_C, OUT_C)),
        "b1": jnp.zeros((1, OUT_C), jnp.float32),
    }

    out_x, pred = gcn_lpa_forward(params, x, soft_labels, edge_index, edge_attr,
                                  lpa_iter=LPA_ITER)
    jax.block_until_ready((out_x, pred))
    assert out_x.shape == (N, OUT_C) and pred.shape == (N, OUT_C)
    assert bool(jnp.all(jnp.isfinite(out_x))) and bool(jnp.all(jnp.isfinite(pred)))
    print("KERNEL_OK")
</pallas_src>

<mosaic_0001>
module attributes {stable_mosaic.version = 11 : i64} {
  func.func @kernel(%arg0: i32, %arg1: i32, %arg2: memref<256x256xbf16, #tpu.memory_space<vmem>>, %arg3: memref<256x1xf32, #tpu.memory_space<vmem>>, %arg4: memref<256x16xf32, #tpu.memory_space<vmem>>, %arg5: memref<16x32xf32, #tpu.memory_space<vmem>>, %arg6: memref<1x32xf32, #tpu.memory_space<vmem>>, %arg7: memref<256x32xf32, #tpu.memory_space<vmem>>, %arg8: memref<256x16xf32, #tpu.memory_space<vmem>>) attributes {dimension_semantics = [#tpu.dimension_semantics<parallel>, #tpu.dimension_semantics<arbitrary>], iteration_bounds = array<i64: 1, 1>, scalar_prefetch = 0 : i64, scratch_operands = 1 : i64, tpu.core_type = #tpu.core_type<tc>, window_params = [{transform_indices = @transform_0, window_bounds = array<i64: 256, 256>}, {transform_indices = @transform_1, window_bounds = array<i64: 256, 1>}, {transform_indices = @transform_2, window_bounds = array<i64: 256, 16>}, {pipeline_mode = #tpu.pipeline_mode<synchronous>, transform_indices = @transform_3, window_bounds = array<i64: 16, 32>}, {pipeline_mode = #tpu.pipeline_mode<synchronous>, transform_indices = @transform_4, window_bounds = array<i64: 1, 32>}, {transform_indices = @transform_5, window_bounds = array<i64: 256, 32>}]} {
    %c0_i32 = arith.constant 0 : i32
    %0 = arith.cmpi eq, %arg1, %c0_i32 : i32
    %1 = arith.extui %0 : i1 to i32
    %c0_i32_0 = arith.constant 0 : i32
    %2 = arith.cmpi ne, %1, %c0_i32_0 : i32
    scf.if %2 {
      %cst_12 = arith.constant 0.000000e+00 : f32
      %17 = vector.broadcast %cst_12 : f32 to vector<256x16xf32>
      %c0_13 = arith.constant 0 : index
      %c0_14 = arith.constant 0 : index
      %18 = vector.load %arg8[%c0_13, %c0_14] : memref<256x16xf32, #tpu.memory_space<vmem>>, vector<256x16xf32>
      tpu.vector_store %arg8[%c0_13, %c0_14], %17 {strides = array<i32>} : memref<256x16xf32, #tpu.memory_space<vmem>>, vector<256x16xf32>,
    } else {
    }
    %c0 = arith.constant 0 : index
    %c0_1 = arith.constant 0 : index
    %3 = vector.load %arg2[%c0, %c0_1] : memref<256x256xbf16, #tpu.memory_space<vmem>>, vector<256x256xbf16>
    %c0_2 = arith.constant 0 : index
    %c0_3 = arith.constant 0 : index
    %4 = vector.load %arg3[%c0_2, %c0_3] : memref<256x1xf32, #tpu.memory_space<vmem>>, vector<256x1xf32>
    %5 = arith.truncf %4 : vector<256x1xf32> to vector<256x1xbf16>
    %6 = vector.broadcast %5 : vector<256x1xbf16> to vector<256x256xbf16>
    %7 = arith.mulf %3, %6 : vector<256x256xbf16>
    %c0_4 = arith.constant 0 : index
    %c0_5 = arith.constant 0 : index
    %8 = vector.load %arg8[%c0_4, %c0_5] : memref<256x16xf32, #tpu.memory_space<vmem>>, vector<256x16xf32>
    %c0_6 = arith.constant 0 : index
    %c0_7 = arith.constant 0 : index
    %9 = vector.load %arg4[%c0_6, %c0_7] : memref<256x16xf32, #tpu.memory_space<vmem>>, vector<256x16xf32>
    %10 = arith.truncf %9 : vector<256x16xf32> to vector<256x16xbf16>
    %cst = arith.constant dense<0.000000e+00> : vector<256x16xf32>
    %11 = tpu.matmul %7, %10, %cst {dimension_numbers = #tpu.dot_dimension_numbers<[1], [0], [0], [1], [0, 0, 1, 1], [], []>} : vector<256x256xbf16>, vector<256x16xbf16>, vector<256x16xf32> -> vector<256x16xf32>
    %12 = arith.addf %8, %11 : vector<256x16xf32>
    %c0_8 = arith.constant 0 : index
    %c0_9 = arith.constant 0 : index
    %13 = vector.load %arg8[%c0_8, %c0_9] : memref<256x16xf32, #tpu.memory_space<vmem>>, vector<256x16xf32>
    tpu.vector_store %arg8[%c0_8, %c0_9], %12 {strides = array<i32>} : memref<256x16xf32, #tpu.memory_space<vmem>>, vector<256x16xf32>,
    %c0_i32_10 = arith.constant 0 : i32
    %14 = arith.cmpi eq, %arg1, %c0_i32_10 : i32
    %15 = arith.extui %14 : i1 to i32
    %c0_i32_11 = arith.constant 0 : i32
    %16 = arith.cmpi ne, %15, %c0_i32_11 : i32
    scf.if %16 {
      %c0_12 = arith.constant 0 : index
      %c0_13 = arith.constant 0 : index
      %17 = vector.load %arg8[%c0_12, %c0_13] : memref<256x16xf32, #tpu.memory_space<vmem>>, vector<256x16xf32>
      %c0_14 = arith.constant 0 : index
      %c0_15 = arith.constant 0 : index
      %18 = vector.load %arg5[%c0_14, %c0_15] : memref<16x32xf32, #tpu.memory_space<vmem>>, vector<16x32xf32>
      %cst_16 = arith.constant dense<0.000000e+00> : vector<256x32xf32>
      %19 = tpu.matmul %17, %18, %cst_16 {dimension_numbers = #tpu.dot_dimension_numbers<[1], [0], [0], [1], [0, 0, 1, 1], [], []>} : vector<256x16xf32>, vector<16x32xf32>, vector<256x32xf32> -> vector<256x32xf32>
      %c0_17 = arith.constant 0 : index
      %c0_18 = arith.constant 0 : index
      %20 = vector.load %arg6[%c0_17, %c0_18] : memref<1x32xf32, #tpu.memory_space<vmem>>, vector<1x32xf32>
      %21 = vector.broadcast %20 : vector<1x32xf32> to vector<256x32xf32>
      %22 = arith.addf %19, %21 : vector<256x32xf32>
      %cst_19 = arith.constant 0.000000e+00 : f32
      %23 = vector.broadcast %cst_19 : f32 to vector<256x32xf32>
      %24 = arith.maximumf %22, %23 : vector<256x32xf32>
      %c0_20 = arith.constant 0 : index
      %c0_21 = arith.constant 0 : index
      %25 = vector.load %arg7[%c0_20, %c0_21] : memref<256x32xf32, #tpu.memory_space<vmem>>, vector<256x32xf32>
      tpu.vector_store %arg7[%c0_20, %c0_21], %24 {strides = array<i32>} : memref<256x32xf32, #tpu.memory_space<vmem>>, vector<256x32xf32>,
    } else {
    }
    return
  }
  func.func @transform_0(%arg0: i32, %arg1: i32) -> (i32, i32) {
    %c0_i32 = arith.constant 0 : i32
    return %arg0, %arg1 : i32, i32
  }
  func.func @transform_1(%arg0: i32, %arg1: i32) -> (i32, i32) {
    %c0_i32 = arith.constant 0 : i32
    %c0_i32_0 = arith.constant 0 : i32
    return %arg0, %c0_i32 : i32, i32
  }
  func.func @transform_2(%arg0: i32, %arg1: i32) -> (i32, i32) {
    %c0_i32 = arith.constant 0 : i32
    %c0_i32_0 = arith.constant 0 : i32
    return %arg1, %c0_i32 : i32, i32
  }
  func.func @transform_3(%arg0: i32, %arg1: i32) -> (i32, i32) {
    %c0_i32 = arith.constant 0 : i32
    %c0_i32_0 = arith.constant 0 : i32
    %c0_i32_1 = arith.constant 0 : i32
    return %c0_i32, %c0_i32_0 : i32, i32
  }
  func.func @transform_4(%arg0: i32, %arg1: i32) -> (i32, i32) {
    %c0_i32 = arith.constant 0 : i32
    %c0_i32_0 = arith.constant 0 : i32
    %c0_i32_1 = arith.constant 0 : i32
    return %c0_i32, %c0_i32_0 : i32, i32
  }
  func.func @transform_5(%arg0: i32, %arg1: i32) -> (i32, i32) {
    %c0_i32 = arith.constant 0 : i32
    %c0_i32_0 = arith.constant 0 : i32
    return %arg0, %c0_i32 : i32, i32
  }
}

module attributes {stable_mosaic.version = 11 : i64} {
  func.func @kernel(%arg0: i32, %arg1: i32, %arg2: memref<256x256xbf16, #tpu.memory_space<vmem>>, %arg3: memref<256x1xf32, #tpu.memory_space<vmem>>, %arg4: memref<256x32xf32, #tpu.memory_space<vmem>>, %arg5: memref<32x8xf32, #tpu.memory_space<vmem>>, %arg6: memref<1x8xf32, #tpu.memory_space<vmem>>, %arg7: memref<256x8xf32, #tpu.memory_space<vmem>>, %arg8: memref<256x32xf32, #tpu.memory_space<vmem>>) attributes {dimension_semantics = [#tpu.dimension_semantics<parallel>, #tpu.dimension_semantics<arbitrary>], iteration_bounds = array<i64: 1, 1>, scalar_prefetch = 0 : i64, scratch_operands = 1 : i64, tpu.core_type = #tpu.core_type<tc>, window_params = [{transform_indices = @transform_0, window_bounds = array<i64: 256, 256>}, {transform_indices = @transform_1, window_bounds = array<i64: 256, 1>}, {transform_indices = @transform_2, window_bounds = array<i64: 256, 32>}, {pipeline_mode = #tpu.pipeline_mode<synchronous>, transform_indices = @transform_3, window_bounds = array<i64: 32, 8>}, {pipeline_mode = #tpu.pipeline_mode<synchronous>, transform_indices = @transform_4, window_bounds = array<i64: 1, 8>}, {transform_indices = @transform_5, window_bounds = array<i64: 256, 8>}]} {
    %c0_i32 = arith.constant 0 : i32
    %0 = arith.cmpi eq, %arg1, %c0_i32 : i32
    %1 = arith.extui %0 : i1 to i32
    %c0_i32_0 = arith.constant 0 : i32
    %2 = arith.cmpi ne, %1, %c0_i32_0 : i32
    scf.if %2 {
      %cst_12 = arith.constant 0.000000e+00 : f32
      %17 = vector.broadcast %cst_12 : f32 to vector<256x32xf32>
      %c0_13 = arith.constant 0 : index
      %c0_14 = arith.constant 0 : index
      %18 = vector.load %arg8[%c0_13, %c0_14] : memref<256x32xf32, #tpu.memory_space<vmem>>, vector<256x32xf32>
      tpu.vector_store %arg8[%c0_13, %c0_14], %17 {strides = array<i32>} : memref<256x32xf32, #tpu.memory_space<vmem>>, vector<256x32xf32>,
    } else {
    }
    %c0 = arith.constant 0 : index
    %c0_1 = arith.constant 0 : index
    %3 = vector.load %arg2[%c0, %c0_1] : memref<256x256xbf16, #tpu.memory_space<vmem>>, vector<256x256xbf16>
    %c0_2 = arith.constant 0 : index
    %c0_3 = arith.constant 0 : index
    %4 = vector.load %arg3[%c0_2, %c0_3] : memref<256x1xf32, #tpu.memory_space<vmem>>, vector<256x1xf32>
    %5 = arith.truncf %4 : vector<256x1xf32> to vector<256x1xbf16>
    %6 = vector.broadcast %5 : vector<256x1xbf16> to vector<256x256xbf16>
    %7 = arith.mulf %3, %6 : vector<256x256xbf16>
    %c0_4 = arith.constant 0 : index
    %c0_5 = arith.constant 0 : index
    %8 = vector.load %arg8[%c0_4, %c0_5] : memref<256x32xf32, #tpu.memory_space<vmem>>, vector<256x32xf32>
    %c0_6 = arith.constant 0 : index
    %c0_7 = arith.constant 0 : index
    %9 = vector.load %arg4[%c0_6, %c0_7] : memref<256x32xf32, #tpu.memory_space<vmem>>, vector<256x32xf32>
    %10 = arith.truncf %9 : vector<256x32xf32> to vector<256x32xbf16>
    %cst = arith.constant dense<0.000000e+00> : vector<256x32xf32>
    %11 = tpu.matmul %7, %10, %cst {dimension_numbers = #tpu.dot_dimension_numbers<[1], [0], [0], [1], [0, 0, 1, 1], [], []>} : vector<256x256xbf16>, vector<256x32xbf16>, vector<256x32xf32> -> vector<256x32xf32>
    %12 = arith.addf %8, %11 : vector<256x32xf32>
    %c0_8 = arith.constant 0 : index
    %c0_9 = arith.constant 0 : index
    %13 = vector.load %arg8[%c0_8, %c0_9] : memref<256x32xf32, #tpu.memory_space<vmem>>, vector<256x32xf32>
    tpu.vector_store %arg8[%c0_8, %c0_9], %12 {strides = array<i32>} : memref<256x32xf32, #tpu.memory_space<vmem>>, vector<256x32xf32>,
    %c0_i32_10 = arith.constant 0 : i32
    %14 = arith.cmpi eq, %arg1, %c0_i32_10 : i32
    %15 = arith.extui %14 : i1 to i32
    %c0_i32_11 = arith.constant 0 : i32
    %16 = arith.cmpi ne, %15, %c0_i32_11 : i32
    scf.if %16 {
      %c0_12 = arith.constant 0 : index
      %c0_13 = arith.constant 0 : index
      %17 = vector.load %arg8[%c0_12, %c0_13] : memref<256x32xf32, #tpu.memory_space<vmem>>, vector<256x32xf32>
      %c0_14 = arith.constant 0 : index
      %c0_15 = arith.constant 0 : index
      %18 = vector.load %arg5[%c0_14, %c0_15] : memref<32x8xf32, #tpu.memory_space<vmem>>, vector<32x8xf32>
      %cst_16 = arith.constant dense<0.000000e+00> : vector<256x8xf32>
      %19 = tpu.matmul %17, %18, %cst_16 {dimension_numbers = #tpu.dot_dimension_numbers<[1], [0], [0], [1], [0, 0, 1, 1], [], []>} : vector<256x32xf32>, vector<32x8xf32>, vector<256x8xf32> -> vector<256x8xf32>
      %c0_17 = arith.constant 0 : index
      %c0_18 = arith.constant 0 : index
      %20 = vector.load %arg6[%c0_17, %c0_18] : memref<1x8xf32, #tpu.memory_space<vmem>>, vector<1x8xf32>
      %21 = vector.broadcast %20 : vector<1x8xf32> to vector<256x8xf32>
      %22 = arith.addf %19, %21 : vector<256x8xf32>
      %23 = arith.negf %22 : vector<256x8xf32>
      %24 = math.exp %23 : vector<256x8xf32>
      %cst_19 = arith.constant 1.000000e+00 : f32
      %25 = vector.broadcast %cst_19 : f32 to vector<256x8xf32>
      %26 = arith.addf %25, %24 : vector<256x8xf32>
      %27 = arith.divf %25, %26 : vector<256x8xf32>
      %c0_20 = arith.constant 0 : index
      %c0_21 = arith.constant 0 : index
      %28 = vector.load %arg7[%c0_20, %c0_21] : memref<256x8xf32, #tpu.memory_space<vmem>>, vector<256x8xf32>
      tpu.vector_store %arg7[%c0_20, %c0_21], %27 {strides = array<i32>} : memref<256x8xf32, #tpu.memory_space<vmem>>, vector<256x8xf32>,
    } else {
    }
    return
  }
  func.func @transform_0(%arg0: i32, %arg1: i32) -> (i32, i32) {
    %c0_i32 = arith.constant 0 : i32
    return %arg0, %arg1 : i32, i32
  }
  func.func @transform_1(%arg0: i32, %arg1: i32) -> (i32, i32) {
    %c0_i32 = arith.constant 0 : i32
    %c0_i32_0 = arith.constant 0 : i32
    return %arg0, %c0_i32 : i32, i32
  }
  func.func @transform_2(%arg0: i32, %arg1: i32) -> (i32, i32) {
    %c0_i32 = arith.constant 0 : i32
    %c0_i32_0 = arith.constant 0 : i32
    return %arg1, %c0_i32 : i32, i32
  }
  func.func @transform_3(%arg0: i32, %arg1: i32) -> (i32, i32) {
    %c0_i32 = arith.constant 0 : i32
    %c0_i32_0 = arith.constant 0 : i32
    %c0_i32_1 = arith.constant 0 : i32
    return %c0_i32, %c0_i32_0 : i32, i32
  }
  func.func @transform_4(%arg0: i32, %arg1: i32) -> (i32, i32) {
    %c0_i32 = arith.constant 0 : i32
    %c0_i32_0 = arith.constant 0 : i32
    %c0_i32_1 = arith.constant 0 : i32
    return %c0_i32, %c0_i32_0 : i32, i32
  }
  func.func @transform_5(%arg0: i32, %arg1: i32) -> (i32, i32) {
    %c0_i32 = arith.constant 0 : i32
    %c0_i32_0 = arith.constant 0 : i32
    return %arg0, %c0_i32 : i32, i32
  }
}

module attributes {stable_mosaic.version = 11 : i64} {
  func.func @kernel(%arg0: i32, %arg1: i32, %arg2: memref<256x256xbf16, #tpu.memory_space<vmem>>, %arg3: memref<256x1xf32, #tpu.memory_space<vmem>>, %arg4: memref<256x8xf32, #tpu.memory_space<vmem>>, %arg5: memref<256x8xf32, #tpu.memory_space<vmem>>, %arg6: memref<256x8xf32, #tpu.memory_space<vmem>>) attributes {dimension_semantics = [#tpu.dimension_semantics<parallel>, #tpu.dimension_semantics<arbitrary>], iteration_bounds = array<i64: 1, 1>, scalar_prefetch = 0 : i64, scratch_operands = 1 : i64, tpu.core_type = #tpu.core_type<tc>, window_params = [{transform_indices = @transform_0, window_bounds = array<i64: 256, 256>}, {transform_indices = @transform_1, window_bounds = array<i64: 256, 1>}, {transform_indices = @transform_2, window_bounds = array<i64: 256, 8>}, {transform_indices = @transform_3, window_bounds = array<i64: 256, 8>}]} {
    %c0_i32 = arith.constant 0 : i32
    %0 = arith.cmpi eq, %arg1, %c0_i32 : i32
    %1 = arith.extui %0 : i1 to i32
    %c0_i32_0 = arith.constant 0 : i32
    %2 = arith.cmpi ne, %1, %c0_i32_0 : i32
    scf.if %2 {
      %cst_12 = arith.constant 0.000000e+00 : f32
      %17 = vector.broadcast %cst_12 : f32 to vector<256x8xf32>
      %c0_13 = arith.constant 0 : index
      %c0_14 = arith.constant 0 : index
      %18 = vector.load %arg6[%c0_13, %c0_14] : memref<256x8xf32, #tpu.memory_space<vmem>>, vector<256x8xf32>
      tpu.vector_store %arg6[%c0_13, %c0_14], %17 {strides = array<i32>} : memref<256x8xf32, #tpu.memory_space<vmem>>, vector<256x8xf32>,
    } else {
    }
    %c0 = arith.constant 0 : index
    %c0_1 = arith.constant 0 : index
    %3 = vector.load %arg2[%c0, %c0_1] : memref<256x256xbf16, #tpu.memory_space<vmem>>, vector<256x256xbf16>
    %c0_2 = arith.constant 0 : index
    %c0_3 = arith.constant 0 : index
    %4 = vector.load %arg3[%c0_2, %c0_3] : memref<256x1xf32, #tpu.memory_space<vmem>>, vector<256x1xf32>
    %5 = arith.truncf %4 : vector<256x1xf32> to vector<256x1xbf16>
    %6 = vector.broadcast %5 : vector<256x1xbf16> to vector<256x256xbf16>
    %7 = arith.mulf %3, %6 : vector<256x256xbf16>
    %c0_4 = arith.constant 0 : index
    %c0_5 = arith.constant 0 : index
    %8 = vector.load %arg6[%c0_4, %c0_5] : memref<256x8xf32, #tpu.memory_space<vmem>>, vector<256x8xf32>
    %c0_6 = arith.constant 0 : index
    %c0_7 = arith.constant 0 : index
    %9 = vector.load %arg4[%c0_6, %c0_7] : memref<256x8xf32, #tpu.memory_space<vmem>>, vector<256x8xf32>
    %10 = arith.truncf %9 : vector<256x8xf32> to vector<256x8xbf16>
    %cst = arith.constant dense<0.000000e+00> : vector<256x8xf32>
    %11 = tpu.matmul %7, %10, %cst {dimension_numbers = #tpu.dot_dimension_numbers<[1], [0], [0], [1], [0, 0, 1, 1], [], []>} : vector<256x256xbf16>, vector<256x8xbf16>, vector<256x8xf32> -> vector<256x8xf32>
    %12 = arith.addf %8, %11 : vector<256x8xf32>
    %c0_8 = arith.constant 0 : index
    %c0_9 = arith.constant 0 : index
    %13 = vector.load %arg6[%c0_8, %c0_9] : memref<256x8xf32, #tpu.memory_space<vmem>>, vector<256x8xf32>
    tpu.vector_store %arg6[%c0_8, %c0_9], %12 {strides = array<i32>} : memref<256x8xf32, #tpu.memory_space<vmem>>, vector<256x8xf32>,
    %c0_i32_10 = arith.constant 0 : i32
    %14 = arith.cmpi eq, %arg1, %c0_i32_10 : i32
    %15 = arith.extui %14 : i1 to i32
    %c0_i32_11 = arith.constant 0 : i32
    %16 = arith.cmpi ne, %15, %c0_i32_11 : i32
    scf.if %16 {
      %c0_12 = arith.constant 0 : index
      %c0_13 = arith.constant 0 : index
      %17 = vector.load %arg6[%c0_12, %c0_13] : memref<256x8xf32, #tpu.memory_space<vmem>>, vector<256x8xf32>
      %c0_14 = arith.constant 0 : index
      %c0_15 = arith.constant 0 : index
      %18 = vector.load %arg5[%c0_14, %c0_15] : memref<256x8xf32, #tpu.memory_space<vmem>>, vector<256x8xf32>
      tpu.vector_store %arg5[%c0_14, %c0_15], %17 {strides = array<i32>} : memref<256x8xf32, #tpu.memory_space<vmem>>, vector<256x8xf32>,
    } else {
    }
    return
  }
  func.func @transform_0(%arg0: i32, %arg1: i32) -> (i32, i32) {
    %c0_i32 = arith.constant 0 : i32
    return %arg0, %arg1 : i32, i32
  }
  func.func @transform_1(%arg0: i32, %arg1: i32) -> (i32, i32) {
    %c0_i32 = arith.constant 0 : i32
    %c0_i32_0 = arith.constant 0 : i32
    return %arg0, %c0_i32 : i32, i32
  }
  func.func @transform_2(%arg0: i32, %arg1: i32) -> (i32, i32) {
    %c0_i32 = arith.constant 0 : i32
    %c0_i32_0 = arith.constant 0 : i32
    return %arg1, %c0_i32 : i32, i32
  }
  func.func @transform_3(%arg0: i32, %arg1: i32) -> (i32, i32) {
    %c0_i32 = arith.constant 0 : i32
    %c0_i32_0 = arith.constant 0 : i32
    return %arg0, %c0_i32 : i32, i32
  }
}

module attributes {stable_mosaic.version = 11 : i64} {
  func.func @kernel(%arg0: i32, %arg1: i32, %arg2: memref<256x256xbf16, #tpu.memory_space<vmem>>, %arg3: memref<256x1xf32, #tpu.memory_space<vmem>>, %arg4: memref<256x8xf32, #tpu.memory_space<vmem>>, %arg5: memref<256x8xf32, #tpu.memory_space<vmem>>, %arg6: memref<256x8xf32, #tpu.memory_space<vmem>>) attributes {dimension_semantics = [#tpu.dimension_semantics<parallel>, #tpu.dimension_semantics<arbitrary>], iteration_bounds = array<i64: 1, 1>, scalar_prefetch = 0 : i64, scratch_operands = 1 : i64, tpu.core_type = #tpu.core_type<tc>, window_params = [{transform_indices = @transform_0, window_bounds = array<i64: 256, 256>}, {transform_indices = @transform_1, window_bounds = array<i64: 256, 1>}, {transform_indices = @transform_2, window_bounds = array<i64: 256, 8>}, {transform_indices = @transform_3, window_bounds = array<i64: 256, 8>}]} {
    %c0_i32 = arith.constant 0 : i32
    %0 = arith.cmpi eq, %arg1, %c0_i32 : i32
    %1 = arith.extui %0 : i1 to i32
    %c0_i32_0 = arith.constant 0 : i32
    %2 = arith.cmpi ne, %1, %c0_i32_0 : i32
    scf.if %2 {
      %cst_12 = arith.constant 0.000000e+00 : f32
      %17 = vector.broadcast %cst_12 : f32 to vector<256x8xf32>
      %c0_13 = arith.constant 0 : index
      %c0_14 = arith.constant 0 : index
      %18 = vector.load %arg6[%c0_13, %c0_14] : memref<256x8xf32, #tpu.memory_space<vmem>>, vector<256x8xf32>
      tpu.vector_store %arg6[%c0_13, %c0_14], %17 {strides = array<i32>} : memref<256x8xf32, #tpu.memory_space<vmem>>, vector<256x8xf32>,
    } else {
    }
    %c0 = arith.constant 0 : index
    %c0_1 = arith.constant 0 : index
    %3 = vector.load %arg2[%c0, %c0_1] : memref<256x256xbf16, #tpu.memory_space<vmem>>, vector<256x256xbf16>
    %c0_2 = arith.constant 0 : index
    %c0_3 = arith.constant 0 : index
    %4 = vector.load %arg3[%c0_2, %c0_3] : memref<256x1xf32, #tpu.memory_space<vmem>>, vector<256x1xf32>
    %5 = arith.truncf %4 : vector<256x1xf32> to vector<256x1xbf16>
    %6 = vector.broadcast %5 : vector<256x1xbf16> to vector<256x256xbf16>
    %7 = arith.mulf %3, %6 : vector<256x256xbf16>
    %c0_4 = arith.constant 0 : index
    %c0_5 = arith.constant 0 : index
    %8 = vector.load %arg6[%c0_4, %c0_5] : memref<256x8xf32, #tpu.memory_space<vmem>>, vector<256x8xf32>
    %c0_6 = arith.constant 0 : index
    %c0_7 = arith.constant 0 : index
    %9 = vector.load %arg4[%c0_6, %c0_7] : memref<256x8xf32, #tpu.memory_space<vmem>>, vector<256x8xf32>
    %10 = arith.truncf %9 : vector<256x8xf32> to vector<256x8xbf16>
    %cst = arith.constant dense<0.000000e+00> : vector<256x8xf32>
    %11 = tpu.matmul %7, %10, %cst {dimension_numbers = #tpu.dot_dimension_numbers<[1], [0], [0], [1], [0, 0, 1, 1], [], []>} : vector<256x256xbf16>, vector<256x8xbf16>, vector<256x8xf32> -> vector<256x8xf32>
    %12 = arith.addf %8, %11 : vector<256x8xf32>
    %c0_8 = arith.constant 0 : index
    %c0_9 = arith.constant 0 : index
    %13 = vector.load %arg6[%c0_8, %c0_9] : memref<256x8xf32, #tpu.memory_space<vmem>>, vector<256x8xf32>
    tpu.vector_store %arg6[%c0_8, %c0_9], %12 {strides = array<i32>} : memref<256x8xf32, #tpu.memory_space<vmem>>, vector<256x8xf32>,
    %c0_i32_10 = arith.constant 0 : i32
    %14 = arith.cmpi eq, %arg1, %c0_i32_10 : i32
    %15 = arith.extui %14 : i1 to i32
    %c0_i32_11 = arith.constant 0 : i32
    %16 = arith.cmpi ne, %15, %c0_i32_11 : i32
    scf.if %16 {
      %c0_12 = arith.constant 0 : index
      %c0_13 = arith.constant 0 : index
      %17 = vector.load %arg6[%c0_12, %c0_13] : memref<256x8xf32, #tpu.memory_space<vmem>>, vector<256x8xf32>
      %18 = arith.negf %17 : vector<256x8xf32>
      %19 = math.exp %18 : vector<256x8xf32>
      %cst_14 = arith.constant 1.000000e+00 : f32
      %20 = vector.broadcast %cst_14 : f32 to vector<256x8xf32>
      %21 = arith.addf %20, %19 : vector<256x8xf32>
      %22 = arith.divf %20, %21 : vector<256x8xf32>
      %c0_15 = arith.constant 0 : index
      %c0_16 = arith.constant 0 : index
      %23 = vector.load %arg5[%c0_15, %c0_16] : memref<256x8xf32, #tpu.memory_space<vmem>>, vector<256x8xf32>
      tpu.vector_store %arg5[%c0_15, %c0_16], %22 {strides = array<i32>} : memref<256x8xf32, #tpu.memory_space<vmem>>, vector<256x8xf32>,
    } else {
    }
    return
  }
  func.func @transform_0(%arg0: i32, %arg1: i32) -> (i32, i32) {
    %c0_i32 = arith.constant 0 : i32
    return %arg0, %arg1 : i32, i32
  }
  func.func @transform_1(%arg0: i32, %arg1: i32) -> (i32, i32) {
    %c0_i32 = arith.constant 0 : i32
    %c0_i32_0 = arith.constant 0 : i32
    return %arg0, %c0_i32 : i32, i32
  }
  func.func @transform_2(%arg0: i32, %arg1: i32) -> (i32, i32) {
    %c0_i32 = arith.constant 0 : i32
    %c0_i32_0 = arith.constant 0 : i32
    return %arg1, %c0_i32 : i32, i32
  }
  func.func @transform_3(%arg0: i32, %arg1: i32) -> (i32, i32) {
    %c0_i32 = arith.constant 0 : i32
    %c0_i32_0 = arith.constant 0 : i32
    return %arg0, %c0_i32 : i32, i32
  }
}

</mosaic_0001>

<bundles_post_ra>
// kernel: gcn_lpa_forward.5
= control target key start
LH: loop header
LB: loop body
LE: loop exit
PB: predicated region body
PF: predicated region fallthrough
CT: control target
= control target key end

     0   :  { %v1332_v0 = vmov 0   ;;  %vm24_vm0 = vcmask 130048   ;;  %vm1238_vm1 = vcmask 261120   ;;  %s2109_s1 = inlined_call_operand.vmem [shape: f32[256,1], index: 1, kind: input, shape index: {}]   ;;  %s2110_s2 = inlined_call_operand.vmem [shape: f32[256,16], index: 2, kind: input, shape index: {}]   ;;  %s2111_s0 = inlined_call_operand.vmem [shape: bf16[256,256], index: 0, kind: input, shape index: {}]   ;;  %s2112_s3 = inlined_call_operand.vmem [shape: f32[16,32], index: 3, kind: input, shape index: {}]   ;;  %s2113_s4 = inlined_call_operand.vmem [shape: f32[1,32], index: 4, kind: input, shape index: {}]   ;;  %s2114_s5 = inlined_call_operand.vmem [shape: f32[256,32], index: 5, kind: output, shape index: {}]  }
   0x1   :  { %1330 = vset.pattern.permute.xlu2 %v1332_v0  ;;  %1329 = vset.pattern.permute.xlu1 %v1332_v0  ;;  %v93_v1 = vld [vmem:[%s2109_s1 + $0x20] sm:$0xff]  ;;  %v91_v2 = vld [vmem:[%s2109_s1 + $0x10] sm:$0xff]  ;;  %v94_v7 = vld [vmem:[%s2109_s1 + $0x28] sm:$0xff] }
   0x2   :  { %v89_v3 = vld [vmem:[%s2109_s1] sm:$0xff]  ;;  %1328 = vset.pattern.permute.xlu0 %v1332_v0  ;;  %v125_v4 = vpack.c.bf16 %v93_v1, %v93_v1  ;;  %v123_v5 = vpack.c.bf16 %v91_v2, %v91_v2  ;;  %v92_v8 = vld [vmem:[%s2109_s1 + $0x18] sm:$0xff]  ;;  %v90_v9 = vld [vmem:[%s2109_s1 + $0x8] sm:$0xff]  ;;  %v126_v10 = vpack.c.bf16 %v94_v7, %v94_v7 }
   0x3   :  { %v121_v6 = vpack.c.bf16 %v89_v3, %v89_v3  ;;  %v124_v11 = vpack.c.bf16 %v92_v8, %v92_v8  ;;  %v122_v12 = vpack.c.bf16 %v90_v9, %v90_v9  ;;  %v97_v13 = vld [vmem:[%s2109_s1 + $0x40] sm:$0xff]  ;;  %v96_v14 = vld [vmem:[%s2109_s1 + $0x38] sm:$0xff]  ;;  %v95_v15 = vld [vmem:[%s2109_s1 + $0x30] sm:$0xff] }
   0x4   :  { %191 = vperm.xlu2 %1330, %v125_v4   ;;  %173 = vperm.xlu1 %1329, %v123_v5   ;;  %v129_v16 = vpack.c.bf16 %v97_v13, %v97_v13  ;;  %v128_v17 = vpack.c.bf16 %v96_v14, %v96_v14  ;;  %v127_v18 = vpack.c.bf16 %v95_v15, %v95_v15  ;;  %v100_v19 = vld [vmem:[%s2109_s1 + $0x58] sm:$0xff]  ;;  %v99_v20 = vld [vmem:[%s2109_s1 + $0x50] sm:$0xff]  ;;  %v98_v21 = vld [vmem:[%s2109_s1 + $0x48] sm:$0xff] }
   0x5   :  { %155 = vperm.xlu0 %1328, %v121_v6   ;;  %v132_v22 = vpack.c.bf16 %v100_v19, %v100_v19  ;;  %v131_v23 = vpack.c.bf16 %v99_v20, %v99_v20  ;;  %v130_v24 = vpack.c.bf16 %v98_v21, %v98_v21  ;;  %v101_v25 = vld [vmem:[%s2109_s1 + $0x60] sm:$0xff]  ;;  %v114_v26 = vld [vmem:[%s2109_s1 + $0xc8] sm:$0xff]  ;;  %v116_v31 = vld [vmem:[%s2109_s1 + $0xd8] sm:$0xff] }
   0x6   :  { %v113_v27 = vld [vmem:[%s2109_s1 + $0xc0] sm:$0xff]  ;;  %v133_v28 = vpack.c.bf16 %v101_v25, %v101_v25  ;;  %v146_v29 = vpack.c.bf16 %v114_v26, %v114_v26  ;;  %v115_v32 = vld [vmem:[%s2109_s1 + $0xd0] sm:$0xff]  ;;  %v102_v33 = vld [vmem:[%s2109_s1 + $0x68] sm:$0xff]  ;;  %v148_v34 = vpack.c.bf16 %v116_v31, %v116_v31 }
   0x7   :  { %v145_v30 = vpack.c.bf16 %v113_v27, %v113_v27  ;;  %v147_v35 = vpack.c.bf16 %v115_v32, %v115_v32  ;;  %v134_v36 = vpack.c.bf16 %v102_v33, %v102_v33  ;;  %v117_v37 = vld [vmem:[%s2109_s1 + $0xe0] sm:$0xff]  ;;  %v104_v38 = vld [vmem:[%s2109_s1 + $0x78] sm:$0xff]  ;;  %v103_v39 = vld [vmem:[%s2109_s1 + $0x70] sm:$0xff] }
   0x8   :  { %v149_v40 = vpack.c.bf16 %v117_v37, %v117_v37  ;;  %v136_v41 = vpack.c.bf16 %v104_v38, %v104_v38  ;;  %v135_v42 = vpack.c.bf16 %v103_v39, %v103_v39  ;;  %v106_v43 = vld [vmem:[%s2109_s1 + $0x88] sm:$0xff]  ;;  %v105_v44 = vld [vmem:[%s2109_s1 + $0x80] sm:$0xff]  ;;  %v107_v49 = vld [vmem:[%s2109_s1 + $0x90] sm:$0xff] }
   0x9   :  { %v118_v45 = vld [vmem:[%s2109_s1 + $0xe8] sm:$0xff]  ;;  %v138_v46 = vpack.c.bf16 %v106_v43, %v106_v43  ;;  %v137_v47 = vpack.c.bf16 %v105_v44, %v105_v44  ;;  %v120_v50 = vld [vmem:[%s2109_s1 + $0xf8] sm:$0xff]  ;;  %v119_v51 = vld [vmem:[%s2109_s1 + $0xf0] sm:$0xff]  ;;  %v139_v52 = vpack.c.bf16 %v107_v49, %v107_v49 }
   0xa   :  { %v150_v48 = vpack.c.bf16 %v118_v45, %v118_v45  ;;  %v152_v53 = vpack.c.bf16 %v120_v50, %v120_v50  ;;  %v151_v54 = vpack.c.bf16 %v119_v51, %v119_v51  ;;  %v110_v55 = vld [vmem:[%s2109_s1 + $0xa8] sm:$0xff]  ;;  %v109_v56 = vld [vmem:[%s2109_s1 + $0xa0] sm:$0xff]  ;;  %v108_v57 = vld [vmem:[%s2109_s1 + $0x98] sm:$0xff] }
   0xb   :  { %v679_v58 = vld [vmem:[%s2110_s2 + $0x70] sm:$0xff]  ;;  %v680_v59 = vld [vmem:[%s2110_s2 + $0x78] sm:$0xff]  ;;  %v142_v63 = vpack.c.bf16 %v110_v55, %v110_v55  ;;  %v141_v0 = vpack.c.bf16 %v109_v56, %v109_v56  ;;  %v140_v2 = vpack.c.bf16 %v108_v57, %v108_v57  ;;  %v677_v3 = vld [vmem:[%s2110_s2 + $0x60] sm:$0xff] }
   0xc   :  { %200 = vperm.xlu2 %1330, %v126_v10   ;;  %182 = vperm.xlu1 %1329, %v124_v11   ;;  %v704_v60 = vpack.c.bf16 %v680_v59, %v679_v58  ;;  %v695_v61 = vld [vmem:[%s2110_s2 + $0xf0] sm:$0xff]  ;;  %v696_v62 = vld [vmem:[%s2110_s2 + $0xf8] sm:$0xff]  ;;  %v678_v4 = vld [vmem:[%s2110_s2 + $0x68] sm:$0xff] }
   0xd   :  { %164 = vperm.xlu0 %1328, %v122_v12   ;;  %v1467_v1 = vpack.c.bf16 %v696_v62, %v695_v61  ;;  %v693_v5 = vld [vmem:[%s2110_s2 + $0xe0] sm:$0xff]  ;;  %v703_v6 = vpack.c.bf16 %v678_v4, %v677_v3  ;;  %v694_v7 = vld [vmem:[%s2110_s2 + $0xe8] sm:$0xff]  ;;  %v112_v9 = vld [vmem:[%s2109_s1 + $0xb8] sm:$0xff] }
   0xe   :  { %713 = vmatpush.bf16.msra.mxu0 %v704_v60  ;;  %1307 = vmatpush.bf16.msra.mxu3 %v704_v60  ;;  %v1482_v8 = vpack.c.bf16 %v694_v7, %v693_v5  ;;  %v111_v10 = vld [vmem:[%s2109_s1 + $0xb0] sm:$0xff]  ;;  %v676_v12 = vld [vmem:[%s2110_s2 + $0x58] sm:$0xff]  ;;  %v673_v19 = vld [vmem:[%s2110_s2 + $0x40] sm:$0xff] }
   0xf   :  { %802 = vmatpush.bf16.msra.mxu1 %v1467_v1  ;;  %v675_v11 = vld [vmem:[%s2110_s2 + $0x50] sm:$0xff]  ;;  %v692_v15 = vld [vmem:[%s2110_s2 + $0xd8] sm:$0xff]  ;;  %v674_v20 = vld [vmem:[%s2110_s2 + $0x48] sm:$0xff] }
  0x10   :  { %v702_v13 = vpack.c.bf16 %v676_v12, %v675_v11  ;;  %v691_v14 = vld [vmem:[%s2110_s2 + $0xd0] sm:$0xff]  ;;  %v689_v21 = vld [vmem:[%s2110_s2 + $0xc0] sm:$0xff]  ;;  %v672_v26 = vld [vmem:[%s2110_s2 + $0x38] sm:$0xff] }
  0x11   :  { %v671_v25 = vld [vmem:[%s2110_s2 + $0x30] sm:$0xff]  ;;  %v669_v31 = vld [vmem:[%s2110_s2 + $0x20] sm:$0xff]  ;;  %v670_v32 = vld [vmem:[%s2110_s2 + $0x28] sm:$0xff] }
  0x12   :  { %714 = vmatpush.bf16.msra.mxu0 %v703_v6  ;;  %1308 = vmatpush.bf16.msra.mxu3 %v703_v6  ;;  %v700_v27 = vpack.c.bf16 %v672_v26, %v671_v25  ;;  %v685_v33 = vld [vmem:[%s2110_s2 + $0xa0] sm:$0xff]  ;;  %v667_v38 = vld [vmem:[%s2110_s2 + $0x10] sm:$0xff]  ;;  %v668_v39 = vld [vmem:[%s2110_s2 + $0x18] sm:$0xff] }
  0x13   :  { %803 = vmatpush.bf16.msra.mxu1 %v1482_v8  ;;  %v665_v44 = vld [vmem:[%s2110_s2] sm:$0xff]  ;;  %v666_v45 = vld [vmem:[%s2110_s2 + $0x8] sm:$0xff]  ;;  %v1588_v11 = vld [vmem:[%s2111_s0 + $0xd8] sm:$0xff] }
  0x14   :  { %227 = vperm.xlu2 %1330, %v129_v16   ;;  %218 = vperm.xlu1 %1329, %v128_v17   ;;  %v144_v16 = vpack.c.bf16 %v112_v9, %v112_v9  ;;  %v710_v17 = vpack.c.bf16 %v692_v15, %v691_v14  ;;  %v57_v58 = vld [vmem:[%s2111_s0] sm:$0xff]  ;;  %v58_v60 = vld [vmem:[%s2111_s0 + $0x8] sm:$0xff] }
  0x15   :  { %209 = vperm.xlu0 %1328, %v127_v18   ;;  %v143_v18 = vpack.c.bf16 %v111_v10, %v111_v10  ;;  %v443_v4 = vunpack.c.l.bf16 %v58_v60  ;;  %v444_v5 = vunpack.c.h.bf16 %v58_v60  ;;  %v1612_v25 = vld [vmem:[%s2111_s0 + $0xe0] sm:$0xff] }
  0x16   :  { %715 = vmatpush.bf16.msra.mxu0 %v702_v13  ;;  %1309 = vmatpush.bf16.msra.mxu3 %v702_v13 }
  0x17   :  { %804 = vmatpush.bf16.msra.mxu1 %v710_v17 }
  0x1c   :  { %254 = vperm.xlu2 %1330, %v132_v22   ;;  %245 = vperm.xlu1 %1329, %v131_v23   ;;  %v701_v22 = vpack.c.bf16 %v674_v20, %v673_v19  ;;  %v690_v23 = vld [vmem:[%s2110_s2 + $0xc8] sm:$0xff]  ;;  %v59_v20 = vld [vmem:[%s2111_s0 + $0x10] sm:$0xff] }
  0x1d   :  { %236 = vperm.xlu0 %1328, %v130_v24   ;;  %v709_v24 = vpack.c.bf16 %v690_v23, %v689_v21  ;;  %v60_v23 = vld [vmem:[%s2111_s0 + $0x18] sm:$0xff]  ;;  %v445_v26 = vunpack.c.l.bf16 %v59_v20 }
  0x1e   :  { %716 = vmatpush.bf16.msra.mxu0 %v701_v22  ;;  %1310 = vmatpush.bf16.msra.mxu3 %v701_v22 }
  0x1f   :  { %805 = vmatpush.bf16.msra.mxu1 %v709_v24 }
  0x22   :  { %717 = vmatpush.bf16.msra.mxu0 %v700_v27  ;;  %1311 = vmatpush.bf16.msra.mxu3 %v700_v27  ;;  %v446_v27 = vunpack.c.h.bf16 %v59_v20 }
  0x24   :  { %263 = vperm.xlu2 %1330, %v133_v28   ;;  %380 = vperm.xlu1 %1329, %v146_v29   ;;  %v687_v28 = vld [vmem:[%s2110_s2 + $0xb0] sm:$0xff]  ;;  %v688_v29 = vld [vmem:[%s2110_s2 + $0xb8] sm:$0xff] }
  0x25   :  { %371 = vperm.xlu0 %1328, %v145_v30   ;;  %v708_v30 = vpack.c.bf16 %v688_v29, %v687_v28  ;;  %v447_v29 = vunpack.c.l.bf16 %v60_v23 }
  0x27   :  { %806 = vmatpush.bf16.msra.mxu1 %v708_v30 }
  0x2c   :  { %398 = vperm.xlu2 %1330, %v148_v34   ;;  %389 = vperm.xlu1 %1329, %v147_v35   ;;  %v699_v34 = vpack.c.bf16 %v670_v32, %v669_v31  ;;  %v686_v35 = vld [vmem:[%s2110_s2 + $0xa8] sm:$0xff] }
  0x2d   :  { %272 = vperm.xlu0 %1328, %v134_v36   ;;  %v707_v36 = vpack.c.bf16 %v686_v35, %v685_v33  ;;  %v498_v35 = vunpack.c.h.bf16 %v1612_v25 }
  0x2e   :  { %718 = vmatpush.bf16.msra.mxu0 %v699_v34  ;;  %1312 = vmatpush.bf16.msra.mxu3 %v699_v34 }
  0x2f   :  { %807 = vmatpush.bf16.msra.mxu1 %v707_v36 }
  0x34   :  { %407 = vperm.xlu2 %1330, %v149_v40   ;;  %290 = vperm.xlu1 %1329, %v136_v41   ;;  %v698_v40 = vpack.c.bf16 %v668_v39, %v667_v38  ;;  %v683_v41 = vld [vmem:[%s2110_s2 + $0x90] sm:$0xff] }
  0x35   :  { %281 = vperm.xlu0 %1328, %v135_v42   ;;  %v684_v42 = vld [vmem:[%s2110_s2 + $0x98] sm:$0xff] }
  0x36   :  { %v706_v43 = vpack.c.bf16 %v684_v42, %v683_v41  ;;  %719 = vmatpush.bf16.msra.mxu0 %v698_v40  ;;  %1313 = vmatpush.bf16.msra.mxu3 %v698_v40 }
  0x38   :  { %808 = vmatpush.bf16.msra.mxu1 %v706_v43 }
  0x3c   :  { %308 = vperm.xlu2 %1330, %v138_v46   ;;  %299 = vperm.xlu1 %1329, %v137_v47   ;;  %v681_v46 = vld [vmem:[%s2110_s2 + $0x80] sm:$0xff]  ;;  %v697_v47 = vpack.c.bf16 %v666_v45, %v665_v44  ;;  %v82_v44 = vld [vmem:[%s2111_s0 + $0xc8] sm:$0xff] }
  0x3d   :  { %416 = vperm.xlu0 %1328, %v150_v48   ;;  %v682_v48 = vld [vmem:[%s2110_s2 + $0x88] sm:$0xff]  ;;  %v81_v45 = vld [vmem:[%s2111_s0 + $0xc0] sm:$0xff] }
  0x3e   :  { %v705_v49 = vpack.c.bf16 %v682_v48, %v681_v46  ;;  %720 = vmatpush.bf16.msra.mxu0 %v697_v47  ;;  %1314 = vmatpush.bf16.msra.mxu3 %v697_v47 }
  0x40   :  { %809 = vmatpush.bf16.msra.mxu1 %v705_v49 }
  0x42   :  { %1315 = vmatpush.bf16.msrb.mxu3 %v1467_v1 }
  0x44   :  { %317 = vperm.xlu2 %1330, %v139_v52   ;;  %434 = vperm.xlu1 %1329, %v152_v53   ;;  %v1333_v52 = vmov 839922192  }
  0x45   :  { %425 = vperm.xlu0 %1328, %v151_v54   ;;  %v159_v53 = vunpack.c.l.s4 %v1333_v52  ;;  %v491_v52 = vunpack.c.l.bf16 %v82_v44 }
  0x46   :  { %1316 = vmatpush.bf16.msrb.mxu3 %v1482_v8 }
  0x47   :  { %v1573_v57 = vunpack.c.0.s8 %v159_v53  ;;  %v492_v53 = vunpack.c.h.bf16 %v82_v44 }
  0x4a   :  { %1317 = vmatpush.bf16.msrb.mxu3 %v710_v17  ;;  %v496_v17 = vunpack.c.h.bf16 %v1588_v11 }
  0x4c   :  { %344 = vperm.xlu2 %1330, %v142_v63   ;;  %335 = vperm.xlu1 %1329, %v141_v0   ;;  %v441_v63 = vunpack.c.l.bf16 %v57_v58  ;;  %v442_v0 = vunpack.c.h.bf16 %v57_v58  ;;  %v489_v58 = vunpack.c.l.bf16 %v81_v45 }
  0x4d   :  { %326 = vperm.xlu0 %1328, %v140_v2  }
  0x4e   :  { %1318 = vmatpush.bf16.msrb.mxu3 %v709_v24 }
  0x52   :  { %1319 = vmatpush.bf16.msrb.mxu3 %v708_v30  ;;  %v448_v30 = vunpack.c.h.bf16 %v60_v23 }
  0x54   :  { %362 = vperm.xlu1 %1329, %v144_v16  }
  0x55   :  { %353 = vperm.xlu0 %1328, %v143_v18  }
  0x56   :  { %1320 = vmatpush.bf16.msrb.mxu3 %v707_v36 }
  0x5a   :  { %1321 = vmatpush.bf16.msrb.mxu3 %v706_v43 }
  0x5e   :  { %v1539_v37 = vpop.permute.xlu2 %191  ;;  %1322 = vmatpush.bf16.msrb.mxu3 %v705_v49 }
  0x66   :  { %v1565_v50 = vpop.permute.xlu2 %200 }
  0x6e   :  { %v1569_v51 = vpop.permute.xlu2 %227 }
  0x76   :  { %v1571_v54 = vpop.permute.xlu2 %254  ;;  %v174_v55 = vpop.permute.xlu1 %173 }
  0x77   :  { %v156_v56 = vpop.permute.xlu0 %155  ;;  %v179_v21 = vperm.slane %v174_v55, %v1573_v57 }
  0x78   :  { %v161_v59 = vperm.slane %v156_v56, %v1573_v57 }
  0x79   :  { %v507_v28 = vunpack.c.l.bf16 %v179_v21 }
  0x7a   :  { %v505_v2 = vunpack.c.l.bf16 %v161_v59  ;;  %v490_v59 = vunpack.c.h.bf16 %v81_v45 }
  0x7b   :  { %v541_v39 = vmul.f32 %v507_v28, %v445_v26  ;;  %v542_v40 = vmul.f32 %v507_v28, %v446_v27 }
  0x7c   :  { %v537_v7 = vmul.f32 %v505_v2, %v441_v63  ;;  %v538_v8 = vmul.f32 %v505_v2, %v442_v0  ;;  %v197_v63 = vperm.slane %v1539_v37, %v1573_v57  ;;  %v62_v0 = vld [vmem:[%s2111_s0 + $0x28] sm:$0xff] }
  0x7e   :  { %v1582_v61 = vpop.permute.xlu2 %263  ;;  %v183_v62 = vpop.permute.xlu1 %182 }
  0x7f   :  { %v165_v1 = vpop.permute.xlu0 %164  ;;  %v188_v22 = vperm.slane %v183_v62, %v1573_v57  ;;  %v61_v62 = vld [vmem:[%s2111_s0 + $0x20] sm:$0xff] }
  0x80   :  { %v170_v3 = vperm.slane %v165_v1, %v1573_v57  ;;  %v206_v1 = vperm.slane %v1565_v50, %v1573_v57  ;;  %v450_v37 = vunpack.c.h.bf16 %v61_v62 }
  0x81   :  { %v508_v31 = vunpack.c.l.bf16 %v188_v22 }
  0x82   :  { %v506_v6 = vunpack.c.l.bf16 %v170_v3 }
  0x83   :  { %v543_v41 = vmul.f32 %v508_v31, %v447_v29  ;;  %v544_v42 = vmul.f32 %v508_v31, %v448_v30 }
  0x84   :  { %v539_v9 = vmul.f32 %v506_v6, %v443_v4  ;;  %v540_v10 = vmul.f32 %v506_v6, %v444_v5 }
  0x85   :  { %v603_v47 = vpack.c.bf16 %v543_v41, %v541_v39  ;;  %v604_v48 = vpack.c.bf16 %v544_v42, %v542_v40  ;;  %v495_v40 = vunpack.c.l.bf16 %v1588_v11  ;;  %v64_v42 = vld [vmem:[%s2111_s0 + $0x38] sm:$0xff] }
  0x86   :  { %v399_v12 = vpop.permute.xlu2 %398  ;;  %v1590_v13 = vpop.permute.xlu1 %218  ;;  %v601_v14 = vpack.c.bf16 %v539_v9, %v537_v7  ;;  %v602_v15 = vpack.c.bf16 %v540_v10, %v538_v8  ;;  %v83_v7 = vld [vmem:[%s2111_s0 + $0xd0] sm:$0xff]  ;;  %v449_v8 = vunpack.c.l.bf16 %v61_v62  ;;  %v451_v9 = vunpack.c.l.bf16 %v62_v0 }
  0x87   :  { %v404_v16 = vperm.slane %v399_v12, %v1573_v57  ;;  %v1594_v18 = vpop.permute.xlu0 %209  ;;  %v452_v10 = vunpack.c.h.bf16 %v62_v0  ;;  %v509_v12 = vunpack.c.l.bf16 %v197_v63  ;;  %v494_v20 = vunpack.c.h.bf16 %v83_v7 }
  0x88   :  { %721 = vmatmul.bf16.vlgmr.msra.gmra.mxu0 %v601_v14  ;;  %810 = vmatmul.bf16.vlgmr.msra.gmra.mxu1 %v602_v15  ;;  %v510_v14 = vunpack.c.l.bf16 %v206_v1  ;;  %v493_v31 = vunpack.c.l.bf16 %v83_v7  ;;  %v224_v41 = vperm.slane %v1590_v13, %v1573_v57  ;;  %v215_v44 = vperm.slane %v1594_v18, %v1573_v57  ;;  %v86_v13 = vld [vmem:[%s2111_s0 + $0xe8] sm:$0xff] }
  0x89   :  { %v1596_v19 = vunpack.c.l.bf16 %v404_v16  ;;  %v545_v23 = vmul.f32 %v509_v12, %v449_v8  ;;  %v546_v26 = vmul.f32 %v509_v12, %v450_v37  ;;  %v455_v11 = vunpack.c.l.bf16 %v64_v42 }
  0x8a   :  { %v547_v27 = vmul.f32 %v510_v14, %v451_v9  ;;  %v548_v28 = vmul.f32 %v510_v14, %v452_v10  ;;  %v499_v7 = vunpack.c.l.bf16 %v86_v13 }
  0x8b   :  { %v1607_v24 = vmul.f32 %v1596_v19, %v496_v17 }
  0x8e   :  { %v408_v32 = vpop.permute.xlu2 %407  ;;  %v1614_v33 = vpop.permute.xlu1 %245 }
  0x8f   :  { %v413_v34 = vperm.slane %v408_v32, %v1573_v57  ;;  %v1618_v36 = vpop.permute.xlu0 %236 }
  0x91   :  { %v1620_v38 = vunpack.c.l.bf16 %v413_v34  ;;  %v605_v34 = vpack.c.bf16 %v547_v27, %v545_v23  ;;  %v66_v27 = vld [vmem:[%s2111_s0 + $0x48] sm:$0xff] }
  0x93   :  { %v1623_v43 = vmul.f32 %v1620_v38, %v498_v35  ;;  %v606_v35 = vpack.c.bf16 %v548_v28, %v546_v26  ;;  %v65_v26 = vld [vmem:[%s2111_s0 + $0x40] sm:$0xff] }
  0x96   :  { %v381_v46 = vpop.permute.xlu1 %380 }
  0x97   :  { %v386_v49 = vperm.slane %v381_v46, %v1573_v57  ;;  %v372_v55 = vpop.permute.xlu0 %371  ;;  %v63_v46 = vld [vmem:[%s2111_s0 + $0x30] sm:$0xff] }
  0x98   :  { %v377_v56 = vperm.slane %v372_v55, %v1573_v57  ;;  %726 = vmatmul.bf16.gmra.mxu0 %v603_v47  ;;  %815 = vmatmul.bf16.gmra.mxu1 %v604_v48  ;;  %v591_v47 = vmul.f32 %v1596_v19, %v495_v40  ;;  %v456_v48 = vunpack.c.h.bf16 %v64_v42  ;;  %v511_v55 = vunpack.c.l.bf16 %v215_v44 }
  0x99   :  { %v530_v60 = vunpack.c.l.bf16 %v386_v49  ;;  %v512_v49 = vunpack.c.l.bf16 %v224_v41  ;;  %v458_v41 = vunpack.c.h.bf16 %v65_v26  ;;  %v459_v44 = vunpack.c.l.bf16 %v66_v27 }
  0x9a   :  { %v529_v2 = vunpack.c.l.bf16 %v377_v56 }
  0x9b   :  { %v587_v3 = vmul.f32 %v530_v60, %v491_v52  ;;  %v1643_v4 = vmul.f32 %v530_v60, %v492_v53  ;;  %v453_v52 = vunpack.c.l.bf16 %v63_v46  ;;  %v454_v53 = vunpack.c.h.bf16 %v63_v46 }
  0x9c   :  { %v585_v5 = vmul.f32 %v529_v2, %v489_v58  ;;  %v1645_v6 = vmul.f32 %v529_v2, %v490_v59  ;;  %v500_v60 = vunpack.c.h.bf16 %v86_v13  ;;  %v551_v62 = vmul.f32 %v512_v49, %v455_v11 }
  0x9d   :  { %v552_v19 = vmul.f32 %v512_v49, %v456_v48  ;;  %v549_v63 = vmul.f32 %v511_v55, %v453_v52  ;;  %v550_v0 = vmul.f32 %v511_v55, %v454_v53 }
  0x9e   :  { %v390_v15 = vpop.permute.xlu1 %389  ;;  %v625_v16 = vpack.c.bf16 %v587_v3, %v585_v5  ;;  %v626_v50 = vpack.c.bf16 %v1643_v4, %v1645_v6  ;;  %v88_v3 = vld [vmem:[%s2111_s0 + $0xf8] sm:$0xff]  ;;  %v87_v5 = vld [vmem:[%s2111_s0 + $0xf0] sm:$0xff] }
  0x9f   :  { %v395_v17 = vperm.slane %v390_v15, %v1573_v57  ;;  %v1653_v21 = vpop.permute.xlu0 %272  ;;  %v607_v37 = vpack.c.bf16 %v551_v62, %v549_v63  ;;  %v608_v9 = vpack.c.bf16 %v552_v19, %v550_v0  ;;  %v504_v14 = vunpack.c.h.bf16 %v88_v3 }
  0xa0   :  { %781 = vmatmul.bf16.vlgmr.msra.gmra.mxu3 %v625_v16  ;;  %v497_v16 = vunpack.c.l.bf16 %v1612_v25  ;;  %v242_v25 = vperm.slane %v1618_v36, %v1573_v57  ;;  %v503_v52 = vunpack.c.l.bf16 %v88_v3  ;;  %v501_v53 = vunpack.c.l.bf16 %v87_v5 }
  0xa1   :  { %v531_v22 = vunpack.c.l.bf16 %v395_v17 }
  0xa2   :  { %v514_v46 = vunpack.c.l.bf16 %v242_v25 }
  0xa3   :  { %v1655_v29 = vmul.f32 %v531_v22, %v494_v20  ;;  %v589_v45 = vmul.f32 %v531_v22, %v493_v31  ;;  %v502_v20 = vunpack.c.h.bf16 %v87_v5  ;;  %v233_v22 = vperm.slane %v1569_v51, %v1573_v57 }
  0xa4   :  { %v457_v51 = vunpack.c.l.bf16 %v65_v26  ;;  %v555_v49 = vmul.f32 %v514_v46, %v459_v44  ;;  %v71_v44 = vld [vmem:[%s2111_s0 + $0x70] sm:$0xff] }
  0xa5   :  { %v628_v30 = vpack.c.bf16 %v1607_v24, %v1655_v29  ;;  %v627_v18 = vpack.c.bf16 %v591_v47, %v589_v45  ;;  %v513_v42 = vunpack.c.l.bf16 %v233_v22  ;;  %v460_v45 = vunpack.c.h.bf16 %v66_v27 }
  0xa6   :  { %v1659_v32 = vpop.permute.xlu1 %290 }
  0xa7   :  { %v1661_v39 = vpop.permute.xlu0 %281  ;;  %v553_v36 = vmul.f32 %v513_v42, %v457_v51  ;;  %v554_v48 = vmul.f32 %v513_v42, %v458_v41  ;;  %v556_v13 = vmul.f32 %v514_v46, %v460_v45  ;;  %v296_v41 = vperm.slane %v1659_v32, %v1573_v57 }
  0xa8   :  { %731 = vmatmul.bf16.gmra.mxu0 %v605_v34  ;;  %820 = vmatmul.bf16.gmra.mxu1 %v606_v35  ;;  %v593_v35 = vmul.f32 %v1620_v38, %v497_v16  ;;  %v70_v16 = vld [vmem:[%s2111_s0 + $0x68] sm:$0xff]  ;;  %v287_v42 = vperm.slane %v1661_v39, %v1573_v57  ;;  %v469_v39 = vunpack.c.l.bf16 %v71_v44 }
  0xa9   :  { %v609_v38 = vpack.c.bf16 %v555_v49, %v553_v36  ;;  %v610_v55 = vpack.c.bf16 %v556_v13, %v554_v48  ;;  %v467_v22 = vunpack.c.l.bf16 %v70_v16  ;;  %v520_v32 = vunpack.c.l.bf16 %v296_v41  ;;  %v992_v48 = vld [vmem:[%s2112_s3 + $0x8] sm:$0xff]  ;;  %v991_v49 = vld [vmem:[%s2112_s3] sm:$0xff] }
  0xaa   :  { %v519_v36 = vunpack.c.l.bf16 %v287_v42  ;;  %1107 = vmatpush.msra.mxu2 %v992_v48  ;;  %1323 = vmatpush.msra.mxu3 %v992_v48  ;;  %v77_v48 = vld [vmem:[%s2111_s0 + $0xa0] sm:$0xff] }
  0xac   :  { %1108 = vmatpush.msra.mxu2 %v991_v49  ;;  %1324 = vmatpush.msra.mxu3 %v991_v49 }
  0xae   :  { %v1678_v56 = vpop.permute.xlu1 %299 }
  0xaf   :  { %v417_v58 = vpop.permute.xlu0 %416 }
  0xb0   :  { %v422_v59 = vperm.slane %v417_v58, %v1573_v57  ;;  %786 = vmatmul.bf16.gmra.mxu3 %v627_v18  ;;  %v68_v18 = vld [vmem:[%s2111_s0 + $0x58] sm:$0xff]  ;;  %v260_v58 = vperm.slane %v1571_v54, %v1573_v57 }
  0xb1   :  { %v463_v63 = vunpack.c.l.bf16 %v68_v18  ;;  %v464_v0 = vunpack.c.h.bf16 %v68_v18  ;;  %v73_v18 = vld [vmem:[%s2111_s0 + $0x80] sm:$0xff] }
  0xb2   :  { %v534_v1 = vunpack.c.l.bf16 %v422_v59  ;;  %v67_v59 = vld [vmem:[%s2111_s0 + $0x50] sm:$0xff]  ;;  %v516_v3 = vunpack.c.l.bf16 %v260_v58 }
  0xb3   :  { %v462_v5 = vunpack.c.h.bf16 %v67_v59 }
  0xb4   :  { %v1681_v2 = vmul.f32 %v534_v1, %v500_v60  ;;  %v595_v28 = vmul.f32 %v534_v1, %v499_v7  ;;  %v251_v60 = vperm.slane %v1614_v33, %v1573_v57  ;;  %v461_v1 = vunpack.c.l.bf16 %v67_v59  ;;  %v74_v59 = vld [vmem:[%s2111_s0 + $0x88] sm:$0xff] }
  0xb5   :  { %v278_v33 = vperm.slane %v1653_v21, %v1573_v57  ;;  %v1334_v21 = vmov 0.0  }
  0xb6   :  { %v435_v8 = vpop.permute.xlu1 %434  ;;  %v630_v10 = vpack.c.bf16 %v1681_v2, %v1623_v43  ;;  %v629_v47 = vpack.c.bf16 %v595_v28, %v593_v35  ;;  %v515_v7 = vunpack.c.l.bf16 %v251_v60  ;;  %25 = vst.msk [vmem:[#allocation2] sm:$0xff] %vm24_vm0, %v1334_v21  ;;  %v474_v60 = vunpack.c.h.bf16 %v73_v18  ;;  %v76_v43 = vld [vmem:[%s2111_s0 + $0x98] sm:$0xff] }
  0xb7   :  { %v440_v12 = vperm.slane %v435_v8, %v1573_v57  ;;  %v426_v15 = vpop.permute.xlu0 %425  ;;  %v518_v26 = vunpack.c.l.bf16 %v278_v33  ;;  %26 = vst.msk [vmem:[#allocation2 + $0x8] sm:$0xff] %vm24_vm0, %v1334_v21 }
  0xb8   :  { %v431_v17 = vperm.slane %v426_v15, %v1573_v57  ;;  %736 = vmatmul.bf16.gmra.mxu0 %v607_v37  ;;  %825 = vmatmul.bf16.gmra.mxu1 %v608_v9  ;;  %v559_v37 = vmul.f32 %v516_v3, %v463_v63  ;;  %v560_v9 = vmul.f32 %v516_v3, %v464_v0  ;;  %v476_v63 = vunpack.c.h.bf16 %v74_v59 }
  0xb9   :  { %v536_v23 = vunpack.c.l.bf16 %v440_v12  ;;  %v557_v54 = vmul.f32 %v515_v7, %v461_v1  ;;  %v558_v12 = vmul.f32 %v515_v7, %v462_v5  ;;  %27 = vst.msk [vmem:[#allocation2 + $0x10] sm:$0xff] %vm24_vm0, %v1334_v21 }
  0xba   :  { %v535_v31 = vunpack.c.l.bf16 %v431_v17  ;;  %v269_v17 = vperm.slane %v1582_v61, %v1573_v57  ;;  %v563_v61 = vmul.f32 %v518_v26, %v467_v22  ;;  %28 = vst.msk [vmem:[#allocation2 + $0x18] sm:$0xff] %vm24_vm0, %v1334_v21 }
  0xbb   :  { %v1704_v34 = vmul.f32 %v536_v23, %v504_v14  ;;  %v599_v62 = vmul.f32 %v536_v23, %v503_v52  ;;  %v611_v14 = vpack.c.bf16 %v559_v37, %v557_v54  ;;  %v612_v15 = vpack.c.bf16 %v560_v9, %v558_v12  ;;  %29 = vst.msk [vmem:[#allocation2 + $0x20] sm:$0xff] %vm24_vm0, %v1334_v21 }
  0xbc   :  { %v1707_v40 = vmul.f32 %v535_v31, %v502_v20  ;;  %v597_v19 = vmul.f32 %v535_v31, %v501_v53  ;;  %v69_v20 = vld [vmem:[%s2111_s0 + $0x60] sm:$0xff]  ;;  %v468_v23 = vunpack.c.h.bf16 %v70_v16  ;;  %v517_v28 = vunpack.c.l.bf16 %v269_v17  ;;  %30 = vst.msk [vmem:[#allocation2 + $0x28] sm:$0xff] %vm24_vm0, %v1334_v21 }
  0xbd   :  { %v465_v27 = vunpack.c.l.bf16 %v69_v20  ;;  %v466_v25 = vunpack.c.h.bf16 %v69_v20  ;;  %31 = vst.msk [vmem:[#allocation2 + $0x30] sm:$0xff] %vm24_vm0, %v1334_v21  ;;  %v565_v53 = vmul.f32 %v519_v36, %v469_v39  ;;  %v633_v37 = vld [vmem:[#allocation2] sm:$0xff] }
  0xbe   :  { %v632_v11 = vpack.c.bf16 %v1704_v34, %v1707_v40  ;;  %v631_v8 = vpack.c.bf16 %v599_v62, %v597_v19  ;;  %v564_v31 = vmul.f32 %v518_v26, %v468_v23  ;;  %32 = vst.msk [vmem:[#allocation2 + $0x38] sm:$0xff] %vm24_vm0, %v1334_v21  ;;  %v475_v19 = vunpack.c.l.bf16 %v74_v59  ;;  %v634_v22 = vld [vmem:[#allocation2 + $0x8] sm:$0xff] }
  0xbf   :  { %v561_v35 = vmul.f32 %v517_v28, %v465_v27  ;;  %v562_v51 = vmul.f32 %v517_v28, %v466_v25  ;;  %33 = vst.msk [vmem:[#allocation2 + $0x40] sm:$0xff] %vm24_vm0, %v1334_v21  ;;  %v479_v26 = vunpack.c.l.bf16 %v76_v43  ;;  %v480_v27 = vunpack.c.h.bf16 %v76_v43  ;;  %v79_v43 = vld [vmem:[%s2111_s0 + $0xb0] sm:$0xff] }
  0xc0   :  { %791 = vmatmul.bf16.gmra.mxu3 %v629_v47  ;;  %34 = vst.msk [vmem:[#allocation2 + $0x48] sm:$0xff] %vm24_vm0, %v1334_v21  ;;  %v470_v47 = vunpack.c.h.bf16 %v71_v44  ;;  %v635_v44 = vld [vmem:[#allocation2 + $0x10] sm:$0xff] }
  0xc1   :  { %v613_v4 = vpack.c.bf16 %v563_v61, %v561_v35  ;;  %v614_v6 = vpack.c.bf16 %v564_v31, %v562_v51  ;;  %35 = vst.msk [vmem:[#allocation2 + $0x50] sm:$0xff] %vm24_vm0, %v1334_v21 }
  0xc2   :  { %36 = vst.msk [vmem:[#allocation2 + $0x58] sm:$0xff] %vm24_vm0, %v1334_v21 }
  0xc3   :  { %37 = vst.msk [vmem:[#allocation2 + $0x60] sm:$0xff] %vm24_vm0, %v1334_v21 }
  0xc4   :  { %38 = vst.msk [vmem:[#allocation2 + $0x68] sm:$0xff] %vm24_vm0, %v1334_v21 }
  0xc5   :  { %39 = vst.msk [vmem:[#allocation2 + $0x70] sm:$0xff] %vm24_vm0, %v1334_v21 }
  0xc6   :  { %40 = vst.msk [vmem:[#allocation2 + $0x78] sm:$0xff] %vm24_vm0, %v1334_v21 }
  0xc7   :  { %41 = vst.msk [vmem:[#allocation2 + $0x80] sm:$0xff] %vm24_vm0, %v1334_v21 }
  0xc8   :  { %741 = vmatmul.bf16.gmra.mxu0 %v609_v38  ;;  %830 = vmatmul.bf16.gmra.mxu1 %v610_v55  ;;  %42 = vst.msk [vmem:[#allocation2 + $0x88] sm:$0xff] %vm24_vm0, %v1334_v21  ;;  %v566_v38 = vmul.f32 %v519_v36, %v470_v47  ;;  %v305_v55 = vperm.slane %v1678_v56, %v1573_v57  ;;  %v473_v56 = vunpack.c.l.bf16 %v73_v18  ;;  %v336_v47 = vpop.permute.xlu1 %335 }
  0xc9   :  { %43 = vst.msk [vmem:[#allocation2 + $0x90] sm:$0xff] %vm24_vm0, %v1334_v21 }
  0xca   :  { %44 = vst.msk [vmem:[#allocation2 + $0x98] sm:$0xff] %vm24_vm0, %v1334_v21  ;;  %v521_v62 = vunpack.c.l.bf16 %v305_v55 }
  0xcb   :  { %45 = vst.msk [vmem:[#allocation2 + $0xa0] sm:$0xff] %vm24_vm0, %v1334_v21 }
  0xcc   :  { %46 = vst.msk [vmem:[#allocation2 + $0xa8] sm:$0xff] %vm24_vm0, %v1334_v21  ;;  %v569_v1 = vmul.f32 %v521_v62, %v473_v56  ;;  %v570_v3 = vmul.f32 %v521_v62, %v474_v60 }
  0xcd   :  { %47 = vst.msk [vmem:[#allocation2 + $0xb0] sm:$0xff] %vm24_vm0, %v1334_v21 }
  0xce   :  { %48 = vst.msk [vmem:[#allocation2 + $0xb8] sm:$0xff] %vm24_vm0, %v1334_v21 }
  0xcf   :  { %49 = vst.msk [vmem:[#allocation2 + $0xc0] sm:$0xff] %vm24_vm0, %v1334_v21 }
  0xd0   :  { %796 = vmatmul.bf16.gmra.mxu3 %v631_v8  ;;  %50 = vst.msk [vmem:[#allocation2 + $0xc8] sm:$0xff] %vm24_vm0, %v1334_v21 }
  0xd1   :  { %51 = vst.msk [vmem:[#allocation2 + $0xd0] sm:$0xff] %vm24_vm0, %v1334_v21 }
  0xd2   :  { %52 = vst.msk [vmem:[#allocation2 + $0xd8] sm:$0xff] %vm24_vm0, %v1334_v21 }
  0xd3   :  { %53 = vst.msk [vmem:[#allocation2 + $0xe0] sm:$0xff] %vm24_vm0, %v1334_v21 }
  0xd4   :  { %54 = vst.msk [vmem:[#allocation2 + $0xe8] sm:$0xff] %vm24_vm0, %v1334_v21 }
  0xd5   :  { %55 = vst.msk [vmem:[#allocation2 + $0xf0] sm:$0xff] %vm24_vm0, %v1334_v21 }
  0xd6   :  { %56 = vst.msk [vmem:[#allocation2 + $0xf8] sm:$0xff] %vm24_vm0, %v1334_v21 }
  0xd8   :  { %746 = vmatmul.bf16.gmra.mxu0 %v611_v14  ;;  %835 = vmatmul.bf16.gmra.mxu1 %v612_v15  ;;  %v327_v15 = vpop.permute.xlu0 %326 }
  0xd9   :  { %v332_v17 = vperm.slane %v327_v15, %v1573_v57 }
  0xdb   :  { %v524_v25 = vunpack.c.l.bf16 %v332_v17 }
  0xe0   :  { %870 = vmatmul.bf16.vlgmr.msrb.gmra.mxu3 %v626_v50  ;;  %v72_v50 = vld [vmem:[%s2111_s0 + $0x78] sm:$0xff] }
  0xe1   :  { %v471_v45 = vunpack.c.l.bf16 %v72_v50  ;;  %v472_v46 = vunpack.c.h.bf16 %v72_v50 }
  0xe3   :  { %v567_v13 = vmul.f32 %v520_v32, %v471_v45  ;;  %v568_v52 = vmul.f32 %v520_v32, %v472_v46 }
  0xe5   :  { %v615_v24 = vpack.c.bf16 %v567_v13, %v565_v53  ;;  %v616_v29 = vpack.c.bf16 %v568_v52, %v566_v38  ;;  %v78_v13 = vld [vmem:[%s2111_s0 + $0xa8] sm:$0xff]  ;;  %v636_v53 = vld [vmem:[#allocation2 + $0x18] sm:$0xff] }
  0xe6   :  { %v483_v18 = vunpack.c.l.bf16 %v78_v13 }
  0xe8   :  { %751 = vmatmul.bf16.gmra.mxu0 %v613_v4  ;;  %840 = vmatmul.bf16.gmra.mxu1 %v614_v6  ;;  %v575_v4 = vmul.f32 %v524_v25, %v479_v26  ;;  %v576_v6 = vmul.f32 %v524_v25, %v480_v27  ;;  %v638_v26 = vld [vmem:[#allocation2 + $0x28] sm:$0xff]  ;;  %v485_v25 = vunpack.c.l.bf16 %v79_v43 }
  0xf0   :  { %875 = vmatmul.bf16.gmra.mxu3 %v628_v30  ;;  %v309_v30 = vpop.permute.xlu2 %308 }
  0xf1   :  { %v314_v58 = vperm.slane %v309_v30, %v1573_v57 }
  0xf3   :  { %v522_v0 = vunpack.c.l.bf16 %v314_v58  ;;  %v484_v58 = vunpack.c.h.bf16 %v78_v13 }
  0xf5   :  { %v571_v5 = vmul.f32 %v522_v0, %v475_v19  ;;  %v572_v7 = vmul.f32 %v522_v0, %v476_v63 }
  0xf7   :  { %v617_v12 = vpack.c.bf16 %v571_v5, %v569_v1  ;;  %v618_v14 = vpack.c.bf16 %v572_v7, %v570_v3  ;;  %v637_v5 = vld [vmem:[#allocation2 + $0x20] sm:$0xff] }
  0xf8   :  { %756 = vmatmul.bf16.gmra.mxu0 %v615_v24  ;;  %845 = vmatmul.bf16.gmra.mxu1 %v616_v29  ;;  %v318_v16 = vpop.permute.xlu2 %317  ;;  %v481_v24 = vunpack.c.l.bf16 %v77_v48  ;;  %v482_v29 = vunpack.c.h.bf16 %v77_v48 }
  0xf9   :  { %v323_v2 = vperm.slane %v318_v16, %v1573_v57  ;;  %v80_v16 = vld [vmem:[%s2111_s0 + $0xb8] sm:$0xff] }
  0xfb   :  { %v523_v31 = vunpack.c.l.bf16 %v323_v2 }
 0x100   :  { %880 = vmatmul.bf16.gmra.mxu3 %v630_v10  ;;  %v75_v10 = vld [vmem:[%s2111_s0 + $0x90] sm:$0xff]  ;;  %v345_v34 = vpop.permute.xlu2 %344 }
 0x101   :  { %v477_v21 = vunpack.c.l.bf16 %v75_v10  ;;  %v478_v61 = vunpack.c.h.bf16 %v75_v10  ;;  %v350_v49 = vperm.slane %v345_v34, %v1573_v57  ;;  %v487_v10 = vunpack.c.l.bf16 %v80_v16 }
 0x103   :  { %v573_v50 = vmul.f32 %v523_v31, %v477_v21  ;;  %v574_v41 = vmul.f32 %v523_v31, %v478_v61  ;;  %v526_v59 = vunpack.c.l.bf16 %v350_v49 }
 0x105   :  { %v722_v8 = vpop.f32.mrf.mxu0  ;;  %v811_v9 = vpop.f32.mrf.mxu1  ;;  %v619_v32 = vpack.c.bf16 %v575_v4, %v573_v50  ;;  %v620_v39 = vpack.c.bf16 %v576_v6, %v574_v41  ;;  %v579_v0 = vmul.f32 %v526_v59, %v483_v18  ;;  %v580_v1 = vmul.f32 %v526_v59, %v484_v58  ;;  %v642_v59 = vld [vmem:[#allocation2 + $0x48] sm:$0xff] }
 0x106   :  { %v812_v54 = vadd.f32 %v811_v9, %v722_v8  ;;  %v363_v8 = vpop.permute.xlu1 %362 }
 0x107   :  { %v368_v15 = vperm.slane %v363_v8, %v1573_v57 }
 0x108   :  { %v891_v33 = vadd.f32 %v812_v54, %v633_v37  ;;  %761 = vmatmul.bf16.gmra.mxu0 %v617_v12  ;;  %850 = vmatmul.bf16.gmra.mxu1 %v618_v14  ;;  %v354_v12 = vpop.permute.xlu0 %353 }
 0x109   :  { %v359_v17 = vperm.slane %v354_v12, %v1573_v57  ;;  %v644_v12 = vld [vmem:[#allocation2 + $0x58] sm:$0xff] }
 0x10a   :  { %924 = vst.msk [vmem:[#allocation2] sm:$0xff] %vm24_vm0, %v891_v33 }
 0x10b   :  { %v527_v21 = vunpack.c.l.bf16 %v359_v17  ;;  %v657_v17 = vld [vmem:[#allocation2 + $0xc0] sm:$0xff] }
 0x10d   :  { %v724_v20 = vpop.f32.mrf.mxu0  ;;  %v813_v23 = vpop.f32.mrf.mxu1  ;;  %v581_v4 = vmul.f32 %v527_v21, %v485_v25 }
 0x10e   :  { %v814_v28 = vadd.f32 %v813_v23, %v724_v20  ;;  %v488_v20 = vunpack.c.h.bf16 %v80_v16 }
 0x110   :  { %v892_v35 = vadd.f32 %v814_v28, %v634_v22  ;;  %885 = vmatmul.bf16.gmra.mxu3 %v632_v11  ;;  %v341_v11 = vperm.slane %v336_v47, %v1573_v57  ;;  %v528_v22 = vunpack.c.l.bf16 %v368_v15  ;;  %v486_v28 = vunpack.c.h.bf16 %v79_v43 }
 0x111   :  { %v959_v51 = vld [vmem:[#allocation2] sm:$0xff] }
 0x112   :  { %925 = vst.msk [vmem:[#allocation2 + $0x8] sm:$0xff] %vm24_vm0, %v892_v35  ;;  %1275 = vmatmul.msk.f32.vlgmr.msra.gmra.mxu2 %vm24_vm0, %v959_v51  ;;  %v525_v30 = vunpack.c.l.bf16 %v341_v11  ;;  %v583_v31 = vmul.f32 %v528_v22, %v487_v10  ;;  %v584_v51 = vmul.f32 %v528_v22, %v488_v20  ;;  %v582_v6 = vmul.f32 %v527_v21, %v486_v28  ;;  %v645_v22 = vld [vmem:[#allocation2 + $0x60] sm:$0xff]  ;;  %v658_v21 = vld [vmem:[#allocation2 + $0xc8] sm:$0xff] }
 0x114   :  { %v577_v62 = vmul.f32 %v525_v30, %v481_v24  ;;  %v578_v19 = vmul.f32 %v525_v30, %v482_v29 }
 0x115   :  { %v727_v42 = vpop.f32.mrf.mxu0  ;;  %v816_v45 = vpop.f32.mrf.mxu1 }
 0x116   :  { %v817_v46 = vadd.f32 %v816_v45, %v727_v42  ;;  %v621_v9 = vpack.c.bf16 %v579_v0, %v577_v62  ;;  %v622_v54 = vpack.c.bf16 %v580_v1, %v578_v19  ;;  %v639_v42 = vld [vmem:[#allocation2 + $0x30] sm:$0xff] }
 0x118   :  { %v893_v36 = vadd.f32 %v817_v46, %v635_v44  ;;  %766 = vmatmul.bf16.gmra.mxu0 %v619_v32  ;;  %855 = vmatmul.bf16.gmra.mxu1 %v620_v39  ;;  %v623_v46 = vpack.c.bf16 %v583_v31, %v581_v4  ;;  %v624_v32 = vpack.c.bf16 %v584_v51, %v582_v6 }
 0x119   :  { %v960_v40 = vld [vmem:[#allocation2 + $0x8] sm:$0xff] }
 0x11a   :  { %926 = vst.msk [vmem:[#allocation2 + $0x10] sm:$0xff] %vm24_vm0, %v893_v36  ;;  %1276 = vmatmul.msk.f32.gmra.mxu2 %vm24_vm0, %v960_v40  ;;  %v640_v40 = vld [vmem:[#allocation2 + $0x38] sm:$0xff] }
 0x11d   :  { %v729_v52 = vpop.f32.mrf.mxu0  ;;  %v818_v38 = vpop.f32.mrf.mxu1 }
 0x11e   :  { %v819_v55 = vadd.f32 %v818_v38, %v729_v52  ;;  %v641_v38 = vld [vmem:[#allocation2 + $0x40] sm:$0xff] }
 0x120   :  { %v894_v56 = vadd.f32 %v819_v55, %v636_v53 }
 0x121   :  { %v961_v60 = vld [vmem:[#allocation2 + $0x10] sm:$0xff] }
 0x122   :  { %927 = vst.msk [vmem:[#allocation2 + $0x18] sm:$0xff] %vm24_vm0, %v894_v56  ;;  %1277 = vmatmul.msk.f32.gmra.mxu2 %vm24_vm0, %v961_v60 }
 0x123   :  { %v1855_v63 = vpop.f32.mrf.mxu3 }
 0x125   :  { %v732_v3 = vpop.f32.mrf.mxu0  ;;  %v821_v7 = vpop.f32.mrf.mxu1 }
 0x126   :  { %v822_v37 = vadd.f32 %v821_v7, %v732_v3  ;;  %v643_v3 = vld [vmem:[#allocation2 + $0x50] sm:$0xff] }
 0x128   :  { %v895_v14 = vadd.f32 %v822_v37, %v637_v5  ;;  %771 = vmatmul.bf16.gmra.mxu0 %v621_v9  ;;  %860 = vmatmul.bf16.gmra.mxu1 %v622_v54 }
 0x129   :  { %v962_v33 = vld [vmem:[#allocation2 + $0x18] sm:$0xff] }
 0x12a   :  { %928 = vst.msk [vmem:[#allocation2 + $0x20] sm:$0xff] %vm24_vm0, %v895_v14  ;;  %1278 = vmatmul.msk.f32.gmra.mxu2 %vm24_vm0, %v962_v33 }
 0x12b   :  { %v1867_v2 = vpop.f32.mrf.mxu3 }
 0x12d   :  { %v734_v23 = vpop.f32.mrf.mxu0  ;;  %v823_v27 = vpop.f32.mrf.mxu1 }
 0x12e   :  { %v824_v57 = vadd.f32 %v823_v27, %v734_v23 }
 0x130   :  { %v896_v61 = vadd.f32 %v824_v57, %v638_v26 }
 0x131   :  { %v963_v35 = vld [vmem:[#allocation2 + $0x20] sm:$0xff] }
 0x132   :  { %929 = vst.msk [vmem:[#allocation2 + $0x28] sm:$0xff] %vm24_vm0, %v896_v61  ;;  %1279 = vmatmul.msk.f32.gmra.mxu2 %vm24_vm0, %v963_v35  ;;  %v646_v35 = vld [vmem:[#allocation2 + $0x68] sm:$0xff] }
 0x133   :  { %v1871_v50 = vpop.f32.mrf.mxu3 }
 0x135   :  { %v737_v41 = vpop.f32.mrf.mxu0  ;;  %v826_v44 = vpop.f32.mrf.mxu1 }
 0x136   :  { %v827_v45 = vadd.f32 %v826_v44, %v737_v41 }
 0x138   :  { %v897_v39 = vadd.f32 %v827_v45, %v639_v42  ;;  %776 = vmatmul.bf16.gmra.mxu0 %v623_v46  ;;  %865 = vmatmul.bf16.gmra.mxu1 %v624_v32  ;;  %v659_v42 = vld [vmem:[#allocation2 + $0xd0] sm:$0xff] }
 0x139   :  { %v964_v47 = vld [vmem:[#allocation2 + $0x28] sm:$0xff]  ;;  %v647_v32 = vld [vmem:[#allocation2 + $0x70] sm:$0xff] }
 0x13a   :  { %930 = vst.msk [vmem:[#allocation2 + $0x30] sm:$0xff] %vm24_vm0, %v897_v39  ;;  %1280 = vmatmul.msk.f32.gmra.mxu2 %vm24_vm0, %v964_v47 }
 0x13b   :  { %v1875_v36 = vpop.f32.mrf.mxu3 }
 0x13d   :  { %v739_v34 = vpop.f32.mrf.mxu0  ;;  %v828_v11 = vpop.f32.mrf.mxu1 }
 0x13e   :  { %v829_v48 = vadd.f32 %v828_v11, %v739_v34  ;;  %v660_v11 = vld [vmem:[#allocation2 + $0xd8] sm:$0xff] }
 0x140   :  { %v898_v49 = vadd.f32 %v829_v48, %v640_v40 }
 0x141   :  { %v965_v13 = vld [vmem:[#allocation2 + $0x30] sm:$0xff] }
 0x142   :  { %931 = vst.msk [vmem:[#allocation2 + $0x38] sm:$0xff] %vm24_vm0, %v898_v49  ;;  %1281 = vmatmul.msk.f32.gmra.mxu2 %vm24_vm0, %v965_v13 }
 0x143   :  { %v1879_v52 = vpop.f32.mrf.mxu3 }
 0x145   :  { %v742_v53 = vpop.f32.mrf.mxu0  ;;  %v831_v24 = vpop.f32.mrf.mxu1 }
 0x146   :  { %v832_v29 = vadd.f32 %v831_v24, %v742_v53  ;;  %v648_v53 = vld [vmem:[#allocation2 + $0x78] sm:$0xff] }
 0x148   :  { %v899_v30 = vadd.f32 %v832_v29, %v641_v38 }
 0x149   :  { %v966_v55 = vld [vmem:[#allocation2 + $0x38] sm:$0xff] }
 0x14a   :  { %932 = vst.msk [vmem:[#allocation2 + $0x40] sm:$0xff] %vm24_vm0, %v899_v30  ;;  %1282 = vmatmul.msk.f32.gmra.mxu2 %vm24_vm0, %v966_v55  ;;  %v661_v55 = vld [vmem:[#allocation2 + $0xe0] sm:$0xff] }
 0x14b   :  { %v1883_v18 = vpop.f32.mrf.mxu3 }
 0x14d   :  { %v744_v58 = vpop.f32.mrf.mxu0  ;;  %v833_v56 = vpop.f32.mrf.mxu1 }
 0x14e   :  { %v834_v60 = vadd.f32 %v833_v56, %v744_v58 }
 0x150   :  { %v900_v62 = vadd.f32 %v834_v60, %v642_v59  ;;  %v649_v60 = vld [vmem:[#allocation2 + $0x80] sm:$0xff] }
 0x151   :  { %v967_v19 = vld [vmem:[#allocation2 + $0x40] sm:$0xff] }
 0x152   :  { %933 = vst.msk [vmem:[#allocation2 + $0x48] sm:$0xff] %vm24_vm0, %v900_v62  ;;  %1283 = vmatmul.msk.f32.gmra.mxu2 %vm24_vm0, %v967_v19 }
 0x153   :  { %v1887_v0 = vpop.f32.mrf.mxu3 }
 0x155   :  { %v747_v1 = vpop.f32.mrf.mxu0  ;;  %v836_v5 = vpop.f32.mrf.mxu1 }
 0x156   :  { %v837_v7 = vadd.f32 %v836_v5, %v747_v1 }
 0x158   :  { %v901_v8 = vadd.f32 %v837_v7, %v643_v3  ;;  %v662_v7 = vld [vmem:[#allocation2 + $0xe8] sm:$0xff] }
 0x159   :  { %v968_v37 = vld [vmem:[#allocation2 + $0x48] sm:$0xff] }
 0x15a   :  { %934 = vst.msk [vmem:[#allocation2 + $0x50] sm:$0xff] %vm24_vm0, %v901_v8  ;;  %1284 = vmatmul.msk.f32.gmra.mxu2 %vm24_vm0, %v968_v37 }
 0x15b   :  { %v1891_v9 = vpop.f32.mrf.mxu3 }
 0x15d   :  { %v749_v54 = vpop.f32.mrf.mxu0  ;;  %v838_v14 = vpop.f32.mrf.mxu1 }
 0x15e   :  { %v839_v15 = vadd.f32 %v838_v14, %v749_v54  ;;  %v650_v54 = vld [vmem:[#allocation2 + $0x88] sm:$0xff] }
 0x160   :  { %v902_v33 = vadd.f32 %v839_v15, %v644_v12 }
 0x161   :  { %v969_v16 = vld [vmem:[#allocation2 + $0x50] sm:$0xff] }
 0x162   :  { %935 = vst.msk [vmem:[#allocation2 + $0x58] sm:$0xff] %vm24_vm0, %v902_v33  ;;  %1285 = vmatmul.msk.f32.gmra.mxu2 %vm24_vm0, %v969_v16 }
 0x163   :  { %v871_v43 = vpop.f32.mrf.mxu3 }
 0x164   :  { %v872_v10 = vadd.f32 %v871_v43, %v1855_v63  ;;  %v663_v43 = vld [vmem:[#allocation2 + $0xf0] sm:$0xff] }
 0x165   :  { %v752_v20 = vpop.f32.mrf.mxu0  ;;  %v841_v23 = vpop.f32.mrf.mxu1 }
 0x166   :  { %v915_v26 = vadd.f32 %v872_v10, %v657_v17  ;;  %v842_v27 = vadd.f32 %v841_v23, %v752_v20  ;;  %v651_v23 = vld [vmem:[#allocation2 + $0x90] sm:$0xff] }
 0x168   :  { %948 = vst.msk [vmem:[#allocation2 + $0xc0] sm:$0xff] %vm24_vm0, %v915_v26  ;;  %v903_v25 = vadd.f32 %v842_v27, %v645_v22 }
 0x169   :  { %v970_v28 = vld [vmem:[#allocation2 + $0x58] sm:$0xff] }
 0x16a   :  { %936 = vst.msk [vmem:[#allocation2 + $0x60] sm:$0xff] %vm24_vm0, %v903_v25  ;;  %1286 = vmatmul.msk.f32.gmra.mxu2 %vm24_vm0, %v970_v28 }
 0x16b   :  { %v873_v57 = vpop.f32.mrf.mxu3 }
 0x16c   :  { %v874_v61 = vadd.f32 %v873_v57, %v1867_v2 }
 0x16d   :  { %v754_v31 = vpop.f32.mrf.mxu0  ;;  %v843_v63 = vpop.f32.mrf.mxu1 }
 0x16e   :  { %v916_v51 = vadd.f32 %v874_v61, %v658_v21  ;;  %v844_v4 = vadd.f32 %v843_v63, %v754_v31 }
 0x170   :  { %949 = vst.msk [vmem:[#allocation2 + $0xc8] sm:$0xff] %vm24_vm0, %v916_v51  ;;  %v904_v6 = vadd.f32 %v844_v4, %v646_v35 }
 0x171   :  { %v971_v41 = vld [vmem:[#allocation2 + $0x60] sm:$0xff] }
 0x172   :  { %937 = vst.msk [vmem:[#allocation2 + $0x68] sm:$0xff] %vm24_vm0, %v904_v6  ;;  %1287 = vmatmul.msk.f32.gmra.mxu2 %vm24_vm0, %v971_v41  ;;  %v652_v6 = vld [vmem:[#allocation2 + $0x98] sm:$0xff] }
 0x173   :  { %v876_v44 = vpop.f32.mrf.mxu3 }
 0x174   :  { %v877_v45 = vadd.f32 %v876_v44, %v1871_v50 }
 0x175   :  { %v757_v46 = vpop.f32.mrf.mxu0  ;;  %v846_v2 = vpop.f32.mrf.mxu1 }
 0x176   :  { %v917_v39 = vadd.f32 %v877_v45, %v659_v42  ;;  %v847_v47 = vadd.f32 %v846_v2, %v757_v46 }
 0x178   :  { %950 = vst.msk [vmem:[#allocation2 + $0xd0] sm:$0xff] %vm24_vm0, %v917_v39  ;;  %v905_v34 = vadd.f32 %v847_v47, %v647_v32 }
 0x179   :  { %v972_v40 = vld [vmem:[#allocation2 + $0x68] sm:$0xff] }
 0x17a   :  { %938 = vst.msk [vmem:[#allocation2 + $0x70] sm:$0xff] %vm24_vm0, %v905_v34  ;;  %1288 = vmatmul.msk.f32.gmra.mxu2 %vm24_vm0, %v972_v40  ;;  %v653_v34 = vld [vmem:[#allocation2 + $0xa0] sm:$0xff] }
 0x17b   :  { %v878_v48 = vpop.f32.mrf.mxu3 }
 0x17c   :  { %v879_v49 = vadd.f32 %v878_v48, %v1875_v36 }
 0x17d   :  { %v759_v13 = vpop.f32.mrf.mxu0  ;;  %v848_v50 = vpop.f32.mrf.mxu1 }
 0x17e   :  { %v918_v38 = vadd.f32 %v879_v49, %v660_v11  ;;  %v849_v24 = vadd.f32 %v848_v50, %v759_v13 }
 0x180   :  { %951 = vst.msk [vmem:[#allocation2 + $0xd8] sm:$0xff] %vm24_vm0, %v918_v38  ;;  %v906_v29 = vadd.f32 %v849_v24, %v648_v53 }
 0x181   :  { %v973_v30 = vld [vmem:[#allocation2 + $0x70] sm:$0xff] }
 0x182   :  { %939 = vst.msk [vmem:[#allocation2 + $0x78] sm:$0xff] %vm24_vm0, %v906_v29  ;;  %1289 = vmatmul.msk.f32.gmra.mxu2 %vm24_vm0, %v973_v30  ;;  %v654_v29 = vld [vmem:[#allocation2 + $0xa8] sm:$0xff] }
 0x183   :  { %v881_v58 = vpop.f32.mrf.mxu3 }
 0x184   :  { %v882_v59 = vadd.f32 %v881_v58, %v1879_v52 }
 0x185   :  { %v762_v56 = vpop.f32.mrf.mxu0  ;;  %v851_v36 = vpop.f32.mrf.mxu1 }
 0x186   :  { %v919_v62 = vadd.f32 %v882_v59, %v661_v55  ;;  %v852_v19 = vadd.f32 %v851_v36, %v762_v56 }
 0x187   :  { %v986_v1 = vld [vmem:[#allocation2 + $0xd8] sm:$0xff] }
 0x188   :  { %952 = vst.msk [vmem:[#allocation2 + $0xe0] sm:$0xff] %vm24_vm0, %v919_v62  ;;  %v907_v3 = vadd.f32 %v852_v19, %v649_v60  ;;  %1302 = vmatmul.msk.f32.vlgmr.msra.gmra.mxu3 %vm24_vm0, %v986_v1  ;;  %v655_v19 = vld [vmem:[#allocation2 + $0xb0] sm:$0xff] }
 0x189   :  { %v974_v5 = vld [vmem:[#allocation2 + $0x78] sm:$0xff] }
 0x18a   :  { %940 = vst.msk [vmem:[#allocation2 + $0x80] sm:$0xff] %vm24_vm0, %v907_v3  ;;  %1290 = vmatmul.msk.f32.gmra.mxu2 %vm24_vm0, %v974_v5 }
 0x18b   :  { %v883_v8 = vpop.f32.mrf.mxu3 }
 0x18c   :  { %v884_v52 = vadd.f32 %v883_v8, %v1883_v18  ;;  %v1924_v18 = vld [vmem:[%s2113_s4] ss:$0 sm:$0xff] }
 0x18d   :  { %v764_v37 = vpop.f32.mrf.mxu0  ;;  %v853_v12 = vpop.f32.mrf.mxu1 }
 0x18e   :  { %v920_v14 = vadd.f32 %v884_v52, %v662_v7  ;;  %v854_v15 = vadd.f32 %v853_v12, %v764_v37  ;;  %v656_v12 = vld [vmem:[#allocation2 + $0xb8] sm:$0xff] }
 0x18f   :  { %v987_v33 = vld [vmem:[#allocation2 + $0xe0] sm:$0xff] }
 0x190   :  { %953 = vst.msk [vmem:[#allocation2 + $0xe8] sm:$0xff] %vm24_vm0, %v920_v14  ;;  %v908_v16 = vadd.f32 %v854_v15, %v650_v54  ;;  %1303 = vmatmul.msk.f32.gmra.mxu3 %vm24_vm0, %v987_v33 }
 0x191   :  { %v975_v17 = vld [vmem:[#allocation2 + $0x80] sm:$0xff] }
 0x192   :  { %941 = vst.msk [vmem:[#allocation2 + $0x88] sm:$0xff] %vm24_vm0, %v908_v16  ;;  %1291 = vmatmul.msk.f32.gmra.mxu2 %vm24_vm0, %v975_v17 }
 0x193   :  { %v886_v10 = vpop.f32.mrf.mxu3 }
 0x194   :  { %v887_v20 = vadd.f32 %v886_v10, %v1887_v0  ;;  %v664_v0 = vld [vmem:[#allocation2 + $0xf8] sm:$0xff] }
 0x195   :  { %v767_v22 = vpop.f32.mrf.mxu0  ;;  %v856_v26 = vpop.f32.mrf.mxu1 }
 0x196   :  { %v921_v27 = vadd.f32 %v887_v20, %v663_v43  ;;  %v857_v25 = vadd.f32 %v856_v26, %v767_v22  ;;  %v1110_v28 = vpop.f32.mrf.mxu2 }
 0x197   :  { %v1111_v21 = vadd.f32 %v1924_v18, %v1110_v28  ;;  %v988_v57 = vld [vmem:[#allocation2 + $0xe8] sm:$0xff] }
 0x198   :  { %954 = vst.msk [vmem:[#allocation2 + $0xf0] sm:$0xff] %vm24_vm0, %v921_v27  ;;  %v909_v61 = vadd.f32 %v857_v25, %v651_v23  ;;  %1304 = vmatmul.msk.f32.gmra.mxu3 %vm24_vm0, %v988_v57 }
 0x199   :  { %v1206_v31 = vmax.f32 %v1111_v21, 0.0  ;;  %v976_v35 = vld [vmem:[#allocation2 + $0x88] sm:$0xff]  ;;  %v983_v21 = vld [vmem:[#allocation2 + $0xc0] sm:$0xff] }
 0x19a   :  { %942 = vst.msk [vmem:[#allocation2 + $0x90] sm:$0xff] %vm24_vm0, %v909_v61  ;;  %1292 = vmatmul.msk.f32.gmra.mxu2 %vm24_vm0, %v976_v35  ;;  %v984_v35 = vld [vmem:[#allocation2 + $0xc8] sm:$0xff] }
 0x19b   :  { %1239 = vst.msk [vmem:[%s2114_s5] sm:$0xff] %vm1238_vm1, %v1206_v31  ;;  %v888_v63 = vpop.f32.mrf.mxu3 }
 0x19c   :  { %v889_v51 = vadd.f32 %v888_v63, %v1891_v9 }
 0x19d   :  { %v769_v4 = vpop.f32.mrf.mxu0  ;;  %v858_v41 = vpop.f32.mrf.mxu1 }
 0x19e   :  { %v922_v42 = vadd.f32 %v889_v51, %v664_v0  ;;  %v859_v44 = vadd.f32 %v858_v41, %v769_v4  ;;  %v1113_v45 = vpop.f32.mrf.mxu2  ;;  %v985_v4 = vld [vmem:[#allocation2 + $0xd0] sm:$0xff] }
 0x19f   :  { %v1114_v46 = vadd.f32 %v1924_v18, %v1113_v45  ;;  %v989_v32 = vld [vmem:[#allocation2 + $0xf0] sm:$0xff] }
 0x1a0   :  { %955 = vst.msk [vmem:[#allocation2 + $0xf8] sm:$0xff] %vm24_vm0, %v922_v42  ;;  %v910_v2 = vadd.f32 %v859_v44, %v652_v6  ;;  %1305 = vmatmul.msk.f32.gmra.mxu3 %vm24_vm0, %v989_v32 }
 0x1a1   :  { %v1207_v39 = vmax.f32 %v1114_v46, 0.0  ;;  %v977_v47 = vld [vmem:[#allocation2 + $0x90] sm:$0xff] }
 0x1a2   :  { %943 = vst.msk [vmem:[#allocation2 + $0x98] sm:$0xff] %vm24_vm0, %v910_v2  ;;  %1293 = vmatmul.msk.f32.gmra.mxu2 %vm24_vm0, %v977_v47 }
 0x1a3   :  { %1240 = vst.msk [vmem:[%s2114_s5 + $0x8] sm:$0xff] %vm1238_vm1, %v1207_v39 }
 0x1a5   :  { %v772_v9 = vpop.f32.mrf.mxu0  ;;  %v861_v40 = vpop.f32.mrf.mxu1 }
 0x1a6   :  { %v862_v11 = vadd.f32 %v861_v40, %v772_v9  ;;  %v1116_v48 = vpop.f32.mrf.mxu2 }
 0x1a7   :  { %v1117_v49 = vadd.f32 %v1924_v18, %v1116_v48  ;;  %v990_v13 = vld [vmem:[#allocation2 + $0xf8] sm:$0xff] }
 0x1a8   :  { %v911_v53 = vadd.f32 %v862_v11, %v653_v34  ;;  %1306 = vmatmul.msk.f32.gmra.mxu3 %vm24_vm0, %v990_v13 }
 0x1a9   :  { %v1208_v50 = vmax.f32 %v1117_v49, 0.0  ;;  %v978_v38 = vld [vmem:[#allocation2 + $0x98] sm:$0xff] }
 0x1aa   :  { %944 = vst.msk [vmem:[#allocation2 + $0xa0] sm:$0xff] %vm24_vm0, %v911_v53  ;;  %1294 = vmatmul.msk.f32.gmra.mxu2 %vm24_vm0, %v978_v38 }
 0x1ab   :  { %1241 = vst.msk [vmem:[%s2114_s5 + $0x10] sm:$0xff] %vm1238_vm1, %v1208_v50 }
 0x1ad   :  { %v774_v24 = vpop.f32.mrf.mxu0  ;;  %v863_v30 = vpop.f32.mrf.mxu1 }
 0x1ae   :  { %v864_v55 = vadd.f32 %v863_v30, %v774_v24  ;;  %v1119_v58 = vpop.f32.mrf.mxu2 }
 0x1af   :  { %v1120_v59 = vadd.f32 %v1924_v18, %v1119_v58 }
 0x1b0   :  { %v912_v56 = vadd.f32 %v864_v55, %v654_v29 }
 0x1b1   :  { %v1209_v60 = vmax.f32 %v1120_v59, 0.0  ;;  %v979_v36 = vld [vmem:[#allocation2 + $0xa0] sm:$0xff] }
 0x1b2   :  { %945 = vst.msk [vmem:[#allocation2 + $0xa8] sm:$0xff] %vm24_vm0, %v912_v56  ;;  %1295 = vmatmul.msk.f32.gmra.mxu2 %vm24_vm0, %v979_v36 }
 0x1b3   :  { %1242 = vst.msk [vmem:[%s2114_s5 + $0x18] sm:$0xff] %vm1238_vm1, %v1209_v60 }
 0x1b5   :  { %v777_v62 = vpop.f32.mrf.mxu0  ;;  %v866_v1 = vpop.f32.mrf.mxu1 }
 0x1b6   :  { %v867_v3 = vadd.f32 %v866_v1, %v777_v62  ;;  %v1122_v5 = vpop.f32.mrf.mxu2 }
 0x1b7   :  { %v1123_v7 = vadd.f32 %v1924_v18, %v1122_v5 }
 0x1b8   :  { %v913_v8 = vadd.f32 %v867_v3, %v655_v19 }
 0x1b9   :  { %v1210_v52 = vmax.f32 %v1123_v7, 0.0  ;;  %v980_v37 = vld [vmem:[#allocation2 + $0xa8] sm:$0xff] }
 0x1ba   :  { %946 = vst.msk [vmem:[#allocation2 + $0xb0] sm:$0xff] %vm24_vm0, %v913_v8  ;;  %1296 = vmatmul.msk.f32.gmra.mxu2 %vm24_vm0, %v980_v37 }
 0x1bb   :  { %1243 = vst.msk [vmem:[%s2114_s5 + $0x20] sm:$0xff] %vm1238_vm1, %v1210_v52 }
 0x1bd   :  { %v779_v54 = vpop.f32.mrf.mxu0  ;;  %v868_v14 = vpop.f32.mrf.mxu1 }
 0x1be   :  { %v869_v15 = vadd.f32 %v868_v14, %v779_v54  ;;  %v1125_v33 = vpop.f32.mrf.mxu2 }
 0x1bf   :  { %v1126_v16 = vadd.f32 %v1924_v18, %v1125_v33 }
 0x1c0   :  { %v914_v17 = vadd.f32 %v869_v15, %v656_v12 }
 0x1c1   :  { %v1211_v43 = vmax.f32 %v1126_v16, 0.0  ;;  %v981_v10 = vld [vmem:[#allocation2 + $0xb0] sm:$0xff] }
 0x1c2   :  { %947 = vst.msk [vmem:[#allocation2 + $0xb8] sm:$0xff] %vm24_vm0, %v914_v17  ;;  %1297 = vmatmul.msk.f32.gmra.mxu2 %vm24_vm0, %v981_v10 }
 0x1c3   :  { %1244 = vst.msk [vmem:[%s2114_s5 + $0x28] sm:$0xff] %vm1238_vm1, %v1211_v43 }
 0x1c6   :  { %v1128_v20 = vpop.f32.mrf.mxu2 }
 0x1c7   :  { %v1129_v22 = vadd.f32 %v1924_v18, %v1128_v20 }
 0x1c9   :  { %v1212_v23 = vmax.f32 %v1129_v22, 0.0  ;;  %v982_v26 = vld [vmem:[#allocation2 + $0xb8] sm:$0xff] }
 0x1ca   :  { %1298 = vmatmul.msk.f32.gmra.mxu2 %vm24_vm0, %v982_v26 }
 0x1cb   :  { %1245 = vst.msk [vmem:[%s2114_s5 + $0x30] sm:$0xff] %vm1238_vm1, %v1212_v23 }
 0x1ce   :  { %v1131_v27 = vpop.f32.mrf.mxu2 }
 0x1cf   :  { %v1132_v25 = vadd.f32 %v1924_v18, %v1131_v27 }
 0x1d1   :  { %v1213_v28 = vmax.f32 %v1132_v25, 0.0 }
 0x1d2   :  { %1299 = vmatmul.msk.f32.gmra.mxu2 %vm24_vm0, %v983_v21 }
 0x1d3   :  { %1246 = vst.msk [vmem:[%s2114_s5 + $0x38] sm:$0xff] %vm1238_vm1, %v1213_v28 }
 0x1d6   :  { %v1134_v57 = vpop.f32.mrf.mxu2 }
 0x1d7   :  { %v1135_v61 = vadd.f32 %v1924_v18, %v1134_v57 }
 0x1d9   :  { %v1214_v31 = vmax.f32 %v1135_v61, 0.0 }
 0x1da   :  { %1300 = vmatmul.msk.f32.gmra.mxu2 %vm24_vm0, %v984_v35 }
 0x1db   :  { %1247 = vst.msk [vmem:[%s2114_s5 + $0x40] sm:$0xff] %vm1238_vm1, %v1214_v31 }
 0x1de   :  { %v1137_v0 = vpop.f32.mrf.mxu2 }
 0x1df   :  { %v1138_v63 = vadd.f32 %v1924_v18, %v1137_v0 }
 0x1e1   :  { %v1215_v51 = vmax.f32 %v1138_v63, 0.0 }
 0x1e2   :  { %1301 = vmatmul.msk.f32.gmra.mxu2 %vm24_vm0, %v985_v4 }
 0x1e3   :  { %1248 = vst.msk [vmem:[%s2114_s5 + $0x48] sm:$0xff] %vm1238_vm1, %v1215_v51 }
 0x1e6   :  { %v1140_v6 = vpop.f32.mrf.mxu2 }
 0x1e7   :  { %v1141_v41 = vadd.f32 %v1924_v18, %v1140_v6 }
 0x1e9   :  { %v1216_v42 = vmax.f32 %v1141_v41, 0.0 }
 0x1eb   :  { %1249 = vst.msk [vmem:[%s2114_s5 + $0x50] sm:$0xff] %vm1238_vm1, %v1216_v42 }
 0x1ee   :  { %v1143_v44 = vpop.f32.mrf.mxu2 }
 0x1ef   :  { %v1144_v45 = vadd.f32 %v1924_v18, %v1143_v44 }
 0x1f1   :  { %v1217_v46 = vmax.f32 %v1144_v45, 0.0 }
 0x1f3   :  { %1250 = vst.msk [vmem:[%s2114_s5 + $0x58] sm:$0xff] %vm1238_vm1, %v1217_v46 }
 0x1f6   :  { %v1146_v32 = vpop.f32.mrf.mxu2 }
 0x1f7   :  { %v1147_v2 = vadd.f32 %v1924_v18, %v1146_v32 }
 0x1f9   :  { %v1218_v39 = vmax.f32 %v1147_v2, 0.0 }
 0x1fb   :  { %1251 = vst.msk [vmem:[%s2114_s5 + $0x60] sm:$0xff] %vm1238_vm1, %v1218_v39 }
 0x1fe   :  { %v1149_v47 = vpop.f32.mrf.mxu2 }
 0x1ff   :  { %v1150_v9 = vadd.f32 %v1924_v18, %v1149_v47 }
 0x201   :  { %v1219_v34 = vmax.f32 %v1150_v9, 0.0 }
 0x203   :  { %1252 = vst.msk [vmem:[%s2114_s5 + $0x68] sm:$0xff] %vm1238_vm1, %v1219_v34 }
 0x206   :  { %v1152_v40 = vpop.f32.mrf.mxu2 }
 0x207   :  { %v1153_v11 = vadd.f32 %v1924_v18, %v1152_v40 }
 0x209   :  { %v1220_v48 = vmax.f32 %v1153_v11, 0.0 }
 0x20b   :  { %1253 = vst.msk [vmem:[%s2114_s5 + $0x70] sm:$0xff] %vm1238_vm1, %v1220_v48  ;;  %v1191_v49 = vpop.f32.mrf.mxu3 }
 0x20c   :  { %v1192_v13 = vadd.f32 %v1924_v18, %v1191_v49 }
 0x20e   :  { %v1233_v53 = vmax.f32 %v1192_v13, 0.0  ;;  %v1155_v50 = vpop.f32.mrf.mxu2 }
 0x20f   :  { %v1156_v38 = vadd.f32 %v1924_v18, %v1155_v50 }
 0x210   :  { %1266 = vst.msk [vmem:[%s2114_s5 + $0xd8] sm:$0xff] %vm1238_vm1, %v1233_v53 }
 0x211   :  { %v1221_v24 = vmax.f32 %v1156_v38, 0.0 }
 0x213   :  { %1254 = vst.msk [vmem:[%s2114_s5 + $0x78] sm:$0xff] %vm1238_vm1, %v1221_v24  ;;  %v1194_v29 = vpop.f32.mrf.mxu3 }
 0x214   :  { %v1195_v30 = vadd.f32 %v1924_v18, %v1194_v29 }
 0x216   :  { %v1234_v55 = vmax.f32 %v1195_v30, 0.0  ;;  %v1158_v58 = vpop.f32.mrf.mxu2 }
 0x217   :  { %v1159_v59 = vadd.f32 %v1924_v18, %v1158_v58 }
 0x218   :  { %1267 = vst.msk [vmem:[%s2114_s5 + $0xe0] sm:$0xff] %vm1238_vm1, %v1234_v55 }
 0x219   :  { %v1222_v56 = vmax.f32 %v1159_v59, 0.0 }
 0x21b   :  { %1255 = vst.msk [vmem:[%s2114_s5 + $0x80] sm:$0xff] %vm1238_vm1, %v1222_v56  ;;  %v1197_v60 = vpop.f32.mrf.mxu3 }
 0x21c   :  { %v1198_v36 = vadd.f32 %v1924_v18, %v1197_v60 }
 0x21e   :  { %v1235_v62 = vmax.f32 %v1198_v36, 0.0  ;;  %v1161_v19 = vpop.f32.mrf.mxu2 }
 0x21f   :  { %v1162_v1 = vadd.f32 %v1924_v18, %v1161_v19 }
 0x220   :  { %1268 = vst.msk [vmem:[%s2114_s5 + $0xe8] sm:$0xff] %vm1238_vm1, %v1235_v62 }
 0x221   :  { %v1223_v3 = vmax.f32 %v1162_v1, 0.0 }
 0x223   :  { %1256 = vst.msk [vmem:[%s2114_s5 + $0x88] sm:$0xff] %vm1238_vm1, %v1223_v3  ;;  %v1200_v5 = vpop.f32.mrf.mxu3 }
 0x224   :  { %v1201_v7 = vadd.f32 %v1924_v18, %v1200_v5 }
 0x226   :  { %v1236_v8 = vmax.f32 %v1201_v7, 0.0  ;;  %v1164_v52 = vpop.f32.mrf.mxu2 }
 0x227   :  { %v1165_v37 = vadd.f32 %v1924_v18, %v1164_v52 }
 0x228   :  { %1269 = vst.msk [vmem:[%s2114_s5 + $0xf0] sm:$0xff] %vm1238_vm1, %v1236_v8 }
 0x229   :  { %v1224_v54 = vmax.f32 %v1165_v37, 0.0 }
 0x22b   :  { %1257 = vst.msk [vmem:[%s2114_s5 + $0x90] sm:$0xff] %vm1238_vm1, %v1224_v54  ;;  %v1203_v12 = vpop.f32.mrf.mxu3 }
 0x22c   :  { %v1204_v14 = vadd.f32 %v1924_v18, %v1203_v12 }
 0x22e   :  { %v1237_v15 = vmax.f32 %v1204_v14, 0.0  ;;  %v1167_v33 = vpop.f32.mrf.mxu2 }
 0x22f   :  { %v1168_v16 = vadd.f32 %v1924_v18, %v1167_v33 }
 0x230   :  { %1270 = vst.msk [vmem:[%s2114_s5 + $0xf8] sm:$0xff] %vm1238_vm1, %v1237_v15 }
 0x231   :  { %v1225_v17 = vmax.f32 %v1168_v16, 0.0 }
 0x233   :  { %1258 = vst.msk [vmem:[%s2114_s5 + $0x98] sm:$0xff] %vm1238_vm1, %v1225_v17 }
 0x236   :  { %v1170_v43 = vpop.f32.mrf.mxu2 }
 0x237   :  { %v1171_v10 = vadd.f32 %v1924_v18, %v1170_v43 }
 0x239   :  { %v1226_v20 = vmax.f32 %v1171_v10, 0.0 }
 0x23b   :  { %1259 = vst.msk [vmem:[%s2114_s5 + $0xa0] sm:$0xff] %vm1238_vm1, %v1226_v20 }
 0x23e   :  { %v1173_v22 = vpop.f32.mrf.mxu2 }
 0x23f   :  { %v1174_v23 = vadd.f32 %v1924_v18, %v1173_v22 }
 0x241   :  { %v1227_v26 = vmax.f32 %v1174_v23, 0.0 }
 0x243   :  { %1260 = vst.msk [vmem:[%s2114_s5 + $0xa8] sm:$0xff] %vm1238_vm1, %v1227_v26 }
 0x246   :  { %v1176_v27 = vpop.f32.mrf.mxu2 }
 0x247   :  { %v1177_v25 = vadd.f32 %v1924_v18, %v1176_v27 }
 0x249   :  { %v1228_v28 = vmax.f32 %v1177_v25, 0.0 }
 0x24b   :  { %1261 = vst.msk [vmem:[%s2114_s5 + $0xb0] sm:$0xff] %vm1238_vm1, %v1228_v28 }
 0x24e   :  { %v1179_v21 = vpop.f32.mrf.mxu2 }
 0x24f   :  { %v1180_v57 = vadd.f32 %v1924_v18, %v1179_v21 }
 0x251   :  { %v1229_v61 = vmax.f32 %v1180_v57, 0.0 }
 0x253   :  { %1262 = vst.msk [vmem:[%s2114_s5 + $0xb8] sm:$0xff] %vm1238_vm1, %v1229_v61 }
 0x256   :  { %v1182_v31 = vpop.f32.mrf.mxu2 }
 0x257   :  { %v1183_v35 = vadd.f32 %v1924_v18, %v1182_v31 }
 0x259   :  { %v1230_v0 = vmax.f32 %v1183_v35, 0.0 }
 0x25b   :  { %1263 = vst.msk [vmem:[%s2114_s5 + $0xc0] sm:$0xff] %vm1238_vm1, %v1230_v0 }
 0x25e   :  { %v1185_v63 = vpop.f32.mrf.mxu2 }
 0x25f   :  { %v1186_v51 = vadd.f32 %v1924_v18, %v1185_v63 }
 0x261   :  { %v1231_v4 = vmax.f32 %v1186_v51, 0.0 }
 0x263   :  { %1264 = vst.msk [vmem:[%s2114_s5 + $0xc8] sm:$0xff] %vm1238_vm1, %v1231_v4 }
 0x266   :  { %v1188_v6 = vpop.f32.mrf.mxu2 }
 0x267   :  { %v1189_v41 = vadd.f32 %v1924_v18, %v1188_v6 }
 0x269   :  { %v1232_v42 = vmax.f32 %v1189_v41, 0.0 }
 0x26b   :  { %1265 = vst.msk [vmem:[%s2114_s5 + $0xd0] sm:$0xff] %vm1238_vm1, %v1232_v42 }

// kernel: gcn_lpa_forward.6
= control target key start
LH: loop header
LB: loop body
LE: loop exit
PB: predicated region body
PF: predicated region fallthrough
CT: control target
= control target key end

     0   :  { %v2073_v0 = vmov 0   ;;  %vm24_vm0 = vcmask 261120   ;;  %vm1816_vm4 = vcmask 64512   ;;  %s2957_s1 = inlined_call_operand.vmem [shape: f32[256,1], index: 1, kind: input, shape index: {}]   ;;  %s2958_s2 = inlined_call_operand.vmem [shape: f32[256,32], index: 2, kind: input, shape index: {}]   ;;  %s2959_s0 = inlined_call_operand.vmem [shape: bf16[256,256], index: 0, kind: input, shape index: {}]   ;;  %s2960_s3 = inlined_call_operand.vmem [shape: f32[32,8], index: 3, kind: input, shape index: {}]   ;;  %s2961_s4 = inlined_call_operand.vmem [shape: f32[1,8], index: 4, kind: input, shape index: {}]   ;;  %s2962_s5 = inlined_call_operand.vmem [shape: f32[256,8], index: 5, kind: output, shape index: {}]  }
   0x1   :  { %1942 = vset.pattern.permute.xlu2 %v2073_v0  ;;  %1941 = vset.pattern.permute.xlu1 %v2073_v0  ;;  %v93_v1 = vld [vmem:[%s2957_s1 + $0x20] sm:$0xff]  ;;  %v91_v2 = vld [vmem:[%s2957_s1 + $0x10] sm:$0xff]  ;;  %v94_v7 = vld [vmem:[%s2957_s1 + $0x28] sm:$0xff] }
   0x2   :  { %v89_v3 = vld [vmem:[%s2957_s1] sm:$0xff]  ;;  %1940 = vset.pattern.permute.xlu0 %v2073_v0  ;;  %v125_v4 = vpack.c.bf16 %v93_v1, %v93_v1  ;;  %v123_v5 = vpack.c.bf16 %v91_v2, %v91_v2  ;;  %v92_v8 = vld [vmem:[%s2957_s1 + $0x18] sm:$0xff]  ;;  %v90_v9 = vld [vmem:[%s2957_s1 + $0x8] sm:$0xff]  ;;  %v126_v10 = vpack.c.bf16 %v94_v7, %v94_v7 }
   0x3   :  { %v121_v6 = vpack.c.bf16 %v89_v3, %v89_v3  ;;  %v124_v11 = vpack.c.bf16 %v92_v8, %v92_v8  ;;  %v122_v12 = vpack.c.bf16 %v90_v9, %v90_v9  ;;  %v97_v13 = vld [vmem:[%s2957_s1 + $0x40] sm:$0xff]  ;;  %v96_v14 = vld [vmem:[%s2957_s1 + $0x38] sm:$0xff]  ;;  %v95_v15 = vld [vmem:[%s2957_s1 + $0x30] sm:$0xff] }
   0x4   :  { %191 = vperm.xlu2 %1942, %v125_v4   ;;  %173 = vperm.xlu1 %1941, %v123_v5   ;;  %v129_v16 = vpack.c.bf16 %v97_v13, %v97_v13  ;;  %v128_v17 = vpack.c.bf16 %v96_v14, %v96_v14  ;;  %v127_v18 = vpack.c.bf16 %v95_v15, %v95_v15  ;;  %v100_v19 = vld [vmem:[%s2957_s1 + $0x58] sm:$0xff]  ;;  %v99_v20 = vld [vmem:[%s2957_s1 + $0x50] sm:$0xff]  ;;  %v98_v21 = vld [vmem:[%s2957_s1 + $0x48] sm:$0xff] }
   0x5   :  { %155 = vperm.xlu0 %1940, %v121_v6   ;;  %v132_v22 = vpack.c.bf16 %v100_v19, %v100_v19  ;;  %v131_v23 = vpack.c.bf16 %v99_v20, %v99_v20  ;;  %v130_v24 = vpack.c.bf16 %v98_v21, %v98_v21  ;;  %v101_v25 = vld [vmem:[%s2957_s1 + $0x60] sm:$0xff]  ;;  %v114_v26 = vld [vmem:[%s2957_s1 + $0xc8] sm:$0xff]  ;;  %v116_v31 = vld [vmem:[%s2957_s1 + $0xd8] sm:$0xff] }
   0x6   :  { %v113_v27 = vld [vmem:[%s2957_s1 + $0xc0] sm:$0xff]  ;;  %v133_v28 = vpack.c.bf16 %v101_v25, %v101_v25  ;;  %v146_v29 = vpack.c.bf16 %v114_v26, %v114_v26  ;;  %v115_v32 = vld [vmem:[%s2957_s1 + $0xd0] sm:$0xff]  ;;  %v102_v33 = vld [vmem:[%s2957_s1 + $0x68] sm:$0xff]  ;;  %v148_v34 = vpack.c.bf16 %v116_v31, %v116_v31 }
   0x7   :  { %v145_v30 = vpack.c.bf16 %v113_v27, %v113_v27  ;;  %v147_v35 = vpack.c.bf16 %v115_v32, %v115_v32  ;;  %v134_v36 = vpack.c.bf16 %v102_v33, %v102_v33  ;;  %v117_v37 = vld [vmem:[%s2957_s1 + $0xe0] sm:$0xff]  ;;  %v104_v38 = vld [vmem:[%s2957_s1 + $0x78] sm:$0xff]  ;;  %v103_v39 = vld [vmem:[%s2957_s1 + $0x70] sm:$0xff] }
   0x8   :  { %v149_v40 = vpack.c.bf16 %v117_v37, %v117_v37  ;;  %v136_v41 = vpack.c.bf16 %v104_v38, %v104_v38  ;;  %v135_v42 = vpack.c.bf16 %v103_v39, %v103_v39  ;;  %v106_v43 = vld [vmem:[%s2957_s1 + $0x88] sm:$0xff]  ;;  %v105_v44 = vld [vmem:[%s2957_s1 + $0x80] sm:$0xff]  ;;  %v107_v49 = vld [vmem:[%s2957_s1 + $0x90] sm:$0xff] }
   0x9   :  { %v118_v45 = vld [vmem:[%s2957_s1 + $0xe8] sm:$0xff]  ;;  %v138_v46 = vpack.c.bf16 %v106_v43, %v106_v43  ;;  %v137_v47 = vpack.c.bf16 %v105_v44, %v105_v44  ;;  %v120_v50 = vld [vmem:[%s2957_s1 + $0xf8] sm:$0xff]  ;;  %v119_v51 = vld [vmem:[%s2957_s1 + $0xf0] sm:$0xff]  ;;  %v139_v52 = vpack.c.bf16 %v107_v49, %v107_v49 }
   0xa   :  { %v150_v48 = vpack.c.bf16 %v118_v45, %v118_v45  ;;  %v152_v53 = vpack.c.bf16 %v120_v50, %v120_v50  ;;  %v151_v54 = vpack.c.bf16 %v119_v51, %v119_v51  ;;  %v110_v55 = vld [vmem:[%s2957_s1 + $0xa8] sm:$0xff]  ;;  %v109_v56 = vld [vmem:[%s2957_s1 + $0xa0] sm:$0xff]  ;;  %v108_v57 = vld [vmem:[%s2957_s1 + $0x98] sm:$0xff] }
   0xb   :  { %v679_v58 = vld [vmem:[%s2958_s2 + $0x70] sm:$0xff]  ;;  %v680_v59 = vld [vmem:[%s2958_s2 + $0x78] sm:$0xff]  ;;  %v142_v63 = vpack.c.bf16 %v110_v55, %v110_v55  ;;  %v141_v0 = vpack.c.bf16 %v109_v56, %v109_v56  ;;  %v140_v2 = vpack.c.bf16 %v108_v57, %v108_v57  ;;  %v677_v3 = vld [vmem:[%s2958_s2 + $0x60] sm:$0xff] }
   0xc   :  { %200 = vperm.xlu2 %1942, %v126_v10   ;;  %182 = vperm.xlu1 %1941, %v124_v11   ;;  %v704_v60 = vpack.c.bf16 %v680_v59, %v679_v58  ;;  %v695_v61 = vld [vmem:[%s2958_s2 + $0xf0] sm:$0xff]  ;;  %v696_v62 = vld [vmem:[%s2958_s2 + $0xf8] sm:$0xff]  ;;  %v678_v4 = vld [vmem:[%s2958_s2 + $0x68] sm:$0xff] }
   0xd   :  { %164 = vperm.xlu0 %1940, %v122_v12   ;;  %v2208_v1 = vpack.c.bf16 %v696_v62, %v695_v61  ;;  %v693_v5 = vld [vmem:[%s2958_s2 + $0xe0] sm:$0xff]  ;;  %v703_v6 = vpack.c.bf16 %v678_v4, %v677_v3  ;;  %v694_v7 = vld [vmem:[%s2958_s2 + $0xe8] sm:$0xff]  ;;  %v112_v9 = vld [vmem:[%s2957_s1 + $0xb8] sm:$0xff] }
   0xe   :  { %713 = vmatpush.bf16.msra.mxu0 %v704_v60  ;;  %1917 = vmatpush.bf16.msra.mxu3 %v704_v60  ;;  %v2223_v8 = vpack.c.bf16 %v694_v7, %v693_v5  ;;  %v111_v10 = vld [vmem:[%s2957_s1 + $0xb0] sm:$0xff]  ;;  %v676_v12 = vld [vmem:[%s2958_s2 + $0x58] sm:$0xff]  ;;  %v673_v19 = vld [vmem:[%s2958_s2 + $0x40] sm:$0xff] }
   0xf   :  { %802 = vmatpush.bf16.msra.mxu1 %v2208_v1  ;;  %v675_v11 = vld [vmem:[%s2958_s2 + $0x50] sm:$0xff]  ;;  %v692_v15 = vld [vmem:[%s2958_s2 + $0xd8] sm:$0xff]  ;;  %v674_v20 = vld [vmem:[%s2958_s2 + $0x48] sm:$0xff] }
  0x10   :  { %v702_v13 = vpack.c.bf16 %v676_v12, %v675_v11  ;;  %v691_v14 = vld [vmem:[%s2958_s2 + $0xd0] sm:$0xff]  ;;  %v689_v21 = vld [vmem:[%s2958_s2 + $0xc0] sm:$0xff]  ;;  %v672_v26 = vld [vmem:[%s2958_s2 + $0x38] sm:$0xff] }
  0x11   :  { %v671_v25 = vld [vmem:[%s2958_s2 + $0x30] sm:$0xff]  ;;  %v669_v31 = vld [vmem:[%s2958_s2 + $0x20] sm:$0xff]  ;;  %v670_v32 = vld [vmem:[%s2958_s2 + $0x28] sm:$0xff] }
  0x12   :  { %714 = vmatpush.bf16.msra.mxu0 %v703_v6  ;;  %1918 = vmatpush.bf16.msra.mxu3 %v703_v6  ;;  %v700_v27 = vpack.c.bf16 %v672_v26, %v671_v25  ;;  %v685_v33 = vld [vmem:[%s2958_s2 + $0xa0] sm:$0xff]  ;;  %v667_v38 = vld [vmem:[%s2958_s2 + $0x10] sm:$0xff]  ;;  %v668_v39 = vld [vmem:[%s2958_s2 + $0x18] sm:$0xff] }
  0x13   :  { %803 = vmatpush.bf16.msra.mxu1 %v2223_v8  ;;  %v665_v44 = vld [vmem:[%s2958_s2] sm:$0xff]  ;;  %v666_v45 = vld [vmem:[%s2958_s2 + $0x8] sm:$0xff]  ;;  %v2329_v11 = vld [vmem:[%s2959_s0 + $0xd8] sm:$0xff] }
  0x14   :  { %227 = vperm.xlu2 %1942, %v129_v16   ;;  %218 = vperm.xlu1 %1941, %v128_v17   ;;  %v144_v16 = vpack.c.bf16 %v112_v9, %v112_v9  ;;  %v710_v17 = vpack.c.bf16 %v692_v15, %v691_v14  ;;  %v57_v58 = vld [vmem:[%s2959_s0] sm:$0xff]  ;;  %v58_v60 = vld [vmem:[%s2959_s0 + $0x8] sm:$0xff] }
  0x15   :  { %209 = vperm.xlu0 %1940, %v127_v18   ;;  %v143_v18 = vpack.c.bf16 %v111_v10, %v111_v10  ;;  %v443_v4 = vunpack.c.l.bf16 %v58_v60  ;;  %v444_v5 = vunpack.c.h.bf16 %v58_v60  ;;  %v2353_v25 = vld [vmem:[%s2959_s0 + $0xe0] sm:$0xff] }
  0x16   :  { %715 = vmatpush.bf16.msra.mxu0 %v702_v13  ;;  %1919 = vmatpush.bf16.msra.mxu3 %v702_v13 }
  0x17   :  { %804 = vmatpush.bf16.msra.mxu1 %v710_v17 }
  0x1c   :  { %254 = vperm.xlu2 %1942, %v132_v22   ;;  %245 = vperm.xlu1 %1941, %v131_v23   ;;  %v701_v22 = vpack.c.bf16 %v674_v20, %v673_v19  ;;  %v690_v23 = vld [vmem:[%s2958_s2 + $0xc8] sm:$0xff]  ;;  %v59_v20 = vld [vmem:[%s2959_s0 + $0x10] sm:$0xff] }
  0x1d   :  { %236 = vperm.xlu0 %1940, %v130_v24   ;;  %v709_v24 = vpack.c.bf16 %v690_v23, %v689_v21  ;;  %v60_v23 = vld [vmem:[%s2959_s0 + $0x18] sm:$0xff]  ;;  %v445_v26 = vunpack.c.l.bf16 %v59_v20 }
  0x1e   :  { %716 = vmatpush.bf16.msra.mxu0 %v701_v22  ;;  %1920 = vmatpush.bf16.msra.mxu3 %v701_v22 }
  0x1f   :  { %805 = vmatpush.bf16.msra.mxu1 %v709_v24 }
  0x22   :  { %717 = vmatpush.bf16.msra.mxu0 %v700_v27  ;;  %1921 = vmatpush.bf16.msra.mxu3 %v700_v27  ;;  %v446_v27 = vunpack.c.h.bf16 %v59_v20 }
  0x24   :  { %263 = vperm.xlu2 %1942, %v133_v28   ;;  %380 = vperm.xlu1 %1941, %v146_v29   ;;  %v687_v28 = vld [vmem:[%s2958_s2 + $0xb0] sm:$0xff]  ;;  %v688_v29 = vld [vmem:[%s2958_s2 + $0xb8] sm:$0xff] }
  0x25   :  { %371 = vperm.xlu0 %1940, %v145_v30   ;;  %v708_v30 = vpack.c.bf16 %v688_v29, %v687_v28  ;;  %v447_v29 = vunpack.c.l.bf16 %v60_v23 }
  0x27   :  { %806 = vmatpush.bf16.msra.mxu1 %v708_v30 }
  0x2c   :  { %398 = vperm.xlu2 %1942, %v148_v34   ;;  %389 = vperm.xlu1 %1941, %v147_v35   ;;  %v699_v34 = vpack.c.bf16 %v670_v32, %v669_v31  ;;  %v686_v35 = vld [vmem:[%s2958_s2 + $0xa8] sm:$0xff] }
  0x2d   :  { %272 = vperm.xlu0 %1940, %v134_v36   ;;  %v707_v36 = vpack.c.bf16 %v686_v35, %v685_v33  ;;  %v498_v35 = vunpack.c.h.bf16 %v2353_v25 }
  0x2e   :  { %718 = vmatpush.bf16.msra.mxu0 %v699_v34  ;;  %1922 = vmatpush.bf16.msra.mxu3 %v699_v34 }
  0x2f   :  { %807 = vmatpush.bf16.msra.mxu1 %v707_v36 }
  0x34   :  { %407 = vperm.xlu2 %1942, %v149_v40   ;;  %290 = vperm.xlu1 %1941, %v136_v41   ;;  %v698_v40 = vpack.c.bf16 %v668_v39, %v667_v38  ;;  %v683_v41 = vld [vmem:[%s2958_s2 + $0x90] sm:$0xff] }
  0x35   :  { %281 = vperm.xlu0 %1940, %v135_v42   ;;  %v684_v42 = vld [vmem:[%s2958_s2 + $0x98] sm:$0xff] }
  0x36   :  { %v706_v43 = vpack.c.bf16 %v684_v42, %v683_v41  ;;  %719 = vmatpush.bf16.msra.mxu0 %v698_v40  ;;  %1923 = vmatpush.bf16.msra.mxu3 %v698_v40 }
  0x38   :  { %808 = vmatpush.bf16.msra.mxu1 %v706_v43 }
  0x3c   :  { %308 = vperm.xlu2 %1942, %v138_v46   ;;  %299 = vperm.xlu1 %1941, %v137_v47   ;;  %v681_v46 = vld [vmem:[%s2958_s2 + $0x80] sm:$0xff]  ;;  %v697_v47 = vpack.c.bf16 %v666_v45, %v665_v44  ;;  %v82_v44 = vld [vmem:[%s2959_s0 + $0xc8] sm:$0xff] }
  0x3d   :  { %416 = vperm.xlu0 %1940, %v150_v48   ;;  %v682_v48 = vld [vmem:[%s2958_s2 + $0x88] sm:$0xff]  ;;  %v81_v45 = vld [vmem:[%s2959_s0 + $0xc0] sm:$0xff] }
  0x3e   :  { %v705_v49 = vpack.c.bf16 %v682_v48, %v681_v46  ;;  %720 = vmatpush.bf16.msra.mxu0 %v697_v47  ;;  %1924 = vmatpush.bf16.msra.mxu3 %v697_v47 }
  0x40   :  { %809 = vmatpush.bf16.msra.mxu1 %v705_v49 }
  0x42   :  { %1925 = vmatpush.bf16.msrb.mxu3 %v2208_v1 }
  0x44   :  { %317 = vperm.xlu2 %1942, %v139_v52   ;;  %434 = vperm.xlu1 %1941, %v152_v53   ;;  %v2074_v52 = vmov 839922192  }
  0x45   :  { %425 = vperm.xlu0 %1940, %v151_v54   ;;  %v159_v53 = vunpack.c.l.s4 %v2074_v52  ;;  %v491_v52 = vunpack.c.l.bf16 %v82_v44 }
  0x46   :  { %1926 = vmatpush.bf16.msrb.mxu3 %v2223_v8 }
  0x47   :  { %v2314_v57 = vunpack.c.0.s8 %v159_v53  ;;  %v492_v53 = vunpack.c.h.bf16 %v82_v44 }
  0x4a   :  { %1927 = vmatpush.bf16.msrb.mxu3 %v710_v17  ;;  %v496_v17 = vunpack.c.h.bf16 %v2329_v11 }
  0x4c   :  { %344 = vperm.xlu2 %1942, %v142_v63   ;;  %335 = vperm.xlu1 %1941, %v141_v0   ;;  %v441_v63 = vunpack.c.l.bf16 %v57_v58  ;;  %v442_v0 = vunpack.c.h.bf16 %v57_v58  ;;  %v489_v58 = vunpack.c.l.bf16 %v81_v45 }
  0x4d   :  { %326 = vperm.xlu0 %1940, %v140_v2  }
  0x4e   :  { %1928 = vmatpush.bf16.msrb.mxu3 %v709_v24 }
  0x52   :  { %1929 = vmatpush.bf16.msrb.mxu3 %v708_v30  ;;  %v448_v30 = vunpack.c.h.bf16 %v60_v23 }
  0x54   :  { %362 = vperm.xlu1 %1941, %v144_v16  }
  0x55   :  { %353 = vperm.xlu0 %1940, %v143_v18  }
  0x56   :  { %1930 = vmatpush.bf16.msrb.mxu3 %v707_v36 }
  0x5a   :  { %1931 = vmatpush.bf16.msrb.mxu3 %v706_v43 }
  0x5e   :  { %v2280_v37 = vpop.permute.xlu2 %191  ;;  %1932 = vmatpush.bf16.msrb.mxu3 %v705_v49 }
  0x66   :  { %v2306_v50 = vpop.permute.xlu2 %200 }
  0x6e   :  { %v2310_v51 = vpop.permute.xlu2 %227 }
  0x76   :  { %v2312_v54 = vpop.permute.xlu2 %254  ;;  %v174_v55 = vpop.permute.xlu1 %173 }
  0x77   :  { %v156_v56 = vpop.permute.xlu0 %155  ;;  %v179_v21 = vperm.slane %v174_v55, %v2314_v57 }
  0x78   :  { %v161_v59 = vperm.slane %v156_v56, %v2314_v57 }
  0x79   :  { %v507_v28 = vunpack.c.l.bf16 %v179_v21 }
  0x7a   :  { %v505_v2 = vunpack.c.l.bf16 %v161_v59  ;;  %v490_v59 = vunpack.c.h.bf16 %v81_v45 }
  0x7b   :  { %v541_v39 = vmul.f32 %v507_v28, %v445_v26  ;;  %v542_v40 = vmul.f32 %v507_v28, %v446_v27 }
  0x7c   :  { %v537_v7 = vmul.f32 %v505_v2, %v441_v63  ;;  %v538_v8 = vmul.f32 %v505_v2, %v442_v0  ;;  %v197_v63 = vperm.slane %v2280_v37, %v2314_v57  ;;  %v62_v0 = vld [vmem:[%s2959_s0 + $0x28] sm:$0xff] }
  0x7e   :  { %v2323_v61 = vpop.permute.xlu2 %263  ;;  %v183_v62 = vpop.permute.xlu1 %182 }
  0x7f   :  { %v165_v1 = vpop.permute.xlu0 %164  ;;  %v188_v22 = vperm.slane %v183_v62, %v2314_v57  ;;  %v61_v62 = vld [vmem:[%s2959_s0 + $0x20] sm:$0xff] }
  0x80   :  { %v170_v3 = vperm.slane %v165_v1, %v2314_v57  ;;  %v206_v1 = vperm.slane %v2306_v50, %v2314_v57  ;;  %v450_v37 = vunpack.c.h.bf16 %v61_v62 }
  0x81   :  { %v508_v31 = vunpack.c.l.bf16 %v188_v22 }
  0x82   :  { %v506_v6 = vunpack.c.l.bf16 %v170_v3 }
  0x83   :  { %v543_v41 = vmul.f32 %v508_v31, %v447_v29  ;;  %v544_v42 = vmul.f32 %v508_v31, %v448_v30 }
  0x84   :  { %v539_v9 = vmul.f32 %v506_v6, %v443_v4  ;;  %v540_v10 = vmul.f32 %v506_v6, %v444_v5 }
  0x85   :  { %v603_v47 = vpack.c.bf16 %v543_v41, %v541_v39  ;;  %v604_v48 = vpack.c.bf16 %v544_v42, %v542_v40  ;;  %v495_v40 = vunpack.c.l.bf16 %v2329_v11  ;;  %v64_v42 = vld [vmem:[%s2959_s0 + $0x38] sm:$0xff] }
  0x86   :  { %v399_v12 = vpop.permute.xlu2 %398  ;;  %v2331_v13 = vpop.permute.xlu1 %218  ;;  %v601_v14 = vpack.c.bf16 %v539_v9, %v537_v7  ;;  %v602_v15 = vpack.c.bf16 %v540_v10, %v538_v8  ;;  %v83_v7 = vld [vmem:[%s2959_s0 + $0xd0] sm:$0xff]  ;;  %v449_v8 = vunpack.c.l.bf16 %v61_v62  ;;  %v451_v9 = vunpack.c.l.bf16 %v62_v0 }
  0x87   :  { %v404_v16 = vperm.slane %v399_v12, %v2314_v57  ;;  %v2335_v18 = vpop.permute.xlu0 %209  ;;  %v452_v10 = vunpack.c.h.bf16 %v62_v0  ;;  %v509_v12 = vunpack.c.l.bf16 %v197_v63  ;;  %v494_v20 = vunpack.c.h.bf16 %v83_v7 }
  0x88   :  { %721 = vmatmul.bf16.vlgmr.msra.gmra.mxu0 %v601_v14  ;;  %810 = vmatmul.bf16.vlgmr.msra.gmra.mxu1 %v602_v15  ;;  %v510_v14 = vunpack.c.l.bf16 %v206_v1  ;;  %v493_v31 = vunpack.c.l.bf16 %v83_v7  ;;  %v224_v41 = vperm.slane %v2331_v13, %v2314_v57  ;;  %v215_v44 = vperm.slane %v2335_v18, %v2314_v57  ;;  %v86_v13 = vld [vmem:[%s2959_s0 + $0xe8] sm:$0xff] }
  0x89   :  { %v2337_v19 = vunpack.c.l.bf16 %v404_v16  ;;  %v545_v23 = vmul.f32 %v509_v12, %v449_v8  ;;  %v546_v26 = vmul.f32 %v509_v12, %v450_v37  ;;  %v455_v11 = vunpack.c.l.bf16 %v64_v42 }
  0x8a   :  { %v547_v27 = vmul.f32 %v510_v14, %v451_v9  ;;  %v548_v28 = vmul.f32 %v510_v14, %v452_v10  ;;  %v499_v7 = vunpack.c.l.bf16 %v86_v13 }
  0x8b   :  { %v2348_v24 = vmul.f32 %v2337_v19, %v496_v17 }
  0x8e   :  { %v408_v32 = vpop.permute.xlu2 %407  ;;  %v2355_v33 = vpop.permute.xlu1 %245 }
  0x8f   :  { %v413_v34 = vperm.slane %v408_v32, %v2314_v57  ;;  %v2359_v36 = vpop.permute.xlu0 %236 }
  0x91   :  { %v2361_v38 = vunpack.c.l.bf16 %v413_v34  ;;  %v605_v34 = vpack.c.bf16 %v547_v27, %v545_v23  ;;  %v66_v27 = vld [vmem:[%s2959_s0 + $0x48] sm:$0xff] }
  0x93   :  { %v2364_v43 = vmul.f32 %v2361_v38, %v498_v35  ;;  %v606_v35 = vpack.c.bf16 %v548_v28, %v546_v26  ;;  %v65_v26 = vld [vmem:[%s2959_s0 + $0x40] sm:$0xff] }
  0x96   :  { %v381_v46 = vpop.permute.xlu1 %380 }
  0x97   :  { %v386_v49 = vperm.slane %v381_v46, %v2314_v57  ;;  %v372_v55 = vpop.permute.xlu0 %371  ;;  %v63_v46 = vld [vmem:[%s2959_s0 + $0x30] sm:$0xff] }
  0x98   :  { %v377_v56 = vperm.slane %v372_v55, %v2314_v57  ;;  %726 = vmatmul.bf16.gmra.mxu0 %v603_v47  ;;  %815 = vmatmul.bf16.gmra.mxu1 %v604_v48  ;;  %v591_v47 = vmul.f32 %v2337_v19, %v495_v40  ;;  %v456_v48 = vunpack.c.h.bf16 %v64_v42  ;;  %v511_v55 = vunpack.c.l.bf16 %v215_v44 }
  0x99   :  { %v530_v60 = vunpack.c.l.bf16 %v386_v49  ;;  %v512_v49 = vunpack.c.l.bf16 %v224_v41  ;;  %v458_v41 = vunpack.c.h.bf16 %v65_v26  ;;  %v459_v44 = vunpack.c.l.bf16 %v66_v27 }
  0x9a   :  { %v529_v2 = vunpack.c.l.bf16 %v377_v56 }
  0x9b   :  { %v587_v3 = vmul.f32 %v530_v60, %v491_v52  ;;  %v2384_v4 = vmul.f32 %v530_v60, %v492_v53  ;;  %v453_v52 = vunpack.c.l.bf16 %v63_v46  ;;  %v454_v53 = vunpack.c.h.bf16 %v63_v46 }
  0x9c   :  { %v585_v5 = vmul.f32 %v529_v2, %v489_v58  ;;  %v2386_v6 = vmul.f32 %v529_v2, %v490_v59  ;;  %v500_v60 = vunpack.c.h.bf16 %v86_v13  ;;  %v551_v62 = vmul.f32 %v512_v49, %v455_v11 }
  0x9d   :  { %v552_v19 = vmul.f32 %v512_v49, %v456_v48  ;;  %v549_v63 = vmul.f32 %v511_v55, %v453_v52  ;;  %v550_v0 = vmul.f32 %v511_v55, %v454_v53 }
  0x9e   :  { %v390_v15 = vpop.permute.xlu1 %389  ;;  %v625_v16 = vpack.c.bf16 %v587_v3, %v585_v5  ;;  %v626_v50 = vpack.c.bf16 %v2384_v4, %v2386_v6  ;;  %v88_v3 = vld [vmem:[%s2959_s0 + $0xf8] sm:$0xff]  ;;  %v87_v5 = vld [vmem:[%s2959_s0 + $0xf0] sm:$0xff] }
  0x9f   :  { %v395_v17 = vperm.slane %v390_v15, %v2314_v57  ;;  %v2394_v21 = vpop.permute.xlu0 %272  ;;  %v607_v37 = vpack.c.bf16 %v551_v62, %v549_v63  ;;  %v608_v9 = vpack.c.bf16 %v552_v19, %v550_v0  ;;  %v504_v14 = vunpack.c.h.bf16 %v88_v3 }
  0xa0   :  { %781 = vmatmul.bf16.vlgmr.msra.gmra.mxu3 %v625_v16  ;;  %v497_v16 = vunpack.c.l.bf16 %v2353_v25  ;;  %v242_v25 = vperm.slane %v2359_v36, %v2314_v57  ;;  %v503_v52 = vunpack.c.l.bf16 %v88_v3  ;;  %v501_v53 = vunpack.c.l.bf16 %v87_v5 }
  0xa1   :  { %v531_v22 = vunpack.c.l.bf16 %v395_v17 }
  0xa2   :  { %v514_v46 = vunpack.c.l.bf16 %v242_v25 }
  0xa3   :  { %v2396_v29 = vmul.f32 %v531_v22, %v494_v20  ;;  %v589_v45 = vmul.f32 %v531_v22, %v493_v31  ;;  %v502_v20 = vunpack.c.h.bf16 %v87_v5  ;;  %v233_v22 = vperm.slane %v2310_v51, %v2314_v57 }
  0xa4   :  { %v457_v51 = vunpack.c.l.bf16 %v65_v26  ;;  %v555_v49 = vmul.f32 %v514_v46, %v459_v44  ;;  %v994_v44 = vld [vmem:[%s2960_s3 + $0x18] sm:$0xff] }
  0xa5   :  { %v628_v30 = vpack.c.bf16 %v2348_v24, %v2396_v29  ;;  %v627_v18 = vpack.c.bf16 %v591_v47, %v589_v45  ;;  %v513_v42 = vunpack.c.l.bf16 %v233_v22  ;;  %v460_v45 = vunpack.c.h.bf16 %v66_v27  ;;  %1107 = vmatpush.msra.mxu2 %v994_v44  ;;  %1933 = vmatpush.msra.mxu3 %v994_v44 }
  0xa6   :  { %v2400_v32 = vpop.permute.xlu1 %290 }
  0xa7   :  { %v2402_v39 = vpop.permute.xlu0 %281  ;;  %v553_v36 = vmul.f32 %v513_v42, %v457_v51  ;;  %v554_v48 = vmul.f32 %v513_v42, %v458_v41  ;;  %v556_v13 = vmul.f32 %v514_v46, %v460_v45  ;;  %v296_v41 = vperm.slane %v2400_v32, %v2314_v57  ;;  %v71_v45 = vld [vmem:[%s2959_s0 + $0x70] sm:$0xff] }
  0xa8   :  { %731 = vmatmul.bf16.gmra.mxu0 %v605_v34  ;;  %820 = vmatmul.bf16.gmra.mxu1 %v606_v35  ;;  %v593_v35 = vmul.f32 %v2361_v38, %v497_v16  ;;  %v70_v16 = vld [vmem:[%s2959_s0 + $0x68] sm:$0xff]  ;;  %v287_v42 = vperm.slane %v2402_v39, %v2314_v57  ;;  %v993_v32 = vld [vmem:[%s2960_s3 + $0x10] sm:$0xff] }
  0xa9   :  { %v609_v38 = vpack.c.bf16 %v555_v49, %v553_v36  ;;  %v610_v55 = vpack.c.bf16 %v556_v13, %v554_v48  ;;  %v467_v22 = vunpack.c.l.bf16 %v70_v16  ;;  %1108 = vmatpush.msra.mxu2 %v993_v32  ;;  %1934 = vmatpush.msra.mxu3 %v993_v32  ;;  %v469_v36 = vunpack.c.l.bf16 %v71_v45  ;;  %v992_v13 = vld [vmem:[%s2960_s3 + $0x8] sm:$0xff] }
  0xaa   :  { %v470_v48 = vunpack.c.h.bf16 %v71_v45  ;;  %v519_v49 = vunpack.c.l.bf16 %v287_v42 }
  0xab   :  { %1109 = vmatpush.msra.mxu2 %v992_v13  ;;  %1935 = vmatpush.msra.mxu3 %v992_v13  ;;  %v77_v13 = vld [vmem:[%s2959_s0 + $0xa0] sm:$0xff] }
  0xae   :  { %v2419_v56 = vpop.permute.xlu1 %299 }
  0xaf   :  { %v417_v58 = vpop.permute.xlu0 %416 }
  0xb0   :  { %v422_v59 = vperm.slane %v417_v58, %v2314_v57  ;;  %786 = vmatmul.bf16.gmra.mxu3 %v627_v18  ;;  %v68_v18 = vld [vmem:[%s2959_s0 + $0x58] sm:$0xff]  ;;  %v260_v58 = vperm.slane %v2312_v54, %v2314_v57 }
  0xb1   :  { %v463_v63 = vunpack.c.l.bf16 %v68_v18  ;;  %v464_v0 = vunpack.c.h.bf16 %v68_v18  ;;  %v566_v18 = vmul.f32 %v519_v49, %v470_v48 }
  0xb2   :  { %v534_v1 = vunpack.c.l.bf16 %v422_v59  ;;  %v67_v59 = vld [vmem:[%s2959_s0 + $0x50] sm:$0xff]  ;;  %v516_v3 = vunpack.c.l.bf16 %v260_v58  ;;  %v305_v58 = vperm.slane %v2419_v56, %v2314_v57 }
  0xb3   :  { %v462_v5 = vunpack.c.h.bf16 %v67_v59 }
  0xb4   :  { %v2422_v2 = vmul.f32 %v534_v1, %v500_v60  ;;  %v595_v28 = vmul.f32 %v534_v1, %v499_v7  ;;  %v251_v60 = vperm.slane %v2355_v33, %v2314_v57  ;;  %v461_v1 = vunpack.c.l.bf16 %v67_v59  ;;  %v73_v59 = vld [vmem:[%s2959_s0 + $0x80] sm:$0xff] }
  0xb5   :  { %v278_v33 = vperm.slane %v2394_v21, %v2314_v57  ;;  %v2075_v21 = vmov 0.0   ;;  %v473_v56 = vunpack.c.l.bf16 %v73_v59 }
  0xb6   :  { %v435_v8 = vpop.permute.xlu1 %434  ;;  %v630_v10 = vpack.c.bf16 %v2422_v2, %v2364_v43  ;;  %v629_v47 = vpack.c.bf16 %v595_v28, %v593_v35  ;;  %v515_v7 = vunpack.c.l.bf16 %v251_v60  ;;  %25 = vst.msk [vmem:[#allocation2] sm:$0xff] %vm24_vm0, %v2075_v21  ;;  %v76_v43 = vld [vmem:[%s2959_s0 + $0x98] sm:$0xff] }
  0xb7   :  { %v440_v12 = vperm.slane %v435_v8, %v2314_v57  ;;  %v426_v15 = vpop.permute.xlu0 %425  ;;  %v518_v26 = vunpack.c.l.bf16 %v278_v33  ;;  %26 = vst.msk [vmem:[#allocation2 + $0x8] sm:$0xff] %vm24_vm0, %v2075_v21 }
  0xb8   :  { %v431_v17 = vperm.slane %v426_v15, %v2314_v57  ;;  %736 = vmatmul.bf16.gmra.mxu0 %v607_v37  ;;  %825 = vmatmul.bf16.gmra.mxu1 %v608_v9  ;;  %v559_v37 = vmul.f32 %v516_v3, %v463_v63  ;;  %v560_v9 = vmul.f32 %v516_v3, %v464_v0  ;;  %v521_v63 = vunpack.c.l.bf16 %v305_v58 }
  0xb9   :  { %v536_v23 = vunpack.c.l.bf16 %v440_v12  ;;  %v557_v54 = vmul.f32 %v515_v7, %v461_v1  ;;  %v558_v12 = vmul.f32 %v515_v7, %v462_v5  ;;  %27 = vst.msk [vmem:[#allocation2 + $0x10] sm:$0xff] %vm24_vm0, %v2075_v21 }
  0xba   :  { %v535_v31 = vunpack.c.l.bf16 %v431_v17  ;;  %v269_v17 = vperm.slane %v2323_v61, %v2314_v57  ;;  %v563_v61 = vmul.f32 %v518_v26, %v467_v22  ;;  %28 = vst.msk [vmem:[#allocation2 + $0x18] sm:$0xff] %vm24_vm0, %v2075_v21  ;;  %v569_v5 = vmul.f32 %v521_v63, %v473_v56 }
  0xbb   :  { %v2445_v34 = vmul.f32 %v536_v23, %v504_v14  ;;  %v599_v62 = vmul.f32 %v536_v23, %v503_v52  ;;  %v611_v14 = vpack.c.bf16 %v559_v37, %v557_v54  ;;  %v612_v15 = vpack.c.bf16 %v560_v9, %v558_v12  ;;  %29 = vst.msk [vmem:[#allocation2 + $0x20] sm:$0xff] %vm24_vm0, %v2075_v21  ;;  %v991_v52 = vld [vmem:[%s2960_s3] sm:$0xff] }
  0xbc   :  { %v2448_v40 = vmul.f32 %v535_v31, %v502_v20  ;;  %v597_v19 = vmul.f32 %v535_v31, %v501_v53  ;;  %v69_v20 = vld [vmem:[%s2959_s0 + $0x60] sm:$0xff]  ;;  %v468_v23 = vunpack.c.h.bf16 %v70_v16  ;;  %v517_v28 = vunpack.c.l.bf16 %v269_v17  ;;  %30 = vst.msk [vmem:[#allocation2 + $0x28] sm:$0xff] %vm24_vm0, %v2075_v21  ;;  %1110 = vmatpush.msra.mxu2 %v991_v52  ;;  %1936 = vmatpush.msra.mxu3 %v991_v52 }
  0xbd   :  { %v465_v27 = vunpack.c.l.bf16 %v69_v20  ;;  %v466_v25 = vunpack.c.h.bf16 %v69_v20  ;;  %31 = vst.msk [vmem:[#allocation2 + $0x30] sm:$0xff] %vm24_vm0, %v2075_v21  ;;  %v633_v54 = vld [vmem:[#allocation2] sm:$0xff] }
  0xbe   :  { %v632_v11 = vpack.c.bf16 %v2445_v34, %v2448_v40  ;;  %v631_v8 = vpack.c.bf16 %v599_v62, %v597_v19  ;;  %v564_v31 = vmul.f32 %v518_v26, %v468_v23  ;;  %32 = vst.msk [vmem:[#allocation2 + $0x38] sm:$0xff] %vm24_vm0, %v2075_v21  ;;  %v74_v62 = vld [vmem:[%s2959_s0 + $0x88] sm:$0xff]  ;;  %v474_v19 = vunpack.c.h.bf16 %v73_v59  ;;  %v336_v48 = vpop.permute.xlu1 %335 }
  0xbf   :  { %v561_v35 = vmul.f32 %v517_v28, %v465_v27  ;;  %v562_v51 = vmul.f32 %v517_v28, %v466_v25  ;;  %33 = vst.msk [vmem:[#allocation2 + $0x40] sm:$0xff] %vm24_vm0, %v2075_v21  ;;  %v475_v0 = vunpack.c.l.bf16 %v74_v62  ;;  %v476_v1 = vunpack.c.h.bf16 %v74_v62  ;;  %v327_v16 = vpop.permute.xlu0 %326  ;;  %v634_v26 = vld [vmem:[#allocation2 + $0x8] sm:$0xff] }
  0xc0   :  { %791 = vmatmul.bf16.gmra.mxu3 %v629_v47  ;;  %34 = vst.msk [vmem:[#allocation2 + $0x48] sm:$0xff] %vm24_vm0, %v2075_v21  ;;  %v520_v47 = vunpack.c.l.bf16 %v296_v41  ;;  %v570_v7 = vmul.f32 %v521_v63, %v474_v19  ;;  %v332_v22 = vperm.slane %v327_v16, %v2314_v57  ;;  %v479_v25 = vunpack.c.l.bf16 %v76_v43  ;;  %v635_v32 = vld [vmem:[#allocation2 + $0x10] sm:$0xff] }
  0xc1   :  { %v613_v4 = vpack.c.bf16 %v563_v61, %v561_v35  ;;  %v614_v6 = vpack.c.bf16 %v564_v31, %v562_v51  ;;  %35 = vst.msk [vmem:[#allocation2 + $0x50] sm:$0xff] %vm24_vm0, %v2075_v21  ;;  %v480_v28 = vunpack.c.h.bf16 %v76_v43  ;;  %v79_v43 = vld [vmem:[%s2959_s0 + $0xb0] sm:$0xff] }
  0xc2   :  { %36 = vst.msk [vmem:[#allocation2 + $0x58] sm:$0xff] %vm24_vm0, %v2075_v21 }
  0xc3   :  { %37 = vst.msk [vmem:[#allocation2 + $0x60] sm:$0xff] %vm24_vm0, %v2075_v21 }
  0xc4   :  { %38 = vst.msk [vmem:[#allocation2 + $0x68] sm:$0xff] %vm24_vm0, %v2075_v21 }
  0xc5   :  { %39 = vst.msk [vmem:[#allocation2 + $0x70] sm:$0xff] %vm24_vm0, %v2075_v21 }
  0xc6   :  { %40 = vst.msk [vmem:[#allocation2 + $0x78] sm:$0xff] %vm24_vm0, %v2075_v21 }
  0xc7   :  { %41 = vst.msk [vmem:[#allocation2 + $0x80] sm:$0xff] %vm24_vm0, %v2075_v21 }
  0xc8   :  { %741 = vmatmul.bf16.gmra.mxu0 %v609_v38  ;;  %830 = vmatmul.bf16.gmra.mxu1 %v610_v55  ;;  %42 = vst.msk [vmem:[#allocation2 + $0x88] sm:$0xff] %vm24_vm0, %v2075_v21  ;;  %v565_v55 = vmul.f32 %v519_v49, %v469_v36 }
  0xc9   :  { %43 = vst.msk [vmem:[#allocation2 + $0x90] sm:$0xff] %vm24_vm0, %v2075_v21 }
  0xca   :  { %44 = vst.msk [vmem:[#allocation2 + $0x98] sm:$0xff] %vm24_vm0, %v2075_v21 }
  0xcb   :  { %45 = vst.msk [vmem:[#allocation2 + $0xa0] sm:$0xff] %vm24_vm0, %v2075_v21 }
  0xcc   :  { %46 = vst.msk [vmem:[#allocation2 + $0xa8] sm:$0xff] %vm24_vm0, %v2075_v21 }
  0xcd   :  { %47 = vst.msk [vmem:[#allocation2 + $0xb0] sm:$0xff] %vm24_vm0, %v2075_v21 }
  0xce   :  { %48 = vst.msk [vmem:[#allocation2 + $0xb8] sm:$0xff] %vm24_vm0, %v2075_v21 }
  0xcf   :  { %49 = vst.msk [vmem:[#allocation2 + $0xc0] sm:$0xff] %vm24_vm0, %v2075_v21 }
  0xd0   :  { %796 = vmatmul.bf16.gmra.mxu3 %v631_v8  ;;  %50 = vst.msk [vmem:[#allocation2 + $0xc8] sm:$0xff] %vm24_vm0, %v2075_v21 }
  0xd1   :  { %51 = vst.msk [vmem:[#allocation2 + $0xd0] sm:$0xff] %vm24_vm0, %v2075_v21 }
  0xd2   :  { %52 = vst.msk [vmem:[#allocation2 + $0xd8] sm:$0xff] %vm24_vm0, %v2075_v21 }
  0xd3   :  { %53 = vst.msk [vmem:[#allocation2 + $0xe0] sm:$0xff] %vm24_vm0, %v2075_v21 }
  0xd4   :  { %54 = vst.msk [vmem:[#allocation2 + $0xe8] sm:$0xff] %vm24_vm0, %v2075_v21 }
  0xd5   :  { %55 = vst.msk [vmem:[#allocation2 + $0xf0] sm:$0xff] %vm24_vm0, %v2075_v21 }
  0xd6   :  { %56 = vst.msk [vmem:[#allocation2 + $0xf8] sm:$0xff] %vm24_vm0, %v2075_v21  ;;  %v524_v21 = vunpack.c.l.bf16 %v332_v22 }
  0xd8   :  { %746 = vmatmul.bf16.gmra.mxu0 %v611_v14  ;;  %835 = vmatmul.bf16.gmra.mxu1 %v612_v15  ;;  %v576_v41 = vmul.f32 %v524_v21, %v480_v28 }
  0xe0   :  { %870 = vmatmul.bf16.vlgmr.msrb.gmra.mxu3 %v626_v50  ;;  %v72_v50 = vld [vmem:[%s2959_s0 + $0x78] sm:$0xff] }
  0xe1   :  { %v471_v39 = vunpack.c.l.bf16 %v72_v50  ;;  %v472_v46 = vunpack.c.h.bf16 %v72_v50  ;;  %v575_v50 = vmul.f32 %v524_v21, %v479_v25  ;;  %v638_v25 = vld [vmem:[#allocation2 + $0x28] sm:$0xff]  ;;  %v485_v21 = vunpack.c.l.bf16 %v79_v43 }
  0xe3   :  { %v567_v53 = vmul.f32 %v520_v47, %v471_v39  ;;  %v568_v38 = vmul.f32 %v520_v47, %v472_v46 }
  0xe5   :  { %v615_v24 = vpack.c.bf16 %v567_v53, %v565_v55  ;;  %v616_v29 = vpack.c.bf16 %v568_v38, %v566_v18  ;;  %v78_v53 = vld [vmem:[%s2959_s0 + $0xa8] sm:$0xff]  ;;  %v636_v55 = vld [vmem:[#allocation2 + $0x18] sm:$0xff] }
  0xe6   :  { %v483_v59 = vunpack.c.l.bf16 %v78_v53 }
  0xe8   :  { %751 = vmatmul.bf16.gmra.mxu0 %v613_v4  ;;  %840 = vmatmul.bf16.gmra.mxu1 %v614_v6 }
  0xf0   :  { %875 = vmatmul.bf16.gmra.mxu3 %v628_v30  ;;  %v309_v30 = vpop.permute.xlu2 %308 }
  0xf1   :  { %v314_v60 = vperm.slane %v309_v30, %v2314_v57 }
  0xf3   :  { %v522_v3 = vunpack.c.l.bf16 %v314_v60  ;;  %v484_v60 = vunpack.c.h.bf16 %v78_v53 }
  0xf5   :  { %v571_v8 = vmul.f32 %v522_v3, %v475_v0  ;;  %v572_v37 = vmul.f32 %v522_v3, %v476_v1 }
  0xf7   :  { %v617_v15 = vpack.c.bf16 %v571_v8, %v569_v5  ;;  %v618_v33 = vpack.c.bf16 %v572_v37, %v570_v7  ;;  %v637_v8 = vld [vmem:[#allocation2 + $0x20] sm:$0xff] }
  0xf8   :  { %756 = vmatmul.bf16.gmra.mxu0 %v615_v24  ;;  %845 = vmatmul.bf16.gmra.mxu1 %v616_v29  ;;  %v318_v20 = vpop.permute.xlu2 %317  ;;  %v481_v24 = vunpack.c.l.bf16 %v77_v13  ;;  %v482_v29 = vunpack.c.h.bf16 %v77_v13 }
  0xf9   :  { %v323_v2 = vperm.slane %v318_v20, %v2314_v57  ;;  %v80_v20 = vld [vmem:[%s2959_s0 + $0xb8] sm:$0xff] }
  0xfb   :  { %v523_v51 = vunpack.c.l.bf16 %v323_v2 }
 0x100   :  { %880 = vmatmul.bf16.gmra.mxu3 %v630_v10  ;;  %v75_v10 = vld [vmem:[%s2959_s0 + $0x90] sm:$0xff]  ;;  %v345_v34 = vpop.permute.xlu2 %344 }
 0x101   :  { %v477_v31 = vunpack.c.l.bf16 %v75_v10  ;;  %v478_v35 = vunpack.c.h.bf16 %v75_v10  ;;  %v350_v52 = vperm.slane %v345_v34, %v2314_v57  ;;  %v487_v10 = vunpack.c.l.bf16 %v80_v20 }
 0x103   :  { %v573_v42 = vmul.f32 %v523_v51, %v477_v31  ;;  %v574_v44 = vmul.f32 %v523_v51, %v478_v35  ;;  %v526_v62 = vunpack.c.l.bf16 %v350_v52 }
 0x105   :  { %v722_v9 = vpop.f32.mrf.mxu0  ;;  %v811_v12 = vpop.f32.mrf.mxu1  ;;  %v619_v47 = vpack.c.bf16 %v575_v50, %v573_v42  ;;  %v620_v36 = vpack.c.bf16 %v576_v41, %v574_v44  ;;  %v579_v3 = vmul.f32 %v526_v62, %v483_v59  ;;  %v580_v5 = vmul.f32 %v526_v62, %v484_v60  ;;  %v642_v62 = vld [vmem:[#allocation2 + $0x48] sm:$0xff] }
 0x106   :  { %v812_v14 = vadd.f32 %v811_v12, %v722_v9  ;;  %v363_v9 = vpop.permute.xlu1 %362 }
 0x107   :  { %v368_v16 = vperm.slane %v363_v9, %v2314_v57 }
 0x108   :  { %v891_v17 = vadd.f32 %v812_v14, %v633_v54  ;;  %761 = vmatmul.bf16.gmra.mxu0 %v617_v15  ;;  %850 = vmatmul.bf16.gmra.mxu1 %v618_v33  ;;  %v354_v15 = vpop.permute.xlu0 %353 }
 0x109   :  { %v359_v22 = vperm.slane %v354_v15, %v2314_v57  ;;  %v644_v15 = vld [vmem:[#allocation2 + $0x58] sm:$0xff] }
 0x10a   :  { %924 = vst.msk [vmem:[#allocation2] sm:$0xff] %vm24_vm0, %v891_v17 }
 0x10b   :  { %v527_v31 = vunpack.c.l.bf16 %v359_v22  ;;  %v657_v22 = vld [vmem:[#allocation2 + $0xc0] sm:$0xff] }
 0x10d   :  { %v724_v23 = vpop.f32.mrf.mxu0  ;;  %v813_v27 = vpop.f32.mrf.mxu1  ;;  %v581_v50 = vmul.f32 %v527_v31, %v485_v21 }
 0x10e   :  { %v814_v61 = vadd.f32 %v813_v27, %v724_v23  ;;  %v488_v23 = vunpack.c.h.bf16 %v80_v20 }
 0x110   :  { %v892_v4 = vadd.f32 %v814_v61, %v634_v26  ;;  %885 = vmatmul.bf16.gmra.mxu3 %v632_v11  ;;  %v341_v11 = vperm.slane %v336_v48, %v2314_v57  ;;  %v528_v26 = vunpack.c.l.bf16 %v368_v16  ;;  %v486_v61 = vunpack.c.h.bf16 %v79_v43 }
 0x111   :  { %v959_v6 = vld [vmem:[#allocation2] sm:$0xff] }
 0x112   :  { %925 = vst.msk [vmem:[#allocation2 + $0x8] sm:$0xff] %vm24_vm0, %v892_v4  ;;  %1853 = vmatmul.msk.f32.vlgmr.msra.gmra.mxu2 %vm24_vm0, %v959_v6  ;;  %v525_v30 = vunpack.c.l.bf16 %v341_v11  ;;  %v583_v51 = vmul.f32 %v528_v26, %v487_v10  ;;  %v584_v6 = vmul.f32 %v528_v26, %v488_v23  ;;  %v582_v41 = vmul.f32 %v527_v31, %v486_v61  ;;  %v645_v26 = vld [vmem:[#allocation2 + $0x60] sm:$0xff]  ;;  %v658_v31 = vld [vmem:[#allocation2 + $0xc8] sm:$0xff] }
 0x114   :  { %v577_v63 = vmul.f32 %v525_v30, %v481_v24  ;;  %v578_v0 = vmul.f32 %v525_v30, %v482_v29 }
 0x115   :  { %v727_v45 = vpop.f32.mrf.mxu0  ;;  %v816_v39 = vpop.f32.mrf.mxu1 }
 0x116   :  { %v817_v46 = vadd.f32 %v816_v39, %v727_v45  ;;  %v621_v12 = vpack.c.bf16 %v579_v3, %v577_v63  ;;  %v622_v14 = vpack.c.bf16 %v580_v5, %v578_v0  ;;  %v639_v45 = vld [vmem:[#allocation2 + $0x30] sm:$0xff] }
 0x118   :  { %v893_v49 = vadd.f32 %v817_v46, %v635_v32  ;;  %766 = vmatmul.bf16.gmra.mxu0 %v619_v47  ;;  %855 = vmatmul.bf16.gmra.mxu1 %v620_v36  ;;  %v623_v46 = vpack.c.bf16 %v583_v51, %v581_v50  ;;  %v624_v47 = vpack.c.bf16 %v584_v6, %v582_v41 }
 0x119   :  { %v960_v40 = vld [vmem:[#allocation2 + $0x8] sm:$0xff] }
 0x11a   :  { %926 = vst.msk [vmem:[#allocation2 + $0x10] sm:$0xff] %vm24_vm0, %v893_v49  ;;  %1854 = vmatmul.msk.f32.gmra.mxu2 %vm24_vm0, %v960_v40  ;;  %v640_v40 = vld [vmem:[#allocation2 + $0x38] sm:$0xff] }
 0x11d   :  { %v729_v38 = vpop.f32.mrf.mxu0  ;;  %v818_v18 = vpop.f32.mrf.mxu1 }
 0x11e   :  { %v819_v58 = vadd.f32 %v818_v18, %v729_v38  ;;  %v641_v18 = vld [vmem:[#allocation2 + $0x40] sm:$0xff] }
 0x120   :  { %v894_v56 = vadd.f32 %v819_v58, %v636_v55 }
 0x121   :  { %v961_v19 = vld [vmem:[#allocation2 + $0x10] sm:$0xff] }
 0x122   :  { %927 = vst.msk [vmem:[#allocation2 + $0x18] sm:$0xff] %vm24_vm0, %v894_v56  ;;  %1855 = vmatmul.msk.f32.gmra.mxu2 %vm24_vm0, %v961_v19 }
 0x123   :  { %v2602_v1 = vpop.f32.mrf.mxu3 }
 0x125   :  { %v732_v7 = vpop.f32.mrf.mxu0  ;;  %v821_v37 = vpop.f32.mrf.mxu1 }
 0x126   :  { %v822_v54 = vadd.f32 %v821_v37, %v732_v7  ;;  %v643_v7 = vld [vmem:[#allocation2 + $0x50] sm:$0xff] }
 0x128   :  { %v895_v33 = vadd.f32 %v822_v54, %v637_v8  ;;  %771 = vmatmul.bf16.gmra.mxu0 %v621_v12  ;;  %860 = vmatmul.bf16.gmra.mxu1 %v622_v14 }
 0x129   :  { %v962_v17 = vld [vmem:[#allocation2 + $0x18] sm:$0xff] }
 0x12a   :  { %928 = vst.msk [vmem:[#allocation2 + $0x20] sm:$0xff] %vm24_vm0, %v895_v33  ;;  %1856 = vmatmul.msk.f32.gmra.mxu2 %vm24_vm0, %v962_v17 }
 0x12b   :  { %v2614_v2 = vpop.f32.mrf.mxu3 }
 0x12d   :  { %v734_v27 = vpop.f32.mrf.mxu0  ;;  %v823_v28 = vpop.f32.mrf.mxu1 }
 0x12e   :  { %v824_v57 = vadd.f32 %v823_v28, %v734_v27 }
 0x130   :  { %v896_v35 = vadd.f32 %v824_v57, %v638_v25 }
 0x131   :  { %v963_v4 = vld [vmem:[#allocation2 + $0x20] sm:$0xff] }
 0x132   :  { %929 = vst.msk [vmem:[#allocation2 + $0x28] sm:$0xff] %vm24_vm0, %v896_v35  ;;  %1857 = vmatmul.msk.f32.gmra.mxu2 %vm24_vm0, %v963_v4  ;;  %v646_v4 = vld [vmem:[#allocation2 + $0x68] sm:$0xff] }
 0x133   :  { %v2618_v42 = vpop.f32.mrf.mxu3 }
 0x135   :  { %v737_v44 = vpop.f32.mrf.mxu0  ;;  %v826_v32 = vpop.f32.mrf.mxu1 }
 0x136   :  { %v827_v39 = vadd.f32 %v826_v32, %v737_v44 }
 0x138   :  { %v897_v36 = vadd.f32 %v827_v39, %v639_v45  ;;  %776 = vmatmul.bf16.gmra.mxu0 %v623_v46  ;;  %865 = vmatmul.bf16.gmra.mxu1 %v624_v47  ;;  %v659_v45 = vld [vmem:[#allocation2 + $0xd0] sm:$0xff] }
 0x139   :  { %v964_v48 = vld [vmem:[#allocation2 + $0x28] sm:$0xff]  ;;  %v647_v47 = vld [vmem:[#allocation2 + $0x70] sm:$0xff] }
 0x13a   :  { %930 = vst.msk [vmem:[#allocation2 + $0x30] sm:$0xff] %vm24_vm0, %v897_v36  ;;  %1858 = vmatmul.msk.f32.gmra.mxu2 %vm24_vm0, %v964_v48 }
 0x13b   :  { %v2622_v49 = vpop.f32.mrf.mxu3 }
 0x13d   :  { %v739_v34 = vpop.f32.mrf.mxu0  ;;  %v828_v11 = vpop.f32.mrf.mxu1 }
 0x13e   :  { %v829_v13 = vadd.f32 %v828_v11, %v739_v34  ;;  %v660_v11 = vld [vmem:[#allocation2 + $0xd8] sm:$0xff] }
 0x140   :  { %v898_v52 = vadd.f32 %v829_v13, %v640_v40 }
 0x141   :  { %v965_v53 = vld [vmem:[#allocation2 + $0x30] sm:$0xff] }
 0x142   :  { %931 = vst.msk [vmem:[#allocation2 + $0x38] sm:$0xff] %vm24_vm0, %v898_v52  ;;  %1859 = vmatmul.msk.f32.gmra.mxu2 %vm24_vm0, %v965_v53 }
 0x143   :  { %v2626_v38 = vpop.f32.mrf.mxu3 }
 0x145   :  { %v742_v55 = vpop.f32.mrf.mxu0  ;;  %v831_v24 = vpop.f32.mrf.mxu1 }
 0x146   :  { %v832_v29 = vadd.f32 %v831_v24, %v742_v55  ;;  %v648_v55 = vld [vmem:[#allocation2 + $0x78] sm:$0xff] }
 0x148   :  { %v899_v30 = vadd.f32 %v832_v29, %v641_v18 }
 0x149   :  { %v966_v58 = vld [vmem:[#allocation2 + $0x38] sm:$0xff] }
 0x14a   :  { %932 = vst.msk [vmem:[#allocation2 + $0x40] sm:$0xff] %vm24_vm0, %v899_v30  ;;  %1860 = vmatmul.msk.f32.gmra.mxu2 %vm24_vm0, %v966_v58  ;;  %v661_v58 = vld [vmem:[#allocation2 + $0xe0] sm:$0xff] }
 0x14b   :  { %v2630_v59 = vpop.f32.mrf.mxu3 }
 0x14d   :  { %v744_v60 = vpop.f32.mrf.mxu0  ;;  %v833_v56 = vpop.f32.mrf.mxu1 }
 0x14e   :  { %v834_v19 = vadd.f32 %v833_v56, %v744_v60 }
 0x150   :  { %v900_v63 = vadd.f32 %v834_v19, %v642_v62  ;;  %v649_v19 = vld [vmem:[#allocation2 + $0x80] sm:$0xff] }
 0x151   :  { %v967_v0 = vld [vmem:[#allocation2 + $0x40] sm:$0xff] }
 0x152   :  { %933 = vst.msk [vmem:[#allocation2 + $0x48] sm:$0xff] %vm24_vm0, %v900_v63  ;;  %1861 = vmatmul.msk.f32.gmra.mxu2 %vm24_vm0, %v967_v0 }
 0x153   :  { %v2634_v3 = vpop.f32.mrf.mxu3 }
 0x155   :  { %v747_v5 = vpop.f32.mrf.mxu0  ;;  %v836_v8 = vpop.f32.mrf.mxu1 }
 0x156   :  { %v837_v37 = vadd.f32 %v836_v8, %v747_v5 }
 0x158   :  { %v901_v9 = vadd.f32 %v837_v37, %v643_v7  ;;  %v662_v37 = vld [vmem:[#allocation2 + $0xe8] sm:$0xff] }
 0x159   :  { %v968_v54 = vld [vmem:[#allocation2 + $0x48] sm:$0xff] }
 0x15a   :  { %934 = vst.msk [vmem:[#allocation2 + $0x50] sm:$0xff] %vm24_vm0, %v901_v9  ;;  %1862 = vmatmul.msk.f32.gmra.mxu2 %vm24_vm0, %v968_v54 }
 0x15b   :  { %v2638_v12 = vpop.f32.mrf.mxu3 }
 0x15d   :  { %v749_v14 = vpop.f32.mrf.mxu0  ;;  %v838_v33 = vpop.f32.mrf.mxu1 }
 0x15e   :  { %v839_v16 = vadd.f32 %v838_v33, %v749_v14  ;;  %v650_v14 = vld [vmem:[#allocation2 + $0x88] sm:$0xff] }
 0x160   :  { %v902_v17 = vadd.f32 %v839_v16, %v644_v15 }
 0x161   :  { %v969_v20 = vld [vmem:[#allocation2 + $0x50] sm:$0xff] }
 0x162   :  { %935 = vst.msk [vmem:[#allocation2 + $0x58] sm:$0xff] %vm24_vm0, %v902_v17  ;;  %1863 = vmatmul.msk.f32.gmra.mxu2 %vm24_vm0, %v969_v20 }
 0x163   :  { %v871_v43 = vpop.f32.mrf.mxu3 }
 0x164   :  { %v872_v10 = vadd.f32 %v871_v43, %v2602_v1  ;;  %v663_v43 = vld [vmem:[#allocation2 + $0xf0] sm:$0xff] }
 0x165   :  { %v752_v23 = vpop.f32.mrf.mxu0  ;;  %v841_v27 = vpop.f32.mrf.mxu1 }
 0x166   :  { %v915_v25 = vadd.f32 %v872_v10, %v657_v22  ;;  %v842_v28 = vadd.f32 %v841_v27, %v752_v23  ;;  %v651_v27 = vld [vmem:[#allocation2 + $0x90] sm:$0xff] }
 0x168   :  { %948 = vst.msk [vmem:[#allocation2 + $0xc0] sm:$0xff] %vm24_vm0, %v915_v25  ;;  %v903_v21 = vadd.f32 %v842_v28, %v645_v26 }
 0x169   :  { %v970_v61 = vld [vmem:[#allocation2 + $0x58] sm:$0xff] }
 0x16a   :  { %936 = vst.msk [vmem:[#allocation2 + $0x60] sm:$0xff] %vm24_vm0, %v903_v21  ;;  %1864 = vmatmul.msk.f32.gmra.mxu2 %vm24_vm0, %v970_v61 }
 0x16b   :  { %v873_v57 = vpop.f32.mrf.mxu3 }
 0x16c   :  { %v874_v35 = vadd.f32 %v873_v57, %v2614_v2 }
 0x16d   :  { %v754_v51 = vpop.f32.mrf.mxu0  ;;  %v843_v1 = vpop.f32.mrf.mxu1 }
 0x16e   :  { %v916_v6 = vadd.f32 %v874_v35, %v658_v31  ;;  %v844_v50 = vadd.f32 %v843_v1, %v754_v51 }
 0x170   :  { %949 = vst.msk [vmem:[#allocation2 + $0xc8] sm:$0xff] %vm24_vm0, %v916_v6  ;;  %v904_v41 = vadd.f32 %v844_v50, %v646_v4 }
 0x171   :  { %v971_v44 = vld [vmem:[#allocation2 + $0x60] sm:$0xff] }
 0x172   :  { %937 = vst.msk [vmem:[#allocation2 + $0x68] sm:$0xff] %vm24_vm0, %v904_v41  ;;  %1865 = vmatmul.msk.f32.gmra.mxu2 %vm24_vm0, %v971_v44  ;;  %v652_v41 = vld [vmem:[#allocation2 + $0x98] sm:$0xff] }
 0x173   :  { %v876_v32 = vpop.f32.mrf.mxu3 }
 0x174   :  { %v877_v39 = vadd.f32 %v876_v32, %v2618_v42 }
 0x175   :  { %v757_v46 = vpop.f32.mrf.mxu0  ;;  %v846_v2 = vpop.f32.mrf.mxu1 }
 0x176   :  { %v917_v36 = vadd.f32 %v877_v39, %v659_v45  ;;  %v847_v48 = vadd.f32 %v846_v2, %v757_v46 }
 0x178   :  { %950 = vst.msk [vmem:[#allocation2 + $0xd0] sm:$0xff] %vm24_vm0, %v917_v36  ;;  %v905_v34 = vadd.f32 %v847_v48, %v647_v47 }
 0x179   :  { %v972_v40 = vld [vmem:[#allocation2 + $0x68] sm:$0xff] }
 0x17a   :  { %938 = vst.msk [vmem:[#allocation2 + $0x70] sm:$0xff] %vm24_vm0, %v905_v34  ;;  %1866 = vmatmul.msk.f32.gmra.mxu2 %vm24_vm0, %v972_v40 }
 0x17b   :  { %v878_v13 = vpop.f32.mrf.mxu3 }
 0x17c   :  { %v879_v52 = vadd.f32 %v878_v13, %v2622_v49 }
 0x17d   :  { %v759_v53 = vpop.f32.mrf.mxu0  ;;  %v848_v42 = vpop.f32.mrf.mxu1 }
 0x17e   :  { %v918_v18 = vadd.f32 %v879_v52, %v660_v11  ;;  %v849_v24 = vadd.f32 %v848_v42, %v759_v53  ;;  %v653_v11 = vld [vmem:[#allocation2 + $0xa0] sm:$0xff] }
 0x180   :  { %951 = vst.msk [vmem:[#allocation2 + $0xd8] sm:$0xff] %vm24_vm0, %v918_v18  ;;  %v906_v29 = vadd.f32 %v849_v24, %v648_v55 }
 0x181   :  { %v973_v30 = vld [vmem:[#allocation2 + $0x70] sm:$0xff] }
 0x182   :  { %939 = vst.msk [vmem:[#allocation2 + $0x78] sm:$0xff] %vm24_vm0, %v906_v29  ;;  %1867 = vmatmul.msk.f32.gmra.mxu2 %vm24_vm0, %v973_v30 }
 0x183   :  { %v881_v60 = vpop.f32.mrf.mxu3 }
 0x184   :  { %v882_v62 = vadd.f32 %v881_v60, %v2626_v38 }
 0x185   :  { %v762_v56 = vpop.f32.mrf.mxu0  ;;  %v851_v49 = vpop.f32.mrf.mxu1 }
 0x186   :  { %v919_v63 = vadd.f32 %v882_v62, %v661_v58  ;;  %v852_v0 = vadd.f32 %v851_v49, %v762_v56  ;;  %v654_v49 = vld [vmem:[#allocation2 + $0xa8] sm:$0xff] }
 0x187   :  { %v986_v5 = vld [vmem:[#allocation2 + $0xd8] sm:$0xff] }
 0x188   :  { %952 = vst.msk [vmem:[#allocation2 + $0xe0] sm:$0xff] %vm24_vm0, %v919_v63  ;;  %v907_v7 = vadd.f32 %v852_v0, %v649_v19  ;;  %1880 = vmatmul.msk.f32.vlgmr.msra.gmra.mxu3 %vm24_vm0, %v986_v5 }
 0x189   :  { %v974_v8 = vld [vmem:[#allocation2 + $0x78] sm:$0xff] }
 0x18a   :  { %940 = vst.msk [vmem:[#allocation2 + $0x80] sm:$0xff] %vm24_vm0, %v907_v7  ;;  %1868 = vmatmul.msk.f32.gmra.mxu2 %vm24_vm0, %v974_v8 }
 0x18b   :  { %v883_v9 = vpop.f32.mrf.mxu3 }
 0x18c   :  { %v884_v38 = vadd.f32 %v883_v9, %v2630_v59  ;;  %v2671_v59 = vld [vmem:[%s2961_s4] ss:$0 sm:$0xff] }
 0x18d   :  { %v764_v54 = vpop.f32.mrf.mxu0  ;;  %v853_v15 = vpop.f32.mrf.mxu1 }
 0x18e   :  { %v920_v33 = vadd.f32 %v884_v38, %v662_v37  ;;  %v854_v16 = vadd.f32 %v853_v15, %v764_v54 }
 0x18f   :  { %v987_v17 = vld [vmem:[#allocation2 + $0xe0] sm:$0xff] }
 0x190   :  { %953 = vst.msk [vmem:[#allocation2 + $0xe8] sm:$0xff] %vm24_vm0, %v920_v33  ;;  %v908_v20 = vadd.f32 %v854_v16, %v650_v14  ;;  %1881 = vmatmul.msk.f32.gmra.mxu3 %vm24_vm0, %v987_v17 }
 0x191   :  { %v975_v22 = vld [vmem:[#allocation2 + $0x80] sm:$0xff] }
 0x192   :  { %941 = vst.msk [vmem:[#allocation2 + $0x88] sm:$0xff] %vm24_vm0, %v908_v20  ;;  %1869 = vmatmul.msk.f32.gmra.mxu2 %vm24_vm0, %v975_v22 }
 0x193   :  { %v886_v10 = vpop.f32.mrf.mxu3 }
 0x194   :  { %v887_v23 = vadd.f32 %v886_v10, %v2634_v3  ;;  %v664_v3 = vld [vmem:[#allocation2 + $0xf8] sm:$0xff] }
 0x195   :  { %v767_v26 = vpop.f32.mrf.mxu0  ;;  %v856_v25 = vpop.f32.mrf.mxu1 }
 0x196   :  { %v921_v28 = vadd.f32 %v887_v23, %v663_v43  ;;  %v857_v21 = vadd.f32 %v856_v25, %v767_v26  ;;  %v1112_v61 = vpop.f32.mrf.mxu2 }
 0x197   :  { %v1113_v31 = vadd.f32 %v2671_v59, %v1112_v61  ;;  %v988_v57 = vld [vmem:[#allocation2 + $0xe8] sm:$0xff] }
 0x198   :  { %954 = vst.msk [vmem:[#allocation2 + $0xf0] sm:$0xff] %vm24_vm0, %v921_v28  ;;  %v909_v35 = vadd.f32 %v857_v21, %v651_v27  ;;  %1882 = vmatmul.msk.f32.gmra.mxu3 %vm24_vm0, %v988_v57  ;;  %v655_v27 = vld [vmem:[#allocation2 + $0xb0] sm:$0xff] }
 0x199   :  { %v1885_v51 = vmul.f32 -1.442695, %v1113_v31  ;;  %v976_v4 = vld [vmem:[#allocation2 + $0x88] sm:$0xff] }
 0x19a   :  { %942 = vst.msk [vmem:[#allocation2 + $0x90] sm:$0xff] %vm24_vm0, %v909_v35  ;;  %1870 = vmatmul.msk.f32.gmra.mxu2 %vm24_vm0, %v976_v4 }
 0x19b   :  { %1944 = vpow2.f32 %v1885_v51  ;;  %v888_v1 = vpop.f32.mrf.mxu3 }
 0x19c   :  { %v889_v6 = vadd.f32 %v888_v1, %v2638_v12 }
 0x19d   :  { %v769_v50 = vpop.f32.mrf.mxu0  ;;  %v858_v44 = vpop.f32.mrf.mxu1 }
 0x19e   :  { %v922_v45 = vadd.f32 %v889_v6, %v664_v3  ;;  %v859_v32 = vadd.f32 %v858_v44, %v769_v50  ;;  %v1115_v39 = vpop.f32.mrf.mxu2 }
 0x19f   :  { %v1116_v46 = vadd.f32 %v2671_v59, %v1115_v39  ;;  %v989_v47 = vld [vmem:[#allocation2 + $0xf0] sm:$0xff] }
 0x1a0   :  { %955 = vst.msk [vmem:[#allocation2 + $0xf8] sm:$0xff] %vm24_vm0, %v922_v45  ;;  %v910_v2 = vadd.f32 %v859_v32, %v652_v41  ;;  %1883 = vmatmul.msk.f32.gmra.mxu3 %vm24_vm0, %v989_v47 }
 0x1a1   :  { %v1945_v36 = vpop.eup %1944  ;;  %v1886_v48 = vmul.f32 -1.442695, %v1116_v46  ;;  %v977_v34 = vld [vmem:[#allocation2 + $0x90] sm:$0xff] }
 0x1a2   :  { %v1304_v40 = vadd.f32 1.0, %v1945_v36  ;;  %943 = vst.msk [vmem:[#allocation2 + $0x98] sm:$0xff] %vm24_vm0, %v910_v2  ;;  %1871 = vmatmul.msk.f32.gmra.mxu2 %vm24_vm0, %v977_v34  ;;  %v656_v2 = vld [vmem:[#allocation2 + $0xb8] sm:$0xff] }
 0x1a3   :  { %1946 = vpow2.f32 %v1886_v48 }
 0x1a4   :  { %1948 = vrcp.f32 %v1304_v40  ;;  %v1347_v0 = vand.u32 2147483648, %v1304_v40  ;;  %v1345_v37 = vand.u32 2147483647, %v1304_v40  ;;  %vm1341_vm2 = vweird.f32 %v1304_v40 }
 0x1a5   :  { %v772_v12 = vpop.f32.mrf.mxu0  ;;  %v861_v13 = vpop.f32.mrf.mxu1 }
 0x1a6   :  { %v862_v52 = vadd.f32 %v861_v13, %v772_v12  ;;  %v1118_v53 = vpop.f32.mrf.mxu2  ;;  %v1348_v17 = vor.u32 1.1754944e-38, %v1347_v0  ;;  %vm1346_vm5 = vcmp.eq.f32.partialorder %v1345_v37, 8.507059e+37 }
 0x1a7   :  { %v1119_v55 = vadd.f32 %v2671_v59, %v1118_v53  ;;  %v990_v42 = vld [vmem:[#allocation2 + $0xf8] sm:$0xff] }
 0x1a8   :  { %v911_v18 = vadd.f32 %v862_v52, %v653_v11  ;;  %1884 = vmatmul.msk.f32.gmra.mxu3 %vm24_vm0, %v990_v42 }
 0x1a9   :  { %v1947_v24 = vpop.eup %1946  ;;  %v1887_v29 = vmul.f32 -1.442695, %v1119_v55  ;;  %v978_v30 = vld [vmem:[#allocation2 + $0x98] sm:$0xff] }
 0x1aa   :  { %v1949_v58 = vpop.eup %1948  ;;  %v2687_v60 = vadd.f32 1.0, %v1947_v24  ;;  %944 = vst.msk [vmem:[#allocation2 + $0xa0] sm:$0xff] %vm24_vm0, %v911_v18  ;;  %1872 = vmatmul.msk.f32.gmra.mxu2 %vm24_vm0, %v978_v30 }
 0x1ab   :  { %v1337_v62 = vmul.f32 %v1949_v58, %v1304_v40  ;;  %1950 = vpow2.f32 %v1887_v29  ;;  %vm1342_vm1 = vweird.f32 %v1949_v58 }
 0x1ac   :  { %1952 = vrcp.f32 %v2687_v60  ;;  %vm1343_vm3 = vmor %vm1341_vm2, %vm1342_vm1  ;;  %v1362_v28 = vand.u32 2147483648, %v2687_v60  ;;  %v1360_v57 = vand.u32 2147483647, %v2687_v60  ;;  %vm1356_vm7 = vweird.f32 %v2687_v60 }
 0x1ad   :  { %v1338_v56 = vsub.f32 1.0, %v1337_v62  ;;  %v774_v19 = vpop.f32.mrf.mxu0  ;;  %v863_v63 = vpop.f32.mrf.mxu1 }
 0x1ae   :  { %v864_v5 = vadd.f32 %v863_v63, %v774_v19  ;;  %v1121_v7 = vpop.f32.mrf.mxu2  ;;  %v1363_v41 = vor.u32 1.1754944e-38, %v1362_v28  ;;  %vm1361_vm9 = vcmp.eq.f32.partialorder %v1360_v57, 8.507059e+37  ;;  %v983_v28 = vld [vmem:[#allocation2 + $0xc0] sm:$0xff] }
 0x1af   :  { %v1339_v8 = vmul.f32 %v1949_v58, %v1338_v56  ;;  %v1122_v9 = vadd.f32 %v2671_v59, %v1121_v7 }
 0x1b0   :  { %v912_v38 = vadd.f32 %v864_v5, %v654_v49 }
 0x1b1   :  { %v1951_v54 = vpop.eup %1950  ;;  %v1340_v14 = vadd.f32 %v1949_v58, %v1339_v8  ;;  %v1888_v15 = vmul.f32 -1.442695, %v1122_v9  ;;  %v979_v33 = vld [vmem:[#allocation2 + $0xa0] sm:$0xff] }
 0x1b2   :  { %v1953_v16 = vpop.eup %1952  ;;  %v2693_v20 = vadd.f32 1.0, %v1951_v54  ;;  %945 = vst.msk [vmem:[#allocation2 + $0xa8] sm:$0xff] %vm24_vm0, %v912_v38  ;;  %1873 = vmatmul.msk.f32.gmra.mxu2 %vm24_vm0, %v979_v33 }
 0x1b3   :  { %v1344_v22 = vsel %vm1343_vm3, %v1949_v58, %v1340_v14  ;;  %v1352_v43 = vmul.f32 %v1953_v16, %v2687_v60  ;;  %1954 = vpow2.f32 %v1888_v15  ;;  %vm1357_vm6 = vweird.f32 %v1953_v16 }
 0x1b4   :  { %v1349_v10 = vsel %vm1346_vm5, %v1348_v17, %v1344_v22  ;;  %1956 = vrcp.f32 %v2693_v20  ;;  %vm1358_vm8 = vmor %vm1356_vm7, %vm1357_vm6  ;;  %v1377_v48 = vand.u32 2147483648, %v2693_v20  ;;  %v1375_v11 = vand.u32 2147483647, %v2693_v20 }
 0x1b5   :  { %1817 = vst.msk [vmem:[%s2962_s5] sm:$0xff] %vm1816_vm4, %v1349_v10  ;;  %v1353_v23 = vsub.f32 1.0, %v1352_v43  ;;  %v777_v26 = vpop.f32.mrf.mxu0  ;;  %v866_v25 = vpop.f32.mrf.mxu1  ;;  %vm1371_vm11 = vweird.f32 %v2693_v20 }
 0x1b6   :  { %v867_v21 = vadd.f32 %v866_v25, %v777_v26  ;;  %v1124_v61 = vpop.f32.mrf.mxu2  ;;  %v1378_v29 = vor.u32 1.1754944e-38, %v1377_v48  ;;  %vm1376_vm13 = vcmp.eq.f32.partialorder %v1375_v11, 8.507059e+37 }
 0x1b7   :  { %v1354_v31 = vmul.f32 %v1953_v16, %v1353_v23  ;;  %v1125_v35 = vadd.f32 %v2671_v59, %v1124_v61 }
 0x1b8   :  { %v913_v51 = vadd.f32 %v867_v21, %v655_v27 }
 0x1b9   :  { %v1955_v4 = vpop.eup %1954  ;;  %v1355_v3 = vadd.f32 %v1953_v16, %v1354_v31  ;;  %v1889_v1 = vmul.f32 -1.442695, %v1125_v35  ;;  %v980_v6 = vld [vmem:[#allocation2 + $0xa8] sm:$0xff] }
 0x1ba   :  { %v1957_v50 = vpop.eup %1956  ;;  %v1307_v44 = vadd.f32 1.0, %v1955_v4  ;;  %946 = vst.msk [vmem:[#allocation2 + $0xb0] sm:$0xff] %vm24_vm0, %v913_v51  ;;  %1874 = vmatmul.msk.f32.gmra.mxu2 %vm24_vm0, %v980_v6 }
 0x1bb   :  { %v1359_v45 = vsel %vm1358_vm8, %v1953_v16, %v1355_v3  ;;  %v1367_v32 = vmul.f32 %v1957_v50, %v2693_v20  ;;  %1958 = vpow2.f32 %v1889_v1  ;;  %vm1372_vm10 = vweird.f32 %v1957_v50 }
 0x1bc   :  { %v1364_v39 = vsel %vm1361_vm9, %v1363_v41, %v1359_v45  ;;  %1960 = vrcp.f32 %v1307_v44  ;;  %vm1373_vm12 = vmor %vm1371_vm11, %vm1372_vm10  ;;  %v1392_v19 = vand.u32 2147483648, %v1307_v44  ;;  %v1390_v0 = vand.u32 2147483647, %v1307_v44 }
 0x1bd   :  { %1818 = vst.msk [vmem:[%s2962_s5 + $0x8] sm:$0xff] %vm1816_vm4, %v1364_v39  ;;  %v1368_v46 = vsub.f32 1.0, %v1367_v32  ;;  %v779_v47 = vpop.f32.mrf.mxu0  ;;  %v868_v36 = vpop.f32.mrf.mxu1  ;;  %vm1386_vm15 = vweird.f32 %v1307_v44  ;;  %v984_v39 = vld [vmem:[#allocation2 + $0xc8] sm:$0xff] }
 0x1be   :  { %v869_v34 = vadd.f32 %v868_v36, %v779_v47  ;;  %v1127_v40 = vpop.f32.mrf.mxu2  ;;  %v1393_v54 = vor.u32 1.1754944e-38, %v1392_v19  ;;  %vm1391_vm2 = vcmp.eq.f32.partialorder %v1390_v0, 8.507059e+37 }
 0x1bf   :  { %v1369_v12 = vmul.f32 %v1957_v50, %v1368_v46  ;;  %v1128_v13 = vadd.f32 %v2671_v59, %v1127_v40 }
 0x1c0   :  { %v914_v52 = vadd.f32 %v869_v34, %v656_v2 }
 0x1c1   :  { %v1959_v53 = vpop.eup %1958  ;;  %v1370_v55 = vadd.f32 %v1957_v50, %v1369_v12  ;;  %v1890_v42 = vmul.f32 -1.442695, %v1128_v13  ;;  %v981_v18 = vld [vmem:[#allocation2 + $0xb0] sm:$0xff] }
 0x1c2   :  { %v1961_v24 = vpop.eup %1960  ;;  %v1308_v30 = vadd.f32 1.0, %v1959_v53  ;;  %947 = vst.msk [vmem:[#allocation2 + $0xb8] sm:$0xff] %vm24_vm0, %v914_v52  ;;  %1875 = vmatmul.msk.f32.gmra.mxu2 %vm24_vm0, %v981_v18 }
 0x1c3   :  { %v1374_v58 = vsel %vm1373_vm12, %v1957_v50, %v1370_v55  ;;  %v1382_v60 = vmul.f32 %v1961_v24, %v1307_v44  ;;  %1962 = vpow2.f32 %v1890_v42  ;;  %vm1387_vm14 = vweird.f32 %v1961_v24 }
 0x1c4   :  { %v1379_v62 = vsel %vm1376_vm13, %v1378_v29, %v1374_v58  ;;  %1964 = vrcp.f32 %v1308_v30  ;;  %vm1388_vm1 = vmor %vm1386_vm15, %vm1387_vm14  ;;  %v1407_v20 = vand.u32 2147483648, %v1308_v30  ;;  %v1405_v10 = vand.u32 2147483647, %v1308_v30 }
 0x1c5   :  { %1819 = vst.msk [vmem:[%s2962_s5 + $0x10] sm:$0xff] %vm1816_vm4, %v1379_v62  ;;  %v1383_v56 = vsub.f32 1.0, %v1382_v60  ;;  %vm1401_vm5 = vweird.f32 %v1308_v30 }
 0x1c6   :  { %v1130_v49 = vpop.f32.mrf.mxu2  ;;  %v1408_v61 = vor.u32 1.1754944e-38, %v1407_v20  ;;  %vm1406_vm7 = vcmp.eq.f32.partialorder %v1405_v10, 8.507059e+37 }
 0x1c7   :  { %v1384_v63 = vmul.f32 %v1961_v24, %v1383_v56  ;;  %v1131_v5 = vadd.f32 %v2671_v59, %v1130_v49 }
 0x1c9   :  { %v1963_v7 = vpop.eup %1962  ;;  %v1385_v8 = vadd.f32 %v1961_v24, %v1384_v63  ;;  %v1891_v37 = vmul.f32 -1.442695, %v1131_v5  ;;  %v982_v9 = vld [vmem:[#allocation2 + $0xb8] sm:$0xff] }
 0x1ca   :  { %v1965_v38 = vpop.eup %1964  ;;  %v1309_v14 = vadd.f32 1.0, %v1963_v7  ;;  %1876 = vmatmul.msk.f32.gmra.mxu2 %vm24_vm0, %v982_v9 }
 0x1cb   :  { %v1389_v15 = vsel %vm1388_vm1, %v1961_v24, %v1385_v8  ;;  %v1397_v33 = vmul.f32 %v1965_v38, %v1308_v30  ;;  %1966 = vpow2.f32 %v1891_v37  ;;  %vm1402_vm3 = vweird.f32 %v1965_v38  ;;  %v985_v24 = vld [vmem:[#allocation2 + $0xd0] sm:$0xff] }
 0x1cc   :  { %v1394_v16 = vsel %vm1391_vm2, %v1393_v54, %v1389_v15  ;;  %1968 = vrcp.f32 %v1309_v14  ;;  %vm1403_vm6 = vmor %vm1401_vm5, %vm1402_vm3  ;;  %v1422_v3 = vand.u32 2147483648, %v1309_v14  ;;  %v1420_v50 = vand.u32 2147483647, %v1309_v14 }
 0x1cd   :  { %1820 = vst.msk [vmem:[%s2962_s5 + $0x18] sm:$0xff] %vm1816_vm4, %v1394_v16  ;;  %v1398_v17 = vsub.f32 1.0, %v1397_v33  ;;  %vm1416_vm9 = vweird.f32 %v1309_v14 }
 0x1ce   :  { %v1133_v22 = vpop.f32.mrf.mxu2  ;;  %v1423_v47 = vor.u32 1.1754944e-38, %v1422_v3  ;;  %vm1421_vm11 = vcmp.eq.f32.partialorder %v1420_v50, 8.507059e+37 }
 0x1cf   :  { %v1399_v43 = vmul.f32 %v1965_v38, %v1398_v17  ;;  %v1134_v23 = vadd.f32 %v2671_v59, %v1133_v22 }
 0x1d1   :  { %v1967_v26 = vpop.eup %1966  ;;  %v1400_v27 = vadd.f32 %v1965_v38, %v1399_v43  ;;  %v1892_v25 = vmul.f32 -1.442695, %v1134_v23 }
 0x1d2   :  { %v1969_v21 = vpop.eup %1968  ;;  %v1310_v31 = vadd.f32 1.0, %v1967_v26  ;;  %1877 = vmatmul.msk.f32.gmra.mxu2 %vm24_vm0, %v983_v28 }
 0x1d3   :  { %v1404_v57 = vsel %vm1403_vm6, %v1965_v38, %v1400_v27  ;;  %v1412_v35 = vmul.f32 %v1969_v21, %v1309_v14  ;;  %1970 = vpow2.f32 %v1892_v25  ;;  %vm1417_vm8 = vweird.f32 %v1969_v21 }
 0x1d4   :  { %v1409_v51 = vsel %vm1406_vm7, %v1408_v61, %v1404_v57  ;;  %1972 = vrcp.f32 %v1310_v31  ;;  %vm1418_vm10 = vmor %vm1416_vm9, %vm1417_vm8  ;;  %v1437_v12 = vand.u32 2147483648, %v1310_v31  ;;  %v1435_v52 = vand.u32 2147483647, %v1310_v31 }
 0x1d5   :  { %1821 = vst.msk [vmem:[%s2962_s5 + $0x20] sm:$0xff] %vm1816_vm4, %v1409_v51  ;;  %v1413_v4 = vsub.f32 1.0, %v1412_v35  ;;  %vm1431_vm13 = vweird.f32 %v1310_v31 }
 0x1d6   :  { %v1136_v1 = vpop.f32.mrf.mxu2  ;;  %v1438_v30 = vor.u32 1.1754944e-38, %v1437_v12  ;;  %vm1436_vm15 = vcmp.eq.f32.partialorder %v1435_v52, 8.507059e+37 }
 0x1d7   :  { %v1414_v6 = vmul.f32 %v1969_v21, %v1413_v4  ;;  %v1137_v41 = vadd.f32 %v2671_v59, %v1136_v1 }
 0x1d9   :  { %v1971_v44 = vpop.eup %1970  ;;  %v1415_v45 = vadd.f32 %v1969_v21, %v1414_v6  ;;  %v1893_v32 = vmul.f32 -1.442695, %v1137_v41 }
 0x1da   :  { %v1973_v46 = vpop.eup %1972  ;;  %v1311_v2 = vadd.f32 1.0, %v1971_v44  ;;  %1878 = vmatmul.msk.f32.gmra.mxu2 %vm24_vm0, %v984_v39 }
 0x1db   :  { %v1419_v36 = vsel %vm1418_vm10, %v1969_v21, %v1415_v45  ;;  %v1427_v48 = vmul.f32 %v1973_v46, %v1310_v31  ;;  %1974 = vpow2.f32 %v1893_v32  ;;  %vm1432_vm12 = vweird.f32 %v1973_v46 }
 0x1dc   :  { %v1424_v34 = vsel %vm1421_vm11, %v1423_v47, %v1419_v36  ;;  %1976 = vrcp.f32 %v1311_v2  ;;  %vm1433_vm14 = vmor %vm1431_vm13, %vm1432_vm12  ;;  %v1452_v49 = vand.u32 2147483648, %v1311_v2  ;;  %v1450_v5 = vand.u32 2147483647, %v1311_v2 }
 0x1dd   :  { %1822 = vst.msk [vmem:[%s2962_s5 + $0x28] sm:$0xff] %vm1816_vm4, %v1424_v34  ;;  %v1428_v40 = vsub.f32 1.0, %v1427_v48 }
 0x1de   :  { %v1139_v11 = vpop.f32.mrf.mxu2  ;;  %v1453_v54 = vor.u32 1.1754944e-38, %v1452_v49  ;;  %vm1451_vm3 = vcmp.eq.f32.partialorder %v1450_v5, 8.507059e+37 }
 0x1df   :  { %v1429_v13 = vmul.f32 %v1973_v46, %v1428_v40  ;;  %v1140_v53 = vadd.f32 %v2671_v59, %v1139_v11 }
 0x1e1   :  { %v1975_v55 = vpop.eup %1974  ;;  %v1430_v42 = vadd.f32 %v1973_v46, %v1429_v13  ;;  %v1894_v18 = vmul.f32 -1.442695, %v1140_v53 }
 0x1e2   :  { %v1977_v29 = vpop.eup %1976  ;;  %v1312_v58 = vadd.f32 1.0, %v1975_v55  ;;  %1879 = vmatmul.msk.f32.gmra.mxu2 %vm24_vm0, %v985_v24  ;;  %vm1446_vm0 = vweird.f32 %v1311_v2 }
 0x1e3   :  { %v1434_v60 = vsel %vm1433_vm14, %v1973_v46, %v1430_v42  ;;  %v1442_v62 = vmul.f32 %v1977_v29, %v1311_v2  ;;  %1978 = vpow2.f32 %v1894_v18  ;;  %vm1447_vm1 = vweird.f32 %v1977_v29 }
 0x1e4   :  { %v1439_v56 = vsel %vm1436_vm15, %v1438_v30, %v1434_v60  ;;  %1980 = vrcp.f32 %v1312_v58  ;;  %vm1448_vm2 = vmor %vm1446_vm0, %vm1447_vm1  ;;  %v1467_v20 = vand.u32 2147483648, %v1312_v58  ;;  %v1465_v10 = vand.u32 2147483647, %v1312_v58 }
 0x1e5   :  { %1823 = vst.msk [vmem:[%s2962_s5 + $0x30] sm:$0xff] %vm1816_vm4, %v1439_v56  ;;  %v1443_v19 = vsub.f32 1.0, %v1442_v62  ;;  %vm1461_vm6 = vweird.f32 %v1312_v58 }
 0x1e6   :  { %v1142_v63 = vpop.f32.mrf.mxu2  ;;  %v1468_v21 = vor.u32 1.1754944e-38, %v1467_v20  ;;  %vm1466_vm8 = vcmp.eq.f32.partialorder %v1465_v10, 8.507059e+37 }
 0x1e7   :  { %v1444_v0 = vmul.f32 %v1977_v29, %v1443_v19  ;;  %v1143_v7 = vadd.f32 %v2671_v59, %v1142_v63 }
 0x1e9   :  { %v1979_v8 = vpop.eup %1978  ;;  %v1445_v37 = vadd.f32 %v1977_v29, %v1444_v0  ;;  %v1895_v9 = vmul.f32 -1.442695, %v1143_v7 }
 0x1ea   :  { %v1981_v38 = vpop.eup %1980  ;;  %v1313_v14 = vadd.f32 1.0, %v1979_v8 }
 0x1eb   :  { %v1449_v15 = vsel %vm1448_vm2, %v1977_v29, %v1445_v37  ;;  %v1457_v33 = vmul.f32 %v1981_v38, %v1312_v58  ;;  %1982 = vpow2.f32 %v1895_v9  ;;  %vm1462_vm5 = vweird.f32 %v1981_v38 }
 0x1ec   :  { %v1454_v16 = vsel %vm1451_vm3, %v1453_v54, %v1449_v15  ;;  %1984 = vrcp.f32 %v1313_v14  ;;  %vm1463_vm7 = vmor %vm1461_vm6, %vm1462_vm5  ;;  %v1482_v4 = vand.u32 2147483648, %v1313_v14  ;;  %v1480_v6 = vand.u32 2147483647, %v1313_v14 }
 0x1ed   :  { %1824 = vst.msk [vmem:[%s2962_s5 + $0x38] sm:$0xff] %vm1816_vm4, %v1454_v16  ;;  %v1458_v17 = vsub.f32 1.0, %v1457_v33  ;;  %vm1476_vm10 = vweird.f32 %v1313_v14 }
 0x1ee   :  { %v1145_v22 = vpop.f32.mrf.mxu2  ;;  %v1483_v39 = vor.u32 1.1754944e-38, %v1482_v4  ;;  %vm1481_vm12 = vcmp.eq.f32.partialorder %v1480_v6, 8.507059e+37 }
 0x1ef   :  { %v1459_v43 = vmul.f32 %v1981_v38, %v1458_v17  ;;  %v1146_v23 = vadd.f32 %v2671_v59, %v1145_v22 }
 0x1f1   :  { %v1983_v26 = vpop.eup %1982  ;;  %v1460_v27 = vadd.f32 %v1981_v38, %v1459_v43  ;;  %v1896_v25 = vmul.f32 -1.442695, %v1146_v23 }
 0x1f2   :  { %v1985_v28 = vpop.eup %1984  ;;  %v1314_v61 = vadd.f32 1.0, %v1983_v26 }
 0x1f3   :  { %v1464_v31 = vsel %vm1463_vm7, %v1981_v38, %v1460_v27  ;;  %v1472_v57 = vmul.f32 %v1985_v28, %v1313_v14  ;;  %1986 = vpow2.f32 %v1896_v25  ;;  %vm1477_vm9 = vweird.f32 %v1985_v28 }
 0x1f4   :  { %v1469_v35 = vsel %vm1466_vm8, %v1468_v21, %v1464_v31  ;;  %1988 = vrcp.f32 %v1314_v61  ;;  %vm1478_vm11 = vmor %vm1476_vm10, %vm1477_vm9  ;;  %v1497_v34 = vand.u32 2147483648, %v1314_v61  ;;  %v1495_v11 = vand.u32 2147483647, %v1314_v61 }
 0x1f5   :  { %1825 = vst.msk [vmem:[%s2962_s5 + $0x40] sm:$0xff] %vm1816_vm4, %v1469_v35  ;;  %v1473_v51 = vsub.f32 1.0, %v1472_v57  ;;  %vm1491_vm14 = vweird.f32 %v1314_v61 }
 0x1f6   :  { %v1148_v3 = vpop.f32.mrf.mxu2  ;;  %v1498_v18 = vor.u32 1.1754944e-38, %v1497_v34  ;;  %vm1496_vm1 = vcmp.eq.f32.partialorder %v1495_v11, 8.507059e+37 }
 0x1f7   :  { %v1474_v1 = vmul.f32 %v1985_v28, %v1473_v51  ;;  %v1149_v50 = vadd.f32 %v2671_v59, %v1148_v3 }
 0x1f9   :  { %v1987_v41 = vpop.eup %1986  ;;  %v1475_v44 = vadd.f32 %v1985_v28, %v1474_v1  ;;  %v1897_v45 = vmul.f32 -1.442695, %v1149_v50 }
 0x1fa   :  { %v1989_v32 = vpop.eup %1988  ;;  %v1315_v46 = vadd.f32 1.0, %v1987_v41 }
 0x1fb   :  { %v1479_v47 = vsel %vm1478_vm11, %v1985_v28, %v1475_v44  ;;  %v1487_v2 = vmul.f32 %v1989_v32, %v1314_v61  ;;  %1990 = vpow2.f32 %v1897_v45  ;;  %vm1492_vm13 = vweird.f32 %v1989_v32 }
 0x1fc   :  { %v1484_v36 = vsel %vm1481_vm12, %v1483_v39, %v1479_v47  ;;  %1992 = vrcp.f32 %v1315_v46  ;;  %vm1493_vm15 = vmor %vm1491_vm14, %vm1492_vm13  ;;  %v1512_v62 = vand.u32 2147483648, %v1315_v46  ;;  %v1510_v49 = vand.u32 2147483647, %v1315_v46 }
 0x1fd   :  { %1826 = vst.msk [vmem:[%s2962_s5 + $0x48] sm:$0xff] %vm1816_vm4, %v1484_v36  ;;  %v1488_v48 = vsub.f32 1.0, %v1487_v2  ;;  %vm1506_vm2 = vweird.f32 %v1315_v46 }
 0x1fe   :  { %v1151_v40 = vpop.f32.mrf.mxu2  ;;  %v1513_v37 = vor.u32 1.1754944e-38, %v1512_v62  ;;  %vm1511_vm5 = vcmp.eq.f32.partialorder %v1510_v49, 8.507059e+37 }
 0x1ff   :  { %v1489_v12 = vmul.f32 %v1989_v32, %v1488_v48  ;;  %v1152_v13 = vadd.f32 %v2671_v59, %v1151_v40 }
 0x201   :  { %v1991_v52 = vpop.eup %1990  ;;  %v1490_v53 = vadd.f32 %v1989_v32, %v1489_v12  ;;  %v1898_v55 = vmul.f32 -1.442695, %v1152_v13 }
 0x202   :  { %v1993_v42 = vpop.eup %1992  ;;  %v1316_v24 = vadd.f32 1.0, %v1991_v52 }
 0x203   :  { %v1494_v29 = vsel %vm1493_vm15, %v1989_v32, %v1490_v53  ;;  %v1502_v30 = vmul.f32 %v1993_v42, %v1315_v46  ;;  %1994 = vpow2.f32 %v1898_v55  ;;  %vm1507_vm0 = vweird.f32 %v1993_v42 }
 0x204   :  { %v1499_v58 = vsel %vm1496_vm1, %v1498_v18, %v1494_v29  ;;  %1996 = vrcp.f32 %v1316_v24  ;;  %vm1508_vm3 = vmor %vm1506_vm2, %vm1507_vm0  ;;  %v1525_v17 = vand.u32 2147483647, %v1316_v24  ;;  %v1527_v20 = vand.u32 2147483648, %v1316_v24 }
 0x205   :  { %1827 = vst.msk [vmem:[%s2962_s5 + $0x50] sm:$0xff] %vm1816_vm4, %v1499_v58  ;;  %v1503_v60 = vsub.f32 1.0, %v1502_v30  ;;  %vm1521_vm7 = vweird.f32 %v1316_v24 }
 0x206   :  { %v1154_v56 = vpop.f32.mrf.mxu2  ;;  %v1528_v21 = vor.u32 1.1754944e-38, %v1527_v20  ;;  %vm1526_vm9 = vcmp.eq.f32.partialorder %v1525_v17, 8.507059e+37 }
 0x207   :  { %v1504_v19 = vmul.f32 %v1993_v42, %v1503_v60  ;;  %v1155_v63 = vadd.f32 %v2671_v59, %v1154_v56 }
 0x209   :  { %v1995_v0 = vpop.eup %1994  ;;  %v1505_v5 = vadd.f32 %v1993_v42, %v1504_v19  ;;  %v1899_v7 = vmul.f32 -1.442695, %v1155_v63 }
 0x20a   :  { %v1997_v8 = vpop.eup %1996  ;;  %v1317_v9 = vadd.f32 1.0, %v1995_v0 }
 0x20b   :  { %v1509_v38 = vsel %vm1508_vm3, %v1993_v42, %v1505_v5  ;;  %v1517_v54 = vmul.f32 %v1997_v8, %v1316_v24  ;;  %1998 = vpow2.f32 %v1899_v7  ;;  %v1193_v14 = vpop.f32.mrf.mxu3  ;;  %vm1522_vm6 = vweird.f32 %v1997_v8 }
 0x20c   :  { %v1514_v15 = vsel %vm1511_vm5, %v1513_v37, %v1509_v38  ;;  %2000 = vrcp.f32 %v1317_v9  ;;  %v1194_v16 = vadd.f32 %v2671_v59, %v1193_v14  ;;  %vm1523_vm8 = vmor %vm1521_vm7, %vm1522_vm6  ;;  %v1540_v1 = vand.u32 2147483647, %v1317_v9 }
 0x20d   :  { %1828 = vst.msk [vmem:[%s2962_s5 + $0x58] sm:$0xff] %vm1816_vm4, %v1514_v15  ;;  %v1518_v33 = vsub.f32 1.0, %v1517_v54  ;;  %v1542_v6 = vand.u32 2147483648, %v1317_v9  ;;  %vm1536_vm11 = vweird.f32 %v1317_v9 }
 0x20e   :  { %v1157_v22 = vpop.f32.mrf.mxu2  ;;  %v1912_v10 = vmul.f32 -1.442695, %v1194_v16  ;;  %vm1541_vm13 = vcmp.eq.f32.partialorder %v1540_v1, 8.507059e+37 }
 0x20f   :  { %v1519_v43 = vmul.f32 %v1997_v8, %v1518_v33  ;;  %v1158_v23 = vadd.f32 %v2671_v59, %v1157_v22  ;;  %v1543_v48 = vor.u32 1.1754944e-38, %v1542_v6 }
 0x210   :  { %2002 = vpow2.f32 %v1912_v10 }
 0x211   :  { %v1999_v26 = vpop.eup %1998  ;;  %v1520_v27 = vadd.f32 %v1997_v8, %v1519_v43  ;;  %v1900_v25 = vmul.f32 -1.442695, %v1158_v23 }
 0x212   :  { %v2001_v28 = vpop.eup %2000  ;;  %v1318_v61 = vadd.f32 1.0, %v1999_v26 }
 0x213   :  { %v1524_v31 = vsel %vm1523_vm8, %v1997_v8, %v1520_v27  ;;  %v1532_v57 = vmul.f32 %v2001_v28, %v1317_v9  ;;  %2004 = vpow2.f32 %v1900_v25  ;;  %v1196_v35 = vpop.f32.mrf.mxu3  ;;  %vm1537_vm10 = vweird.f32 %v2001_v28 }
 0x214   :  { %v1529_v51 = vsel %vm1526_vm9, %v1528_v21, %v1524_v31  ;;  %2006 = vrcp.f32 %v1318_v61  ;;  %v1197_v3 = vadd.f32 %v2671_v59, %v1196_v35  ;;  %vm1538_vm12 = vmor %vm1536_vm11, %vm1537_vm10  ;;  %v1555_v53 = vand.u32 2147483647, %v1318_v61 }
 0x215   :  { %1829 = vst.msk [vmem:[%s2962_s5 + $0x60] sm:$0xff] %vm1816_vm4, %v1529_v51  ;;  %v1533_v4 = vsub.f32 1.0, %v1532_v57  ;;  %v1557_v55 = vand.u32 2147483648, %v1318_v61  ;;  %vm1551_vm15 = vweird.f32 %v1318_v61 }
 0x216   :  { %v1160_v50 = vpop.f32.mrf.mxu2  ;;  %v2003_v41 = vpop.eup %2002  ;;  %v1913_v45 = vmul.f32 -1.442695, %v1197_v3  ;;  %vm1556_vm1 = vcmp.eq.f32.partialorder %v1555_v53, 8.507059e+37 }
 0x217   :  { %v1534_v44 = vmul.f32 %v2001_v28, %v1533_v4  ;;  %v1161_v32 = vadd.f32 %v2671_v59, %v1160_v50  ;;  %v2781_v39 = vadd.f32 1.0, %v2003_v41  ;;  %v1558_v63 = vor.u32 1.1754944e-38, %v1557_v55 }
 0x218   :  { %2008 = vpow2.f32 %v1913_v45 }
 0x219   :  { %v2005_v46 = vpop.eup %2004  ;;  %v1535_v47 = vadd.f32 %v2001_v28, %v1534_v44  ;;  %v1901_v2 = vmul.f32 -1.442695, %v1161_v32  ;;  %2010 = vrcp.f32 %v2781_v39  ;;  %v1750_v0 = vand.u32 2147483647, %v2781_v39 }
 0x21a   :  { %v2007_v36 = vpop.eup %2006  ;;  %v2784_v12 = vadd.f32 1.0, %v2005_v46  ;;  %v1752_v14 = vand.u32 2147483648, %v2781_v39  ;;  %vm1746_vm3 = vweird.f32 %v2781_v39 }
 0x21b   :  { %v1539_v34 = vsel %vm1538_vm12, %v2001_v28, %v1535_v47  ;;  %v1547_v40 = vmul.f32 %v2007_v36, %v1318_v61  ;;  %v1199_v11 = vpop.f32.mrf.mxu3  ;;  %2012 = vpow2.f32 %v1901_v2  ;;  %vm1552_vm14 = vweird.f32 %v2007_v36 }
 0x21c   :  { %v1544_v13 = vsel %vm1541_vm13, %v1543_v48, %v1539_v34  ;;  %2014 = vrcp.f32 %v2784_v12  ;;  %v1200_v42 = vadd.f32 %v2671_v59, %v1199_v11  ;;  %vm1553_vm0 = vmor %vm1551_vm15, %vm1552_vm14  ;;  %vm2808_vm5 = vcmp.eq.f32.partialorder %v1750_v0, 8.507059e+37 }
 0x21d   :  { %1830 = vst.msk [vmem:[%s2962_s5 + $0x68] sm:$0xff] %vm1816_vm4, %v1544_v13  ;;  %v1548_v52 = vsub.f32 1.0, %v1547_v40  ;;  %v1572_v43 = vand.u32 2147483648, %v2784_v12  ;;  %v1753_v27 = vor.u32 1.1754944e-38, %v1752_v14  ;;  %v1570_v28 = vand.u32 2147483647, %v2784_v12 }
 0x21e   :  { %v1163_v18 = vpop.f32.mrf.mxu2  ;;  %v2009_v24 = vpop.eup %2008  ;;  %v1914_v62 = vmul.f32 -1.442695, %v1200_v42  ;;  %vm1566_vm8 = vweird.f32 %v2784_v12 }
 0x21f   :  { %v1549_v29 = vmul.f32 %v2007_v36, %v1548_v52  ;;  %v1164_v30 = vadd.f32 %v2671_v59, %v1163_v18  ;;  %v2011_v58 = vpop.eup %2010  ;;  %v2793_v60 = vadd.f32 1.0, %v2009_v24  ;;  %v1573_v6 = vor.u32 1.1754944e-38, %v1572_v43 }
 0x220   :  { %v1742_v19 = vmul.f32 %v2011_v58, %v2781_v39  ;;  %vm1747_vm2 = vweird.f32 %v2011_v58  ;;  %vm1571_vm10 = vcmp.eq.f32.partialorder %v1570_v28, 8.507059e+37 }
 0x221   :  { %v1550_v56 = vadd.f32 %v2007_v36, %v1549_v29  ;;  %v2013_v49 = vpop.eup %2012  ;;  %2016 = vrcp.f32 %v2793_v60  ;;  %v1902_v5 = vmul.f32 -1.442695, %v1164_v30  ;;  %vm1748_vm6 = vmor %vm1746_vm3, %vm1747_vm2  ;;  %v1767_v41 = vand.u32 2147483648, %v2793_v60 }
 0x222   :  { %v2015_v7 = vpop.eup %2014  ;;  %v1743_v37 = vsub.f32 1.0, %v1742_v19  ;;  %v2798_v9 = vadd.f32 1.0, %v2013_v49  ;;  %2018 = vpow2.f32 %v1914_v62  ;;  %v1765_v2 = vand.u32 2147483647, %v2793_v60 }
 0x223   :  { %v1554_v8 = vsel %vm1553_vm0, %v2007_v36, %v1550_v56  ;;  %v1202_v38 = vpop.f32.mrf.mxu3  ;;  %v1562_v15 = vmul.f32 %v2015_v7, %v2784_v12  ;;  %vm1567_vm7 = vweird.f32 %v2015_v7  ;;  %vm1761_vm12 = vweird.f32 %v2793_v60 }
 0x224   :  { %v1559_v54 = vsel %vm1556_vm1, %v1558_v63, %v1554_v8  ;;  %v1744_v33 = vmul.f32 %v2011_v58, %v1743_v37  ;;  %2020 = vrcp.f32 %v2798_v9  ;;  %v1203_v10 = vadd.f32 %v2671_v59, %v1202_v38  ;;  %vm1568_vm9 = vmor %vm1566_vm8, %vm1567_vm7 }
 0x225   :  { %1831 = vst.msk [vmem:[%s2962_s5 + $0x70] sm:$0xff] %vm1816_vm4, %v1559_v54  ;;  %v1563_v17 = vsub.f32 1.0, %v1562_v15  ;;  %2022 = vpow2.f32 %v1902_v5  ;;  %v1768_v12 = vor.u32 1.1754944e-38, %v1767_v41  ;;  %v1587_v11 = vand.u32 2147483648, %v2798_v9 }
 0x226   :  { %v1166_v20 = vpop.f32.mrf.mxu2  ;;  %v1745_v22 = vadd.f32 %v2011_v58, %v1744_v33  ;;  %v1915_v57 = vmul.f32 -1.442695, %v1203_v10  ;;  %v1585_v53 = vand.u32 2147483647, %v2798_v9  ;;  %vm1766_vm15 = vcmp.eq.f32.partialorder %v1765_v2, 8.507059e+37 }
 0x227   :  { %v1167_v23 = vadd.f32 %v2671_v59, %v1166_v20  ;;  %v2017_v26 = vpop.eup %2016  ;;  %v1564_v25 = vmul.f32 %v2015_v7, %v1563_v17  ;;  %vm1581_vm1 = vweird.f32 %v2798_v9  ;;  %v1588_v62 = vor.u32 1.1754944e-38, %v1587_v11  ;;  %v2865_v33 = vld [vmem:[%s2961_s4] ss:$0 sm:$0xff] }
 0x228   :  { %v2019_v21 = vpop.eup %2018  ;;  %v1749_v61 = vsel %vm1748_vm6, %v2011_v58, %v1745_v22  ;;  %v1757_v31 = vmul.f32 %v2017_v26, %v2793_v60  ;;  %2024 = vpow2.f32 %v1915_v57  ;;  %vm1762_vm11 = vweird.f32 %v2017_v26 }
 0x229   :  { %v1754_v35 = vsel %vm2808_vm5, %v1753_v27, %v1749_v61  ;;  %v1565_v51 = vadd.f32 %v2015_v7, %v1564_v25  ;;  %v2820_v4 = vadd.f32 1.0, %v2019_v21  ;;  %v1903_v3 = vmul.f32 -1.442695, %v1167_v23  ;;  %vm1763_vm13 = vmor %vm1761_vm12, %vm1762_vm11 }
 0x22a   :  { %v2021_v1 = vpop.eup %2020  ;;  %1844 = vst.msk [vmem:[%s2962_s5 + $0xd8] sm:$0xff] %vm1816_vm4, %v1754_v35  ;;  %v1758_v50 = vsub.f32 1.0, %v1757_v31  ;;  %vm1586_vm2 = vcmp.eq.f32.partialorder %v1585_v53, 8.507059e+37 }
 0x22b   :  { %v2023_v44 = vpop.eup %2022  ;;  %v1569_v45 = vsel %vm1568_vm9, %v2015_v7, %v1565_v51  ;;  %v1577_v32 = vmul.f32 %v2021_v1, %v2798_v9  ;;  %2026 = vrcp.f32 %v2820_v4  ;;  %v1205_v39 = vpop.f32.mrf.mxu3  ;;  %vm1582_vm14 = vweird.f32 %v2021_v1 }
 0x22c   :  { %v1574_v46 = vsel %vm1571_vm10, %v1573_v6, %v1569_v45  ;;  %v1759_v47 = vmul.f32 %v2017_v26, %v1758_v50  ;;  %v2835_v48 = vadd.f32 1.0, %v2023_v44  ;;  %2028 = vpow2.f32 %v1903_v3  ;;  %vm1583_vm0 = vmor %vm1581_vm1, %vm1582_vm14 }
 0x22d   :  { %1832 = vst.msk [vmem:[%s2962_s5 + $0x78] sm:$0xff] %vm1816_vm4, %v1574_v46  ;;  %v1578_v36 = vsub.f32 1.0, %v1577_v32  ;;  %v1206_v13 = vadd.f32 %v2671_v59, %v1205_v39  ;;  %v1780_v8 = vand.u32 2147483647, %v2820_v4  ;;  %v1782_v37 = vand.u32 2147483648, %v2820_v4 }
 0x22e   :  { %v1169_v34 = vpop.f32.mrf.mxu2  ;;  %v1760_v40 = vadd.f32 %v2017_v26, %v1759_v47  ;;  %2030 = vrcp.f32 %v2835_v48  ;;  %v2025_v55 = vpop.eup %2024  ;;  %vm1776_vm5 = vweird.f32 %v2820_v4  ;;  %v1600_v22 = vand.u32 2147483647, %v2835_v48 }
 0x22f   :  { %v1579_v52 = vmul.f32 %v2021_v1, %v1578_v36  ;;  %v1170_v18 = vadd.f32 %v2671_v59, %v1169_v34  ;;  %v2843_v58 = vadd.f32 1.0, %v2025_v55  ;;  %v1916_v60 = vmul.f32 -1.442695, %v1206_v13 }
 0x230   :  { %v1764_v42 = vsel %vm1763_vm13, %v2017_v26, %v1760_v40  ;;  %vm1781_vm7 = vcmp.eq.f32.partialorder %v1780_v8, 8.507059e+37  ;;  %v1783_v20 = vor.u32 1.1754944e-38, %v1782_v37  ;;  %v1602_v43 = vand.u32 2147483648, %v2835_v48 }
 0x231   :  { %v2027_v24 = vpop.eup %2026  ;;  %v1769_v29 = vsel %vm1766_vm15, %v1768_v12, %v1764_v42  ;;  %v1580_v30 = vadd.f32 %v2021_v1, %v1579_v52  ;;  %2032 = vrcp.f32 %v2843_v58  ;;  %v1904_v5 = vmul.f32 -1.442695, %v1170_v18 }
 0x232   :  { %1845 = vst.msk [vmem:[%s2962_s5 + $0xe0] sm:$0xff] %vm1816_vm4, %v1769_v29  ;;  %v1772_v56 = vmul.f32 %v2027_v24, %v2820_v4  ;;  %v2029_v19 = vpop.eup %2028  ;;  %2034 = vpow2.f32 %v1916_v60  ;;  %vm1777_vm3 = vweird.f32 %v2027_v24  ;;  %vm1596_vm9 = vweird.f32 %v2835_v48 }
 0x233   :  { %v1584_v49 = vsel %vm1583_vm0, %v2021_v1, %v1580_v30  ;;  %v2851_v0 = vadd.f32 1.0, %v2029_v19  ;;  %vm1778_vm6 = vmor %vm1776_vm5, %vm1777_vm3  ;;  %v1795_v31 = vand.u32 2147483647, %v2843_v58  ;;  %vm1601_vm11 = vcmp.eq.f32.partialorder %v1600_v22, 8.507059e+37 }
 0x234   :  { %v1589_v59 = vsel %vm1586_vm2, %v1588_v62, %v1584_v49  ;;  %v1773_v63 = vsub.f32 1.0, %v1772_v56  ;;  %v2031_v7 = vpop.eup %2030  ;;  %v1603_v51 = vor.u32 1.1754944e-38, %v1602_v43  ;;  %v1797_v4 = vand.u32 2147483648, %v2843_v58 }
 0x235   :  { %1833 = vst.msk [vmem:[%s2962_s5 + $0x80] sm:$0xff] %vm1816_vm4, %v1589_v59  ;;  %v1592_v54 = vmul.f32 %v2031_v7, %v2835_v48  ;;  %2036 = vrcp.f32 %v2851_v0  ;;  %vm1597_vm8 = vweird.f32 %v2031_v7  ;;  %vm1791_vm13 = vweird.f32 %v2843_v58 }
 0x236   :  { %v1172_v9 = vpop.f32.mrf.mxu2  ;;  %v1774_v38 = vmul.f32 %v2027_v24, %v1773_v63  ;;  %2038 = vpow2.f32 %v1904_v5  ;;  %vm1598_vm10 = vmor %vm1596_vm9, %vm1597_vm8  ;;  %vm1796_vm14 = vcmp.eq.f32.partialorder %v1795_v31, 8.507059e+37  ;;  %v1798_v46 = vor.u32 1.1754944e-38, %v1797_v4 }
 0x237   :  { %v1593_v15 = vsub.f32 1.0, %v1592_v54  ;;  %v1173_v16 = vadd.f32 %v2865_v33, %v1172_v9  ;;  %v2033_v17 = vpop.eup %2032  ;;  %v1615_v47 = vand.u32 2147483647, %v2851_v0  ;;  %v1617_v2 = vand.u32 2147483648, %v2851_v0 }
 0x238   :  { %v1775_v14 = vadd.f32 %v2027_v24, %v1774_v38  ;;  %v1787_v26 = vmul.f32 %v2033_v17, %v2843_v58  ;;  %v2035_v27 = vpop.eup %2034  ;;  %vm1792_vm12 = vweird.f32 %v2033_v17  ;;  %vm1611_vm0 = vweird.f32 %v2851_v0 }
 0x239   :  { %v1594_v23 = vmul.f32 %v2031_v7, %v1593_v15  ;;  %v1905_v28 = vmul.f32 -1.442695, %v1173_v16  ;;  %v2877_v57 = vadd.f32 1.0, %v2035_v27  ;;  %vm1793_vm15 = vmor %vm1791_vm13, %vm1792_vm12  ;;  %v1618_v55 = vor.u32 1.1754944e-38, %v1617_v2 }
 0x23a   :  { %v1779_v10 = vsel %vm1778_vm6, %v2027_v24, %v1775_v14  ;;  %v1788_v61 = vsub.f32 1.0, %v1787_v26  ;;  %vm1616_vm3 = vcmp.eq.f32.partialorder %v1615_v47, 8.507059e+37 }
 0x23b   :  { %v1784_v25 = vsel %vm1781_vm7, %v1783_v20, %v1779_v10  ;;  %v1595_v21 = vadd.f32 %v2031_v7, %v1594_v23  ;;  %v2037_v35 = vpop.eup %2036  ;;  %2040 = vpow2.f32 %v1905_v28  ;;  %v1810_v30 = vand.u32 2147483647, %v2877_v57 }
 0x23c   :  { %1846 = vst.msk [vmem:[%s2962_s5 + $0xe8] sm:$0xff] %vm1816_vm4, %v1784_v25  ;;  %v2039_v1 = vpop.eup %2038  ;;  %v1789_v50 = vmul.f32 %v2033_v17, %v1788_v61  ;;  %v1607_v41 = vmul.f32 %v2037_v35, %v2851_v0  ;;  %2042 = vrcp.f32 %v2877_v57  ;;  %vm1612_vm1 = vweird.f32 %v2037_v35 }
 0x23d   :  { %v1599_v6 = vsel %vm1598_vm10, %v2031_v7, %v1595_v21  ;;  %v1323_v39 = vadd.f32 1.0, %v2039_v1  ;;  %vm1613_vm2 = vmor %vm1611_vm0, %vm1612_vm1  ;;  %v1812_v62 = vand.u32 2147483648, %v2877_v57  ;;  %vm1806_vm6 = vweird.f32 %v2877_v57 }
 0x23e   :  { %v1175_v3 = vpop.f32.mrf.mxu2  ;;  %v1604_v44 = vsel %vm1601_vm11, %v1603_v51, %v1599_v6  ;;  %v1790_v45 = vadd.f32 %v2033_v17, %v1789_v50  ;;  %v1608_v32 = vsub.f32 1.0, %v1607_v41  ;;  %vm1811_vm7 = vcmp.eq.f32.partialorder %v1810_v30, 8.507059e+37 }
 0x23f   :  { %1834 = vst.msk [vmem:[%s2962_s5 + $0x88] sm:$0xff] %vm1816_vm4, %v1604_v44  ;;  %v1176_v36 = vadd.f32 %v2865_v33, %v1175_v3  ;;  %2044 = vrcp.f32 %v1323_v39  ;;  %v1630_v49 = vand.u32 2147483647, %v1323_v39  ;;  %v1632_v63 = vand.u32 2147483648, %v1323_v39 }
 0x240   :  { %v1794_v48 = vsel %vm1793_vm15, %v2033_v17, %v1790_v45  ;;  %v1609_v34 = vmul.f32 %v2037_v35, %v1608_v32  ;;  %v1813_v37 = vor.u32 1.1754944e-38, %v1812_v62  ;;  %vm1626_vm9 = vweird.f32 %v1323_v39 }
 0x241   :  { %v2041_v40 = vpop.eup %2040  ;;  %v1799_v12 = vsel %vm1796_vm14, %v1798_v46, %v1794_v48  ;;  %v1906_v52 = vmul.f32 -1.442695, %v1176_v36  ;;  %vm2908_vm11 = vcmp.eq.f32.partialorder %v1630_v49, 8.507059e+37  ;;  %v1633_v17 = vor.u32 1.1754944e-38, %v1632_v63 }
 0x242   :  { %1847 = vst.msk [vmem:[%s2962_s5 + $0xf0] sm:$0xff] %vm1816_vm4, %v1799_v12  ;;  %v1610_v11 = vadd.f32 %v2037_v35, %v1609_v34  ;;  %v2895_v13 = vadd.f32 1.0, %v2041_v40  ;;  %v2043_v53 = vpop.eup %2042 }
 0x243   :  { %v1802_v24 = vmul.f32 %v2043_v53, %v2877_v57  ;;  %vm1807_vm5 = vweird.f32 %v2043_v53 }
 0x244   :  { %v1614_v18 = vsel %vm1613_vm2, %v2037_v35, %v1610_v11  ;;  %2046 = vrcp.f32 %v2895_v13  ;;  %vm1808_vm8 = vmor %vm1806_vm6, %vm1807_vm5  ;;  %v1645_v26 = vand.u32 2147483647, %v2895_v13  ;;  %v1647_v27 = vand.u32 2147483648, %v2895_v13 }
 0x245   :  { %v1619_v29 = vsel %vm1616_vm3, %v1618_v55, %v1614_v18  ;;  %v2045_v58 = vpop.eup %2044  ;;  %v1803_v60 = vsub.f32 1.0, %v1802_v24  ;;  %2048 = vpow2.f32 %v1906_v52  ;;  %vm1641_vm14 = vweird.f32 %v2895_v13 }
 0x246   :  { %v1178_v42 = vpop.f32.mrf.mxu2  ;;  %1835 = vst.msk [vmem:[%s2962_s5 + $0x90] sm:$0xff] %vm1816_vm4, %v1619_v29  ;;  %v1622_v19 = vmul.f32 %v2045_v58, %v1323_v39  ;;  %vm1627_vm10 = vweird.f32 %v2045_v58  ;;  %v1648_v51 = vor.u32 1.1754944e-38, %v1647_v27  ;;  %vm1646_vm1 = vcmp.eq.f32.partialorder %v1645_v26, 8.507059e+37 }
 0x247   :  { %v1179_v56 = vadd.f32 %v2865_v33, %v1178_v42  ;;  %v1804_v59 = vmul.f32 %v2043_v53, %v1803_v60  ;;  %vm1628_vm12 = vmor %vm1626_vm9, %vm1627_vm10 }
 0x248   :  { %v1623_v5 = vsub.f32 1.0, %v1622_v19 }
 0x249   :  { %v1907_v0 = vmul.f32 -1.442695, %v1179_v56  ;;  %v1805_v8 = vadd.f32 %v2043_v53, %v1804_v59 }
 0x24a   :  { %v2047_v7 = vpop.eup %2046  ;;  %v1624_v9 = vmul.f32 %v2045_v58, %v1623_v5 }
 0x24b   :  { %2050 = vpow2.f32 %v1907_v0  ;;  %v1637_v38 = vmul.f32 %v2047_v7, %v2895_v13  ;;  %v2049_v14 = vpop.eup %2048  ;;  %v1809_v15 = vsel %vm1808_vm8, %v2043_v53, %v1805_v8  ;;  %vm1642_vm13 = vweird.f32 %v2047_v7 }
 0x24c   :  { %v1814_v22 = vsel %vm1811_vm7, %v1813_v37, %v1809_v15  ;;  %v1625_v43 = vadd.f32 %v2045_v58, %v1624_v9  ;;  %v1325_v23 = vadd.f32 1.0, %v2049_v14  ;;  %vm1643_vm15 = vmor %vm1641_vm14, %vm1642_vm13 }
 0x24d   :  { %v1638_v10 = vsub.f32 1.0, %v1637_v38  ;;  %1848 = vst.msk [vmem:[%s2962_s5 + $0xf8] sm:$0xff] %vm1816_vm4, %v1814_v22 }
 0x24e   :  { %v1181_v54 = vpop.f32.mrf.mxu2  ;;  %v1629_v28 = vsel %vm1628_vm12, %v2045_v58, %v1625_v43  ;;  %2052 = vrcp.f32 %v1325_v23  ;;  %v1660_v47 = vand.u32 2147483647, %v1325_v23  ;;  %v1662_v2 = vand.u32 2147483648, %v1325_v23 }
 0x24f   :  { %v1182_v20 = vadd.f32 %v2865_v33, %v1181_v54  ;;  %v1639_v21 = vmul.f32 %v2047_v7, %v1638_v10  ;;  %v1634_v31 = vsel %vm2908_vm11, %v1633_v17, %v1629_v28  ;;  %vm1656_vm2 = vweird.f32 %v1325_v23 }
 0x250   :  { %1836 = vst.msk [vmem:[%s2962_s5 + $0x98] sm:$0xff] %vm1816_vm4, %v1634_v31  ;;  %vm1661_vm5 = vcmp.eq.f32.partialorder %v1660_v47, 8.507059e+37  ;;  %v1663_v13 = vor.u32 1.1754944e-38, %v1662_v2 }
 0x251   :  { %v1908_v25 = vmul.f32 -1.442695, %v1182_v20  ;;  %v2051_v61 = vpop.eup %2050  ;;  %v1640_v57 = vadd.f32 %v2047_v7, %v1639_v21 }
 0x252   :  { %v1326_v35 = vadd.f32 1.0, %v2051_v61 }
 0x253   :  { %2054 = vpow2.f32 %v1908_v25  ;;  %v1644_v4 = vsel %vm1643_vm15, %v2047_v7, %v1640_v57 }
 0x254   :  { %2056 = vrcp.f32 %v1326_v35  ;;  %v1649_v1 = vsel %vm1646_vm1, %v1648_v51, %v1644_v4  ;;  %v2053_v50 = vpop.eup %2052  ;;  %v1675_v52 = vand.u32 2147483647, %v1326_v35  ;;  %v1677_v53 = vand.u32 2147483648, %v1326_v35 }
 0x255   :  { %1837 = vst.msk [vmem:[%s2962_s5 + $0xa0] sm:$0xff] %vm1816_vm4, %v1649_v1  ;;  %v1652_v44 = vmul.f32 %v2053_v50, %v1325_v23  ;;  %vm1657_vm0 = vweird.f32 %v2053_v50  ;;  %vm1671_vm7 = vweird.f32 %v1326_v35 }
 0x256   :  { %v1184_v3 = vpop.f32.mrf.mxu2  ;;  %vm1658_vm3 = vmor %vm1656_vm2, %vm1657_vm0  ;;  %v1678_v56 = vor.u32 1.1754944e-38, %v1677_v53  ;;  %vm1676_vm9 = vcmp.eq.f32.partialorder %v1675_v52, 8.507059e+37 }
 0x257   :  { %v1185_v6 = vadd.f32 %v2865_v33, %v1184_v3  ;;  %v1653_v39 = vsub.f32 1.0, %v1652_v44 }
 0x259   :  { %v2055_v41 = vpop.eup %2054  ;;  %v1909_v45 = vmul.f32 -1.442695, %v1185_v6  ;;  %v1654_v36 = vmul.f32 %v2053_v50, %v1653_v39 }
 0x25a   :  { %v1327_v32 = vadd.f32 1.0, %v2055_v41  ;;  %v2057_v46 = vpop.eup %2056 }
 0x25b   :  { %2058 = vpow2.f32 %v1909_v45  ;;  %v1667_v48 = vmul.f32 %v2057_v46, %v1326_v35  ;;  %v1655_v40 = vadd.f32 %v2053_v50, %v1654_v36  ;;  %vm1672_vm6 = vweird.f32 %v2057_v46 }
 0x25c   :  { %2060 = vrcp.f32 %v1327_v32  ;;  %vm1673_vm8 = vmor %vm1671_vm7, %vm1672_vm6  ;;  %v1692_v63 = vand.u32 2147483648, %v1327_v32  ;;  %v1690_v7 = vand.u32 2147483647, %v1327_v32  ;;  %vm1686_vm11 = vweird.f32 %v1327_v32 }
 0x25d   :  { %v1668_v12 = vsub.f32 1.0, %v1667_v48  ;;  %v1659_v42 = vsel %vm1658_vm3, %v2053_v50, %v1655_v40 }
 0x25e   :  { %v1187_v34 = vpop.f32.mrf.mxu2  ;;  %v1664_v30 = vsel %vm1661_vm5, %v1663_v13, %v1659_v42  ;;  %v1693_v14 = vor.u32 1.1754944e-38, %v1692_v63  ;;  %vm1691_vm13 = vcmp.eq.f32.partialorder %v1690_v7, 8.507059e+37 }
 0x25f   :  { %v1188_v11 = vadd.f32 %v2865_v33, %v1187_v34  ;;  %v1669_v18 = vmul.f32 %v2057_v46, %v1668_v12  ;;  %1838 = vst.msk [vmem:[%s2962_s5 + $0xa8] sm:$0xff] %vm1816_vm4, %v1664_v30 }
 0x261   :  { %v2059_v55 = vpop.eup %2058  ;;  %v1910_v24 = vmul.f32 -1.442695, %v1188_v11  ;;  %v1670_v60 = vadd.f32 %v2057_v46, %v1669_v18 }
 0x262   :  { %v2061_v29 = vpop.eup %2060  ;;  %v1328_v58 = vadd.f32 1.0, %v2059_v55 }
 0x263   :  { %v1682_v62 = vmul.f32 %v2061_v29, %v1327_v32  ;;  %2062 = vpow2.f32 %v1910_v24  ;;  %v1674_v19 = vsel %vm1673_vm8, %v2057_v46, %v1670_v60  ;;  %vm1687_vm10 = vweird.f32 %v2061_v29 }
 0x264   :  { %2064 = vrcp.f32 %v1328_v58  ;;  %v1679_v59 = vsel %vm1676_vm9, %v1678_v56, %v1674_v19  ;;  %vm1688_vm12 = vmor %vm1686_vm11, %vm1687_vm10  ;;  %v1707_v22 = vand.u32 2147483648, %v1328_v58  ;;  %v1705_v10 = vand.u32 2147483647, %v1328_v58 }
 0x265   :  { %v1683_v49 = vsub.f32 1.0, %v1682_v62  ;;  %1839 = vst.msk [vmem:[%s2962_s5 + $0xb0] sm:$0xff] %vm1816_vm4, %v1679_v59  ;;  %vm1701_vm15 = vweird.f32 %v1328_v58 }
 0x266   :  { %v1190_v0 = vpop.f32.mrf.mxu2  ;;  %v1708_v25 = vor.u32 1.1754944e-38, %v1707_v22  ;;  %vm1706_vm0 = vcmp.eq.f32.partialorder %v1705_v10, 8.507059e+37 }
 0x267   :  { %v1684_v5 = vmul.f32 %v2061_v29, %v1683_v49  ;;  %v1191_v8 = vadd.f32 %v2865_v33, %v1190_v0 }
 0x269   :  { %v2063_v37 = vpop.eup %2062  ;;  %v1685_v9 = vadd.f32 %v2061_v29, %v1684_v5  ;;  %v1911_v38 = vmul.f32 -1.442695, %v1191_v8 }
 0x26a   :  { %v2065_v54 = vpop.eup %2064  ;;  %v1329_v15 = vadd.f32 1.0, %v2063_v37 }
 0x26b   :  { %v1689_v16 = vsel %vm1688_vm12, %v2061_v29, %v1685_v9  ;;  %v1697_v17 = vmul.f32 %v2065_v54, %v1328_v58  ;;  %2066 = vpow2.f32 %v1911_v38  ;;  %vm1702_vm14 = vweird.f32 %v2065_v54 }
 0x26c   :  { %v1694_v20 = vsel %vm1691_vm13, %v1693_v14, %v1689_v16  ;;  %2068 = vrcp.f32 %v1329_v15  ;;  %vm1703_vm1 = vmor %vm1701_vm15, %vm1702_vm14  ;;  %v1722_v35 = vand.u32 2147483648, %v1329_v15  ;;  %v1720_v4 = vand.u32 2147483647, %v1329_v15 }
 0x26d   :  { %1840 = vst.msk [vmem:[%s2962_s5 + $0xb8] sm:$0xff] %vm1816_vm4, %v1694_v20  ;;  %v1698_v33 = vsub.f32 1.0, %v1697_v17  ;;  %vm1716_vm3 = vweird.f32 %v1329_v15 }
 0x26e   :  { %v1723_v6 = vor.u32 1.1754944e-38, %v1722_v35  ;;  %vm1721_vm6 = vcmp.eq.f32.partialorder %v1720_v4, 8.507059e+37 }
 0x26f   :  { %v1699_v43 = vmul.f32 %v2065_v54, %v1698_v33 }
 0x271   :  { %v2067_v23 = vpop.eup %2066  ;;  %v1700_v26 = vadd.f32 %v2065_v54, %v1699_v43 }
 0x272   :  { %v2069_v27 = vpop.eup %2068  ;;  %v1330_v28 = vadd.f32 1.0, %v2067_v23 }
 0x273   :  { %v1704_v21 = vsel %vm1703_vm1, %v2065_v54, %v1700_v26  ;;  %v1712_v61 = vmul.f32 %v2069_v27, %v1329_v15  ;;  %vm1717_vm2 = vweird.f32 %v2069_v27 }
 0x274   :  { %v1709_v31 = vsel %vm1706_vm0, %v1708_v25, %v1704_v21  ;;  %2070 = vrcp.f32 %v1330_v28  ;;  %vm1718_vm5 = vmor %vm1716_vm3, %vm1717_vm2  ;;  %v1737_v32 = vand.u32 2147483648, %v1330_v28  ;;  %v1735_v46 = vand.u32 2147483647, %v1330_v28 }
 0x275   :  { %1841 = vst.msk [vmem:[%s2962_s5 + $0xc0] sm:$0xff] %vm1816_vm4, %v1709_v31  ;;  %v1713_v57 = vsub.f32 1.0, %v1712_v61  ;;  %vm1731_vm8 = vweird.f32 %v1330_v28 }
 0x276   :  { %v1738_v2 = vor.u32 1.1754944e-38, %v1737_v32  ;;  %vm1736_vm10 = vcmp.eq.f32.partialorder %v1735_v46, 8.507059e+37 }
 0x277   :  { %v1714_v51 = vmul.f32 %v2069_v27, %v1713_v57 }
 0x279   :  { %v1715_v3 = vadd.f32 %v2069_v27, %v1714_v51 }
 0x27a   :  { %v2071_v1 = vpop.eup %2070 }
 0x27b   :  { %v1719_v50 = vsel %vm1718_vm5, %v2069_v27, %v1715_v3  ;;  %v1727_v41 = vmul.f32 %v2071_v1, %v1330_v28  ;;  %vm1732_vm7 = vweird.f32 %v2071_v1 }
 0x27c   :  { %v1724_v44 = vsel %vm1721_vm6, %v1723_v6, %v1719_v50  ;;  %vm1733_vm9 = vmor %vm1731_vm8, %vm1732_vm7 }
 0x27d   :  { %1842 = vst.msk [vmem:[%s2962_s5 + $0xc8] sm:$0xff] %vm1816_vm4, %v1724_v44  ;;  %v1728_v45 = vsub.f32 1.0, %v1727_v41 }
 0x27f   :  { %v1729_v39 = vmul.f32 %v2071_v1, %v1728_v45 }
 0x281   :  { %v1730_v47 = vadd.f32 %v2071_v1, %v1729_v39 }
 0x283   :  { %v1734_v36 = vsel %vm1733_vm9, %v2071_v1, %v1730_v47 }
 0x284   :  { %v1739_v48 = vsel %vm1736_vm10, %v1738_v2, %v1734_v36 }
 0x285   :  { %1843 = vst.msk [vmem:[%s2962_s5 + $0xd0] sm:$0xff] %vm1816_vm4, %v1739_v48 }

// kernel: gcn_lpa_forward.7
= control target key start
LH: loop header
LB: loop body
LE: loop exit
PB: predicated region body
PF: predicated region fallthrough
CT: control target
= control target key end

     0   :  { %v1043_v0 = vmov 0   ;;  %vm18_vm0 = vcmask 64512   ;;  %s1612_s1 = inlined_call_operand.vmem [shape: f32[256,1], index: 1, kind: input, shape index: {}]   ;;  %s1613_s2 = inlined_call_operand.vmem [shape: f32[256,8], index: 2, kind: input, shape index: {}]   ;;  %s1614_s0 = inlined_call_operand.vmem [shape: bf16[256,256], index: 0, kind: input, shape index: {}]   ;;  %s1615_s3 = inlined_call_operand.vmem [shape: f32[256,8], index: 3, kind: output, shape index: {}]  }
   0x1   :  { %1042 = vset.pattern.permute.xlu2 %v1043_v0  ;;  %1041 = vset.pattern.permute.xlu1 %v1043_v0  ;;  %v101_v1 = vld [vmem:[%s1612_s1 + $0x90] sm:$0xff]  ;;  %v99_v2 = vld [vmem:[%s1612_s1 + $0x80] sm:$0xff]  ;;  %v102_v7 = vld [vmem:[%s1612_s1 + $0x98] sm:$0xff] }
   0x2   :  { %v83_v3 = vld [vmem:[%s1612_s1] sm:$0xff]  ;;  %1040 = vset.pattern.permute.xlu0 %v1043_v0  ;;  %v133_v4 = vpack.c.bf16 %v101_v1, %v101_v1  ;;  %v131_v5 = vpack.c.bf16 %v99_v2, %v99_v2  ;;  %v100_v8 = vld [vmem:[%s1612_s1 + $0x88] sm:$0xff]  ;;  %v134_v10 = vpack.c.bf16 %v102_v7, %v102_v7  ;;  %v85_v14 = vld [vmem:[%s1612_s1 + $0x10] sm:$0xff] }
   0x3   :  { %v115_v6 = vpack.c.bf16 %v83_v3, %v83_v3  ;;  %v84_v9 = vld [vmem:[%s1612_s1 + $0x8] sm:$0xff]  ;;  %v132_v11 = vpack.c.bf16 %v100_v8, %v100_v8  ;;  %v103_v13 = vld [vmem:[%s1612_s1 + $0xa0] sm:$0xff]  ;;  %v86_v15 = vld [vmem:[%s1612_s1 + $0x18] sm:$0xff]  ;;  %v117_v17 = vpack.c.bf16 %v85_v14, %v85_v14 }
   0x4   :  { %311 = vperm.xlu2 %1042, %v133_v4   ;;  %293 = vperm.xlu0 %1040, %v131_v5   ;;  %v116_v12 = vpack.c.bf16 %v84_v9, %v84_v9  ;;  %v135_v16 = vpack.c.bf16 %v103_v13, %v103_v13  ;;  %v118_v18 = vpack.c.bf16 %v86_v15, %v86_v15  ;;  %v88_v19 = vld [vmem:[%s1612_s1 + $0x28] sm:$0xff]  ;;  %v87_v21 = vld [vmem:[%s1612_s1 + $0x20] sm:$0xff]  ;;  %v89_v25 = vld [vmem:[%s1612_s1 + $0x30] sm:$0xff] }
   0x5   :  { %149 = vperm.xlu1 %1041, %v115_v6   ;;  %v104_v20 = vld [vmem:[%s1612_s1 + $0xa8] sm:$0xff]  ;;  %v120_v22 = vpack.c.bf16 %v88_v19, %v88_v19  ;;  %v119_v24 = vpack.c.bf16 %v87_v21, %v87_v21  ;;  %v105_v26 = vld [vmem:[%s1612_s1 + $0xb0] sm:$0xff]  ;;  %v106_v27 = vld [vmem:[%s1612_s1 + $0xb8] sm:$0xff]  ;;  %v121_v28 = vpack.c.bf16 %v89_v25, %v89_v25 }
   0x6   :  { %v136_v23 = vpack.c.bf16 %v104_v20, %v104_v20  ;;  %v137_v29 = vpack.c.bf16 %v105_v26, %v105_v26  ;;  %v138_v30 = vpack.c.bf16 %v106_v27, %v106_v27  ;;  %v108_v31 = vld [vmem:[%s1612_s1 + $0xc8] sm:$0xff]  ;;  %v90_v32 = vld [vmem:[%s1612_s1 + $0x38] sm:$0xff]  ;;  %v107_v33 = vld [vmem:[%s1612_s1 + $0xc0] sm:$0xff] }
   0x7   :  { %v140_v34 = vpack.c.bf16 %v108_v31, %v108_v31  ;;  %v122_v35 = vpack.c.bf16 %v90_v32, %v90_v32  ;;  %v139_v36 = vpack.c.bf16 %v107_v33, %v107_v33  ;;  %v109_v37 = vld [vmem:[%s1612_s1 + $0xd0] sm:$0xff]  ;;  %v91_v38 = vld [vmem:[%s1612_s1 + $0x40] sm:$0xff]  ;;  %v92_v39 = vld [vmem:[%s1612_s1 + $0x48] sm:$0xff] }
   0x8   :  { %v141_v40 = vpack.c.bf16 %v109_v37, %v109_v37  ;;  %v123_v41 = vpack.c.bf16 %v91_v38, %v91_v38  ;;  %v124_v42 = vpack.c.bf16 %v92_v39, %v92_v39  ;;  %v94_v43 = vld [vmem:[%s1612_s1 + $0x58] sm:$0xff]  ;;  %v93_v45 = vld [vmem:[%s1612_s1 + $0x50] sm:$0xff]  ;;  %v95_v49 = vld [vmem:[%s1612_s1 + $0x60] sm:$0xff] }
   0x9   :  { %v110_v44 = vld [vmem:[%s1612_s1 + $0xd8] sm:$0xff]  ;;  %v126_v46 = vpack.c.bf16 %v94_v43, %v94_v43  ;;  %v125_v48 = vpack.c.bf16 %v93_v45, %v93_v45  ;;  %v111_v50 = vld [vmem:[%s1612_s1 + $0xe0] sm:$0xff]  ;;  %v112_v51 = vld [vmem:[%s1612_s1 + $0xe8] sm:$0xff]  ;;  %v127_v52 = vpack.c.bf16 %v95_v49, %v95_v49  ;;  %v1044_v49 = vmov 839922192  }
   0xa   :  { %v142_v47 = vpack.c.bf16 %v110_v44, %v110_v44  ;;  %v143_v53 = vpack.c.bf16 %v111_v50, %v111_v50  ;;  %v144_v54 = vpack.c.bf16 %v112_v51, %v112_v51  ;;  %v114_v55 = vld [vmem:[%s1612_s1 + $0xf8] sm:$0xff]  ;;  %v96_v56 = vld [vmem:[%s1612_s1 + $0x68] sm:$0xff]  ;;  %v113_v57 = vld [vmem:[%s1612_s1 + $0xf0] sm:$0xff]  ;;  %v153_v50 = vunpack.c.l.s4 %v1044_v49 }
   0xb   :  { %v673_v58 = vld [vmem:[%s1613_s2 + $0x70] sm:$0xff]  ;;  %v674_v59 = vld [vmem:[%s1613_s2 + $0x78] sm:$0xff]  ;;  %v146_v63 = vpack.c.bf16 %v114_v55, %v114_v55  ;;  %v128_v0 = vpack.c.bf16 %v96_v56, %v96_v56  ;;  %v145_v2 = vpack.c.bf16 %v113_v57, %v113_v57  ;;  %v671_v3 = vld [vmem:[%s1613_s2 + $0x60] sm:$0xff] }
   0xc   :  { %320 = vperm.xlu2 %1042, %v134_v10   ;;  %302 = vperm.xlu0 %1040, %v132_v11   ;;  %v698_v60 = vpack.c.bf16 %v674_v59, %v673_v58  ;;  %v689_v61 = vld [vmem:[%s1613_s2 + $0xf0] sm:$0xff]  ;;  %v690_v62 = vld [vmem:[%s1613_s2 + $0xf8] sm:$0xff]  ;;  %v672_v4 = vld [vmem:[%s1613_s2 + $0x68] sm:$0xff] }
   0xd   :  { %158 = vperm.xlu1 %1041, %v116_v12   ;;  %v706_v1 = vpack.c.bf16 %v690_v62, %v689_v61  ;;  %v687_v5 = vld [vmem:[%s1613_s2 + $0xe0] sm:$0xff]  ;;  %v697_v6 = vpack.c.bf16 %v672_v4, %v671_v3  ;;  %v688_v7 = vld [vmem:[%s1613_s2 + $0xe8] sm:$0xff]  ;;  %v97_v9 = vld [vmem:[%s1612_s1 + $0x70] sm:$0xff] }
   0xe   :  { %707 = vmatpush.bf16.msra.mxu0 %v698_v60  ;;  %1021 = vmatpush.bf16.msra.mxu2 %v698_v60  ;;  %v705_v8 = vpack.c.bf16 %v688_v7, %v687_v5  ;;  %v98_v10 = vld [vmem:[%s1612_s1 + $0x78] sm:$0xff]  ;;  %v669_v11 = vld [vmem:[%s1613_s2 + $0x50] sm:$0xff]  ;;  %v667_v19 = vld [vmem:[%s1613_s2 + $0x40] sm:$0xff] }
   0xf   :  { %796 = vmatpush.bf16.msra.mxu1 %v706_v1  ;;  %1029 = vmatpush.bf16.msra.mxu3 %v706_v1  ;;  %v670_v12 = vld [vmem:[%s1613_s2 + $0x58] sm:$0xff]  ;;  %v685_v14 = vld [vmem:[%s1613_s2 + $0xd0] sm:$0xff]  ;;  %v668_v20 = vld [vmem:[%s1613_s2 + $0x48] sm:$0xff] }
  0x10   :  { %v696_v13 = vpack.c.bf16 %v670_v12, %v669_v11  ;;  %v686_v15 = vld [vmem:[%s1613_s2 + $0xd8] sm:$0xff]  ;;  %v683_v21 = vld [vmem:[%s1613_s2 + $0xc0] sm:$0xff]  ;;  %v665_v25 = vld [vmem:[%s1613_s2 + $0x30] sm:$0xff] }
  0x11   :  { %v666_v26 = vld [vmem:[%s1613_s2 + $0x38] sm:$0xff]  ;;  %v663_v31 = vld [vmem:[%s1613_s2 + $0x20] sm:$0xff]  ;;  %v664_v32 = vld [vmem:[%s1613_s2 + $0x28] sm:$0xff] }
  0x12   :  { %708 = vmatpush.bf16.msra.mxu0 %v697_v6  ;;  %1022 = vmatpush.bf16.msra.mxu2 %v697_v6  ;;  %v694_v27 = vpack.c.bf16 %v666_v26, %v665_v25  ;;  %v679_v33 = vld [vmem:[%s1613_s2 + $0xa0] sm:$0xff]  ;;  %v661_v37 = vld [vmem:[%s1613_s2 + $0x10] sm:$0xff]  ;;  %v662_v38 = vld [vmem:[%s1613_s2 + $0x18] sm:$0xff] }
  0x13   :  { %797 = vmatpush.bf16.msra.mxu1 %v705_v8  ;;  %1030 = vmatpush.bf16.msra.mxu3 %v705_v8  ;;  %v692_v39 = vpack.c.bf16 %v662_v38, %v661_v37  ;;  %v659_v43 = vld [vmem:[%s1613_s2] sm:$0xff]  ;;  %v660_v44 = vld [vmem:[%s1613_s2 + $0x8] sm:$0xff] }
  0x14   :  { %329 = vperm.xlu2 %1042, %v135_v16   ;;  %167 = vperm.xlu0 %1040, %v117_v17   ;;  %v129_v16 = vpack.c.bf16 %v97_v9, %v97_v9  ;;  %v704_v17 = vpack.c.bf16 %v686_v15, %v685_v14  ;;  %v675_v45 = vld [vmem:[%s1613_s2 + $0x80] sm:$0xff]  ;;  %v68_v59 = vld [vmem:[%s1614_s0 + $0x88] sm:$0xff] }
  0x15   :  { %176 = vperm.xlu1 %1041, %v118_v18   ;;  %v130_v18 = vpack.c.bf16 %v98_v10, %v98_v10  ;;  %v51_v56 = vld [vmem:[%s1614_s0] sm:$0xff]  ;;  %v52_v60 = vld [vmem:[%s1614_s0 + $0x8] sm:$0xff]  ;;  %v469_v4 = vunpack.c.l.bf16 %v68_v59  ;;  %v470_v5 = vunpack.c.h.bf16 %v68_v59 }
  0x16   :  { %709 = vmatpush.bf16.msra.mxu0 %v696_v13  ;;  %1023 = vmatpush.bf16.msra.mxu2 %v696_v13  ;;  %v437_v9 = vunpack.c.l.bf16 %v52_v60  ;;  %v438_v10 = vunpack.c.h.bf16 %v52_v60 }
  0x17   :  { %798 = vmatpush.bf16.msra.mxu1 %v704_v17  ;;  %1031 = vmatpush.bf16.msra.mxu3 %v704_v17 }
  0x1c   :  { %194 = vperm.xlu2 %1042, %v120_v22   ;;  %338 = vperm.xlu0 %1040, %v136_v23   ;;  %v695_v22 = vpack.c.bf16 %v668_v20, %v667_v19  ;;  %v684_v23 = vld [vmem:[%s1613_s2 + $0xc8] sm:$0xff] }
  0x1d   :  { %185 = vperm.xlu1 %1041, %v119_v24   ;;  %v703_v24 = vpack.c.bf16 %v684_v23, %v683_v21 }
  0x1e   :  { %710 = vmatpush.bf16.msra.mxu0 %v695_v22  ;;  %1024 = vmatpush.bf16.msra.mxu2 %v695_v22 }
  0x1f   :  { %799 = vmatpush.bf16.msra.mxu1 %v703_v24  ;;  %1032 = vmatpush.bf16.msra.mxu3 %v703_v24 }
  0x22   :  { %711 = vmatpush.bf16.msra.mxu0 %v694_v27  ;;  %1025 = vmatpush.bf16.msra.mxu2 %v694_v27 }
  0x24   :  { %203 = vperm.xlu2 %1042, %v121_v28   ;;  %347 = vperm.xlu0 %1040, %v137_v29   ;;  %v681_v28 = vld [vmem:[%s1613_s2 + $0xb0] sm:$0xff]  ;;  %v682_v29 = vld [vmem:[%s1613_s2 + $0xb8] sm:$0xff] }
  0x25   :  { %356 = vperm.xlu1 %1041, %v138_v30   ;;  %v702_v30 = vpack.c.bf16 %v682_v29, %v681_v28  ;;  %v69_v28 = vld [vmem:[%s1614_s0 + $0x90] sm:$0xff] }
  0x26   :  { %v472_v37 = vunpack.c.h.bf16 %v69_v28 }
  0x27   :  { %800 = vmatpush.bf16.msra.mxu1 %v702_v30  ;;  %1033 = vmatpush.bf16.msra.mxu3 %v702_v30  ;;  %v70_v30 = vld [vmem:[%s1614_s0 + $0x98] sm:$0xff] }
  0x28   :  { %v473_v38 = vunpack.c.l.bf16 %v70_v30 }
  0x2c   :  { %374 = vperm.xlu2 %1042, %v140_v34   ;;  %212 = vperm.xlu0 %1040, %v122_v35   ;;  %v693_v34 = vpack.c.bf16 %v664_v32, %v663_v31  ;;  %v680_v35 = vld [vmem:[%s1613_s2 + $0xa8] sm:$0xff]  ;;  %v53_v32 = vld [vmem:[%s1614_s0 + $0x10] sm:$0xff] }
  0x2d   :  { %365 = vperm.xlu1 %1041, %v139_v36   ;;  %v701_v36 = vpack.c.bf16 %v680_v35, %v679_v33  ;;  %v54_v35 = vld [vmem:[%s1614_s0 + $0x18] sm:$0xff] }
  0x2e   :  { %712 = vmatpush.bf16.msra.mxu0 %v693_v34  ;;  %1026 = vmatpush.bf16.msra.mxu2 %v693_v34 }
  0x2f   :  { %801 = vmatpush.bf16.msra.mxu1 %v701_v36  ;;  %1034 = vmatpush.bf16.msra.mxu3 %v701_v36  ;;  %v471_v36 = vunpack.c.l.bf16 %v69_v28 }
  0x32   :  { %713 = vmatpush.bf16.msra.mxu0 %v692_v39  ;;  %1027 = vmatpush.bf16.msra.mxu2 %v692_v39  ;;  %v474_v39 = vunpack.c.h.bf16 %v70_v30 }
  0x34   :  { %383 = vperm.xlu2 %1042, %v141_v40   ;;  %221 = vperm.xlu0 %1040, %v123_v41   ;;  %v677_v40 = vld [vmem:[%s1613_s2 + $0x90] sm:$0xff]  ;;  %v678_v41 = vld [vmem:[%s1613_s2 + $0x98] sm:$0xff] }
  0x35   :  { %230 = vperm.xlu1 %1041, %v124_v42   ;;  %v700_v42 = vpack.c.bf16 %v678_v41, %v677_v40 }
  0x37   :  { %802 = vmatpush.bf16.msra.mxu1 %v700_v42  ;;  %1035 = vmatpush.bf16.msra.mxu3 %v700_v42  ;;  %v439_v42 = vunpack.c.l.bf16 %v53_v32 }
  0x3c   :  { %248 = vperm.xlu2 %1042, %v126_v46   ;;  %392 = vperm.xlu0 %1040, %v142_v47   ;;  %v691_v46 = vpack.c.bf16 %v660_v44, %v659_v43  ;;  %v676_v47 = vld [vmem:[%s1613_s2 + $0x88] sm:$0xff]  ;;  %v440_v43 = vunpack.c.h.bf16 %v53_v32 }
  0x3d   :  { %239 = vperm.xlu1 %1041, %v125_v48   ;;  %v699_v48 = vpack.c.bf16 %v676_v47, %v675_v45  ;;  %v441_v45 = vunpack.c.l.bf16 %v54_v35 }
  0x3e   :  { %714 = vmatpush.bf16.msra.mxu0 %v691_v46  ;;  %1028 = vmatpush.bf16.msra.mxu2 %v691_v46  ;;  %v442_v46 = vunpack.c.h.bf16 %v54_v35 }
  0x3f   :  { %803 = vmatpush.bf16.msra.mxu1 %v699_v48  ;;  %1036 = vmatpush.bf16.msra.mxu3 %v699_v48 }
  0x44   :  { %257 = vperm.xlu2 %1042, %v127_v52   ;;  %401 = vperm.xlu0 %1040, %v143_v53   ;;  %v1258_v52 = vunpack.c.0.s8 %v153_v50 }
  0x45   :  { %410 = vperm.xlu1 %1041, %v144_v54   ;;  %v67_v54 = vld [vmem:[%s1614_s0 + $0x80] sm:$0xff] }
  0x46   :  { %v467_v61 = vunpack.c.l.bf16 %v67_v54  ;;  %v468_v62 = vunpack.c.h.bf16 %v67_v54 }
  0x4c   :  { %428 = vperm.xlu2 %1042, %v146_v63   ;;  %266 = vperm.xlu0 %1040, %v128_v0   ;;  %v435_v63 = vunpack.c.l.bf16 %v51_v56  ;;  %v436_v0 = vunpack.c.h.bf16 %v51_v56 }
  0x4d   :  { %419 = vperm.xlu1 %1041, %v145_v2  }
  0x54   :  { %275 = vperm.xlu0 %1040, %v129_v16  }
  0x55   :  { %284 = vperm.xlu1 %1041, %v130_v18  }
  0x5e   :  { %v312_v57 = vpop.permute.xlu2 %311 }
  0x5f   :  { %v317_v29 = vperm.slane %v312_v57, %v1258_v52 }
  0x61   :  { %v517_v40 = vunpack.c.l.bf16 %v317_v29 }
  0x63   :  { %v567_v48 = vmul.f32 %v517_v40, %v471_v36  ;;  %v568_v49 = vmul.f32 %v517_v40, %v472_v37  ;;  %v73_v36 = vld [vmem:[%s1614_s0 + $0xb0] sm:$0xff] }
  0x66   :  { %v321_v23 = vpop.permute.xlu2 %320 }
  0x67   :  { %v326_v31 = vperm.slane %v321_v23, %v1258_v52 }
  0x69   :  { %v518_v41 = vunpack.c.l.bf16 %v326_v31 }
  0x6b   :  { %v569_v50 = vmul.f32 %v518_v41, %v473_v38 }
  0x6d   :  { %v613_v59 = vpack.c.bf16 %v569_v50, %v567_v48 }
  0x76   :  { %v294_v51 = vpop.permute.xlu0 %293 }
  0x77   :  { %v150_v53 = vpop.permute.xlu1 %149  ;;  %v299_v55 = vperm.slane %v294_v51, %v1258_v52  ;;  %v570_v51 = vmul.f32 %v518_v41, %v474_v39  ;;  %v74_v39 = vld [vmem:[%s1614_s0 + $0xb8] sm:$0xff] }
  0x78   :  { %v155_v58 = vperm.slane %v150_v53, %v1258_v52  ;;  %v330_v53 = vpop.permute.xlu2 %329  ;;  %v481_v48 = vunpack.c.l.bf16 %v74_v39 }
  0x79   :  { %v515_v2 = vunpack.c.l.bf16 %v299_v55  ;;  %v614_v60 = vpack.c.bf16 %v570_v51, %v568_v49  ;;  %v482_v49 = vunpack.c.h.bf16 %v74_v39 }
  0x7a   :  { %v499_v7 = vunpack.c.l.bf16 %v155_v58 }
  0x7b   :  { %v563_v13 = vmul.f32 %v515_v2, %v467_v61  ;;  %v564_v14 = vmul.f32 %v515_v2, %v468_v62 }
  0x7c   :  { %v531_v17 = vmul.f32 %v499_v7, %v435_v63  ;;  %v532_v18 = vmul.f32 %v499_v7, %v436_v0 }
  0x7e   :  { %v303_v1 = vpop.permute.xlu0 %302 }
  0x7f   :  { %v308_v3 = vperm.slane %v303_v1, %v1258_v52  ;;  %v159_v6 = vpop.permute.xlu1 %158  ;;  %v72_v1 = vld [vmem:[%s1614_s0 + $0xa8] sm:$0xff] }
  0x80   :  { %v164_v8 = vperm.slane %v159_v6, %v1258_v52  ;;  %v71_v6 = vld [vmem:[%s1614_s0 + $0xa0] sm:$0xff] }
  0x81   :  { %v516_v11 = vunpack.c.l.bf16 %v308_v3  ;;  %v335_v3 = vperm.slane %v330_v53, %v1258_v52 }
  0x82   :  { %v500_v12 = vunpack.c.l.bf16 %v164_v8  ;;  %v56_v8 = vld [vmem:[%s1614_s0 + $0x28] sm:$0xff] }
  0x83   :  { %v565_v15 = vmul.f32 %v516_v11, %v469_v4  ;;  %v566_v16 = vmul.f32 %v516_v11, %v470_v5  ;;  %v195_v4 = vpop.permute.xlu2 %194  ;;  %v55_v5 = vld [vmem:[%s1614_s0 + $0x20] sm:$0xff] }
  0x84   :  { %v533_v19 = vmul.f32 %v500_v12, %v437_v9  ;;  %v534_v20 = vmul.f32 %v500_v12, %v438_v10  ;;  %v200_v7 = vperm.slane %v195_v4, %v1258_v52  ;;  %v477_v9 = vunpack.c.l.bf16 %v72_v1 }
  0x85   :  { %v611_v21 = vpack.c.bf16 %v565_v15, %v563_v13  ;;  %v612_v22 = vpack.c.bf16 %v566_v16, %v564_v14  ;;  %v478_v10 = vunpack.c.h.bf16 %v72_v1  ;;  %v443_v13 = vunpack.c.l.bf16 %v55_v5 }
  0x86   :  { %v595_v24 = vpack.c.bf16 %v533_v19, %v531_v17  ;;  %v596_v25 = vpack.c.bf16 %v534_v20, %v532_v18  ;;  %v168_v26 = vpop.permute.xlu0 %167  ;;  %v444_v14 = vunpack.c.h.bf16 %v55_v5  ;;  %v475_v16 = vunpack.c.l.bf16 %v71_v6 }
  0x87   :  { %v177_v27 = vpop.permute.xlu1 %176  ;;  %755 = vmatmul.bf16.vlgmr.msra.gmra.mxu2 %v611_v21  ;;  %844 = vmatmul.bf16.vlgmr.msra.gmra.mxu3 %v612_v22  ;;  %v173_v33 = vperm.slane %v168_v26, %v1258_v52  ;;  %v476_v17 = vunpack.c.h.bf16 %v71_v6  ;;  %v519_v18 = vunpack.c.l.bf16 %v335_v3  ;;  %v445_v19 = vunpack.c.l.bf16 %v56_v8 }
  0x88   :  { %715 = vmatmul.bf16.vlgmr.msra.gmra.mxu0 %v595_v24  ;;  %804 = vmatmul.bf16.vlgmr.msra.gmra.mxu1 %v596_v25  ;;  %v182_v34 = vperm.slane %v177_v27, %v1258_v52  ;;  %v446_v20 = vunpack.c.h.bf16 %v56_v8  ;;  %v504_v21 = vunpack.c.l.bf16 %v200_v7 }
  0x89   :  { %v501_v44 = vunpack.c.l.bf16 %v173_v33  ;;  %v571_v26 = vmul.f32 %v519_v18, %v475_v16  ;;  %v572_v27 = vmul.f32 %v519_v18, %v476_v17  ;;  %v60_v16 = vld [vmem:[%s1614_s0 + $0x48] sm:$0xff] }
  0x8a   :  { %v502_v47 = vunpack.c.l.bf16 %v182_v34  ;;  %v541_v29 = vmul.f32 %v504_v21, %v445_v19  ;;  %v542_v30 = vmul.f32 %v504_v21, %v446_v20  ;;  %v76_v17 = vld [vmem:[%s1614_s0 + $0xc8] sm:$0xff] }
  0x8b   :  { %v535_v54 = vmul.f32 %v501_v44, %v439_v42  ;;  %v536_v55 = vmul.f32 %v501_v44, %v440_v43  ;;  %v204_v41 = vpop.permute.xlu2 %203  ;;  %v58_v42 = vld [vmem:[%s1614_s0 + $0x38] sm:$0xff]  ;;  %v479_v44 = vunpack.c.l.bf16 %v73_v36 }
  0x8c   :  { %v537_v56 = vmul.f32 %v502_v47, %v441_v45  ;;  %v538_v57 = vmul.f32 %v502_v47, %v442_v46  ;;  %v209_v43 = vperm.slane %v204_v41, %v1258_v52  ;;  %v480_v45 = vunpack.c.h.bf16 %v73_v36  ;;  %v57_v46 = vld [vmem:[%s1614_s0 + $0x30] sm:$0xff] }
  0x8d   :  { %v449_v53 = vunpack.c.l.bf16 %v58_v42 }
  0x8e   :  { %v339_v58 = vpop.permute.xlu0 %338  ;;  %v597_v61 = vpack.c.bf16 %v537_v56, %v535_v54  ;;  %v598_v62 = vpack.c.bf16 %v538_v57, %v536_v55  ;;  %v450_v54 = vunpack.c.h.bf16 %v58_v42  ;;  %v447_v56 = vunpack.c.l.bf16 %v57_v46 }
  0x8f   :  { %v186_v63 = vpop.permute.xlu1 %185  ;;  %v344_v0 = vperm.slane %v339_v58, %v1258_v52  ;;  %v448_v57 = vunpack.c.h.bf16 %v57_v46  ;;  %v505_v58 = vunpack.c.l.bf16 %v209_v43 }
  0x90   :  { %v191_v2 = vperm.slane %v186_v63, %v1258_v52 }
  0x91   :  { %v520_v11 = vunpack.c.l.bf16 %v344_v0  ;;  %v543_v1 = vmul.f32 %v505_v58, %v447_v56 }
  0x92   :  { %v503_v15 = vunpack.c.l.bf16 %v191_v2  ;;  %v544_v2 = vmul.f32 %v505_v58, %v448_v57 }
  0x93   :  { %v573_v22 = vmul.f32 %v520_v11, %v477_v9  ;;  %v574_v23 = vmul.f32 %v520_v11, %v478_v10  ;;  %v375_v3 = vpop.permute.xlu2 %374  ;;  %v75_v10 = vld [vmem:[%s1614_s0 + $0xc0] sm:$0xff] }
  0x94   :  { %v539_v24 = vmul.f32 %v503_v15, %v443_v13  ;;  %v540_v25 = vmul.f32 %v503_v15, %v444_v14  ;;  %v380_v15 = vperm.slane %v375_v3, %v1258_v52  ;;  %v483_v18 = vunpack.c.l.bf16 %v75_v10 }
  0x95   :  { %v615_v31 = vpack.c.bf16 %v573_v22, %v571_v26  ;;  %v616_v32 = vpack.c.bf16 %v574_v23, %v572_v27  ;;  %v484_v19 = vunpack.c.h.bf16 %v75_v10  ;;  %v485_v27 = vunpack.c.l.bf16 %v76_v17 }
  0x96   :  { %v348_v12 = vpop.permute.xlu0 %347  ;;  %v599_v33 = vpack.c.bf16 %v541_v29, %v539_v24  ;;  %v600_v34 = vpack.c.bf16 %v542_v30, %v540_v25  ;;  %v453_v24 = vunpack.c.l.bf16 %v60_v16  ;;  %v454_v25 = vunpack.c.h.bf16 %v60_v16 }
  0x97   :  { %760 = vmatmul.bf16.gmra.mxu2 %v613_v59  ;;  %849 = vmatmul.bf16.gmra.mxu3 %v614_v60  ;;  %v357_v28 = vpop.permute.xlu1 %356  ;;  %v353_v37 = vperm.slane %v348_v12, %v1258_v52  ;;  %v59_v12 = vld [vmem:[%s1614_s0 + $0x40] sm:$0xff]  ;;  %v524_v29 = vunpack.c.l.bf16 %v380_v15 }
  0x98   :  { %720 = vmatmul.bf16.gmra.mxu0 %v597_v61  ;;  %809 = vmatmul.bf16.gmra.mxu1 %v598_v62  ;;  %v362_v38 = vperm.slane %v357_v28, %v1258_v52  ;;  %v451_v21 = vunpack.c.l.bf16 %v59_v12  ;;  %v452_v22 = vunpack.c.h.bf16 %v59_v12  ;;  %v486_v28 = vunpack.c.h.bf16 %v76_v17 }
  0x99   :  { %v521_v47 = vunpack.c.l.bf16 %v353_v37  ;;  %v581_v37 = vmul.f32 %v524_v29, %v485_v27 }
  0x9a   :  { %v522_v50 = vunpack.c.l.bf16 %v362_v38  ;;  %v582_v38 = vmul.f32 %v524_v29, %v486_v28  ;;  %v63_v28 = vld [vmem:[%s1614_s0 + $0x60] sm:$0xff] }
  0x9b   :  { %v575_v59 = vmul.f32 %v521_v47, %v479_v44  ;;  %v576_v60 = vmul.f32 %v521_v47, %v480_v45  ;;  %v384_v30 = vpop.permute.xlu2 %383  ;;  %v78_v47 = vld [vmem:[%s1614_s0 + $0xd8] sm:$0xff] }
  0x9c   :  { %v577_v61 = vmul.f32 %v522_v50, %v481_v48  ;;  %v578_v62 = vmul.f32 %v522_v50, %v482_v49  ;;  %v389_v49 = vperm.slane %v384_v30, %v1258_v52  ;;  %v61_v50 = vld [vmem:[%s1614_s0 + $0x50] sm:$0xff]  ;;  %v490_v56 = vunpack.c.h.bf16 %v78_v47 }
  0x9e   :  { %v213_v35 = vpop.permute.xlu0 %212  ;;  %v617_v4 = vpack.c.bf16 %v577_v61, %v575_v59  ;;  %v618_v5 = vpack.c.bf16 %v578_v62, %v576_v60  ;;  %v455_v59 = vunpack.c.l.bf16 %v61_v50  ;;  %v456_v60 = vunpack.c.h.bf16 %v61_v50 }
  0x9f   :  { %v218_v40 = vperm.slane %v213_v35, %v1258_v52  ;;  %v366_v51 = vpop.permute.xlu1 %365 }
  0xa0   :  { %v371_v11 = vperm.slane %v366_v51, %v1258_v52  ;;  %v77_v51 = vld [vmem:[%s1614_s0 + $0xd0] sm:$0xff] }
  0xa1   :  { %v506_v55 = vunpack.c.l.bf16 %v218_v40  ;;  %v487_v62 = vunpack.c.l.bf16 %v77_v51 }
  0xa2   :  { %v523_v20 = vunpack.c.l.bf16 %v371_v11 }
  0xa3   :  { %v545_v63 = vmul.f32 %v506_v55, %v449_v53  ;;  %v546_v0 = vmul.f32 %v506_v55, %v450_v54  ;;  %v249_v45 = vpop.permute.xlu2 %248  ;;  %v62_v54 = vld [vmem:[%s1614_s0 + $0x58] sm:$0xff]  ;;  %v489_v55 = vunpack.c.l.bf16 %v78_v47 }
  0xa4   :  { %v254_v53 = vperm.slane %v249_v45, %v1258_v52 }
  0xa5   :  { %v601_v6 = vpack.c.bf16 %v545_v63, %v543_v1  ;;  %v602_v7 = vpack.c.bf16 %v546_v0, %v544_v2  ;;  %v488_v63 = vunpack.c.h.bf16 %v77_v51  ;;  %v525_v0 = vunpack.c.l.bf16 %v389_v49 }
  0xa6   :  { %v222_v8 = vpop.permute.xlu0 %221  ;;  %v457_v1 = vunpack.c.l.bf16 %v62_v54  ;;  %v458_v2 = vunpack.c.h.bf16 %v62_v54  ;;  %v510_v3 = vunpack.c.l.bf16 %v254_v53 }
  0xa7   :  { %765 = vmatmul.bf16.gmra.mxu2 %v615_v31  ;;  %854 = vmatmul.bf16.gmra.mxu3 %v616_v32  ;;  %v231_v9 = vpop.permute.xlu1 %230  ;;  %v227_v13 = vperm.slane %v222_v8, %v1258_v52  ;;  %v579_v31 = vmul.f32 %v523_v20, %v483_v18  ;;  %v580_v32 = vmul.f32 %v523_v20, %v484_v19  ;;  %v79_v19 = vld [vmem:[%s1614_s0 + $0xe0] sm:$0xff] }
  0xa8   :  { %725 = vmatmul.bf16.gmra.mxu0 %v599_v33  ;;  %814 = vmatmul.bf16.gmra.mxu1 %v600_v34  ;;  %v236_v14 = vperm.slane %v231_v9, %v1258_v52  ;;  %v583_v8 = vmul.f32 %v525_v0, %v487_v62  ;;  %v584_v9 = vmul.f32 %v525_v0, %v488_v63  ;;  %v492_v27 = vunpack.c.h.bf16 %v79_v19  ;;  %v66_v63 = vld [vmem:[%s1614_s0 + $0x78] sm:$0xff] }
  0xa9   :  { %v507_v23 = vunpack.c.l.bf16 %v227_v13  ;;  %v619_v40 = vpack.c.bf16 %v581_v37, %v579_v31  ;;  %v620_v41 = vpack.c.bf16 %v582_v38, %v580_v32  ;;  %v553_v11 = vmul.f32 %v510_v3, %v457_v1  ;;  %v82_v0 = vld [vmem:[%s1614_s0 + $0xf8] sm:$0xff] }
  0xaa   :  { %v508_v26 = vunpack.c.l.bf16 %v236_v14  ;;  %v554_v12 = vmul.f32 %v510_v3, %v458_v2  ;;  %v459_v37 = vunpack.c.l.bf16 %v63_v28  ;;  %v460_v38 = vunpack.c.h.bf16 %v63_v28 }
  0xab   :  { %v547_v33 = vmul.f32 %v507_v23, %v451_v21  ;;  %v548_v34 = vmul.f32 %v507_v23, %v452_v22  ;;  %v258_v18 = vpop.permute.xlu2 %257  ;;  %v80_v22 = vld [vmem:[%s1614_s0 + $0xe8] sm:$0xff] }
  0xac   :  { %v549_v35 = vmul.f32 %v508_v26, %v453_v24  ;;  %v550_v36 = vmul.f32 %v508_v26, %v454_v25  ;;  %v64_v24 = vld [vmem:[%s1614_s0 + $0x68] sm:$0xff]  ;;  %v263_v25 = vperm.slane %v258_v18, %v1258_v52  ;;  %v491_v26 = vunpack.c.l.bf16 %v79_v19 }
  0xad   :  { %v493_v30 = vunpack.c.l.bf16 %v80_v22  ;;  %v494_v31 = vunpack.c.h.bf16 %v80_v22 }
  0xae   :  { %v393_v39 = vpop.permute.xlu0 %392  ;;  %v603_v42 = vpack.c.bf16 %v549_v35, %v547_v33  ;;  %v604_v43 = vpack.c.bf16 %v550_v36, %v548_v34  ;;  %v461_v34 = vunpack.c.l.bf16 %v64_v24  ;;  %v462_v35 = vunpack.c.h.bf16 %v64_v24 }
  0xaf   :  { %v240_v44 = vpop.permute.xlu1 %239  ;;  %v398_v46 = vperm.slane %v393_v39, %v1258_v52  ;;  %v511_v39 = vunpack.c.l.bf16 %v263_v25 }
  0xb0   :  { %v245_v48 = vperm.slane %v240_v44, %v1258_v52 }
  0xb1   :  { %v526_v57 = vunpack.c.l.bf16 %v398_v46  ;;  %v555_v47 = vmul.f32 %v511_v39, %v459_v37 }
  0xb2   :  { %v509_v61 = vunpack.c.l.bf16 %v245_v48  ;;  %v556_v48 = vmul.f32 %v511_v39, %v460_v38 }
  0xb6   :  { %v402_v58 = vpop.permute.xlu0 %401 }
  0xb7   :  { %770 = vmatmul.bf16.gmra.mxu2 %v617_v4  ;;  %859 = vmatmul.bf16.gmra.mxu3 %v618_v5  ;;  %v585_v4 = vmul.f32 %v526_v57, %v489_v55  ;;  %v586_v5 = vmul.f32 %v526_v57, %v490_v56  ;;  %v411_v10 = vpop.permute.xlu1 %410  ;;  %v407_v20 = vperm.slane %v402_v58, %v1258_v52  ;;  %v429_v56 = vpop.permute.xlu2 %428  ;;  %v81_v57 = vld [vmem:[%s1614_s0 + $0xf0] sm:$0xff] }
  0xb8   :  { %730 = vmatmul.bf16.gmra.mxu0 %v601_v6  ;;  %819 = vmatmul.bf16.gmra.mxu1 %v602_v7  ;;  %v551_v6 = vmul.f32 %v509_v61, %v455_v59  ;;  %v552_v7 = vmul.f32 %v509_v61, %v456_v60  ;;  %v416_v21 = vperm.slane %v411_v10, %v1258_v52  ;;  %v65_v59 = vld [vmem:[%s1614_s0 + $0x70] sm:$0xff]  ;;  %v495_v1 = vunpack.c.l.bf16 %v81_v57 }
  0xb9   :  { %v621_v13 = vpack.c.bf16 %v585_v4, %v583_v8  ;;  %v622_v14 = vpack.c.bf16 %v586_v5, %v584_v9  ;;  %v527_v29 = vunpack.c.l.bf16 %v407_v20  ;;  %v434_v62 = vperm.slane %v429_v56, %v1258_v52 }
  0xba   :  { %v605_v15 = vpack.c.bf16 %v553_v11, %v551_v6  ;;  %v606_v16 = vpack.c.bf16 %v554_v12, %v552_v7  ;;  %v528_v32 = vunpack.c.l.bf16 %v416_v21  ;;  %v496_v2 = vunpack.c.h.bf16 %v81_v57 }
  0xbb   :  { %v463_v4 = vunpack.c.l.bf16 %v65_v59  ;;  %v464_v5 = vunpack.c.h.bf16 %v65_v59  ;;  %v465_v6 = vunpack.c.l.bf16 %v66_v63  ;;  %v466_v7 = vunpack.c.h.bf16 %v66_v63 }
  0xbc   :  { %v590_v44 = vmul.f32 %v528_v32, %v494_v31  ;;  %v497_v9 = vunpack.c.l.bf16 %v82_v0  ;;  %v498_v10 = vunpack.c.h.bf16 %v82_v0  ;;  %v530_v11 = vunpack.c.l.bf16 %v434_v62 }
  0xbe   :  { %v267_v17 = vpop.permute.xlu0 %266  ;;  %v593_v18 = vmul.f32 %v530_v11, %v497_v9  ;;  %v594_v19 = vmul.f32 %v530_v11, %v498_v10 }
  0xbf   :  { %v272_v23 = vperm.slane %v267_v17, %v1258_v52  ;;  %v420_v33 = vpop.permute.xlu1 %419 }
  0xc0   :  { %v425_v58 = vperm.slane %v420_v33, %v1258_v52 }
  0xc1   :  { %v512_v36 = vunpack.c.l.bf16 %v272_v23 }
  0xc2   :  { %v529_v3 = vunpack.c.l.bf16 %v425_v58 }
  0xc3   :  { %v557_v45 = vmul.f32 %v512_v36, %v461_v34  ;;  %v558_v46 = vmul.f32 %v512_v36, %v462_v35 }
  0xc4   :  { %v591_v12 = vmul.f32 %v529_v3, %v495_v1 }
  0xc5   :  { %v607_v51 = vpack.c.bf16 %v557_v45, %v555_v47  ;;  %v608_v53 = vpack.c.bf16 %v558_v46, %v556_v48 }
  0xc6   :  { %v276_v54 = vpop.permute.xlu0 %275  ;;  %v625_v20 = vpack.c.bf16 %v593_v18, %v591_v12 }
  0xc7   :  { %775 = vmatmul.bf16.gmra.mxu2 %v619_v40  ;;  %864 = vmatmul.bf16.gmra.mxu3 %v620_v41  ;;  %v1045_v40 = vmov 0.0   ;;  %v587_v41 = vmul.f32 %v527_v29, %v491_v26  ;;  %v285_v55 = vpop.permute.xlu1 %284  ;;  %v281_v60 = vperm.slane %v276_v54, %v1258_v52 }
  0xc8   :  { %735 = vmatmul.bf16.gmra.mxu0 %v603_v42  ;;  %824 = vmatmul.bf16.gmra.mxu1 %v604_v43  ;;  %19 = vst.msk [vmem:[#allocation2] sm:$0xff] %vm18_vm0, %v1045_v40  ;;  %v588_v42 = vmul.f32 %v527_v29, %v492_v27  ;;  %v589_v43 = vmul.f32 %v528_v32, %v493_v30 }
  0xc9   :  { %20 = vst.msk [vmem:[#allocation2 + $0x8] sm:$0xff] %vm18_vm0, %v1045_v40  ;;  %v290_v61 = vperm.slane %v285_v55, %v1258_v52  ;;  %v513_v52 = vunpack.c.l.bf16 %v281_v60 }
  0xca   :  { %21 = vst.msk [vmem:[#allocation2 + $0x10] sm:$0xff] %vm18_vm0, %v1045_v40  ;;  %v623_v49 = vpack.c.bf16 %v589_v43, %v587_v41  ;;  %v624_v50 = vpack.c.bf16 %v590_v44, %v588_v42 }
  0xcb   :  { %22 = vst.msk [vmem:[#allocation2 + $0x18] sm:$0xff] %vm18_vm0, %v1045_v40  ;;  %v514_v8 = vunpack.c.l.bf16 %v290_v61 }
  0xcc   :  { %23 = vst.msk [vmem:[#allocation2 + $0x20] sm:$0xff] %vm18_vm0, %v1045_v40 }
  0xcd   :  { %24 = vst.msk [vmem:[#allocation2 + $0x28] sm:$0xff] %vm18_vm0, %v1045_v40  ;;  %v562_v17 = vmul.f32 %v514_v8, %v466_v7 }
  0xce   :  { %25 = vst.msk [vmem:[#allocation2 + $0x30] sm:$0xff] %vm18_vm0, %v1045_v40 }
  0xcf   :  { %26 = vst.msk [vmem:[#allocation2 + $0x38] sm:$0xff] %vm18_vm0, %v1045_v40  ;;  %v627_v25 = vld [vmem:[#allocation2] sm:$0xff] }
  0xd0   :  { %27 = vst.msk [vmem:[#allocation2 + $0x40] sm:$0xff] %vm18_vm0, %v1045_v40  ;;  %v628_v35 = vld [vmem:[#allocation2 + $0x8] sm:$0xff] }
  0xd1   :  { %28 = vst.msk [vmem:[#allocation2 + $0x48] sm:$0xff] %vm18_vm0, %v1045_v40  ;;  %v629_v46 = vld [vmem:[#allocation2 + $0x10] sm:$0xff] }
  0xd2   :  { %29 = vst.msk [vmem:[#allocation2 + $0x50] sm:$0xff] %vm18_vm0, %v1045_v40  ;;  %v630_v59 = vld [vmem:[#allocation2 + $0x18] sm:$0xff] }
  0xd3   :  { %30 = vst.msk [vmem:[#allocation2 + $0x58] sm:$0xff] %vm18_vm0, %v1045_v40 }
  0xd4   :  { %31 = vst.msk [vmem:[#allocation2 + $0x60] sm:$0xff] %vm18_vm0, %v1045_v40  ;;  %v632_v18 = vld [vmem:[#allocation2 + $0x28] sm:$0xff] }
  0xd5   :  { %32 = vst.msk [vmem:[#allocation2 + $0x68] sm:$0xff] %vm18_vm0, %v1045_v40 }
  0xd6   :  { %33 = vst.msk [vmem:[#allocation2 + $0x70] sm:$0xff] %vm18_vm0, %v1045_v40 }
  0xd7   :  { %780 = vmatmul.bf16.gmra.mxu2 %v621_v13  ;;  %869 = vmatmul.bf16.gmra.mxu3 %v622_v14  ;;  %34 = vst.msk [vmem:[#allocation2 + $0x78] sm:$0xff] %vm18_vm0, %v1045_v40  ;;  %v592_v13 = vmul.f32 %v529_v3, %v496_v2  ;;  %v559_v14 = vmul.f32 %v513_v52, %v463_v4 }
  0xd8   :  { %740 = vmatmul.bf16.gmra.mxu0 %v605_v15  ;;  %829 = vmatmul.bf16.gmra.mxu1 %v606_v16  ;;  %35 = vst.msk [vmem:[#allocation2 + $0x80] sm:$0xff] %vm18_vm0, %v1045_v40  ;;  %v560_v15 = vmul.f32 %v513_v52, %v464_v5  ;;  %v561_v16 = vmul.f32 %v514_v8, %v465_v6  ;;  %v631_v6 = vld [vmem:[#allocation2 + $0x20] sm:$0xff] }
  0xd9   :  { %36 = vst.msk [vmem:[#allocation2 + $0x88] sm:$0xff] %vm18_vm0, %v1045_v40  ;;  %v626_v21 = vpack.c.bf16 %v594_v19, %v592_v13 }
  0xda   :  { %37 = vst.msk [vmem:[#allocation2 + $0x90] sm:$0xff] %vm18_vm0, %v1045_v40  ;;  %v609_v22 = vpack.c.bf16 %v561_v16, %v559_v14  ;;  %v610_v23 = vpack.c.bf16 %v562_v17, %v560_v15 }
  0xdb   :  { %38 = vst.msk [vmem:[#allocation2 + $0x98] sm:$0xff] %vm18_vm0, %v1045_v40 }
  0xdc   :  { %39 = vst.msk [vmem:[#allocation2 + $0xa0] sm:$0xff] %vm18_vm0, %v1045_v40 }
  0xdd   :  { %40 = vst.msk [vmem:[#allocation2 + $0xa8] sm:$0xff] %vm18_vm0, %v1045_v40 }
  0xde   :  { %41 = vst.msk [vmem:[#allocation2 + $0xb0] sm:$0xff] %vm18_vm0, %v1045_v40 }
  0xdf   :  { %42 = vst.msk [vmem:[#allocation2 + $0xb8] sm:$0xff] %vm18_vm0, %v1045_v40  ;;  %v643_v30 = vld [vmem:[#allocation2 + $0x80] sm:$0xff] }
  0xe0   :  { %43 = vst.msk [vmem:[#allocation2 + $0xc0] sm:$0xff] %vm18_vm0, %v1045_v40  ;;  %v644_v41 = vld [vmem:[#allocation2 + $0x88] sm:$0xff] }
  0xe1   :  { %44 = vst.msk [vmem:[#allocation2 + $0xc8] sm:$0xff] %vm18_vm0, %v1045_v40  ;;  %v645_v54 = vld [vmem:[#allocation2 + $0x90] sm:$0xff] }
  0xe2   :  { %45 = vst.msk [vmem:[#allocation2 + $0xd0] sm:$0xff] %vm18_vm0, %v1045_v40  ;;  %v646_v2 = vld [vmem:[#allocation2 + $0x98] sm:$0xff] }
  0xe3   :  { %46 = vst.msk [vmem:[#allocation2 + $0xd8] sm:$0xff] %vm18_vm0, %v1045_v40  ;;  %v647_v13 = vld [vmem:[#allocation2 + $0xa0] sm:$0xff] }
  0xe4   :  { %47 = vst.msk [vmem:[#allocation2 + $0xe0] sm:$0xff] %vm18_vm0, %v1045_v40 }
  0xe5   :  { %48 = vst.msk [vmem:[#allocation2 + $0xe8] sm:$0xff] %vm18_vm0, %v1045_v40 }
  0xe6   :  { %49 = vst.msk [vmem:[#allocation2 + $0xf0] sm:$0xff] %vm18_vm0, %v1045_v40 }
  0xe7   :  { %785 = vmatmul.bf16.gmra.mxu2 %v623_v49  ;;  %874 = vmatmul.bf16.gmra.mxu3 %v624_v50  ;;  %50 = vst.msk [vmem:[#allocation2 + $0xf8] sm:$0xff] %vm18_vm0, %v1045_v40 }
  0xe8   :  { %745 = vmatmul.bf16.gmra.mxu0 %v607_v51  ;;  %834 = vmatmul.bf16.gmra.mxu1 %v608_v53 }
  0xf7   :  { %790 = vmatmul.bf16.gmra.mxu2 %v625_v20  ;;  %879 = vmatmul.bf16.gmra.mxu3 %v626_v21 }
  0xf8   :  { %750 = vmatmul.bf16.gmra.mxu0 %v609_v22  ;;  %839 = vmatmul.bf16.gmra.mxu1 %v610_v23 }
 0x105   :  { %v716_v24 = vpop.f32.mrf.mxu0  ;;  %v805_v26 = vpop.f32.mrf.mxu1 }
 0x106   :  { %v806_v27 = vadd.f32 %v805_v26, %v716_v24 }
 0x108   :  { %v885_v28 = vadd.f32 %v806_v27, %v627_v25  ;;  %v648_v25 = vld [vmem:[#allocation2 + $0xa8] sm:$0xff] }
 0x10a   :  { %918 = vst.msk [vmem:[#allocation2] sm:$0xff] %vm18_vm0, %v885_v28  ;;  %v756_v29 = vpop.f32.mrf.mxu2  ;;  %v845_v31 = vpop.f32.mrf.mxu3 }
 0x10b   :  { %v846_v32 = vadd.f32 %v845_v31, %v756_v29 }
 0x10d   :  { %v901_v33 = vadd.f32 %v846_v32, %v643_v30  ;;  %v718_v34 = vpop.f32.mrf.mxu0  ;;  %v807_v36 = vpop.f32.mrf.mxu1  ;;  %v633_v30 = vld [vmem:[#allocation2 + $0x30] sm:$0xff] }
 0x10e   :  { %v808_v37 = vadd.f32 %v807_v36, %v718_v34 }
 0x10f   :  { %934 = vst.msk [vmem:[#allocation2 + $0x80] sm:$0xff] %vm18_vm0, %v901_v33 }
 0x110   :  { %v886_v38 = vadd.f32 %v808_v37, %v628_v35  ;;  %v649_v37 = vld [vmem:[#allocation2 + $0xb0] sm:$0xff] }
 0x111   :  { %v953_v39 = vld [vmem:[#allocation2] sm:$0xff] }
 0x112   :  { %985 = vst.msk [vmem:[%s1615_s3] sm:$0xff] %vm18_vm0, %v953_v39  ;;  %v758_v40 = vpop.f32.mrf.mxu2  ;;  %v847_v42 = vpop.f32.mrf.mxu3 }
 0x113   :  { %919 = vst.msk [vmem:[#allocation2 + $0x8] sm:$0xff] %vm18_vm0, %v886_v38  ;;  %v848_v43 = vadd.f32 %v847_v42, %v758_v40  ;;  %v634_v42 = vld [vmem:[#allocation2 + $0x38] sm:$0xff] }
 0x115   :  { %v902_v44 = vadd.f32 %v848_v43, %v644_v41  ;;  %v721_v45 = vpop.f32.mrf.mxu0  ;;  %v810_v47 = vpop.f32.mrf.mxu1 }
 0x116   :  { %v969_v48 = vld [vmem:[#allocation2 + $0x80] sm:$0xff]  ;;  %v811_v49 = vadd.f32 %v810_v47, %v721_v45 }
 0x117   :  { %1001 = vst.msk [vmem:[%s1615_s3 + $0x80] sm:$0xff] %vm18_vm0, %v969_v48 }
 0x118   :  { %935 = vst.msk [vmem:[#allocation2 + $0x88] sm:$0xff] %vm18_vm0, %v902_v44  ;;  %v887_v50 = vadd.f32 %v811_v49, %v629_v46  ;;  %v650_v49 = vld [vmem:[#allocation2 + $0xb8] sm:$0xff] }
 0x11a   :  { %v954_v51 = vld [vmem:[#allocation2 + $0x8] sm:$0xff]  ;;  %920 = vst.msk [vmem:[#allocation2 + $0x10] sm:$0xff] %vm18_vm0, %v887_v50  ;;  %v761_v53 = vpop.f32.mrf.mxu2  ;;  %v850_v55 = vpop.f32.mrf.mxu3 }
 0x11b   :  { %986 = vst.msk [vmem:[%s1615_s3 + $0x8] sm:$0xff] %vm18_vm0, %v954_v51  ;;  %v851_v56 = vadd.f32 %v850_v55, %v761_v53  ;;  %v635_v55 = vld [vmem:[#allocation2 + $0x40] sm:$0xff] }
 0x11d   :  { %v903_v57 = vadd.f32 %v851_v56, %v645_v54  ;;  %v723_v58 = vpop.f32.mrf.mxu0  ;;  %v812_v60 = vpop.f32.mrf.mxu1 }
 0x11e   :  { %v813_v61 = vadd.f32 %v812_v60, %v723_v58 }
 0x11f   :  { %v970_v62 = vld [vmem:[#allocation2 + $0x88] sm:$0xff]  ;;  %936 = vst.msk [vmem:[#allocation2 + $0x90] sm:$0xff] %vm18_vm0, %v903_v57 }
 0x120   :  { %1002 = vst.msk [vmem:[%s1615_s3 + $0x88] sm:$0xff] %vm18_vm0, %v970_v62  ;;  %v888_v63 = vadd.f32 %v813_v61, %v630_v59  ;;  %v651_v62 = vld [vmem:[#allocation2 + $0xc0] sm:$0xff] }
 0x121   :  { %v955_v0 = vld [vmem:[#allocation2 + $0x10] sm:$0xff] }
 0x122   :  { %987 = vst.msk [vmem:[%s1615_s3 + $0x10] sm:$0xff] %vm18_vm0, %v955_v0  ;;  %v763_v1 = vpop.f32.mrf.mxu2  ;;  %v852_v3 = vpop.f32.mrf.mxu3 }
 0x123   :  { %921 = vst.msk [vmem:[#allocation2 + $0x18] sm:$0xff] %vm18_vm0, %v888_v63  ;;  %v853_v4 = vadd.f32 %v852_v3, %v763_v1  ;;  %v636_v3 = vld [vmem:[#allocation2 + $0x48] sm:$0xff] }
 0x125   :  { %v904_v5 = vadd.f32 %v853_v4, %v646_v2  ;;  %v726_v52 = vpop.f32.mrf.mxu0  ;;  %v815_v7 = vpop.f32.mrf.mxu1 }
 0x126   :  { %v971_v8 = vld [vmem:[#allocation2 + $0x90] sm:$0xff]  ;;  %v816_v9 = vadd.f32 %v815_v7, %v726_v52 }
 0x127   :  { %1003 = vst.msk [vmem:[%s1615_s3 + $0x90] sm:$0xff] %vm18_vm0, %v971_v8 }
 0x128   :  { %937 = vst.msk [vmem:[#allocation2 + $0x98] sm:$0xff] %vm18_vm0, %v904_v5  ;;  %v889_v10 = vadd.f32 %v816_v9, %v631_v6  ;;  %v652_v9 = vld [vmem:[#allocation2 + $0xc8] sm:$0xff] }
 0x12a   :  { %v956_v11 = vld [vmem:[#allocation2 + $0x18] sm:$0xff]  ;;  %922 = vst.msk [vmem:[#allocation2 + $0x20] sm:$0xff] %vm18_vm0, %v889_v10  ;;  %v766_v12 = vpop.f32.mrf.mxu2  ;;  %v855_v14 = vpop.f32.mrf.mxu3 }
 0x12b   :  { %988 = vst.msk [vmem:[%s1615_s3 + $0x18] sm:$0xff] %vm18_vm0, %v956_v11  ;;  %v856_v15 = vadd.f32 %v855_v14, %v766_v12  ;;  %v637_v14 = vld [vmem:[#allocation2 + $0x50] sm:$0xff] }
 0x12d   :  { %v905_v16 = vadd.f32 %v856_v15, %v647_v13  ;;  %v728_v17 = vpop.f32.mrf.mxu0  ;;  %v817_v19 = vpop.f32.mrf.mxu1 }
 0x12e   :  { %v818_v20 = vadd.f32 %v817_v19, %v728_v17 }
 0x12f   :  { %v972_v21 = vld [vmem:[#allocation2 + $0x98] sm:$0xff]  ;;  %938 = vst.msk [vmem:[#allocation2 + $0xa0] sm:$0xff] %vm18_vm0, %v905_v16 }
 0x130   :  { %1004 = vst.msk [vmem:[%s1615_s3 + $0x98] sm:$0xff] %vm18_vm0, %v972_v21  ;;  %v890_v22 = vadd.f32 %v818_v20, %v632_v18  ;;  %v653_v21 = vld [vmem:[#allocation2 + $0xd0] sm:$0xff] }
 0x131   :  { %v957_v23 = vld [vmem:[#allocation2 + $0x20] sm:$0xff] }
 0x132   :  { %989 = vst.msk [vmem:[%s1615_s3 + $0x20] sm:$0xff] %vm18_vm0, %v957_v23  ;;  %v768_v24 = vpop.f32.mrf.mxu2  ;;  %v857_v26 = vpop.f32.mrf.mxu3 }
 0x133   :  { %923 = vst.msk [vmem:[#allocation2 + $0x28] sm:$0xff] %vm18_vm0, %v890_v22  ;;  %v858_v27 = vadd.f32 %v857_v26, %v768_v24  ;;  %v638_v26 = vld [vmem:[#allocation2 + $0x58] sm:$0xff] }
 0x135   :  { %v906_v28 = vadd.f32 %v858_v27, %v648_v25  ;;  %v731_v29 = vpop.f32.mrf.mxu0  ;;  %v820_v31 = vpop.f32.mrf.mxu1 }
 0x136   :  { %v973_v32 = vld [vmem:[#allocation2 + $0xa0] sm:$0xff]  ;;  %v821_v33 = vadd.f32 %v820_v31, %v731_v29 }
 0x137   :  { %1005 = vst.msk [vmem:[%s1615_s3 + $0xa0] sm:$0xff] %vm18_vm0, %v973_v32 }
 0x138   :  { %939 = vst.msk [vmem:[#allocation2 + $0xa8] sm:$0xff] %vm18_vm0, %v906_v28  ;;  %v891_v34 = vadd.f32 %v821_v33, %v633_v30  ;;  %v654_v33 = vld [vmem:[#allocation2 + $0xd8] sm:$0xff] }
 0x13a   :  { %v958_v35 = vld [vmem:[#allocation2 + $0x28] sm:$0xff]  ;;  %924 = vst.msk [vmem:[#allocation2 + $0x30] sm:$0xff] %vm18_vm0, %v891_v34  ;;  %v771_v36 = vpop.f32.mrf.mxu2  ;;  %v860_v38 = vpop.f32.mrf.mxu3 }
 0x13b   :  { %990 = vst.msk [vmem:[%s1615_s3 + $0x28] sm:$0xff] %vm18_vm0, %v958_v35  ;;  %v861_v39 = vadd.f32 %v860_v38, %v771_v36  ;;  %v639_v38 = vld [vmem:[#allocation2 + $0x60] sm:$0xff] }
 0x13d   :  { %v907_v40 = vadd.f32 %v861_v39, %v649_v37  ;;  %v733_v41 = vpop.f32.mrf.mxu0  ;;  %v822_v43 = vpop.f32.mrf.mxu1 }
 0x13e   :  { %v823_v44 = vadd.f32 %v822_v43, %v733_v41 }
 0x13f   :  { %v974_v45 = vld [vmem:[#allocation2 + $0xa8] sm:$0xff]  ;;  %940 = vst.msk [vmem:[#allocation2 + $0xb0] sm:$0xff] %vm18_vm0, %v907_v40 }
 0x140   :  { %1006 = vst.msk [vmem:[%s1615_s3 + $0xa8] sm:$0xff] %vm18_vm0, %v974_v45  ;;  %v892_v46 = vadd.f32 %v823_v44, %v634_v42  ;;  %v655_v45 = vld [vmem:[#allocation2 + $0xe0] sm:$0xff] }
 0x141   :  { %v959_v47 = vld [vmem:[#allocation2 + $0x30] sm:$0xff] }
 0x142   :  { %991 = vst.msk [vmem:[%s1615_s3 + $0x30] sm:$0xff] %vm18_vm0, %v959_v47  ;;  %v773_v48 = vpop.f32.mrf.mxu2  ;;  %v862_v50 = vpop.f32.mrf.mxu3 }
 0x143   :  { %925 = vst.msk [vmem:[#allocation2 + $0x38] sm:$0xff] %vm18_vm0, %v892_v46  ;;  %v863_v51 = vadd.f32 %v862_v50, %v773_v48  ;;  %v640_v50 = vld [vmem:[#allocation2 + $0x68] sm:$0xff] }
 0x145   :  { %v908_v53 = vadd.f32 %v863_v51, %v650_v49  ;;  %v736_v54 = vpop.f32.mrf.mxu0  ;;  %v825_v56 = vpop.f32.mrf.mxu1 }
 0x146   :  { %v975_v57 = vld [vmem:[#allocation2 + $0xb0] sm:$0xff]  ;;  %v826_v58 = vadd.f32 %v825_v56, %v736_v54 }
 0x147   :  { %1007 = vst.msk [vmem:[%s1615_s3 + $0xb0] sm:$0xff] %vm18_vm0, %v975_v57 }
 0x148   :  { %941 = vst.msk [vmem:[#allocation2 + $0xb8] sm:$0xff] %vm18_vm0, %v908_v53  ;;  %v893_v59 = vadd.f32 %v826_v58, %v635_v55  ;;  %v656_v58 = vld [vmem:[#allocation2 + $0xe8] sm:$0xff] }
 0x14a   :  { %v960_v60 = vld [vmem:[#allocation2 + $0x38] sm:$0xff]  ;;  %926 = vst.msk [vmem:[#allocation2 + $0x40] sm:$0xff] %vm18_vm0, %v893_v59  ;;  %v776_v61 = vpop.f32.mrf.mxu2  ;;  %v865_v63 = vpop.f32.mrf.mxu3 }
 0x14b   :  { %992 = vst.msk [vmem:[%s1615_s3 + $0x38] sm:$0xff] %vm18_vm0, %v960_v60  ;;  %v866_v0 = vadd.f32 %v865_v63, %v776_v61  ;;  %v641_v63 = vld [vmem:[#allocation2 + $0x70] sm:$0xff] }
 0x14d   :  { %v909_v1 = vadd.f32 %v866_v0, %v651_v62  ;;  %v738_v2 = vpop.f32.mrf.mxu0  ;;  %v827_v4 = vpop.f32.mrf.mxu1 }
 0x14e   :  { %v828_v5 = vadd.f32 %v827_v4, %v738_v2 }
 0x14f   :  { %v976_v52 = vld [vmem:[#allocation2 + $0xb8] sm:$0xff]  ;;  %942 = vst.msk [vmem:[#allocation2 + $0xc0] sm:$0xff] %vm18_vm0, %v909_v1 }
 0x150   :  { %1008 = vst.msk [vmem:[%s1615_s3 + $0xb8] sm:$0xff] %vm18_vm0, %v976_v52  ;;  %v894_v6 = vadd.f32 %v828_v5, %v636_v3  ;;  %v657_v52 = vld [vmem:[#allocation2 + $0xf0] sm:$0xff] }
 0x151   :  { %v961_v7 = vld [vmem:[#allocation2 + $0x40] sm:$0xff] }
 0x152   :  { %993 = vst.msk [vmem:[%s1615_s3 + $0x40] sm:$0xff] %vm18_vm0, %v961_v7  ;;  %v778_v8 = vpop.f32.mrf.mxu2  ;;  %v867_v10 = vpop.f32.mrf.mxu3 }
 0x153   :  { %927 = vst.msk [vmem:[#allocation2 + $0x48] sm:$0xff] %vm18_vm0, %v894_v6  ;;  %v868_v11 = vadd.f32 %v867_v10, %v778_v8  ;;  %v642_v10 = vld [vmem:[#allocation2 + $0x78] sm:$0xff] }
 0x155   :  { %v910_v12 = vadd.f32 %v868_v11, %v652_v9  ;;  %v741_v13 = vpop.f32.mrf.mxu0  ;;  %v830_v15 = vpop.f32.mrf.mxu1 }
 0x156   :  { %v977_v16 = vld [vmem:[#allocation2 + $0xc0] sm:$0xff]  ;;  %v831_v17 = vadd.f32 %v830_v15, %v741_v13 }
 0x157   :  { %1009 = vst.msk [vmem:[%s1615_s3 + $0xc0] sm:$0xff] %vm18_vm0, %v977_v16 }
 0x158   :  { %943 = vst.msk [vmem:[#allocation2 + $0xc8] sm:$0xff] %vm18_vm0, %v910_v12  ;;  %v895_v18 = vadd.f32 %v831_v17, %v637_v14  ;;  %v658_v17 = vld [vmem:[#allocation2 + $0xf8] sm:$0xff] }
 0x15a   :  { %v962_v19 = vld [vmem:[#allocation2 + $0x48] sm:$0xff]  ;;  %928 = vst.msk [vmem:[#allocation2 + $0x50] sm:$0xff] %vm18_vm0, %v895_v18  ;;  %v781_v20 = vpop.f32.mrf.mxu2  ;;  %v870_v22 = vpop.f32.mrf.mxu3 }
 0x15b   :  { %994 = vst.msk [vmem:[%s1615_s3 + $0x48] sm:$0xff] %vm18_vm0, %v962_v19  ;;  %v871_v23 = vadd.f32 %v870_v22, %v781_v20 }
 0x15d   :  { %v911_v24 = vadd.f32 %v871_v23, %v653_v21  ;;  %v743_v25 = vpop.f32.mrf.mxu0  ;;  %v832_v27 = vpop.f32.mrf.mxu1 }
 0x15e   :  { %v833_v28 = vadd.f32 %v832_v27, %v743_v25 }
 0x15f   :  { %v978_v29 = vld [vmem:[#allocation2 + $0xc8] sm:$0xff]  ;;  %944 = vst.msk [vmem:[#allocation2 + $0xd0] sm:$0xff] %vm18_vm0, %v911_v24 }
 0x160   :  { %1010 = vst.msk [vmem:[%s1615_s3 + $0xc8] sm:$0xff] %vm18_vm0, %v978_v29  ;;  %v896_v30 = vadd.f32 %v833_v28, %v638_v26 }
 0x161   :  { %v963_v31 = vld [vmem:[#allocation2 + $0x50] sm:$0xff] }
 0x162   :  { %995 = vst.msk [vmem:[%s1615_s3 + $0x50] sm:$0xff] %vm18_vm0, %v963_v31  ;;  %v783_v32 = vpop.f32.mrf.mxu2  ;;  %v872_v34 = vpop.f32.mrf.mxu3 }
 0x163   :  { %929 = vst.msk [vmem:[#allocation2 + $0x58] sm:$0xff] %vm18_vm0, %v896_v30  ;;  %v873_v35 = vadd.f32 %v872_v34, %v783_v32 }
 0x165   :  { %v912_v36 = vadd.f32 %v873_v35, %v654_v33  ;;  %v746_v37 = vpop.f32.mrf.mxu0  ;;  %v835_v39 = vpop.f32.mrf.mxu1 }
 0x166   :  { %v979_v40 = vld [vmem:[#allocation2 + $0xd0] sm:$0xff]  ;;  %v836_v41 = vadd.f32 %v835_v39, %v746_v37 }
 0x167   :  { %1011 = vst.msk [vmem:[%s1615_s3 + $0xd0] sm:$0xff] %vm18_vm0, %v979_v40 }
 0x168   :  { %945 = vst.msk [vmem:[#allocation2 + $0xd8] sm:$0xff] %vm18_vm0, %v912_v36  ;;  %v897_v42 = vadd.f32 %v836_v41, %v639_v38 }
 0x16a   :  { %v964_v43 = vld [vmem:[#allocation2 + $0x58] sm:$0xff]  ;;  %930 = vst.msk [vmem:[#allocation2 + $0x60] sm:$0xff] %vm18_vm0, %v897_v42  ;;  %v786_v44 = vpop.f32.mrf.mxu2  ;;  %v875_v46 = vpop.f32.mrf.mxu3 }
 0x16b   :  { %996 = vst.msk [vmem:[%s1615_s3 + $0x58] sm:$0xff] %vm18_vm0, %v964_v43  ;;  %v876_v47 = vadd.f32 %v875_v46, %v786_v44 }
 0x16d   :  { %v913_v48 = vadd.f32 %v876_v47, %v655_v45  ;;  %v748_v49 = vpop.f32.mrf.mxu0  ;;  %v837_v51 = vpop.f32.mrf.mxu1 }
 0x16e   :  { %v838_v53 = vadd.f32 %v837_v51, %v748_v49 }
 0x16f   :  { %v980_v54 = vld [vmem:[#allocation2 + $0xd8] sm:$0xff]  ;;  %946 = vst.msk [vmem:[#allocation2 + $0xe0] sm:$0xff] %vm18_vm0, %v913_v48 }
 0x170   :  { %1012 = vst.msk [vmem:[%s1615_s3 + $0xd8] sm:$0xff] %vm18_vm0, %v980_v54  ;;  %v898_v55 = vadd.f32 %v838_v53, %v640_v50 }
 0x171   :  { %v965_v56 = vld [vmem:[#allocation2 + $0x60] sm:$0xff] }
 0x172   :  { %997 = vst.msk [vmem:[%s1615_s3 + $0x60] sm:$0xff] %vm18_vm0, %v965_v56  ;;  %v788_v57 = vpop.f32.mrf.mxu2  ;;  %v877_v59 = vpop.f32.mrf.mxu3 }
 0x173   :  { %931 = vst.msk [vmem:[#allocation2 + $0x68] sm:$0xff] %vm18_vm0, %v898_v55  ;;  %v878_v60 = vadd.f32 %v877_v59, %v788_v57 }
 0x175   :  { %v914_v61 = vadd.f32 %v878_v60, %v656_v58  ;;  %v751_v62 = vpop.f32.mrf.mxu0  ;;  %v840_v0 = vpop.f32.mrf.mxu1 }
 0x176   :  { %v981_v1 = vld [vmem:[#allocation2 + $0xe0] sm:$0xff]  ;;  %v841_v2 = vadd.f32 %v840_v0, %v751_v62 }
 0x177   :  { %1013 = vst.msk [vmem:[%s1615_s3 + $0xe0] sm:$0xff] %vm18_vm0, %v981_v1 }
 0x178   :  { %947 = vst.msk [vmem:[#allocation2 + $0xe8] sm:$0xff] %vm18_vm0, %v914_v61  ;;  %v899_v3 = vadd.f32 %v841_v2, %v641_v63 }
 0x17a   :  { %v966_v4 = vld [vmem:[#allocation2 + $0x68] sm:$0xff]  ;;  %932 = vst.msk [vmem:[#allocation2 + $0x70] sm:$0xff] %vm18_vm0, %v899_v3  ;;  %v791_v5 = vpop.f32.mrf.mxu2  ;;  %v880_v6 = vpop.f32.mrf.mxu3 }
 0x17b   :  { %998 = vst.msk [vmem:[%s1615_s3 + $0x68] sm:$0xff] %vm18_vm0, %v966_v4  ;;  %v881_v7 = vadd.f32 %v880_v6, %v791_v5 }
 0x17d   :  { %v915_v8 = vadd.f32 %v881_v7, %v657_v52  ;;  %v753_v9 = vpop.f32.mrf.mxu0  ;;  %v842_v11 = vpop.f32.mrf.mxu1 }
 0x17e   :  { %v843_v12 = vadd.f32 %v842_v11, %v753_v9 }
 0x17f   :  { %v982_v13 = vld [vmem:[#allocation2 + $0xe8] sm:$0xff]  ;;  %948 = vst.msk [vmem:[#allocation2 + $0xf0] sm:$0xff] %vm18_vm0, %v915_v8 }
 0x180   :  { %1014 = vst.msk [vmem:[%s1615_s3 + $0xe8] sm:$0xff] %vm18_vm0, %v982_v13  ;;  %v900_v14 = vadd.f32 %v843_v12, %v642_v10 }
 0x181   :  { %v967_v15 = vld [vmem:[#allocation2 + $0x70] sm:$0xff] }
 0x182   :  { %999 = vst.msk [vmem:[%s1615_s3 + $0x70] sm:$0xff] %vm18_vm0, %v967_v15  ;;  %v793_v16 = vpop.f32.mrf.mxu2  ;;  %v882_v18 = vpop.f32.mrf.mxu3 }
 0x183   :  { %933 = vst.msk [vmem:[#allocation2 + $0x78] sm:$0xff] %vm18_vm0, %v900_v14  ;;  %v883_v19 = vadd.f32 %v882_v18, %v793_v16 }
 0x185   :  { %v916_v20 = vadd.f32 %v883_v19, %v658_v17 }
 0x186   :  { %v983_v21 = vld [vmem:[#allocation2 + $0xf0] sm:$0xff] }
 0x187   :  { %1015 = vst.msk [vmem:[%s1615_s3 + $0xf0] sm:$0xff] %vm18_vm0, %v983_v21 }
 0x188   :  { %949 = vst.msk [vmem:[#allocation2 + $0xf8] sm:$0xff] %vm18_vm0, %v916_v20 }
 0x18a   :  { %v968_v22 = vld [vmem:[#allocation2 + $0x78] sm:$0xff] }
 0x18b   :  { %1000 = vst.msk [vmem:[%s1615_s3 + $0x78] sm:$0xff] %vm18_vm0, %v968_v22 }
 0x18f   :  { %v984_v23 = vld [vmem:[#allocation2 + $0xf8] sm:$0xff] }
 0x190   :  { %1016 = vst.msk [vmem:[%s1615_s3 + $0xf8] sm:$0xff] %vm18_vm0, %v984_v23 }

// kernel: gcn_lpa_forward.9
= control target key start
LH: loop header
LB: loop body
LE: loop exit
PB: predicated region body
PF: predicated region fallthrough
CT: control target
= control target key end

     0   :  { %v1811_v0 = vmov 0   ;;  %vm18_vm0 = vcmask 64512   ;;  %s2886_s1 = inlined_call_operand.vmem [shape: f32[256,1], index: 1, kind: input, shape index: {}]   ;;  %s2887_s2 = inlined_call_operand.vmem [shape: f32[256,8], index: 2, kind: input, shape index: {}]   ;;  %s2888_s0 = inlined_call_operand.vmem [shape: bf16[256,256], index: 0, kind: input, shape index: {}]   ;;  %s2889_s3 = inlined_call_operand.vmem [shape: f32[256,8], index: 3, kind: output, shape index: {}]  }
   0x1   :  { %1682 = vset.pattern.permute.xlu2 %v1811_v0  ;;  %1681 = vset.pattern.permute.xlu1 %v1811_v0  ;;  %v101_v1 = vld [vmem:[%s2886_s1 + $0x90] sm:$0xff]  ;;  %v99_v2 = vld [vmem:[%s2886_s1 + $0x80] sm:$0xff]  ;;  %v102_v7 = vld [vmem:[%s2886_s1 + $0x98] sm:$0xff] }
   0x2   :  { %v83_v3 = vld [vmem:[%s2886_s1] sm:$0xff]  ;;  %1680 = vset.pattern.permute.xlu0 %v1811_v0  ;;  %v133_v4 = vpack.c.bf16 %v101_v1, %v101_v1  ;;  %v131_v5 = vpack.c.bf16 %v99_v2, %v99_v2  ;;  %v100_v8 = vld [vmem:[%s2886_s1 + $0x88] sm:$0xff]  ;;  %v134_v10 = vpack.c.bf16 %v102_v7, %v102_v7  ;;  %v85_v14 = vld [vmem:[%s2886_s1 + $0x10] sm:$0xff] }
   0x3   :  { %v115_v6 = vpack.c.bf16 %v83_v3, %v83_v3  ;;  %v84_v9 = vld [vmem:[%s2886_s1 + $0x8] sm:$0xff]  ;;  %v132_v11 = vpack.c.bf16 %v100_v8, %v100_v8  ;;  %v103_v13 = vld [vmem:[%s2886_s1 + $0xa0] sm:$0xff]  ;;  %v86_v15 = vld [vmem:[%s2886_s1 + $0x18] sm:$0xff]  ;;  %v117_v17 = vpack.c.bf16 %v85_v14, %v85_v14 }
   0x4   :  { %311 = vperm.xlu2 %1682, %v133_v4   ;;  %293 = vperm.xlu0 %1680, %v131_v5   ;;  %v116_v12 = vpack.c.bf16 %v84_v9, %v84_v9  ;;  %v135_v16 = vpack.c.bf16 %v103_v13, %v103_v13  ;;  %v118_v18 = vpack.c.bf16 %v86_v15, %v86_v15  ;;  %v88_v19 = vld [vmem:[%s2886_s1 + $0x28] sm:$0xff]  ;;  %v87_v21 = vld [vmem:[%s2886_s1 + $0x20] sm:$0xff]  ;;  %v89_v25 = vld [vmem:[%s2886_s1 + $0x30] sm:$0xff] }
   0x5   :  { %149 = vperm.xlu1 %1681, %v115_v6   ;;  %v104_v20 = vld [vmem:[%s2886_s1 + $0xa8] sm:$0xff]  ;;  %v120_v22 = vpack.c.bf16 %v88_v19, %v88_v19  ;;  %v119_v24 = vpack.c.bf16 %v87_v21, %v87_v21  ;;  %v105_v26 = vld [vmem:[%s2886_s1 + $0xb0] sm:$0xff]  ;;  %v106_v27 = vld [vmem:[%s2886_s1 + $0xb8] sm:$0xff]  ;;  %v121_v28 = vpack.c.bf16 %v89_v25, %v89_v25 }
   0x6   :  { %v136_v23 = vpack.c.bf16 %v104_v20, %v104_v20  ;;  %v137_v29 = vpack.c.bf16 %v105_v26, %v105_v26  ;;  %v138_v30 = vpack.c.bf16 %v106_v27, %v106_v27  ;;  %v108_v31 = vld [vmem:[%s2886_s1 + $0xc8] sm:$0xff]  ;;  %v90_v32 = vld [vmem:[%s2886_s1 + $0x38] sm:$0xff]  ;;  %v107_v33 = vld [vmem:[%s2886_s1 + $0xc0] sm:$0xff] }
   0x7   :  { %v140_v34 = vpack.c.bf16 %v108_v31, %v108_v31  ;;  %v122_v35 = vpack.c.bf16 %v90_v32, %v90_v32  ;;  %v139_v36 = vpack.c.bf16 %v107_v33, %v107_v33  ;;  %v109_v37 = vld [vmem:[%s2886_s1 + $0xd0] sm:$0xff]  ;;  %v91_v38 = vld [vmem:[%s2886_s1 + $0x40] sm:$0xff]  ;;  %v92_v39 = vld [vmem:[%s2886_s1 + $0x48] sm:$0xff] }
   0x8   :  { %v141_v40 = vpack.c.bf16 %v109_v37, %v109_v37  ;;  %v123_v41 = vpack.c.bf16 %v91_v38, %v91_v38  ;;  %v124_v42 = vpack.c.bf16 %v92_v39, %v92_v39  ;;  %v94_v43 = vld [vmem:[%s2886_s1 + $0x58] sm:$0xff]  ;;  %v93_v45 = vld [vmem:[%s2886_s1 + $0x50] sm:$0xff]  ;;  %v95_v49 = vld [vmem:[%s2886_s1 + $0x60] sm:$0xff] }
   0x9   :  { %v110_v44 = vld [vmem:[%s2886_s1 + $0xd8] sm:$0xff]  ;;  %v126_v46 = vpack.c.bf16 %v94_v43, %v94_v43  ;;  %v125_v48 = vpack.c.bf16 %v93_v45, %v93_v45  ;;  %v111_v50 = vld [vmem:[%s2886_s1 + $0xe0] sm:$0xff]  ;;  %v112_v51 = vld [vmem:[%s2886_s1 + $0xe8] sm:$0xff]  ;;  %v127_v52 = vpack.c.bf16 %v95_v49, %v95_v49  ;;  %v1812_v49 = vmov 839922192  }
   0xa   :  { %v142_v47 = vpack.c.bf16 %v110_v44, %v110_v44  ;;  %v143_v53 = vpack.c.bf16 %v111_v50, %v111_v50  ;;  %v144_v54 = vpack.c.bf16 %v112_v51, %v112_v51  ;;  %v114_v55 = vld [vmem:[%s2886_s1 + $0xf8] sm:$0xff]  ;;  %v96_v56 = vld [vmem:[%s2886_s1 + $0x68] sm:$0xff]  ;;  %v113_v57 = vld [vmem:[%s2886_s1 + $0xf0] sm:$0xff]  ;;  %v153_v50 = vunpack.c.l.s4 %v1812_v49 }
   0xb   :  { %v673_v58 = vld [vmem:[%s2887_s2 + $0x70] sm:$0xff]  ;;  %v674_v59 = vld [vmem:[%s2887_s2 + $0x78] sm:$0xff]  ;;  %v146_v63 = vpack.c.bf16 %v114_v55, %v114_v55  ;;  %v128_v0 = vpack.c.bf16 %v96_v56, %v96_v56  ;;  %v145_v2 = vpack.c.bf16 %v113_v57, %v113_v57  ;;  %v671_v3 = vld [vmem:[%s2887_s2 + $0x60] sm:$0xff] }
   0xc   :  { %320 = vperm.xlu2 %1682, %v134_v10   ;;  %302 = vperm.xlu0 %1680, %v132_v11   ;;  %v698_v60 = vpack.c.bf16 %v674_v59, %v673_v58  ;;  %v689_v61 = vld [vmem:[%s2887_s2 + $0xf0] sm:$0xff]  ;;  %v690_v62 = vld [vmem:[%s2887_s2 + $0xf8] sm:$0xff]  ;;  %v672_v4 = vld [vmem:[%s2887_s2 + $0x68] sm:$0xff] }
   0xd   :  { %158 = vperm.xlu1 %1681, %v116_v12   ;;  %v706_v1 = vpack.c.bf16 %v690_v62, %v689_v61  ;;  %v687_v5 = vld [vmem:[%s2887_s2 + $0xe0] sm:$0xff]  ;;  %v697_v6 = vpack.c.bf16 %v672_v4, %v671_v3  ;;  %v688_v7 = vld [vmem:[%s2887_s2 + $0xe8] sm:$0xff]  ;;  %v97_v9 = vld [vmem:[%s2886_s1 + $0x70] sm:$0xff] }
   0xe   :  { %707 = vmatpush.bf16.msra.mxu0 %v698_v60  ;;  %1661 = vmatpush.bf16.msra.mxu2 %v698_v60  ;;  %v705_v8 = vpack.c.bf16 %v688_v7, %v687_v5  ;;  %v98_v10 = vld [vmem:[%s2886_s1 + $0x78] sm:$0xff]  ;;  %v669_v11 = vld [vmem:[%s2887_s2 + $0x50] sm:$0xff]  ;;  %v667_v19 = vld [vmem:[%s2887_s2 + $0x40] sm:$0xff] }
   0xf   :  { %796 = vmatpush.bf16.msra.mxu1 %v706_v1  ;;  %1669 = vmatpush.bf16.msra.mxu3 %v706_v1  ;;  %v670_v12 = vld [vmem:[%s2887_s2 + $0x58] sm:$0xff]  ;;  %v685_v14 = vld [vmem:[%s2887_s2 + $0xd0] sm:$0xff]  ;;  %v668_v20 = vld [vmem:[%s2887_s2 + $0x48] sm:$0xff] }
  0x10   :  { %v696_v13 = vpack.c.bf16 %v670_v12, %v669_v11  ;;  %v686_v15 = vld [vmem:[%s2887_s2 + $0xd8] sm:$0xff]  ;;  %v683_v21 = vld [vmem:[%s2887_s2 + $0xc0] sm:$0xff]  ;;  %v665_v25 = vld [vmem:[%s2887_s2 + $0x30] sm:$0xff] }
  0x11   :  { %v666_v26 = vld [vmem:[%s2887_s2 + $0x38] sm:$0xff]  ;;  %v663_v31 = vld [vmem:[%s2887_s2 + $0x20] sm:$0xff]  ;;  %v664_v32 = vld [vmem:[%s2887_s2 + $0x28] sm:$0xff] }
  0x12   :  { %708 = vmatpush.bf16.msra.mxu0 %v697_v6  ;;  %1662 = vmatpush.bf16.msra.mxu2 %v697_v6  ;;  %v694_v27 = vpack.c.bf16 %v666_v26, %v665_v25  ;;  %v679_v33 = vld [vmem:[%s2887_s2 + $0xa0] sm:$0xff]  ;;  %v661_v37 = vld [vmem:[%s2887_s2 + $0x10] sm:$0xff]  ;;  %v662_v38 = vld [vmem:[%s2887_s2 + $0x18] sm:$0xff] }
  0x13   :  { %797 = vmatpush.bf16.msra.mxu1 %v705_v8  ;;  %1670 = vmatpush.bf16.msra.mxu3 %v705_v8  ;;  %v692_v39 = vpack.c.bf16 %v662_v38, %v661_v37  ;;  %v659_v43 = vld [vmem:[%s2887_s2] sm:$0xff]  ;;  %v660_v44 = vld [vmem:[%s2887_s2 + $0x8] sm:$0xff] }
  0x14   :  { %329 = vperm.xlu2 %1682, %v135_v16   ;;  %167 = vperm.xlu0 %1680, %v117_v17   ;;  %v129_v16 = vpack.c.bf16 %v97_v9, %v97_v9  ;;  %v704_v17 = vpack.c.bf16 %v686_v15, %v685_v14  ;;  %v675_v45 = vld [vmem:[%s2887_s2 + $0x80] sm:$0xff]  ;;  %v68_v59 = vld [vmem:[%s2888_s0 + $0x88] sm:$0xff] }
  0x15   :  { %176 = vperm.xlu1 %1681, %v118_v18   ;;  %v130_v18 = vpack.c.bf16 %v98_v10, %v98_v10  ;;  %v51_v56 = vld [vmem:[%s2888_s0] sm:$0xff]  ;;  %v52_v60 = vld [vmem:[%s2888_s0 + $0x8] sm:$0xff]  ;;  %v469_v4 = vunpack.c.l.bf16 %v68_v59  ;;  %v470_v5 = vunpack.c.h.bf16 %v68_v59 }
  0x16   :  { %709 = vmatpush.bf16.msra.mxu0 %v696_v13  ;;  %1663 = vmatpush.bf16.msra.mxu2 %v696_v13  ;;  %v437_v9 = vunpack.c.l.bf16 %v52_v60  ;;  %v438_v10 = vunpack.c.h.bf16 %v52_v60 }
  0x17   :  { %798 = vmatpush.bf16.msra.mxu1 %v704_v17  ;;  %1671 = vmatpush.bf16.msra.mxu3 %v704_v17 }
  0x1c   :  { %194 = vperm.xlu2 %1682, %v120_v22   ;;  %338 = vperm.xlu0 %1680, %v136_v23   ;;  %v695_v22 = vpack.c.bf16 %v668_v20, %v667_v19  ;;  %v684_v23 = vld [vmem:[%s2887_s2 + $0xc8] sm:$0xff] }
  0x1d   :  { %185 = vperm.xlu1 %1681, %v119_v24   ;;  %v703_v24 = vpack.c.bf16 %v684_v23, %v683_v21 }
  0x1e   :  { %710 = vmatpush.bf16.msra.mxu0 %v695_v22  ;;  %1664 = vmatpush.bf16.msra.mxu2 %v695_v22 }
  0x1f   :  { %799 = vmatpush.bf16.msra.mxu1 %v703_v24  ;;  %1672 = vmatpush.bf16.msra.mxu3 %v703_v24 }
  0x22   :  { %711 = vmatpush.bf16.msra.mxu0 %v694_v27  ;;  %1665 = vmatpush.bf16.msra.mxu2 %v694_v27 }
  0x24   :  { %203 = vperm.xlu2 %1682, %v121_v28   ;;  %347 = vperm.xlu0 %1680, %v137_v29   ;;  %v681_v28 = vld [vmem:[%s2887_s2 + $0xb0] sm:$0xff]  ;;  %v682_v29 = vld [vmem:[%s2887_s2 + $0xb8] sm:$0xff] }
  0x25   :  { %356 = vperm.xlu1 %1681, %v138_v30   ;;  %v702_v30 = vpack.c.bf16 %v682_v29, %v681_v28  ;;  %v69_v28 = vld [vmem:[%s2888_s0 + $0x90] sm:$0xff] }
  0x26   :  { %v472_v37 = vunpack.c.h.bf16 %v69_v28 }
  0x27   :  { %800 = vmatpush.bf16.msra.mxu1 %v702_v30  ;;  %1673 = vmatpush.bf16.msra.mxu3 %v702_v30  ;;  %v70_v30 = vld [vmem:[%s2888_s0 + $0x98] sm:$0xff] }
  0x28   :  { %v473_v38 = vunpack.c.l.bf16 %v70_v30 }
  0x2c   :  { %374 = vperm.xlu2 %1682, %v140_v34   ;;  %212 = vperm.xlu0 %1680, %v122_v35   ;;  %v693_v34 = vpack.c.bf16 %v664_v32, %v663_v31  ;;  %v680_v35 = vld [vmem:[%s2887_s2 + $0xa8] sm:$0xff]  ;;  %v53_v32 = vld [vmem:[%s2888_s0 + $0x10] sm:$0xff] }
  0x2d   :  { %365 = vperm.xlu1 %1681, %v139_v36   ;;  %v701_v36 = vpack.c.bf16 %v680_v35, %v679_v33  ;;  %v54_v35 = vld [vmem:[%s2888_s0 + $0x18] sm:$0xff] }
  0x2e   :  { %712 = vmatpush.bf16.msra.mxu0 %v693_v34  ;;  %1666 = vmatpush.bf16.msra.mxu2 %v693_v34 }
  0x2f   :  { %801 = vmatpush.bf16.msra.mxu1 %v701_v36  ;;  %1674 = vmatpush.bf16.msra.mxu3 %v701_v36  ;;  %v471_v36 = vunpack.c.l.bf16 %v69_v28 }
  0x32   :  { %713 = vmatpush.bf16.msra.mxu0 %v692_v39  ;;  %1667 = vmatpush.bf16.msra.mxu2 %v692_v39  ;;  %v474_v39 = vunpack.c.h.bf16 %v70_v30 }
  0x34   :  { %383 = vperm.xlu2 %1682, %v141_v40   ;;  %221 = vperm.xlu0 %1680, %v123_v41   ;;  %v677_v40 = vld [vmem:[%s2887_s2 + $0x90] sm:$0xff]  ;;  %v678_v41 = vld [vmem:[%s2887_s2 + $0x98] sm:$0xff] }
  0x35   :  { %230 = vperm.xlu1 %1681, %v124_v42   ;;  %v700_v42 = vpack.c.bf16 %v678_v41, %v677_v40 }
  0x37   :  { %802 = vmatpush.bf16.msra.mxu1 %v700_v42  ;;  %1675 = vmatpush.bf16.msra.mxu3 %v700_v42  ;;  %v439_v42 = vunpack.c.l.bf16 %v53_v32 }
  0x3c   :  { %248 = vperm.xlu2 %1682, %v126_v46   ;;  %392 = vperm.xlu0 %1680, %v142_v47   ;;  %v691_v46 = vpack.c.bf16 %v660_v44, %v659_v43  ;;  %v676_v47 = vld [vmem:[%s2887_s2 + $0x88] sm:$0xff]  ;;  %v440_v43 = vunpack.c.h.bf16 %v53_v32 }
  0x3d   :  { %239 = vperm.xlu1 %1681, %v125_v48   ;;  %v699_v48 = vpack.c.bf16 %v676_v47, %v675_v45  ;;  %v441_v45 = vunpack.c.l.bf16 %v54_v35 }
  0x3e   :  { %714 = vmatpush.bf16.msra.mxu0 %v691_v46  ;;  %1668 = vmatpush.bf16.msra.mxu2 %v691_v46  ;;  %v442_v46 = vunpack.c.h.bf16 %v54_v35 }
  0x3f   :  { %803 = vmatpush.bf16.msra.mxu1 %v699_v48  ;;  %1676 = vmatpush.bf16.msra.mxu3 %v699_v48 }
  0x44   :  { %257 = vperm.xlu2 %1682, %v127_v52   ;;  %401 = vperm.xlu0 %1680, %v143_v53   ;;  %v2026_v52 = vunpack.c.0.s8 %v153_v50 }
  0x45   :  { %410 = vperm.xlu1 %1681, %v144_v54   ;;  %v67_v54 = vld [vmem:[%s2888_s0 + $0x80] sm:$0xff] }
  0x46   :  { %v467_v61 = vunpack.c.l.bf16 %v67_v54  ;;  %v468_v62 = vunpack.c.h.bf16 %v67_v54 }
  0x4c   :  { %428 = vperm.xlu2 %1682, %v146_v63   ;;  %266 = vperm.xlu0 %1680, %v128_v0   ;;  %v435_v63 = vunpack.c.l.bf16 %v51_v56  ;;  %v436_v0 = vunpack.c.h.bf16 %v51_v56 }
  0x4d   :  { %419 = vperm.xlu1 %1681, %v145_v2  }
  0x54   :  { %275 = vperm.xlu0 %1680, %v129_v16  }
  0x55   :  { %284 = vperm.xlu1 %1681, %v130_v18  }
  0x5e   :  { %v312_v57 = vpop.permute.xlu2 %311 }
  0x5f   :  { %v317_v29 = vperm.slane %v312_v57, %v2026_v52 }
  0x61   :  { %v517_v40 = vunpack.c.l.bf16 %v317_v29 }
  0x63   :  { %v567_v48 = vmul.f32 %v517_v40, %v471_v36  ;;  %v568_v49 = vmul.f32 %v517_v40, %v472_v37  ;;  %v73_v36 = vld [vmem:[%s2888_s0 + $0xb0] sm:$0xff] }
  0x66   :  { %v321_v23 = vpop.permute.xlu2 %320 }
  0x67   :  { %v326_v31 = vperm.slane %v321_v23, %v2026_v52 }
  0x69   :  { %v518_v41 = vunpack.c.l.bf16 %v326_v31 }
  0x6b   :  { %v569_v50 = vmul.f32 %v518_v41, %v473_v38 }
  0x6d   :  { %v613_v59 = vpack.c.bf16 %v569_v50, %v567_v48 }
  0x76   :  { %v294_v51 = vpop.permute.xlu0 %293 }
  0x77   :  { %v150_v53 = vpop.permute.xlu1 %149  ;;  %v299_v55 = vperm.slane %v294_v51, %v2026_v52  ;;  %v570_v51 = vmul.f32 %v518_v41, %v474_v39  ;;  %v74_v39 = vld [vmem:[%s2888_s0 + $0xb8] sm:$0xff] }
  0x78   :  { %v155_v58 = vperm.slane %v150_v53, %v2026_v52  ;;  %v330_v53 = vpop.permute.xlu2 %329  ;;  %v481_v48 = vunpack.c.l.bf16 %v74_v39 }
  0x79   :  { %v515_v2 = vunpack.c.l.bf16 %v299_v55  ;;  %v614_v60 = vpack.c.bf16 %v570_v51, %v568_v49  ;;  %v482_v49 = vunpack.c.h.bf16 %v74_v39 }
  0x7a   :  { %v499_v7 = vunpack.c.l.bf16 %v155_v58 }
  0x7b   :  { %v563_v13 = vmul.f32 %v515_v2, %v467_v61  ;;  %v564_v14 = vmul.f32 %v515_v2, %v468_v62 }
  0x7c   :  { %v531_v17 = vmul.f32 %v499_v7, %v435_v63  ;;  %v532_v18 = vmul.f32 %v499_v7, %v436_v0 }
  0x7e   :  { %v303_v1 = vpop.permute.xlu0 %302 }
  0x7f   :  { %v308_v3 = vperm.slane %v303_v1, %v2026_v52  ;;  %v159_v6 = vpop.permute.xlu1 %158  ;;  %v72_v1 = vld [vmem:[%s2888_s0 + $0xa8] sm:$0xff] }
  0x80   :  { %v164_v8 = vperm.slane %v159_v6, %v2026_v52  ;;  %v71_v6 = vld [vmem:[%s2888_s0 + $0xa0] sm:$0xff] }
  0x81   :  { %v516_v11 = vunpack.c.l.bf16 %v308_v3  ;;  %v335_v3 = vperm.slane %v330_v53, %v2026_v52 }
  0x82   :  { %v500_v12 = vunpack.c.l.bf16 %v164_v8  ;;  %v56_v8 = vld [vmem:[%s2888_s0 + $0x28] sm:$0xff] }
  0x83   :  { %v565_v15 = vmul.f32 %v516_v11, %v469_v4  ;;  %v566_v16 = vmul.f32 %v516_v11, %v470_v5  ;;  %v195_v4 = vpop.permute.xlu2 %194  ;;  %v55_v5 = vld [vmem:[%s2888_s0 + $0x20] sm:$0xff] }
  0x84   :  { %v533_v19 = vmul.f32 %v500_v12, %v437_v9  ;;  %v534_v20 = vmul.f32 %v500_v12, %v438_v10  ;;  %v200_v7 = vperm.slane %v195_v4, %v2026_v52  ;;  %v477_v9 = vunpack.c.l.bf16 %v72_v1 }
  0x85   :  { %v611_v21 = vpack.c.bf16 %v565_v15, %v563_v13  ;;  %v612_v22 = vpack.c.bf16 %v566_v16, %v564_v14  ;;  %v478_v10 = vunpack.c.h.bf16 %v72_v1  ;;  %v443_v13 = vunpack.c.l.bf16 %v55_v5 }
  0x86   :  { %v595_v24 = vpack.c.bf16 %v533_v19, %v531_v17  ;;  %v596_v25 = vpack.c.bf16 %v534_v20, %v532_v18  ;;  %v168_v26 = vpop.permute.xlu0 %167  ;;  %v444_v14 = vunpack.c.h.bf16 %v55_v5  ;;  %v475_v16 = vunpack.c.l.bf16 %v71_v6 }
  0x87   :  { %v177_v27 = vpop.permute.xlu1 %176  ;;  %755 = vmatmul.bf16.vlgmr.msra.gmra.mxu2 %v611_v21  ;;  %844 = vmatmul.bf16.vlgmr.msra.gmra.mxu3 %v612_v22  ;;  %v173_v33 = vperm.slane %v168_v26, %v2026_v52  ;;  %v476_v17 = vunpack.c.h.bf16 %v71_v6  ;;  %v519_v18 = vunpack.c.l.bf16 %v335_v3  ;;  %v445_v19 = vunpack.c.l.bf16 %v56_v8 }
  0x88   :  { %715 = vmatmul.bf16.vlgmr.msra.gmra.mxu0 %v595_v24  ;;  %804 = vmatmul.bf16.vlgmr.msra.gmra.mxu1 %v596_v25  ;;  %v182_v34 = vperm.slane %v177_v27, %v2026_v52  ;;  %v446_v20 = vunpack.c.h.bf16 %v56_v8  ;;  %v504_v21 = vunpack.c.l.bf16 %v200_v7 }
  0x89   :  { %v501_v44 = vunpack.c.l.bf16 %v173_v33  ;;  %v571_v26 = vmul.f32 %v519_v18, %v475_v16  ;;  %v572_v27 = vmul.f32 %v519_v18, %v476_v17  ;;  %v60_v16 = vld [vmem:[%s2888_s0 + $0x48] sm:$0xff] }
  0x8a   :  { %v502_v47 = vunpack.c.l.bf16 %v182_v34  ;;  %v541_v29 = vmul.f32 %v504_v21, %v445_v19  ;;  %v542_v30 = vmul.f32 %v504_v21, %v446_v20  ;;  %v76_v17 = vld [vmem:[%s2888_s0 + $0xc8] sm:$0xff] }
  0x8b   :  { %v535_v54 = vmul.f32 %v501_v44, %v439_v42  ;;  %v536_v55 = vmul.f32 %v501_v44, %v440_v43  ;;  %v204_v41 = vpop.permute.xlu2 %203  ;;  %v58_v42 = vld [vmem:[%s2888_s0 + $0x38] sm:$0xff]  ;;  %v479_v44 = vunpack.c.l.bf16 %v73_v36 }
  0x8c   :  { %v537_v56 = vmul.f32 %v502_v47, %v441_v45  ;;  %v538_v57 = vmul.f32 %v502_v47, %v442_v46  ;;  %v209_v43 = vperm.slane %v204_v41, %v2026_v52  ;;  %v480_v45 = vunpack.c.h.bf16 %v73_v36  ;;  %v57_v46 = vld [vmem:[%s2888_s0 + $0x30] sm:$0xff] }
  0x8d   :  { %v449_v53 = vunpack.c.l.bf16 %v58_v42 }
  0x8e   :  { %v339_v58 = vpop.permute.xlu0 %338  ;;  %v597_v61 = vpack.c.bf16 %v537_v56, %v535_v54  ;;  %v598_v62 = vpack.c.bf16 %v538_v57, %v536_v55  ;;  %v450_v54 = vunpack.c.h.bf16 %v58_v42  ;;  %v447_v56 = vunpack.c.l.bf16 %v57_v46 }
  0x8f   :  { %v186_v63 = vpop.permute.xlu1 %185  ;;  %v344_v0 = vperm.slane %v339_v58, %v2026_v52  ;;  %v448_v57 = vunpack.c.h.bf16 %v57_v46  ;;  %v505_v58 = vunpack.c.l.bf16 %v209_v43 }
  0x90   :  { %v191_v2 = vperm.slane %v186_v63, %v2026_v52 }
  0x91   :  { %v520_v11 = vunpack.c.l.bf16 %v344_v0  ;;  %v543_v1 = vmul.f32 %v505_v58, %v447_v56 }
  0x92   :  { %v503_v15 = vunpack.c.l.bf16 %v191_v2  ;;  %v544_v2 = vmul.f32 %v505_v58, %v448_v57 }
  0x93   :  { %v573_v22 = vmul.f32 %v520_v11, %v477_v9  ;;  %v574_v23 = vmul.f32 %v520_v11, %v478_v10  ;;  %v375_v3 = vpop.permute.xlu2 %374  ;;  %v75_v10 = vld [vmem:[%s2888_s0 + $0xc0] sm:$0xff] }
  0x94   :  { %v539_v24 = vmul.f32 %v503_v15, %v443_v13  ;;  %v540_v25 = vmul.f32 %v503_v15, %v444_v14  ;;  %v380_v15 = vperm.slane %v375_v3, %v2026_v52  ;;  %v483_v18 = vunpack.c.l.bf16 %v75_v10 }
  0x95   :  { %v615_v31 = vpack.c.bf16 %v573_v22, %v571_v26  ;;  %v616_v32 = vpack.c.bf16 %v574_v23, %v572_v27  ;;  %v484_v19 = vunpack.c.h.bf16 %v75_v10  ;;  %v485_v27 = vunpack.c.l.bf16 %v76_v17 }
  0x96   :  { %v348_v12 = vpop.permute.xlu0 %347  ;;  %v599_v33 = vpack.c.bf16 %v541_v29, %v539_v24  ;;  %v600_v34 = vpack.c.bf16 %v542_v30, %v540_v25  ;;  %v453_v24 = vunpack.c.l.bf16 %v60_v16  ;;  %v454_v25 = vunpack.c.h.bf16 %v60_v16 }
  0x97   :  { %760 = vmatmul.bf16.gmra.mxu2 %v613_v59  ;;  %849 = vmatmul.bf16.gmra.mxu3 %v614_v60  ;;  %v357_v28 = vpop.permute.xlu1 %356  ;;  %v353_v37 = vperm.slane %v348_v12, %v2026_v52  ;;  %v59_v12 = vld [vmem:[%s2888_s0 + $0x40] sm:$0xff]  ;;  %v524_v29 = vunpack.c.l.bf16 %v380_v15 }
  0x98   :  { %720 = vmatmul.bf16.gmra.mxu0 %v597_v61  ;;  %809 = vmatmul.bf16.gmra.mxu1 %v598_v62  ;;  %v362_v38 = vperm.slane %v357_v28, %v2026_v52  ;;  %v451_v21 = vunpack.c.l.bf16 %v59_v12  ;;  %v452_v22 = vunpack.c.h.bf16 %v59_v12  ;;  %v486_v28 = vunpack.c.h.bf16 %v76_v17 }
  0x99   :  { %v521_v47 = vunpack.c.l.bf16 %v353_v37  ;;  %v581_v37 = vmul.f32 %v524_v29, %v485_v27 }
  0x9a   :  { %v522_v50 = vunpack.c.l.bf16 %v362_v38  ;;  %v582_v38 = vmul.f32 %v524_v29, %v486_v28  ;;  %v63_v28 = vld [vmem:[%s2888_s0 + $0x60] sm:$0xff] }
  0x9b   :  { %v575_v59 = vmul.f32 %v521_v47, %v479_v44  ;;  %v576_v60 = vmul.f32 %v521_v47, %v480_v45  ;;  %v384_v30 = vpop.permute.xlu2 %383  ;;  %v78_v47 = vld [vmem:[%s2888_s0 + $0xd8] sm:$0xff] }
  0x9c   :  { %v577_v61 = vmul.f32 %v522_v50, %v481_v48  ;;  %v578_v62 = vmul.f32 %v522_v50, %v482_v49  ;;  %v389_v49 = vperm.slane %v384_v30, %v2026_v52  ;;  %v61_v50 = vld [vmem:[%s2888_s0 + $0x50] sm:$0xff]  ;;  %v490_v56 = vunpack.c.h.bf16 %v78_v47 }
  0x9e   :  { %v213_v35 = vpop.permute.xlu0 %212  ;;  %v617_v4 = vpack.c.bf16 %v577_v61, %v575_v59  ;;  %v618_v5 = vpack.c.bf16 %v578_v62, %v576_v60  ;;  %v455_v59 = vunpack.c.l.bf16 %v61_v50  ;;  %v456_v60 = vunpack.c.h.bf16 %v61_v50 }
  0x9f   :  { %v218_v40 = vperm.slane %v213_v35, %v2026_v52  ;;  %v366_v51 = vpop.permute.xlu1 %365 }
  0xa0   :  { %v371_v11 = vperm.slane %v366_v51, %v2026_v52  ;;  %v77_v51 = vld [vmem:[%s2888_s0 + $0xd0] sm:$0xff] }
  0xa1   :  { %v506_v55 = vunpack.c.l.bf16 %v218_v40  ;;  %v487_v62 = vunpack.c.l.bf16 %v77_v51 }
  0xa2   :  { %v523_v20 = vunpack.c.l.bf16 %v371_v11 }
  0xa3   :  { %v545_v63 = vmul.f32 %v506_v55, %v449_v53  ;;  %v546_v0 = vmul.f32 %v506_v55, %v450_v54  ;;  %v249_v45 = vpop.permute.xlu2 %248  ;;  %v62_v54 = vld [vmem:[%s2888_s0 + $0x58] sm:$0xff]  ;;  %v489_v55 = vunpack.c.l.bf16 %v78_v47 }
  0xa4   :  { %v254_v53 = vperm.slane %v249_v45, %v2026_v52 }
  0xa5   :  { %v601_v6 = vpack.c.bf16 %v545_v63, %v543_v1  ;;  %v602_v7 = vpack.c.bf16 %v546_v0, %v544_v2  ;;  %v488_v63 = vunpack.c.h.bf16 %v77_v51  ;;  %v525_v0 = vunpack.c.l.bf16 %v389_v49 }
  0xa6   :  { %v222_v8 = vpop.permute.xlu0 %221  ;;  %v457_v1 = vunpack.c.l.bf16 %v62_v54  ;;  %v458_v2 = vunpack.c.h.bf16 %v62_v54  ;;  %v510_v3 = vunpack.c.l.bf16 %v254_v53 }
  0xa7   :  { %765 = vmatmul.bf16.gmra.mxu2 %v615_v31  ;;  %854 = vmatmul.bf16.gmra.mxu3 %v616_v32  ;;  %v231_v9 = vpop.permute.xlu1 %230  ;;  %v227_v13 = vperm.slane %v222_v8, %v2026_v52  ;;  %v579_v31 = vmul.f32 %v523_v20, %v483_v18  ;;  %v580_v32 = vmul.f32 %v523_v20, %v484_v19  ;;  %v79_v19 = vld [vmem:[%s2888_s0 + $0xe0] sm:$0xff] }
  0xa8   :  { %725 = vmatmul.bf16.gmra.mxu0 %v599_v33  ;;  %814 = vmatmul.bf16.gmra.mxu1 %v600_v34  ;;  %v236_v14 = vperm.slane %v231_v9, %v2026_v52  ;;  %v583_v8 = vmul.f32 %v525_v0, %v487_v62  ;;  %v584_v9 = vmul.f32 %v525_v0, %v488_v63  ;;  %v492_v27 = vunpack.c.h.bf16 %v79_v19  ;;  %v66_v63 = vld [vmem:[%s2888_s0 + $0x78] sm:$0xff] }
  0xa9   :  { %v507_v23 = vunpack.c.l.bf16 %v227_v13  ;;  %v619_v40 = vpack.c.bf16 %v581_v37, %v579_v31  ;;  %v620_v41 = vpack.c.bf16 %v582_v38, %v580_v32  ;;  %v553_v11 = vmul.f32 %v510_v3, %v457_v1  ;;  %v82_v0 = vld [vmem:[%s2888_s0 + $0xf8] sm:$0xff] }
  0xaa   :  { %v508_v26 = vunpack.c.l.bf16 %v236_v14  ;;  %v554_v12 = vmul.f32 %v510_v3, %v458_v2  ;;  %v459_v37 = vunpack.c.l.bf16 %v63_v28  ;;  %v460_v38 = vunpack.c.h.bf16 %v63_v28 }
  0xab   :  { %v547_v33 = vmul.f32 %v507_v23, %v451_v21  ;;  %v548_v34 = vmul.f32 %v507_v23, %v452_v22  ;;  %v258_v18 = vpop.permute.xlu2 %257  ;;  %v80_v22 = vld [vmem:[%s2888_s0 + $0xe8] sm:$0xff] }
  0xac   :  { %v549_v35 = vmul.f32 %v508_v26, %v453_v24  ;;  %v550_v36 = vmul.f32 %v508_v26, %v454_v25  ;;  %v64_v24 = vld [vmem:[%s2888_s0 + $0x68] sm:$0xff]  ;;  %v263_v25 = vperm.slane %v258_v18, %v2026_v52  ;;  %v491_v26 = vunpack.c.l.bf16 %v79_v19 }
  0xad   :  { %v493_v30 = vunpack.c.l.bf16 %v80_v22  ;;  %v494_v31 = vunpack.c.h.bf16 %v80_v22 }
  0xae   :  { %v393_v39 = vpop.permute.xlu0 %392  ;;  %v603_v42 = vpack.c.bf16 %v549_v35, %v547_v33  ;;  %v604_v43 = vpack.c.bf16 %v550_v36, %v548_v34  ;;  %v461_v34 = vunpack.c.l.bf16 %v64_v24  ;;  %v462_v35 = vunpack.c.h.bf16 %v64_v24 }
  0xaf   :  { %v240_v44 = vpop.permute.xlu1 %239  ;;  %v398_v46 = vperm.slane %v393_v39, %v2026_v52  ;;  %v511_v39 = vunpack.c.l.bf16 %v263_v25 }
  0xb0   :  { %v245_v48 = vperm.slane %v240_v44, %v2026_v52 }
  0xb1   :  { %v526_v57 = vunpack.c.l.bf16 %v398_v46  ;;  %v555_v47 = vmul.f32 %v511_v39, %v459_v37 }
  0xb2   :  { %v509_v61 = vunpack.c.l.bf16 %v245_v48  ;;  %v556_v48 = vmul.f32 %v511_v39, %v460_v38 }
  0xb6   :  { %v402_v58 = vpop.permute.xlu0 %401 }
  0xb7   :  { %770 = vmatmul.bf16.gmra.mxu2 %v617_v4  ;;  %859 = vmatmul.bf16.gmra.mxu3 %v618_v5  ;;  %v585_v4 = vmul.f32 %v526_v57, %v489_v55  ;;  %v586_v5 = vmul.f32 %v526_v57, %v490_v56  ;;  %v411_v10 = vpop.permute.xlu1 %410  ;;  %v407_v20 = vperm.slane %v402_v58, %v2026_v52  ;;  %v429_v56 = vpop.permute.xlu2 %428  ;;  %v81_v57 = vld [vmem:[%s2888_s0 + $0xf0] sm:$0xff] }
  0xb8   :  { %730 = vmatmul.bf16.gmra.mxu0 %v601_v6  ;;  %819 = vmatmul.bf16.gmra.mxu1 %v602_v7  ;;  %v551_v6 = vmul.f32 %v509_v61, %v455_v59  ;;  %v552_v7 = vmul.f32 %v509_v61, %v456_v60  ;;  %v416_v21 = vperm.slane %v411_v10, %v2026_v52  ;;  %v65_v59 = vld [vmem:[%s2888_s0 + $0x70] sm:$0xff]  ;;  %v495_v1 = vunpack.c.l.bf16 %v81_v57 }
  0xb9   :  { %v621_v13 = vpack.c.bf16 %v585_v4, %v583_v8  ;;  %v622_v14 = vpack.c.bf16 %v586_v5, %v584_v9  ;;  %v527_v29 = vunpack.c.l.bf16 %v407_v20  ;;  %v434_v62 = vperm.slane %v429_v56, %v2026_v52 }
  0xba   :  { %v605_v15 = vpack.c.bf16 %v553_v11, %v551_v6  ;;  %v606_v16 = vpack.c.bf16 %v554_v12, %v552_v7  ;;  %v528_v32 = vunpack.c.l.bf16 %v416_v21  ;;  %v496_v2 = vunpack.c.h.bf16 %v81_v57 }
  0xbb   :  { %v463_v4 = vunpack.c.l.bf16 %v65_v59  ;;  %v464_v5 = vunpack.c.h.bf16 %v65_v59  ;;  %v465_v6 = vunpack.c.l.bf16 %v66_v63  ;;  %v466_v7 = vunpack.c.h.bf16 %v66_v63 }
  0xbc   :  { %v590_v44 = vmul.f32 %v528_v32, %v494_v31  ;;  %v497_v9 = vunpack.c.l.bf16 %v82_v0  ;;  %v498_v10 = vunpack.c.h.bf16 %v82_v0  ;;  %v530_v11 = vunpack.c.l.bf16 %v434_v62 }
  0xbe   :  { %v267_v17 = vpop.permute.xlu0 %266  ;;  %v593_v18 = vmul.f32 %v530_v11, %v497_v9  ;;  %v594_v19 = vmul.f32 %v530_v11, %v498_v10 }
  0xbf   :  { %v272_v23 = vperm.slane %v267_v17, %v2026_v52  ;;  %v420_v33 = vpop.permute.xlu1 %419 }
  0xc0   :  { %v425_v58 = vperm.slane %v420_v33, %v2026_v52 }
  0xc1   :  { %v512_v36 = vunpack.c.l.bf16 %v272_v23 }
  0xc2   :  { %v529_v3 = vunpack.c.l.bf16 %v425_v58 }
  0xc3   :  { %v557_v45 = vmul.f32 %v512_v36, %v461_v34  ;;  %v558_v46 = vmul.f32 %v512_v36, %v462_v35 }
  0xc4   :  { %v591_v12 = vmul.f32 %v529_v3, %v495_v1 }
  0xc5   :  { %v607_v51 = vpack.c.bf16 %v557_v45, %v555_v47  ;;  %v608_v53 = vpack.c.bf16 %v558_v46, %v556_v48 }
  0xc6   :  { %v276_v54 = vpop.permute.xlu0 %275  ;;  %v625_v20 = vpack.c.bf16 %v593_v18, %v591_v12 }
  0xc7   :  { %775 = vmatmul.bf16.gmra.mxu2 %v619_v40  ;;  %864 = vmatmul.bf16.gmra.mxu3 %v620_v41  ;;  %v1813_v40 = vmov 0.0   ;;  %v587_v41 = vmul.f32 %v527_v29, %v491_v26  ;;  %v285_v55 = vpop.permute.xlu1 %284  ;;  %v281_v60 = vperm.slane %v276_v54, %v2026_v52 }
  0xc8   :  { %735 = vmatmul.bf16.gmra.mxu0 %v603_v42  ;;  %824 = vmatmul.bf16.gmra.mxu1 %v604_v43  ;;  %19 = vst.msk [vmem:[#allocation2] sm:$0xff] %vm18_vm0, %v1813_v40  ;;  %v588_v42 = vmul.f32 %v527_v29, %v492_v27  ;;  %v589_v43 = vmul.f32 %v528_v32, %v493_v30 }
  0xc9   :  { %20 = vst.msk [vmem:[#allocation2 + $0x8] sm:$0xff] %vm18_vm0, %v1813_v40  ;;  %v290_v61 = vperm.slane %v285_v55, %v2026_v52  ;;  %v513_v52 = vunpack.c.l.bf16 %v281_v60 }
  0xca   :  { %21 = vst.msk [vmem:[#allocation2 + $0x10] sm:$0xff] %vm18_vm0, %v1813_v40  ;;  %v623_v49 = vpack.c.bf16 %v589_v43, %v587_v41  ;;  %v624_v50 = vpack.c.bf16 %v590_v44, %v588_v42 }
  0xcb   :  { %22 = vst.msk [vmem:[#allocation2 + $0x18] sm:$0xff] %vm18_vm0, %v1813_v40  ;;  %v514_v8 = vunpack.c.l.bf16 %v290_v61 }
  0xcc   :  { %23 = vst.msk [vmem:[#allocation2 + $0x20] sm:$0xff] %vm18_vm0, %v1813_v40 }
  0xcd   :  { %24 = vst.msk [vmem:[#allocation2 + $0x28] sm:$0xff] %vm18_vm0, %v1813_v40  ;;  %v562_v17 = vmul.f32 %v514_v8, %v466_v7 }
  0xce   :  { %25 = vst.msk [vmem:[#allocation2 + $0x30] sm:$0xff] %vm18_vm0, %v1813_v40 }
  0xcf   :  { %26 = vst.msk [vmem:[#allocation2 + $0x38] sm:$0xff] %vm18_vm0, %v1813_v40  ;;  %v627_v25 = vld [vmem:[#allocation2] sm:$0xff] }
  0xd0   :  { %27 = vst.msk [vmem:[#allocation2 + $0x40] sm:$0xff] %vm18_vm0, %v1813_v40  ;;  %v628_v35 = vld [vmem:[#allocation2 + $0x8] sm:$0xff] }
  0xd1   :  { %28 = vst.msk [vmem:[#allocation2 + $0x48] sm:$0xff] %vm18_vm0, %v1813_v40  ;;  %v629_v47 = vld [vmem:[#allocation2 + $0x10] sm:$0xff] }
  0xd2   :  { %29 = vst.msk [vmem:[#allocation2 + $0x50] sm:$0xff] %vm18_vm0, %v1813_v40  ;;  %v630_v63 = vld [vmem:[#allocation2 + $0x18] sm:$0xff] }
  0xd3   :  { %30 = vst.msk [vmem:[#allocation2 + $0x58] sm:$0xff] %vm18_vm0, %v1813_v40 }
  0xd4   :  { %31 = vst.msk [vmem:[#allocation2 + $0x60] sm:$0xff] %vm18_vm0, %v1813_v40 }
  0xd5   :  { %32 = vst.msk [vmem:[#allocation2 + $0x68] sm:$0xff] %vm18_vm0, %v1813_v40 }
  0xd6   :  { %33 = vst.msk [vmem:[#allocation2 + $0x70] sm:$0xff] %vm18_vm0, %v1813_v40 }
  0xd7   :  { %780 = vmatmul.bf16.gmra.mxu2 %v621_v13  ;;  %869 = vmatmul.bf16.gmra.mxu3 %v622_v14  ;;  %34 = vst.msk [vmem:[#allocation2 + $0x78] sm:$0xff] %vm18_vm0, %v1813_v40  ;;  %v592_v13 = vmul.f32 %v529_v3, %v496_v2  ;;  %v559_v14 = vmul.f32 %v513_v52, %v463_v4 }
  0xd8   :  { %740 = vmatmul.bf16.gmra.mxu0 %v605_v15  ;;  %829 = vmatmul.bf16.gmra.mxu1 %v606_v16  ;;  %35 = vst.msk [vmem:[#allocation2 + $0x80] sm:$0xff] %vm18_vm0, %v1813_v40  ;;  %v560_v15 = vmul.f32 %v513_v52, %v464_v5  ;;  %v561_v16 = vmul.f32 %v514_v8, %v465_v6 }
  0xd9   :  { %36 = vst.msk [vmem:[#allocation2 + $0x88] sm:$0xff] %vm18_vm0, %v1813_v40  ;;  %v626_v21 = vpack.c.bf16 %v594_v19, %v592_v13 }
  0xda   :  { %37 = vst.msk [vmem:[#allocation2 + $0x90] sm:$0xff] %vm18_vm0, %v1813_v40  ;;  %v609_v22 = vpack.c.bf16 %v561_v16, %v559_v14  ;;  %v610_v23 = vpack.c.bf16 %v562_v17, %v560_v15 }
  0xdb   :  { %38 = vst.msk [vmem:[#allocation2 + $0x98] sm:$0xff] %vm18_vm0, %v1813_v40 }
  0xdc   :  { %39 = vst.msk [vmem:[#allocation2 + $0xa0] sm:$0xff] %vm18_vm0, %v1813_v40 }
  0xdd   :  { %40 = vst.msk [vmem:[#allocation2 + $0xa8] sm:$0xff] %vm18_vm0, %v1813_v40 }
  0xde   :  { %41 = vst.msk [vmem:[#allocation2 + $0xb0] sm:$0xff] %vm18_vm0, %v1813_v40 }
  0xdf   :  { %42 = vst.msk [vmem:[#allocation2 + $0xb8] sm:$0xff] %vm18_vm0, %v1813_v40  ;;  %v643_v30 = vld [vmem:[#allocation2 + $0x80] sm:$0xff] }
  0xe0   :  { %43 = vst.msk [vmem:[#allocation2 + $0xc0] sm:$0xff] %vm18_vm0, %v1813_v40  ;;  %v644_v42 = vld [vmem:[#allocation2 + $0x88] sm:$0xff] }
  0xe1   :  { %44 = vst.msk [vmem:[#allocation2 + $0xc8] sm:$0xff] %vm18_vm0, %v1813_v40  ;;  %v645_v60 = vld [vmem:[#allocation2 + $0x90] sm:$0xff] }
  0xe2   :  { %45 = vst.msk [vmem:[#allocation2 + $0xd0] sm:$0xff] %vm18_vm0, %v1813_v40  ;;  %v646_v14 = vld [vmem:[#allocation2 + $0x98] sm:$0xff] }
  0xe3   :  { %46 = vst.msk [vmem:[#allocation2 + $0xd8] sm:$0xff] %vm18_vm0, %v1813_v40 }
  0xe4   :  { %47 = vst.msk [vmem:[#allocation2 + $0xe0] sm:$0xff] %vm18_vm0, %v1813_v40 }
  0xe5   :  { %48 = vst.msk [vmem:[#allocation2 + $0xe8] sm:$0xff] %vm18_vm0, %v1813_v40 }
  0xe6   :  { %49 = vst.msk [vmem:[#allocation2 + $0xf0] sm:$0xff] %vm18_vm0, %v1813_v40 }
  0xe7   :  { %785 = vmatmul.bf16.gmra.mxu2 %v623_v49  ;;  %874 = vmatmul.bf16.gmra.mxu3 %v624_v50  ;;  %50 = vst.msk [vmem:[#allocation2 + $0xf8] sm:$0xff] %vm18_vm0, %v1813_v40 }
  0xe8   :  { %745 = vmatmul.bf16.gmra.mxu0 %v607_v51  ;;  %834 = vmatmul.bf16.gmra.mxu1 %v608_v53 }
  0xf7   :  { %790 = vmatmul.bf16.gmra.mxu2 %v625_v20  ;;  %879 = vmatmul.bf16.gmra.mxu3 %v626_v21  ;;  %v631_v20 = vld [vmem:[#allocation2 + $0x20] sm:$0xff] }
  0xf8   :  { %750 = vmatmul.bf16.gmra.mxu0 %v609_v22  ;;  %839 = vmatmul.bf16.gmra.mxu1 %v610_v23 }
 0x105   :  { %v716_v24 = vpop.f32.mrf.mxu0  ;;  %v805_v26 = vpop.f32.mrf.mxu1 }
 0x106   :  { %v806_v27 = vadd.f32 %v805_v26, %v716_v24 }
 0x108   :  { %v885_v28 = vadd.f32 %v806_v27, %v627_v25 }
 0x10a   :  { %918 = vst.msk [vmem:[#allocation2] sm:$0xff] %vm18_vm0, %v885_v28  ;;  %v756_v29 = vpop.f32.mrf.mxu2  ;;  %v845_v31 = vpop.f32.mrf.mxu3 }
 0x10b   :  { %v846_v32 = vadd.f32 %v845_v31, %v756_v29 }
 0x10d   :  { %v901_v33 = vadd.f32 %v846_v32, %v643_v30  ;;  %v718_v34 = vpop.f32.mrf.mxu0  ;;  %v807_v36 = vpop.f32.mrf.mxu1 }
 0x10e   :  { %v808_v37 = vadd.f32 %v807_v36, %v718_v34 }
 0x10f   :  { %934 = vst.msk [vmem:[#allocation2 + $0x80] sm:$0xff] %vm18_vm0, %v901_v33 }
 0x110   :  { %v886_v38 = vadd.f32 %v808_v37, %v628_v35 }
 0x111   :  { %v953_v39 = vld [vmem:[#allocation2] sm:$0xff] }
 0x112   :  { %v1629_v40 = vmul.f32 -1.442695, %v953_v39  ;;  %919 = vst.msk [vmem:[#allocation2 + $0x8] sm:$0xff] %vm18_vm0, %v886_v38  ;;  %v758_v41 = vpop.f32.mrf.mxu2  ;;  %v847_v43 = vpop.f32.mrf.mxu3 }
 0x113   :  { %v848_v44 = vadd.f32 %v847_v43, %v758_v41 }
 0x114   :  { %1683 = vpow2.f32 %v1629_v40 }
 0x115   :  { %v902_v45 = vadd.f32 %v848_v44, %v644_v42  ;;  %v721_v46 = vpop.f32.mrf.mxu0  ;;  %v810_v48 = vpop.f32.mrf.mxu1 }
 0x116   :  { %v969_v49 = vld [vmem:[#allocation2 + $0x80] sm:$0xff]  ;;  %v811_v50 = vadd.f32 %v810_v48, %v721_v46 }
 0x117   :  { %v1645_v51 = vmul.f32 -1.442695, %v969_v49  ;;  %935 = vst.msk [vmem:[#allocation2 + $0x88] sm:$0xff] %vm18_vm0, %v902_v45 }
 0x118   :  { %v887_v53 = vadd.f32 %v811_v50, %v629_v47 }
 0x119   :  { %1685 = vpow2.f32 %v1645_v51  ;;  %v954_v54 = vld [vmem:[#allocation2 + $0x8] sm:$0xff] }
 0x11a   :  { %v1684_v55 = vpop.eup %1683  ;;  %v1630_v56 = vmul.f32 -1.442695, %v954_v54  ;;  %920 = vst.msk [vmem:[#allocation2 + $0x10] sm:$0xff] %vm18_vm0, %v887_v53  ;;  %v761_v57 = vpop.f32.mrf.mxu2  ;;  %v647_v53 = vld [vmem:[#allocation2 + $0xa0] sm:$0xff] }
 0x11b   :  { %v850_v58 = vpop.f32.mrf.mxu3  ;;  %v1081_v59 = vadd.f32 1.0, %v1684_v55 }
 0x11c   :  { %v851_v61 = vadd.f32 %v850_v58, %v761_v57  ;;  %1687 = vpow2.f32 %v1630_v56 }
 0x11d   :  { %1689 = vrcp.f32 %v1081_v59  ;;  %v723_v62 = vpop.f32.mrf.mxu0  ;;  %v812_v0 = vpop.f32.mrf.mxu1  ;;  %v1122_v17 = vand.u32 2147483647, %v1081_v59  ;;  %v1124_v18 = vand.u32 2147483648, %v1081_v59  ;;  %vm1118_vm2 = vweird.f32 %v1081_v59 }
 0x11e   :  { %v970_v1 = vld [vmem:[#allocation2 + $0x88] sm:$0xff]  ;;  %v903_v2 = vadd.f32 %v851_v61, %v645_v60  ;;  %v813_v3 = vadd.f32 %v812_v0, %v723_v62 }
 0x11f   :  { %v1686_v4 = vpop.eup %1685  ;;  %v1646_v5 = vmul.f32 -1.442695, %v970_v1  ;;  %vm2237_vm3 = vcmp.eq.f32.partialorder %v1122_v17, 8.507059e+37  ;;  %v1125_v37 = vor.u32 1.1754944e-38, %v1124_v18 }
 0x120   :  { %v2225_v52 = vadd.f32 1.0, %v1686_v4  ;;  %936 = vst.msk [vmem:[#allocation2 + $0x90] sm:$0xff] %vm18_vm0, %v903_v2  ;;  %v888_v6 = vadd.f32 %v813_v3, %v630_v63  ;;  %v632_v3 = vld [vmem:[#allocation2 + $0x28] sm:$0xff] }
 0x121   :  { %1691 = vpow2.f32 %v1646_v5  ;;  %v955_v7 = vld [vmem:[#allocation2 + $0x10] sm:$0xff] }
 0x122   :  { %v1688_v8 = vpop.eup %1687  ;;  %1693 = vrcp.f32 %v2225_v52  ;;  %921 = vst.msk [vmem:[#allocation2 + $0x18] sm:$0xff] %vm18_vm0, %v888_v6  ;;  %v763_v9 = vpop.f32.mrf.mxu2  ;;  %v1631_v13 = vmul.f32 -1.442695, %v955_v7  ;;  %v1362_v26 = vand.u32 2147483647, %v2225_v52  ;;  %vm1358_vm4 = vweird.f32 %v2225_v52  ;;  %v649_v6 = vld [vmem:[#allocation2 + $0xb0] sm:$0xff] }
 0x123   :  { %v852_v10 = vpop.f32.mrf.mxu3  ;;  %v1690_v11 = vpop.eup %1689  ;;  %v2230_v12 = vadd.f32 1.0, %v1688_v8  ;;  %v1364_v42 = vand.u32 2147483648, %v2225_v52 }
 0x124   :  { %v853_v15 = vadd.f32 %v852_v10, %v763_v9  ;;  %v1114_v16 = vmul.f32 %v1690_v11, %v1081_v59  ;;  %vm1119_vm1 = vweird.f32 %v1690_v11  ;;  %vm2249_vm6 = vcmp.eq.f32.partialorder %v1362_v26, 8.507059e+37 }
 0x125   :  { %1695 = vrcp.f32 %v2230_v12  ;;  %v726_v19 = vpop.f32.mrf.mxu0  ;;  %v815_v21 = vpop.f32.mrf.mxu1  ;;  %vm1120_vm5 = vmor %vm1118_vm2, %vm1119_vm1  ;;  %v1137_v48 = vand.u32 2147483647, %v2230_v12  ;;  %v1139_v57 = vand.u32 2147483648, %v2230_v12  ;;  %v1365_v60 = vor.u32 1.1754944e-38, %v1364_v42 }
 0x126   :  { %v1115_v22 = vsub.f32 1.0, %v1114_v16  ;;  %1697 = vpow2.f32 %v1631_v13  ;;  %v904_v23 = vadd.f32 %v853_v15, %v646_v14  ;;  %v816_v24 = vadd.f32 %v815_v21, %v726_v19 }
 0x127   :  { %v1692_v25 = vpop.eup %1691  ;;  %v971_v27 = vld [vmem:[#allocation2 + $0x90] sm:$0xff]  ;;  %vm1133_vm10 = vweird.f32 %v2230_v12  ;;  %vm2274_vm11 = vcmp.eq.f32.partialorder %v1137_v48, 8.507059e+37  ;;  %v1140_v10 = vor.u32 1.1754944e-38, %v1139_v57 }
 0x128   :  { %v1694_v28 = vpop.eup %1693  ;;  %v1116_v29 = vmul.f32 %v1690_v11, %v1115_v22  ;;  %v2234_v30 = vadd.f32 1.0, %v1692_v25  ;;  %v1647_v31 = vmul.f32 -1.442695, %v971_v27  ;;  %937 = vst.msk [vmem:[#allocation2 + $0x98] sm:$0xff] %vm18_vm0, %v904_v23  ;;  %v889_v32 = vadd.f32 %v816_v24, %v631_v20 }
 0x129   :  { %v1354_v34 = vmul.f32 %v1694_v28, %v2225_v52  ;;  %v956_v35 = vld [vmem:[#allocation2 + $0x18] sm:$0xff]  ;;  %vm1359_vm7 = vweird.f32 %v1694_v28 }
 0x12a   :  { %v1117_v36 = vadd.f32 %v1690_v11, %v1116_v29  ;;  %1699 = vrcp.f32 %v2234_v30  ;;  %922 = vst.msk [vmem:[#allocation2 + $0x20] sm:$0xff] %vm18_vm0, %v889_v32  ;;  %v766_v38 = vpop.f32.mrf.mxu2  ;;  %v1632_v43 = vmul.f32 -1.442695, %v956_v35  ;;  %vm1360_vm8 = vmor %vm1358_vm4, %vm1359_vm7  ;;  %v1377_v19 = vand.u32 2147483647, %v2234_v30 }
 0x12b   :  { %v855_v39 = vpop.f32.mrf.mxu3  ;;  %v2245_v40 = vpop.eup %1695  ;;  %v1355_v41 = vsub.f32 1.0, %v1354_v34  ;;  %1701 = vpow2.f32 %v1647_v31  ;;  %v1379_v20 = vand.u32 2147483648, %v2234_v30  ;;  %vm1373_vm14 = vweird.f32 %v2234_v30 }
 0x12c   :  { %v1698_v44 = vpop.eup %1697  ;;  %v1121_v45 = vsel %vm1120_vm5, %v1690_v11, %v1117_v36  ;;  %v1129_v47 = vmul.f32 %v2245_v40, %v2230_v12  ;;  %1703 = vpow2.f32 %v1632_v43  ;;  %v856_v58 = vadd.f32 %v855_v39, %v766_v38  ;;  %v648_v39 = vld [vmem:[#allocation2 + $0xa8] sm:$0xff] }
 0x12d   :  { %v1126_v49 = vsel %vm2237_vm3, %v1125_v37, %v1121_v45  ;;  %v1356_v50 = vmul.f32 %v1694_v28, %v1355_v41  ;;  %v2258_v51 = vadd.f32 1.0, %v1698_v44  ;;  %v728_v54 = vpop.f32.mrf.mxu0  ;;  %v817_v55 = vpop.f32.mrf.mxu1  ;;  %vm1134_vm9 = vweird.f32 %v2245_v40 }
 0x12e   :  { %1593 = vst.msk [vmem:[%s2889_s3] sm:$0xff] %vm18_vm0, %v1126_v49  ;;  %v1130_v56 = vsub.f32 1.0, %v1129_v47  ;;  %v818_v62 = vadd.f32 %v817_v55, %v728_v54  ;;  %v905_v2 = vadd.f32 %v856_v58, %v647_v53  ;;  %vm1135_vm12 = vmor %vm1133_vm10, %vm1134_vm9  ;;  %vm1378_vm1 = vcmp.eq.f32.partialorder %v1377_v19, 8.507059e+37 }
 0x12f   :  { %v1357_v59 = vadd.f32 %v1694_v28, %v1356_v50  ;;  %1705 = vrcp.f32 %v2258_v51  ;;  %v972_v61 = vld [vmem:[#allocation2 + $0x98] sm:$0xff]  ;;  %v1154_v31 = vand.u32 2147483648, %v2258_v51  ;;  %v1380_v32 = vor.u32 1.1754944e-38, %v1379_v20 }
 0x130   :  { %v2266_v63 = vpop.eup %1699  ;;  %v1131_v0 = vmul.f32 %v2245_v40, %v1130_v56  ;;  %v1648_v1 = vmul.f32 -1.442695, %v972_v61  ;;  %938 = vst.msk [vmem:[#allocation2 + $0xa0] sm:$0xff] %vm18_vm0, %v905_v2  ;;  %v890_v16 = vadd.f32 %v818_v62, %v632_v3  ;;  %vm1148_vm2 = vweird.f32 %v2258_v51 }
 0x131   :  { %v1702_v4 = vpop.eup %1701  ;;  %v1361_v5 = vsel %vm1360_vm8, %v1694_v28, %v1357_v59  ;;  %v1369_v7 = vmul.f32 %v2266_v63, %v2234_v30  ;;  %v957_v52 = vld [vmem:[#allocation2 + $0x20] sm:$0xff]  ;;  %vm1374_vm13 = vweird.f32 %v2266_v63  ;;  %v1152_v28 = vand.u32 2147483647, %v2258_v51 }
 0x132   :  { %v1366_v8 = vsel %vm2249_vm6, %v1365_v60, %v1361_v5  ;;  %v1132_v9 = vadd.f32 %v2245_v40, %v1131_v0  ;;  %v2283_v11 = vadd.f32 1.0, %v1702_v4  ;;  %v768_v13 = vpop.f32.mrf.mxu2  ;;  %1707 = vpow2.f32 %v1648_v1  ;;  %v1704_v17 = vpop.eup %1703  ;;  %923 = vst.msk [vmem:[#allocation2 + $0x28] sm:$0xff] %vm18_vm0, %v890_v16  ;;  %vm1375_vm15 = vmor %vm1373_vm14, %vm1374_vm13  ;;  %v650_v16 = vld [vmem:[#allocation2 + $0xb8] sm:$0xff] }
 0x133   :  { %v857_v12 = vpop.f32.mrf.mxu3  ;;  %1609 = vst.msk [vmem:[%s2889_s3 + $0x80] sm:$0xff] %vm18_vm0, %v1366_v8  ;;  %v1370_v14 = vsub.f32 1.0, %v1369_v7  ;;  %v1633_v15 = vmul.f32 -1.442695, %v957_v52  ;;  %v2300_v24 = vadd.f32 1.0, %v1704_v17  ;;  %vm2316_vm4 = vcmp.eq.f32.partialorder %v1152_v28, 8.507059e+37 }
 0x134   :  { %v1136_v18 = vsel %vm1135_vm12, %v2245_v40, %v1132_v9  ;;  %1709 = vrcp.f32 %v2283_v11  ;;  %v858_v34 = vadd.f32 %v857_v12, %v768_v13  ;;  %v1392_v37 = vand.u32 2147483647, %v2283_v11  ;;  %v633_v40 = vld [vmem:[#allocation2 + $0x30] sm:$0xff] }
 0x135   :  { %v1706_v21 = vpop.eup %1705  ;;  %v1141_v22 = vsel %vm2274_vm11, %v1140_v10, %v1136_v18  ;;  %v1371_v23 = vmul.f32 %v2266_v63, %v1370_v14  ;;  %v731_v25 = vpop.f32.mrf.mxu0  ;;  %1711 = vpow2.f32 %v1633_v15  ;;  %v1155_v47 = vor.u32 1.1754944e-38, %v1154_v31  ;;  %v634_v14 = vld [vmem:[#allocation2 + $0x38] sm:$0xff] }
 0x136   :  { %v820_v26 = vpop.f32.mrf.mxu1  ;;  %1594 = vst.msk [vmem:[%s2889_s3 + $0x8] sm:$0xff] %vm18_vm0, %v1141_v22  ;;  %v1144_v27 = vmul.f32 %v1706_v21, %v2258_v51  ;;  %1713 = vrcp.f32 %v2300_v24  ;;  %vm1149_vm3 = vweird.f32 %v1706_v21  ;;  %vm1388_vm5 = vweird.f32 %v2283_v11 }
 0x137   :  { %v1372_v29 = vadd.f32 %v2266_v63, %v1371_v23  ;;  %v973_v38 = vld [vmem:[#allocation2 + $0xa0] sm:$0xff]  ;;  %v821_v30 = vadd.f32 %v820_v26, %v731_v25  ;;  %v906_v55 = vadd.f32 %v858_v34, %v648_v39  ;;  %vm1150_vm6 = vmor %vm1148_vm2, %vm1149_vm3  ;;  %vm2333_vm7 = vcmp.eq.f32.partialorder %v1392_v37, 8.507059e+37 }
 0x138   :  { %v1145_v33 = vsub.f32 1.0, %v1144_v27  ;;  %v1708_v35 = vpop.eup %1707  ;;  %v1649_v54 = vmul.f32 -1.442695, %v973_v38  ;;  %v1394_v60 = vand.u32 2147483648, %v2283_v11  ;;  %v1167_v2 = vand.u32 2147483647, %v2300_v24 }
 0x139   :  { %v1376_v36 = vsel %vm1375_vm15, %v2266_v63, %v1372_v29  ;;  %v2326_v49 = vadd.f32 1.0, %v1708_v35  ;;  %v891_v56 = vadd.f32 %v821_v30, %v633_v40  ;;  %v958_v61 = vld [vmem:[#allocation2 + $0x28] sm:$0xff]  ;;  %939 = vst.msk [vmem:[#allocation2 + $0xa8] sm:$0xff] %vm18_vm0, %v906_v55  ;;  %v1169_v52 = vand.u32 2147483648, %v2300_v24 }
 0x13a   :  { %v1710_v41 = vpop.eup %1709  ;;  %v1381_v42 = vsel %vm1378_vm1, %v1380_v32, %v1376_v36  ;;  %v1146_v43 = vmul.f32 %v1706_v21, %v1145_v33  ;;  %v771_v45 = vpop.f32.mrf.mxu2  ;;  %v1634_v8 = vmul.f32 -1.442695, %v958_v61  ;;  %v1395_v10 = vor.u32 1.1754944e-38, %v1394_v60 }
 0x13b   :  { %v860_v46 = vpop.f32.mrf.mxu3  ;;  %1610 = vst.msk [vmem:[%s2889_s3 + $0x88] sm:$0xff] %vm18_vm0, %v1381_v42  ;;  %v1384_v48 = vmul.f32 %v1710_v41, %v2283_v11  ;;  %v1712_v50 = vpop.eup %1711  ;;  %1715 = vrcp.f32 %v2326_v49  ;;  %vm1389_vm8 = vweird.f32 %v1710_v41  ;;  %vm1163_vm9 = vweird.f32 %v2300_v24 }
 0x13c   :  { %v1147_v53 = vadd.f32 %v1706_v21, %v1146_v43  ;;  %v2328_v57 = vpop.eup %1713  ;;  %v861_v51 = vadd.f32 %v860_v46, %v771_v45  ;;  %v2345_v5 = vadd.f32 1.0, %v1712_v50  ;;  %924 = vst.msk [vmem:[#allocation2 + $0x30] sm:$0xff] %vm18_vm0, %v891_v56  ;;  %1717 = vpow2.f32 %v1649_v54  ;;  %vm1390_vm10 = vmor %vm1388_vm5, %vm1389_vm8 }
 0x13d   :  { %v1385_v58 = vsub.f32 1.0, %v1384_v48  ;;  %v733_v62 = vpop.f32.mrf.mxu0  ;;  %v1159_v1 = vmul.f32 %v2328_v57, %v2300_v24  ;;  %vm1164_vm11 = vweird.f32 %v2328_v57  ;;  %vm2359_vm12 = vcmp.eq.f32.partialorder %v1167_v2, 8.507059e+37 }
 0x13e   :  { %v822_v63 = vpop.f32.mrf.mxu1  ;;  %v1151_v0 = vsel %vm1150_vm6, %v1706_v21, %v1147_v53  ;;  %1719 = vrcp.f32 %v2345_v5  ;;  %v907_v12 = vadd.f32 %v861_v51, %v649_v6  ;;  %v1170_v25 = vor.u32 1.1754944e-38, %v1169_v52  ;;  %vm2376_vm13 = vmor %vm1163_vm9, %vm1164_vm11 }
 0x13f   :  { %v1156_v3 = vsel %vm2316_vm4, %v1155_v47, %v1151_v0  ;;  %v1386_v4 = vmul.f32 %v1710_v41, %v1385_v58  ;;  %v1160_v7 = vsub.f32 1.0, %v1159_v1  ;;  %1721 = vpow2.f32 %v1634_v8  ;;  %v635_v47 = vld [vmem:[#allocation2 + $0x40] sm:$0xff] }
 0x140   :  { %1595 = vst.msk [vmem:[%s2889_s3 + $0x10] sm:$0xff] %vm18_vm0, %v1156_v3  ;;  %v823_v21 = vadd.f32 %v822_v63, %v733_v62  ;;  %vm1403_vm14 = vweird.f32 %v2326_v49  ;;  %v1407_v28 = vand.u32 2147483647, %v2326_v49  ;;  %v974_v29 = vld [vmem:[#allocation2 + $0xa8] sm:$0xff]  ;;  %v1409_v24 = vand.u32 2147483648, %v2326_v49  ;;  %v651_v62 = vld [vmem:[#allocation2 + $0xc0] sm:$0xff] }
 0x141   :  { %v1387_v9 = vadd.f32 %v1710_v41, %v1386_v4  ;;  %v1161_v13 = vmul.f32 %v2328_v57, %v1160_v7  ;;  %v1716_v18 = vpop.eup %1715  ;;  %940 = vst.msk [vmem:[#allocation2 + $0xb0] sm:$0xff] %vm18_vm0, %v907_v12  ;;  %v1650_v38 = vmul.f32 -1.442695, %v974_v29  ;;  %v1182_v50 = vand.u32 2147483647, %v2345_v5 }
 0x142   :  { %v773_v15 = vpop.f32.mrf.mxu2  ;;  %v1399_v26 = vmul.f32 %v1716_v18, %v2326_v49  ;;  %v892_v31 = vadd.f32 %v823_v21, %v634_v14  ;;  %v1718_v35 = vpop.eup %1717  ;;  %vm1404_vm15 = vweird.f32 %v1716_v18  ;;  %vm2399_vm1 = vcmp.eq.f32.partialorder %v1407_v28, 8.507059e+37 }
 0x143   :  { %v862_v17 = vpop.f32.mrf.mxu3  ;;  %v1391_v19 = vsel %vm1390_vm10, %v1710_v41, %v1387_v9  ;;  %v1162_v23 = vadd.f32 %v2328_v57, %v1161_v13  ;;  %v959_v39 = vld [vmem:[#allocation2 + $0x30] sm:$0xff]  ;;  %v2390_v41 = vadd.f32 1.0, %v1718_v35  ;;  %1723 = vpow2.f32 %v1650_v38  ;;  %vm1405_vm2 = vmor %vm1403_vm14, %vm1404_vm15 }
 0x144   :  { %v863_v22 = vadd.f32 %v862_v17, %v773_v15  ;;  %v1396_v11 = vsel %vm2333_vm7, %v1395_v10, %v1391_v19  ;;  %v1400_v37 = vsub.f32 1.0, %v1399_v26  ;;  %v2386_v40 = vpop.eup %1719  ;;  %v1635_v42 = vmul.f32 -1.442695, %v959_v39  ;;  %925 = vst.msk [vmem:[#allocation2 + $0x38] sm:$0xff] %vm18_vm0, %v892_v31 }
 0x145   :  { %1611 = vst.msk [vmem:[%s2889_s3 + $0x90] sm:$0xff] %vm18_vm0, %v1396_v11  ;;  %v736_v33 = vpop.f32.mrf.mxu0  ;;  %v1166_v36 = vsel %vm2376_vm13, %v2328_v57, %v1162_v23  ;;  %v1722_v44 = vpop.eup %1721  ;;  %v1174_v46 = vmul.f32 %v2386_v40, %v2345_v5  ;;  %v1184_v53 = vand.u32 2147483648, %v2345_v5  ;;  %1725 = vrcp.f32 %v2390_v41 }
 0x146   :  { %v908_v32 = vadd.f32 %v863_v22, %v650_v16  ;;  %v825_v34 = vpop.f32.mrf.mxu1  ;;  %v1171_v30 = vsel %vm2359_vm12, %v1170_v25, %v1166_v36  ;;  %v1401_v45 = vmul.f32 %v1716_v18, %v1400_v37  ;;  %v2407_v56 = vadd.f32 1.0, %v1722_v44 }
 0x147   :  { %v826_v43 = vadd.f32 %v825_v34, %v736_v33  ;;  %1596 = vst.msk [vmem:[%s2889_s3 + $0x18] sm:$0xff] %vm18_vm0, %v1171_v30  ;;  %v1175_v55 = vsub.f32 1.0, %v1174_v46  ;;  %1727 = vpow2.f32 %v1635_v42  ;;  %v1410_v59 = vor.u32 1.1754944e-38, %v1409_v24  ;;  %v636_v33 = vld [vmem:[#allocation2 + $0x48] sm:$0xff] }
 0x148   :  { %941 = vst.msk [vmem:[#allocation2 + $0xb8] sm:$0xff] %vm18_vm0, %v908_v32  ;;  %v1402_v54 = vadd.f32 %v1716_v18, %v1401_v45  ;;  %vm1179_vm3 = vweird.f32 %v2386_v40  ;;  %v975_v60 = vld [vmem:[#allocation2 + $0xb0] sm:$0xff]  ;;  %v1422_v2 = vand.u32 2147483647, %v2390_v41  ;;  %1729 = vrcp.f32 %v2407_v56 }
 0x149   :  { %v893_v61 = vadd.f32 %v826_v43, %v635_v47  ;;  %v1176_v1 = vmul.f32 %v2386_v40, %v1175_v55  ;;  %vm1178_vm4 = vweird.f32 %v2345_v5  ;;  %v1651_v49 = vmul.f32 -1.442695, %v975_v60  ;;  %v1724_v6 = vpop.eup %1723 }
 0x14a   :  { %v776_v57 = vpop.f32.mrf.mxu2  ;;  %v1406_v0 = vsel %vm1405_vm2, %v1716_v18, %v1402_v54  ;;  %vm2425_vm5 = vcmp.eq.f32.partialorder %v1182_v50, 8.507059e+37  ;;  %v1185_v8 = vor.u32 1.1754944e-38, %v1184_v53  ;;  %vm1180_vm6 = vmor %vm1178_vm4, %vm1179_vm3  ;;  %vm1418_vm7 = vweird.f32 %v2390_v41 }
 0x14b   :  { %v865_v58 = vpop.f32.mrf.mxu3  ;;  %v1411_v51 = vsel %vm2399_vm1, %v1410_v59, %v1406_v0  ;;  %926 = vst.msk [vmem:[#allocation2 + $0x40] sm:$0xff] %vm18_vm0, %v893_v61  ;;  %v1177_v7 = vadd.f32 %v2386_v40, %v1176_v1  ;;  %v960_v9 = vld [vmem:[#allocation2 + $0x38] sm:$0xff]  ;;  %v1726_v10 = vpop.eup %1725  ;;  %v1424_v13 = vand.u32 2147483648, %v2390_v41  ;;  %v2433_v12 = vadd.f32 1.0, %v1724_v6 }
 0x14c   :  { %v866_v63 = vadd.f32 %v865_v58, %v776_v57  ;;  %1612 = vst.msk [vmem:[%s2889_s3 + $0x98] sm:$0xff] %vm18_vm0, %v1411_v51  ;;  %1731 = vpow2.f32 %v1651_v49  ;;  %v1414_v16 = vmul.f32 %v1726_v10, %v2390_v41  ;;  %vm2437_vm8 = vcmp.eq.f32.partialorder %v1422_v2, 8.507059e+37 }
 0x14d   :  { %v738_v3 = vpop.f32.mrf.mxu0  ;;  %v1728_v14 = vpop.eup %1727  ;;  %v1181_v15 = vsel %vm1180_vm6, %v2386_v40, %v1177_v7  ;;  %v1636_v18 = vmul.f32 -1.442695, %v960_v9  ;;  %v1197_v21 = vand.u32 2147483647, %v2407_v56  ;;  %v1199_v22 = vand.u32 2147483648, %v2407_v56 }
 0x14e   :  { %v827_v4 = vpop.f32.mrf.mxu1  ;;  %v909_v5 = vadd.f32 %v866_v63, %v651_v62  ;;  %v1186_v20 = vsel %vm2425_vm5, %v1185_v8, %v1181_v15  ;;  %1733 = vrcp.f32 %v2433_v12  ;;  %v2447_v11 = vpop.eup %1729  ;;  %v1415_v23 = vsub.f32 1.0, %v1414_v16 }
 0x14f   :  { %v976_v19 = vld [vmem:[#allocation2 + $0xb8] sm:$0xff]  ;;  %1597 = vst.msk [vmem:[%s2889_s3 + $0x20] sm:$0xff] %vm18_vm0, %v1186_v20  ;;  %v2453_v25 = vadd.f32 1.0, %v1728_v14  ;;  %1735 = vpow2.f32 %v1636_v18  ;;  %v828_v26 = vadd.f32 %v827_v4, %v738_v3  ;;  %v1425_v29 = vor.u32 1.1754944e-38, %v1424_v13  ;;  %v652_v4 = vld [vmem:[#allocation2 + $0xc8] sm:$0xff] }
 0x150   :  { %942 = vst.msk [vmem:[#allocation2 + $0xc0] sm:$0xff] %vm18_vm0, %v909_v5  ;;  %v1189_v31 = vmul.f32 %v2447_v11, %v2407_v56  ;;  %vm1193_vm9 = vweird.f32 %v2407_v56  ;;  %v1652_v32 = vmul.f32 -1.442695, %v976_v19  ;;  %v1416_v34 = vmul.f32 %v1726_v10, %v1415_v23 }
 0x151   :  { %vm1419_vm10 = vweird.f32 %v1726_v10  ;;  %v1437_v35 = vand.u32 2147483647, %v2433_v12  ;;  %1737 = vrcp.f32 %v2453_v25  ;;  %vm2460_vm11 = vcmp.eq.f32.partialorder %v1197_v21, 8.507059e+37 }
 0x152   :  { %v778_v27 = vpop.f32.mrf.mxu2  ;;  %v961_v36 = vld [vmem:[#allocation2 + $0x40] sm:$0xff]  ;;  %v1732_v37 = vpop.eup %1731  ;;  %v1190_v24 = vsub.f32 1.0, %v1189_v31  ;;  %v1200_v39 = vor.u32 1.1754944e-38, %v1199_v22  ;;  %1739 = vpow2.f32 %v1652_v32  ;;  %v1417_v42 = vadd.f32 %v1726_v10, %v1416_v34  ;;  %vm1420_vm12 = vmor %vm1418_vm7, %vm1419_vm10 }
 0x153   :  { %v867_v28 = vpop.f32.mrf.mxu3  ;;  %v2468_v43 = vadd.f32 1.0, %v1732_v37  ;;  %v1637_v44 = vmul.f32 -1.442695, %v961_v36  ;;  %v894_v45 = vadd.f32 %v828_v26, %v636_v33  ;;  %vm1194_vm13 = vweird.f32 %v2447_v11 }
 0x154   :  { %v1734_v46 = vpop.eup %1733  ;;  %v1191_v47 = vmul.f32 %v2447_v11, %v1190_v24  ;;  %vm1433_vm14 = vweird.f32 %v2433_v12  ;;  %v1439_v48 = vand.u32 2147483648, %v2433_v12  ;;  %v1421_v53 = vsel %vm1420_vm12, %v1726_v10, %v1417_v42  ;;  %vm1195_vm1 = vmor %vm1193_vm9, %vm1194_vm13 }
 0x155   :  { %v2464_v40 = vpop.f32.mrf.mxu0  ;;  %v1736_v50 = vpop.eup %1735  ;;  %v1429_v54 = vmul.f32 %v1734_v46, %v2433_v12  ;;  %vm2478_vm15 = vcmp.eq.f32.partialorder %v1437_v35, 8.507059e+37  ;;  %1741 = vrcp.f32 %v2468_v43  ;;  %927 = vst.msk [vmem:[#allocation2 + $0x48] sm:$0xff] %vm18_vm0, %v894_v45  ;;  %v1426_v41 = vsel %vm2437_vm8, %v1425_v29, %v1421_v53  ;;  %v637_v53 = vld [vmem:[#allocation2 + $0x50] sm:$0xff] }
 0x156   :  { %v2466_v30 = vpop.f32.mrf.mxu1  ;;  %v1192_v57 = vadd.f32 %v2447_v11, %v1191_v47  ;;  %v1212_v58 = vand.u32 2147483647, %v2453_v25  ;;  %v1214_v59 = vand.u32 2147483648, %v2453_v25  ;;  %1613 = vst.msk [vmem:[%s2889_s3 + $0xa0] sm:$0xff] %vm18_vm0, %v1426_v41  ;;  %v2499_v62 = vadd.f32 1.0, %v1736_v50 }
 0x157   :  { %v2489_v60 = vpop.eup %1737  ;;  %v1430_v61 = vsub.f32 1.0, %v1429_v54  ;;  %1743 = vpow2.f32 %v1637_v44  ;;  %v868_v63 = vadd.f32 %v867_v28, %v778_v27  ;;  %v1440_v49 = vor.u32 1.1754944e-38, %v1439_v48  ;;  %v977_v56 = vld [vmem:[#allocation2 + $0xc0] sm:$0xff] }
 0x158   :  { %v1740_v2 = vpop.eup %1739  ;;  %v1196_v51 = vsel %vm1195_vm1, %v2447_v11, %v1192_v57  ;;  %v1204_v3 = vmul.f32 %v2489_v60, %v2453_v25  ;;  %vm1208_vm2 = vweird.f32 %v2453_v25  ;;  %vm1434_vm3 = vweird.f32 %v1734_v46 }
 0x159   :  { %v1201_v6 = vsel %vm2460_vm11, %v1200_v39, %v1196_v51  ;;  %v1431_v7 = vmul.f32 %v1734_v46, %v1430_v61  ;;  %1745 = vrcp.f32 %v2499_v62  ;;  %vm2516_vm4 = vcmp.eq.f32.partialorder %v1212_v58, 8.507059e+37  ;;  %vm1435_vm5 = vmor %vm1433_vm14, %vm1434_vm3 }
 0x15a   :  { %v2501_v0 = vpop.f32.mrf.mxu2  ;;  %1598 = vst.msk [vmem:[%s2889_s3 + $0x28] sm:$0xff] %vm18_vm0, %v1201_v6  ;;  %v1205_v52 = vsub.f32 1.0, %v1204_v3  ;;  %v1215_v9 = vor.u32 1.1754944e-38, %v1214_v59  ;;  %v1452_v5 = vand.u32 2147483647, %v2468_v43  ;;  %v2525_v16 = vadd.f32 1.0, %v1740_v2 }
 0x15b   :  { %v2503_v1 = vpop.f32.mrf.mxu3  ;;  %v1742_v14 = vpop.eup %1741  ;;  %v1432_v15 = vadd.f32 %v1734_v46, %v1431_v7  ;;  %v1653_v17 = vmul.f32 -1.442695, %v977_v56  ;;  %v910_v18 = vadd.f32 %v868_v63, %v652_v4  ;;  %vm1209_vm6 = vweird.f32 %v2489_v60  ;;  %v653_v59 = vld [vmem:[#allocation2 + $0xd0] sm:$0xff] }
 0x15c   :  { %v1206_v19 = vmul.f32 %v2489_v60, %v1205_v52  ;;  %v1444_v20 = vmul.f32 %v1742_v14, %v2468_v43  ;;  %vm1448_vm7 = vweird.f32 %v2468_v43  ;;  %v962_v21 = vld [vmem:[#allocation2 + $0x48] sm:$0xff]  ;;  %v1454_v23 = vand.u32 2147483648, %v2468_v43  ;;  %vm1210_vm8 = vmor %vm1208_vm2, %vm1209_vm6 }
 0x15d   :  { %v2521_v10 = vpop.f32.mrf.mxu0  ;;  %v1744_v22 = vpop.eup %1743  ;;  %v1436_v11 = vsel %vm1435_vm5, %v1734_v46, %v1432_v15  ;;  %v1227_v26 = vand.u32 2147483647, %v2499_v62  ;;  %1747 = vrcp.f32 %v2525_v16  ;;  %943 = vst.msk [vmem:[#allocation2 + $0xc8] sm:$0xff] %vm18_vm0, %v910_v18  ;;  %v1229_v29 = vand.u32 2147483648, %v2499_v62 }
 0x15e   :  { %v2523_v13 = vpop.f32.mrf.mxu1  ;;  %v1441_v12 = vsel %vm2478_vm15, %v1440_v49, %v1436_v11  ;;  %v1207_v27 = vadd.f32 %v2489_v60, %v1206_v19  ;;  %v1445_v28 = vsub.f32 1.0, %v1444_v20  ;;  %vm2551_vm9 = vcmp.eq.f32.partialorder %v1452_v5, 8.507059e+37  ;;  %v638_v5 = vld [vmem:[#allocation2 + $0x58] sm:$0xff] }
 0x15f   :  { %v2541_v31 = vpop.eup %1745  ;;  %1614 = vst.msk [vmem:[%s2889_s3 + $0xa8] sm:$0xff] %vm18_vm0, %v1441_v12  ;;  %v2555_v33 = vadd.f32 1.0, %v1744_v22  ;;  %1749 = vpow2.f32 %v1653_v17  ;;  %v1638_v34 = vmul.f32 -1.442695, %v962_v21  ;;  %vm1449_vm10 = vweird.f32 %v1742_v14 }
 0x160   :  { %v1211_v37 = vsel %vm1210_vm8, %v2489_v60, %v1207_v27  ;;  %v1446_v24 = vmul.f32 %v1742_v14, %v1445_v28  ;;  %v1219_v38 = vmul.f32 %v2541_v31, %v2499_v62  ;;  %v1455_v39 = vor.u32 1.1754944e-38, %v1454_v23  ;;  %vm1450_vm13 = vmor %vm1448_vm7, %vm1449_vm10  ;;  %v639_v27 = vld [vmem:[#allocation2 + $0x60] sm:$0xff] }
 0x161   :  { %v1216_v25 = vsel %vm2516_vm4, %v1215_v9, %v1211_v37  ;;  %vm1223_vm11 = vweird.f32 %v2499_v62  ;;  %1751 = vrcp.f32 %v2555_v33  ;;  %vm2568_vm12 = vcmp.eq.f32.partialorder %v1227_v26, 8.507059e+37 }
 0x162   :  { %v783_v35 = vpop.f32.mrf.mxu2  ;;  %1599 = vst.msk [vmem:[%s2889_s3 + $0x30] sm:$0xff] %vm18_vm0, %v1216_v25  ;;  %v1447_v42 = vadd.f32 %v1742_v14, %v1446_v24  ;;  %v1220_v44 = vsub.f32 1.0, %v1219_v38  ;;  %v1230_v46 = vor.u32 1.1754944e-38, %v1229_v29  ;;  %vm1463_vm14 = vweird.f32 %v2525_v16 }
 0x163   :  { %v872_v36 = vpop.f32.mrf.mxu3  ;;  %v2572_v50 = vpop.eup %1747  ;;  %1753 = vpow2.f32 %v1638_v34  ;;  %v831_v54 = vadd.f32 %v2466_v30, %v2464_v40  ;;  %v871_v55 = vadd.f32 %v2503_v1, %v2501_v0  ;;  %vm1224_vm15 = vweird.f32 %v2541_v31 }
 0x164   :  { %v1451_v41 = vsel %vm1450_vm13, %v1742_v14, %v1447_v42  ;;  %v1221_v57 = vmul.f32 %v2541_v31, %v1220_v44  ;;  %v1459_v58 = vmul.f32 %v2572_v50, %v2525_v16  ;;  %v978_v43 = vld [vmem:[#allocation2 + $0xc8] sm:$0xff]  ;;  %v1467_v63 = vand.u32 2147483647, %v2525_v16  ;;  %vm2602_vm1 = vmor %vm1223_vm11, %vm1224_vm15  ;;  %v654_v14 = vld [vmem:[#allocation2 + $0xd8] sm:$0xff] }
 0x165   :  { %v746_v47 = vpop.f32.mrf.mxu0  ;;  %v1750_v60 = vpop.eup %1749  ;;  %v1456_v61 = vsel %vm2551_vm9, %v1455_v39, %v1451_v41  ;;  %v1469_v40 = vand.u32 2147483648, %v2525_v16  ;;  %v1654_v30 = vmul.f32 -1.442695, %v978_v43  ;;  %v895_v51 = vadd.f32 %v831_v54, %v637_v53  ;;  %v655_v44 = vld [vmem:[#allocation2 + $0xe0] sm:$0xff] }
 0x166   :  { %v835_v48 = vpop.f32.mrf.mxu1  ;;  %1615 = vst.msk [vmem:[%s2889_s3 + $0xb0] sm:$0xff] %vm18_vm0, %v1456_v61  ;;  %v1222_v0 = vadd.f32 %v2541_v31, %v1221_v57  ;;  %v1460_v1 = vsub.f32 1.0, %v1459_v58  ;;  %v2594_v2 = vadd.f32 1.0, %v1750_v60  ;;  %v911_v56 = vadd.f32 %v871_v55, %v653_v59  ;;  %v640_v58 = vld [vmem:[#allocation2 + $0x68] sm:$0xff] }
 0x167   :  { %v2596_v49 = vpop.eup %1751  ;;  %1755 = vpow2.f32 %v1654_v30  ;;  %v833_v4 = vadd.f32 %v2523_v13, %v2521_v10  ;;  %v873_v6 = vadd.f32 %v872_v36, %v783_v35  ;;  %vm1464_vm2 = vweird.f32 %v2572_v50  ;;  %928 = vst.msk [vmem:[#allocation2 + $0x50] sm:$0xff] %vm18_vm0, %v895_v51  ;;  %v656_v51 = vld [vmem:[#allocation2 + $0xe8] sm:$0xff] }
 0x168   :  { %v1226_v8 = vsel %vm2602_vm1, %v2541_v31, %v1222_v0  ;;  %v1461_v9 = vmul.f32 %v2572_v50, %v1460_v1  ;;  %v1234_v62 = vmul.f32 %v2596_v49, %v2555_v33  ;;  %vm2618_vm3 = vcmp.eq.f32.partialorder %v1467_v63, 8.507059e+37  ;;  %944 = vst.msk [vmem:[#allocation2 + $0xd0] sm:$0xff] %vm18_vm0, %v911_v56  ;;  %vm1465_vm4 = vmor %vm1463_vm14, %vm1464_vm2 }
 0x169   :  { %v1754_v15 = vpop.eup %1753  ;;  %v1231_v10 = vsel %vm2568_vm12, %v1230_v46, %v1226_v8  ;;  %v1470_v17 = vor.u32 1.1754944e-38, %v1469_v40  ;;  %1757 = vrcp.f32 %v2594_v2  ;;  %v1242_v20 = vand.u32 2147483647, %v2555_v33 }
 0x16a   :  { %v786_v7 = vpop.f32.mrf.mxu2  ;;  %1600 = vst.msk [vmem:[%s2889_s3 + $0x38] sm:$0xff] %vm18_vm0, %v1231_v10  ;;  %v1462_v18 = vadd.f32 %v2572_v50, %v1461_v9  ;;  %v1235_v19 = vsub.f32 1.0, %v1234_v62  ;;  %v2630_v21 = vadd.f32 1.0, %v1754_v15  ;;  %v1244_v23 = vand.u32 2147483648, %v2555_v33 }
 0x16b   :  { %v875_v52 = vpop.f32.mrf.mxu3  ;;  %v896_v26 = vadd.f32 %v833_v4, %v638_v5  ;;  %v912_v12 = vadd.f32 %v873_v6, %v654_v14  ;;  %v836_v28 = vadd.f32 %v835_v48, %v746_v47  ;;  %vm1239_vm5 = vweird.f32 %v2596_v49 }
 0x16c   :  { %v1466_v29 = vsel %vm1465_vm4, %v2572_v50, %v1462_v18  ;;  %v1236_v31 = vmul.f32 %v2596_v49, %v1235_v19  ;;  %1759 = vrcp.f32 %v2630_v21  ;;  %vm1238_vm6 = vweird.f32 %v2555_v33 }
 0x16d   :  { %v748_v22 = vpop.f32.mrf.mxu0  ;;  %v1756_v32 = vpop.eup %1755  ;;  %v1471_v34 = vsel %vm2618_vm3, %v1470_v17, %v1466_v29  ;;  %v1482_v16 = vand.u32 2147483647, %v2594_v2  ;;  %929 = vst.msk [vmem:[#allocation2 + $0x58] sm:$0xff] %vm18_vm0, %v896_v26  ;;  %v897_v37 = vadd.f32 %v836_v28, %v639_v27  ;;  %v876_v24 = vadd.f32 %v875_v52, %v786_v7  ;;  %vm2655_vm7 = vmor %vm1238_vm6, %vm1239_vm5  ;;  %v641_v52 = vld [vmem:[#allocation2 + $0x70] sm:$0xff] }
 0x16e   :  { %v837_v11 = vpop.f32.mrf.mxu1  ;;  %1616 = vst.msk [vmem:[%s2889_s3 + $0xb8] sm:$0xff] %vm18_vm0, %v1471_v34  ;;  %v1237_v35 = vadd.f32 %v2596_v49, %v1236_v31  ;;  %v2651_v36 = vadd.f32 1.0, %v1756_v32  ;;  %vm1243_vm8 = vcmp.eq.f32.partialorder %v1242_v20, 8.507059e+37  ;;  %v1245_v33 = vor.u32 1.1754944e-38, %v1244_v23  ;;  %v963_v42 = vld [vmem:[#allocation2 + $0x50] sm:$0xff] }
 0x16f   :  { %v2653_v38 = vpop.eup %1757  ;;  %vm1478_vm9 = vweird.f32 %v2594_v2  ;;  %v1484_v39 = vand.u32 2147483648, %v2594_v2  ;;  %945 = vst.msk [vmem:[#allocation2 + $0xd8] sm:$0xff] %vm18_vm0, %v912_v12  ;;  %v979_v50 = vld [vmem:[#allocation2 + $0xd0] sm:$0xff]  ;;  %v838_v53 = vadd.f32 %v837_v11, %v748_v22  ;;  %vm2669_vm10 = vcmp.eq.f32.partialorder %v1482_v16, 8.507059e+37 }
 0x170   :  { %v1241_v47 = vsel %vm2655_vm7, %v2596_v49, %v1237_v35  ;;  %v1474_v48 = vmul.f32 %v2653_v38, %v2594_v2  ;;  %1761 = vrcp.f32 %v2651_v36  ;;  %930 = vst.msk [vmem:[#allocation2 + $0x60] sm:$0xff] %vm18_vm0, %v897_v37  ;;  %v1257_v41 = vand.u32 2147483647, %v2630_v21  ;;  %v657_v28 = vld [vmem:[#allocation2 + $0xf0] sm:$0xff] }
 0x171   :  { %v1246_v54 = vsel %vm1243_vm8, %v1245_v33, %v1241_v47  ;;  %v1259_v57 = vand.u32 2147483648, %v2630_v21  ;;  %v1639_v60 = vmul.f32 -1.442695, %v963_v42  ;;  %v1655_v61 = vmul.f32 -1.442695, %v979_v50 }
 0x172   :  { %v788_v45 = vpop.f32.mrf.mxu2  ;;  %v2675_v43 = vpop.eup %1759  ;;  %1601 = vst.msk [vmem:[%s2889_s3 + $0x40] sm:$0xff] %vm18_vm0, %v1246_v54  ;;  %v1475_v59 = vsub.f32 1.0, %v1474_v48  ;;  %v913_v63 = vadd.f32 %v876_v24, %v655_v44  ;;  %vm1479_vm11 = vweird.f32 %v2653_v38  ;;  %v1485_v0 = vor.u32 1.1754944e-38, %v1484_v39 }
 0x173   :  { %v877_v46 = vpop.f32.mrf.mxu3  ;;  %v1249_v1 = vmul.f32 %v2675_v43, %v2630_v21  ;;  %vm1253_vm12 = vweird.f32 %v2630_v21  ;;  %1763 = vpow2.f32 %v1639_v60  ;;  %v898_v56 = vadd.f32 %v838_v53, %v640_v58  ;;  %vm1480_vm14 = vmor %vm1478_vm9, %vm1479_vm11 }
 0x174   :  { %v1476_v49 = vmul.f32 %v2653_v38, %v1475_v59  ;;  %v964_v3 = vld [vmem:[#allocation2 + $0x58] sm:$0xff]  ;;  %946 = vst.msk [vmem:[#allocation2 + $0xe0] sm:$0xff] %vm18_vm0, %v913_v63  ;;  %v878_v4 = vadd.f32 %v877_v46, %v788_v45  ;;  %1765 = vpow2.f32 %v1655_v61  ;;  %vm2688_vm13 = vcmp.eq.f32.partialorder %v1257_v41, 8.507059e+37 }
 0x175   :  { %v751_v40 = vpop.f32.mrf.mxu0  ;;  %v1250_v6 = vsub.f32 1.0, %v1249_v1  ;;  %v1640_v7 = vmul.f32 -1.442695, %v964_v3  ;;  %v1260_v14 = vor.u32 1.1754944e-38, %v1259_v57  ;;  %931 = vst.msk [vmem:[#allocation2 + $0x68] sm:$0xff] %vm18_vm0, %v898_v56  ;;  %vm1254_vm15 = vweird.f32 %v2675_v43 }
 0x176   :  { %v840_v30 = vpop.f32.mrf.mxu1  ;;  %v1762_v9 = vpop.eup %1761  ;;  %v1477_v62 = vadd.f32 %v2653_v38, %v1476_v49  ;;  %v980_v15 = vld [vmem:[#allocation2 + $0xd8] sm:$0xff]  ;;  %v914_v10 = vadd.f32 %v878_v4, %v656_v51  ;;  %vm1255_vm1 = vmor %vm1253_vm12, %vm1254_vm15  ;;  %v1497_v32 = vand.u32 2147483647, %v2651_v36  ;;  %v1499_v34 = vand.u32 2147483648, %v2651_v36 }
 0x177   :  { %v841_v8 = vadd.f32 %v840_v30, %v751_v40  ;;  %v1251_v13 = vmul.f32 %v2675_v43, %v1250_v6  ;;  %v1489_v17 = vmul.f32 %v1762_v9, %v2651_v36  ;;  %1767 = vpow2.f32 %v1640_v7  ;;  %v965_v18 = vld [vmem:[#allocation2 + $0x60] sm:$0xff] }
 0x178   :  { %v1481_v22 = vsel %vm1480_vm14, %v2653_v38, %v1477_v62  ;;  %v1656_v11 = vmul.f32 -1.442695, %v980_v15  ;;  %v1641_v23 = vmul.f32 -1.442695, %v965_v18  ;;  %947 = vst.msk [vmem:[#allocation2 + $0xe8] sm:$0xff] %vm18_vm0, %v914_v10  ;;  %vm1494_vm2 = vweird.f32 %v1762_v9 }
 0x179   :  { %v899_v26 = vadd.f32 %v841_v8, %v641_v52  ;;  %v1486_v2 = vsel %vm2669_vm10, %v1485_v0, %v1481_v22  ;;  %v1252_v12 = vadd.f32 %v2675_v43, %v1251_v13  ;;  %v1490_v27 = vsub.f32 1.0, %v1489_v17  ;;  %v1764_v31 = vpop.eup %1763 }
 0x17a   :  { %v791_v19 = vpop.f32.mrf.mxu2  ;;  %1617 = vst.msk [vmem:[%s2889_s3 + $0xc0] sm:$0xff] %vm18_vm0, %v1486_v2  ;;  %1769 = vpow2.f32 %v1656_v11  ;;  %v1766_v16 = vpop.eup %1765  ;;  %v2716_v24 = vadd.f32 1.0, %v1764_v31  ;;  %vm1493_vm3 = vweird.f32 %v2651_v36  ;;  %v1500_v45 = vor.u32 1.1754944e-38, %v1499_v34 }
 0x17b   :  { %v880_v20 = vpop.f32.mrf.mxu3  ;;  %v1256_v35 = vsel %vm1255_vm1, %v2675_v43, %v1252_v12  ;;  %v1491_v37 = vmul.f32 %v1762_v9, %v1490_v27  ;;  %1771 = vpow2.f32 %v1641_v23  ;;  %v981_v38 = vld [vmem:[#allocation2 + $0xe0] sm:$0xff]  ;;  %932 = vst.msk [vmem:[#allocation2 + $0x70] sm:$0xff] %vm18_vm0, %v899_v26  ;;  %v2721_v25 = vadd.f32 1.0, %v1766_v16  ;;  %vm1495_vm4 = vmor %vm1493_vm3, %vm1494_vm2 }
 0x17c   :  { %v881_v29 = vadd.f32 %v880_v20, %v791_v19  ;;  %v1261_v21 = vsel %vm2688_vm13, %v1260_v14, %v1256_v35  ;;  %v1657_v33 = vmul.f32 -1.442695, %v981_v38  ;;  %1773 = vrcp.f32 %v2716_v24  ;;  %v966_v59 = vld [vmem:[#allocation2 + $0x68] sm:$0xff]  ;;  %v642_v38 = vld [vmem:[#allocation2 + $0x78] sm:$0xff] }
 0x17d   :  { %v1768_v42 = vpop.eup %1767  ;;  %1602 = vst.msk [vmem:[%s2889_s3 + $0x48] sm:$0xff] %vm18_vm0, %v1261_v21  ;;  %v1492_v44 = vadd.f32 %v1762_v9, %v1491_v37  ;;  %1775 = vrcp.f32 %v2721_v25  ;;  %vm1498_vm5 = vcmp.eq.f32.partialorder %v1497_v32, 8.507059e+37  ;;  %v1272_v53 = vand.u32 2147483647, %v2716_v24  ;;  %v753_v51 = vpop.f32.mrf.mxu0 }
 0x17e   :  { %v915_v39 = vadd.f32 %v881_v29, %v657_v28  ;;  %v2732_v47 = vadd.f32 1.0, %v1768_v42  ;;  %1777 = vpow2.f32 %v1657_v33  ;;  %v1274_v36 = vand.u32 2147483648, %v2716_v24  ;;  %v842_v49 = vpop.f32.mrf.mxu1 }
 0x17f   :  { %v1496_v46 = vsel %vm1495_vm4, %v1762_v9, %v1492_v44  ;;  %v1512_v55 = vand.u32 2147483647, %v2721_v25  ;;  %v1514_v41 = vand.u32 2147483648, %v2721_v25  ;;  %vm1268_vm6 = vweird.f32 %v2716_v24  ;;  %v982_v60 = vld [vmem:[#allocation2 + $0xe8] sm:$0xff] }
 0x180   :  { %948 = vst.msk [vmem:[#allocation2 + $0xf0] sm:$0xff] %vm18_vm0, %v915_v39  ;;  %v1770_v48 = vpop.eup %1769  ;;  %v1501_v50 = vsel %vm1498_vm5, %v1500_v45, %v1496_v46  ;;  %1779 = vrcp.f32 %v2732_v47  ;;  %vm1508_vm7 = vweird.f32 %v2721_v25  ;;  %vm2750_vm8 = vcmp.eq.f32.partialorder %v1272_v53, 8.507059e+37 }
 0x181   :  { %v1772_v54 = vpop.eup %1771  ;;  %1618 = vst.msk [vmem:[%s2889_s3 + $0xc8] sm:$0xff] %vm18_vm0, %v1501_v50  ;;  %v2743_v57 = vadd.f32 1.0, %v1770_v48  ;;  %v1287_v30 = vand.u32 2147483647, %v2732_v47  ;;  %v1289_v0 = vand.u32 2147483648, %v2732_v47  ;;  %v1275_v3 = vor.u32 1.1754944e-38, %v1274_v36 }
 0x182   :  { %v2745_v58 = vadd.f32 1.0, %v1772_v54  ;;  %v1774_v43 = vpop.eup %1773  ;;  %v967_v1 = vld [vmem:[#allocation2 + $0x70] sm:$0xff]  ;;  %vm2758_vm9 = vcmp.eq.f32.partialorder %v1512_v55, 8.507059e+37  ;;  %v1515_v6 = vor.u32 1.1754944e-38, %v1514_v41  ;;  %vm1283_vm10 = vweird.f32 %v2732_v47  ;;  %v793_v21 = vpop.f32.mrf.mxu2  ;;  %v658_v54 = vld [vmem:[#allocation2 + $0xf8] sm:$0xff] }
 0x183   :  { %v1776_v61 = vpop.eup %1775  ;;  %v1264_v63 = vmul.f32 %v1774_v43, %v2716_v24  ;;  %1781 = vrcp.f32 %v2743_v57  ;;  %v1642_v8 = vmul.f32 -1.442695, %v966_v59  ;;  %v1658_v9 = vmul.f32 -1.442695, %v982_v60  ;;  %v882_v33 = vpop.f32.mrf.mxu3 }
 0x184   :  { %v1504_v56 = vmul.f32 %v1776_v61, %v2721_v25  ;;  %v1778_v7 = vpop.eup %1777  ;;  %1783 = vrcp.f32 %v2745_v58  ;;  %vm1269_vm11 = vweird.f32 %v1774_v43  ;;  %v1643_v14 = vmul.f32 -1.442695, %v967_v1 }
 0x185   :  { %v1265_v52 = vsub.f32 1.0, %v1264_v63  ;;  %v843_v15 = vadd.f32 %v842_v49, %v753_v51  ;;  %vm1509_vm12 = vweird.f32 %v1776_v61  ;;  %vm2765_vm13 = vcmp.eq.f32.partialorder %v1287_v30, 8.507059e+37  ;;  %vm1270_vm15 = vmor %vm1268_vm6, %vm1269_vm11 }
 0x186   :  { %v1780_v62 = vpop.eup %1779  ;;  %v1505_v5 = vsub.f32 1.0, %v1504_v56  ;;  %v1290_v18 = vor.u32 1.1754944e-38, %v1289_v0  ;;  %vm1523_vm14 = vweird.f32 %v2743_v57  ;;  %v1527_v20 = vand.u32 2147483647, %v2743_v57  ;;  %vm1510_vm2 = vmor %vm1508_vm7, %vm1509_vm12 }
 0x187   :  { %v1266_v10 = vmul.f32 %v1774_v43, %v1265_v52  ;;  %v1279_v13 = vmul.f32 %v1780_v62, %v2732_v47  ;;  %v2771_v22 = vadd.f32 1.0, %v1778_v7  ;;  %v1529_v2 = vand.u32 2147483648, %v2743_v57  ;;  %v983_v28 = vld [vmem:[#allocation2 + $0xf0] sm:$0xff] }
 0x188   :  { %v1506_v19 = vmul.f32 %v1776_v61, %v1505_v5  ;;  %1785 = vpow2.f32 %v1642_v8  ;;  %vm1298_vm1 = vweird.f32 %v2745_v58  ;;  %vm1284_vm3 = vweird.f32 %v1780_v62 }
 0x189   :  { %v1782_v11 = vpop.eup %1781  ;;  %v1267_v23 = vadd.f32 %v1774_v43, %v1266_v10  ;;  %v1280_v26 = vsub.f32 1.0, %v1279_v13  ;;  %1787 = vrcp.f32 %v2771_v22  ;;  %v1302_v34 = vand.u32 2147483647, %v2745_v58  ;;  %vm1285_vm4 = vmor %vm1283_vm10, %vm1284_vm3 }
 0x18a   :  { %v1507_v12 = vadd.f32 %v1776_v61, %v1506_v19  ;;  %v1519_v27 = vmul.f32 %v1782_v11, %v2743_v57  ;;  %v1784_v29 = vpop.eup %1783  ;;  %v1304_v42 = vand.u32 2147483648, %v2745_v58  ;;  %v1659_v44 = vmul.f32 -1.442695, %v983_v28 }
 0x18b   :  { %v1271_v31 = vsel %vm1270_vm15, %v1774_v43, %v1267_v23  ;;  %v1281_v32 = vmul.f32 %v1780_v62, %v1280_v26  ;;  %v1294_v24 = vmul.f32 %v1784_v29, %v2745_v58  ;;  %vm1524_vm5 = vweird.f32 %v1782_v11 }
 0x18c   :  { %v1276_v16 = vsel %vm2750_vm8, %v1275_v3, %v1271_v31  ;;  %v1511_v35 = vsel %vm1510_vm2, %v1776_v61, %v1507_v12  ;;  %v1520_v37 = vsub.f32 1.0, %v1519_v27  ;;  %1789 = vpow2.f32 %v1658_v9  ;;  %vm1525_vm7 = vmor %vm1523_vm14, %vm1524_vm5 }
 0x18d   :  { %1603 = vst.msk [vmem:[%s2889_s3 + $0x50] sm:$0xff] %vm18_vm0, %v1276_v16  ;;  %v1516_v25 = vsel %vm2758_vm9, %v1515_v6, %v1511_v35  ;;  %v1282_v39 = vadd.f32 %v1780_v62, %v1281_v32  ;;  %v1295_v46 = vsub.f32 1.0, %v1294_v24  ;;  %1791 = vpow2.f32 %v1643_v14 }
 0x18e   :  { %1619 = vst.msk [vmem:[%s2889_s3 + $0xd0] sm:$0xff] %vm18_vm0, %v1516_v25  ;;  %v1521_v45 = vmul.f32 %v1782_v11, %v1520_v37  ;;  %v1786_v48 = vpop.eup %1785  ;;  %v900_v53 = vadd.f32 %v843_v15, %v642_v38  ;;  %v883_v36 = vadd.f32 %v882_v33, %v793_v21  ;;  %vm1299_vm6 = vweird.f32 %v1784_v29 }
 0x18f   :  { %v1286_v50 = vsel %vm1285_vm4, %v1780_v62, %v1282_v39  ;;  %v1788_v55 = vpop.eup %1787  ;;  %v1296_v59 = vmul.f32 %v1784_v29, %v1295_v46  ;;  %v1530_v47 = vor.u32 1.1754944e-38, %v1529_v2  ;;  %v2811_v61 = vadd.f32 1.0, %v1786_v48  ;;  %vm1300_vm9 = vmor %vm1298_vm1, %vm1299_vm6 }
 0x190   :  { %v1291_v41 = vsel %vm2765_vm13, %v1290_v18, %v1286_v50  ;;  %v1522_v43 = vadd.f32 %v1782_v11, %v1521_v45  ;;  %v1534_v60 = vmul.f32 %v1788_v55, %v2771_v22  ;;  %1793 = vpow2.f32 %v1659_v44  ;;  %933 = vst.msk [vmem:[#allocation2 + $0x78] sm:$0xff] %vm18_vm0, %v900_v53 }
 0x191   :  { %1604 = vst.msk [vmem:[%s2889_s3 + $0x58] sm:$0xff] %vm18_vm0, %v1291_v41  ;;  %vm1528_vm8 = vcmp.eq.f32.partialorder %v1527_v20, 8.507059e+37  ;;  %v1297_v40 = vadd.f32 %v1784_v29, %v1296_v59  ;;  %v916_v30 = vadd.f32 %v883_v36, %v658_v54  ;;  %v1305_v1 = vor.u32 1.1754944e-38, %v1304_v42 }
 0x192   :  { %v1526_v63 = vsel %vm1525_vm7, %v1782_v11, %v1522_v43  ;;  %v1535_v51 = vsub.f32 1.0, %v1534_v60  ;;  %1795 = vrcp.f32 %v2811_v61  ;;  %v1790_v57 = vpop.eup %1789  ;;  %vm1303_vm10 = vcmp.eq.f32.partialorder %v1302_v34, 8.507059e+37 }
 0x193   :  { %v1531_v0 = vsel %vm1528_vm8, %v1530_v47, %v1526_v63  ;;  %v1301_v49 = vsel %vm1300_vm9, %v1784_v29, %v1297_v40  ;;  %v1542_v3 = vand.u32 2147483647, %v2771_v22  ;;  %v1544_v56 = vand.u32 2147483648, %v2771_v22  ;;  %v1792_v4 = vpop.eup %1791  ;;  %949 = vst.msk [vmem:[#allocation2 + $0xf8] sm:$0xff] %vm18_vm0, %v916_v30 }
 0x194   :  { %1620 = vst.msk [vmem:[%s2889_s3 + $0xd8] sm:$0xff] %vm18_vm0, %v1531_v0  ;;  %v1306_v6 = vsel %vm1303_vm10, %v1305_v1, %v1301_v49  ;;  %v1536_v58 = vmul.f32 %v1788_v55, %v1535_v51  ;;  %vm1539_vm11 = vweird.f32 %v1788_v55  ;;  %v1110_v7 = vadd.f32 1.0, %v1790_v57 }
 0x195   :  { %1605 = vst.msk [vmem:[%s2889_s3 + $0x60] sm:$0xff] %vm18_vm0, %v1306_v6  ;;  %v2828_v52 = vadd.f32 1.0, %v1792_v4  ;;  %vm1538_vm12 = vweird.f32 %v2771_v22  ;;  %v1545_v62 = vor.u32 1.1754944e-38, %v1544_v56  ;;  %vm1543_vm14 = vcmp.eq.f32.partialorder %v1542_v3, 8.507059e+37 }
 0x196   :  { %v1794_v8 = vpop.eup %1793  ;;  %v1537_v9 = vadd.f32 %v1788_v55, %v1536_v58  ;;  %1797 = vrcp.f32 %v1110_v7  ;;  %vm1540_vm13 = vmor %vm1538_vm12, %vm1539_vm11  ;;  %v1317_v15 = vand.u32 2147483647, %v2811_v61  ;;  %v1319_v19 = vand.u32 2147483648, %v2811_v61 }
 0x197   :  { %1799 = vrcp.f32 %v2828_v52  ;;  %v2833_v10 = vadd.f32 1.0, %v1794_v8  ;;  %v968_v13 = vld [vmem:[#allocation2 + $0x78] sm:$0xff]  ;;  %vm1313_vm15 = vweird.f32 %v2811_v61  ;;  %vm1553_vm3 = vweird.f32 %v1110_v7 }
 0x198   :  { %v1796_v5 = vpop.eup %1795  ;;  %v1541_v14 = vsel %vm1540_vm13, %v1788_v55, %v1537_v9  ;;  %v1644_v22 = vmul.f32 -1.442695, %v968_v13  ;;  %vm2843_vm1 = vcmp.eq.f32.partialorder %v1317_v15, 8.507059e+37  ;;  %v1320_v27 = vor.u32 1.1754944e-38, %v1319_v19 }
 0x199   :  { %v1546_v17 = vsel %vm1543_vm14, %v1545_v62, %v1541_v14  ;;  %v1309_v18 = vmul.f32 %v1796_v5, %v2811_v61  ;;  %1801 = vrcp.f32 %v2833_v10  ;;  %vm1314_vm2 = vweird.f32 %v1796_v5 }
 0x19a   :  { %1621 = vst.msk [vmem:[%s2889_s3 + $0xe0] sm:$0xff] %vm18_vm0, %v1546_v17  ;;  %v984_v26 = vld [vmem:[#allocation2 + $0xf8] sm:$0xff]  ;;  %v1557_v29 = vand.u32 2147483647, %v1110_v7  ;;  %1803 = vpow2.f32 %v1644_v22  ;;  %v1559_v16 = vand.u32 2147483648, %v1110_v7  ;;  %vm1315_vm4 = vmor %vm1313_vm15, %vm1314_vm2  ;;  %vm1328_vm5 = vweird.f32 %v2828_v52 }
 0x19b   :  { %v1310_v20 = vsub.f32 1.0, %v1309_v18  ;;  %v1660_v35 = vmul.f32 -1.442695, %v984_v26  ;;  %v1332_v38 = vand.u32 2147483647, %v2828_v52  ;;  %v1334_v21 = vand.u32 2147483648, %v2828_v52 }
 0x19c   :  { %v1798_v11 = vpop.eup %1797  ;;  %vm1558_vm8 = vcmp.eq.f32.partialorder %v1557_v29, 8.507059e+37  ;;  %v1560_v46 = vor.u32 1.1754944e-38, %v1559_v16  ;;  %v1572_v36 = vand.u32 2147483647, %v2833_v10  ;;  %v1574_v55 = vand.u32 2147483648, %v2833_v10 }
 0x19d   :  { %v1800_v2 = vpop.eup %1799  ;;  %v1311_v12 = vmul.f32 %v1796_v5, %v1310_v20  ;;  %v1549_v28 = vmul.f32 %v1798_v11, %v1110_v7  ;;  %vm1554_vm6 = vweird.f32 %v1798_v11  ;;  %1805 = vpow2.f32 %v1660_v35 }
 0x19e   :  { %v1324_v31 = vmul.f32 %v1800_v2, %v2828_v52  ;;  %vm1329_vm7 = vweird.f32 %v1800_v2  ;;  %vm1555_vm9 = vmor %vm1553_vm3, %vm1554_vm6  ;;  %v1335_v54 = vor.u32 1.1754944e-38, %v1334_v21  ;;  %vm1333_vm12 = vcmp.eq.f32.partialorder %v1332_v38, 8.507059e+37 }
 0x19f   :  { %v1312_v32 = vadd.f32 %v1796_v5, %v1311_v12  ;;  %v1550_v34 = vsub.f32 1.0, %v1549_v28  ;;  %v1802_v37 = vpop.eup %1801  ;;  %vm1330_vm10 = vmor %vm1328_vm5, %vm1329_vm7  ;;  %vm1568_vm13 = vweird.f32 %v2833_v10  ;;  %v1575_v30 = vor.u32 1.1754944e-38, %v1574_v55 }
 0x1a0   :  { %v1325_v24 = vsub.f32 1.0, %v1324_v31  ;;  %v1564_v39 = vmul.f32 %v1802_v37, %v2833_v10  ;;  %v1804_v50 = vpop.eup %1803  ;;  %vm1569_vm11 = vweird.f32 %v1802_v37  ;;  %vm1573_vm15 = vcmp.eq.f32.partialorder %v1572_v36, 8.507059e+37 }
 0x1a1   :  { %v1316_v33 = vsel %vm1315_vm4, %v1796_v5, %v1312_v32  ;;  %v1551_v25 = vmul.f32 %v1798_v11, %v1550_v34  ;;  %v1096_v59 = vadd.f32 1.0, %v1804_v50  ;;  %vm1570_vm14 = vmor %vm1568_vm13, %vm1569_vm11 }
 0x1a2   :  { %v1321_v42 = vsel %vm2843_vm1, %v1320_v27, %v1316_v33  ;;  %v1326_v44 = vmul.f32 %v1800_v2, %v1325_v24  ;;  %v1565_v48 = vsub.f32 1.0, %v1564_v39 }
 0x1a3   :  { %1606 = vst.msk [vmem:[%s2889_s3 + $0x68] sm:$0xff] %vm18_vm0, %v1321_v42  ;;  %v1552_v45 = vadd.f32 %v1798_v11, %v1551_v25  ;;  %1807 = vrcp.f32 %v1096_v59  ;;  %v1806_v40 = vpop.eup %1805  ;;  %v1347_v4 = vand.u32 2147483647, %v1096_v59  ;;  %v1349_v6 = vand.u32 2147483648, %v1096_v59 }
 0x1a4   :  { %v1327_v53 = vadd.f32 %v1800_v2, %v1326_v44  ;;  %v1566_v43 = vmul.f32 %v1802_v37, %v1565_v48  ;;  %v1112_v1 = vadd.f32 1.0, %v1806_v40  ;;  %vm1343_vm2 = vweird.f32 %v1096_v59 }
 0x1a5   :  { %v1556_v41 = vsel %vm1555_vm9, %v1798_v11, %v1552_v45  ;;  %vm1348_vm4 = vcmp.eq.f32.partialorder %v1347_v4, 8.507059e+37  ;;  %v1350_v9 = vor.u32 1.1754944e-38, %v1349_v6 }
 0x1a6   :  { %v1561_v47 = vsel %vm1558_vm8, %v1560_v46, %v1556_v41  ;;  %v1331_v60 = vsel %vm1330_vm10, %v1800_v2, %v1327_v53  ;;  %v1567_v63 = vadd.f32 %v1802_v37, %v1566_v43  ;;  %1809 = vrcp.f32 %v1112_v1 }
 0x1a7   :  { %1622 = vst.msk [vmem:[%s2889_s3 + $0xe8] sm:$0xff] %vm18_vm0, %v1561_v47  ;;  %v1336_v61 = vsel %vm1333_vm12, %v1335_v54, %v1331_v60  ;;  %v1589_v62 = vand.u32 2147483648, %v1112_v1  ;;  %v1587_v15 = vand.u32 2147483647, %v1112_v1  ;;  %vm1583_vm6 = vweird.f32 %v1112_v1 }
 0x1a8   :  { %1607 = vst.msk [vmem:[%s2889_s3 + $0x70] sm:$0xff] %vm18_vm0, %v1336_v61  ;;  %v1571_v0 = vsel %vm1570_vm14, %v1802_v37, %v1567_v63 }
 0x1a9   :  { %v1576_v51 = vsel %vm1573_vm15, %v1575_v30, %v1571_v0  ;;  %v1808_v57 = vpop.eup %1807  ;;  %v1590_v17 = vor.u32 1.1754944e-38, %v1589_v62  ;;  %vm1588_vm8 = vcmp.eq.f32.partialorder %v1587_v15, 8.507059e+37 }
 0x1aa   :  { %1623 = vst.msk [vmem:[%s2889_s3 + $0xf0] sm:$0xff] %vm18_vm0, %v1576_v51  ;;  %v1339_v49 = vmul.f32 %v1808_v57, %v1096_v59  ;;  %vm1344_vm1 = vweird.f32 %v1808_v57 }
 0x1ab   :  { %vm1345_vm3 = vmor %vm1343_vm2, %vm1344_vm1 }
 0x1ac   :  { %v1340_v3 = vsub.f32 1.0, %v1339_v49  ;;  %v1810_v56 = vpop.eup %1809 }
 0x1ad   :  { %v1579_v7 = vmul.f32 %v1810_v56, %v1112_v1  ;;  %vm1584_vm5 = vweird.f32 %v1810_v56 }
 0x1ae   :  { %v1341_v58 = vmul.f32 %v1808_v57, %v1340_v3  ;;  %vm1585_vm7 = vmor %vm1583_vm6, %vm1584_vm5 }
 0x1af   :  { %v1580_v8 = vsub.f32 1.0, %v1579_v7 }
 0x1b0   :  { %v1342_v52 = vadd.f32 %v1808_v57, %v1341_v58 }
 0x1b1   :  { %v1581_v14 = vmul.f32 %v1810_v56, %v1580_v8 }
 0x1b2   :  { %v1346_v5 = vsel %vm1345_vm3, %v1808_v57, %v1342_v52 }
 0x1b3   :  { %v1351_v10 = vsel %vm1348_vm4, %v1350_v9, %v1346_v5  ;;  %v1582_v13 = vadd.f32 %v1810_v56, %v1581_v14 }
 0x1b4   :  { %1608 = vst.msk [vmem:[%s2889_s3 + $0x78] sm:$0xff] %vm18_vm0, %v1351_v10 }
 0x1b5   :  { %v1586_v18 = vsel %vm1585_vm7, %v1810_v56, %v1582_v13 }
 0x1b6   :  { %v1591_v19 = vsel %vm1588_vm8, %v1590_v17, %v1586_v18 }
 0x1b7   :  { %1624 = vst.msk [vmem:[%s2889_s3 + $0xf8] sm:$0xff] %vm18_vm0, %v1591_v19 }

</bundles_post_ra>
